<compile_context>
chip_gen: v5e
topology: v5e:2x2
jax: 0.10.0
libtpu: 0.0.40
codegen_flags: <defaults>
</compile_context>

<pallas_src>
import functools

import jax
import jax.numpy as jnp
from jax import lax
from jax.experimental import pallas as pl
from jax.experimental.pallas import tpu as pltpu

EPS = 1e-5                      # PyTorch BatchNorm2d default eps
LANE = 128                      # TPU vreg lane width; channel dims padded to this
# Set to jnp.bfloat16 for production throughput on v6e/v7x (native MXU dtype, halves
# HBM traffic of the growing feature slab).  Kept f32 here so the strict 1e-3 check
# against the HIGHEST-precision f32 reference below holds.
MATMUL_DTYPE = jnp.float32


def _round_up(x, m):
    return ((x + m - 1) // m) * m


def _pick_tm(m, cap=2048):
    """Largest multiple of 8 that divides m and is <= cap (None if none exists)."""
    best = None
    for t in range(8, min(cap, m) + 1, 8):
        if m % t == 0:
            best = t
    return best


def _const_spec(shape):
    """BlockSpec for a constant-index operand; single-buffered when supported."""
    index_map = lambda *_: (0,) * len(shape)
    try:
        return pl.BlockSpec(shape, index_map, pipeline_mode=pl.Buffered(1))
    except Exception:  # older jax without pipeline_mode / pl.Buffered
        return pl.BlockSpec(shape, index_map)


def _compiler_params(dimension_semantics):
    kwargs = dict(dimension_semantics=dimension_semantics)
    try:
        cap = pltpu.get_tpu_info().vmem_capacity_bytes
        kwargs["vmem_limit_bytes"] = (int(cap) // 4) * 3   # ~25% headroom per chip
    except Exception:
        pass  # fall back to the default scoped VMEM limit (plenty at these sizes)
    return pltpu.CompilerParams(**kwargs)


# --------------- kernel 1: fused BN-affine + ReLU + 1x1 conv (+ batch stats) ---------

def _bn_relu_conv1x1_kernel(x_ref, ab_ref, w_ref, o_ref, st_ref, *, m_real, tm):
    # x: (tm, Cp)   ab: (2, Cp) = [scale; shift] (f32)   w: (Cp, Kp)
    # o: (tm, Kp)   st: (1, 2, Kp) per-tile [sum; sum of squares] of o (f32)
    x = x_ref[...].astype(jnp.float32)
    y = jnp.maximum(x * ab_ref[0:1, :] + ab_ref[1:2, :], 0.0)
    if m_real is not None:
        # Fallback path only (tm does not divide M): zero the padded rows so they store
        # exact zeros and do not pollute the fused batch statistics.
        rows = lax.broadcasted_iota(jnp.int32, y.shape, 0) + pl.program_id(0) * tm
        y = jnp.where(rows < m_real, y, 0.0)
    out = jnp.dot(y.astype(w_ref.dtype), w_ref[...], preferred_element_type=jnp.float32)
    o_ref[...] = out.astype(o_ref.dtype)
    st_ref[0, 0:1, :] = jnp.sum(out, axis=0, keepdims=True)
    st_ref[0, 1:2, :] = jnp.sum(out * out, axis=0, keepdims=True)


def bn_relu_conv1x1(x_flat, ab, w, *, tm, m_real):
    mp = x_flat.shape[0]
    cp, kp = w.shape
    n_tiles = mp // tm
    kern = functools.partial(_bn_relu_conv1x1_kernel, m_real=m_real, tm=tm)
    return pl.pallas_call(
        kern,
        out_shape=(jax.ShapeDtypeStruct((mp, kp), MATMUL_DTYPE),
                   jax.ShapeDtypeStruct((n_tiles, 2, kp), jnp.float32)),
        grid=(n_tiles,),
        in_specs=[
            pl.BlockSpec((tm, cp), lambda i: (i, 0)),
            _const_spec((2, cp)),
            _const_spec((cp, kp)),
        ],
        out_specs=(pl.BlockSpec((tm, kp), lambda i: (i, 0)),
                   pl.BlockSpec((1, 2, kp), lambda i: (i, 0, 0))),
        compiler_params=_compiler_params(("parallel",)),
    )(x_flat, ab, w)


# --------- kernel 2: fused BN-affine + ReLU + 3x3 conv pad=1 (+ batch stats) ---------

def _bn_relu_conv3x3_kernel(x_ref, ab_ref, w_ref, o_ref, st_ref, ypad_ref):
    # x : (1, H, W, Kp) unpadded 1x1 output   ab: (2, Kp) f32   w: (9, Kp, Gp)
    # o : (1, H*W, Gp) lane-dense slab        st: (1, 2, Gp) per-image [sum; sum sq]
    # ypad (scratch): (H+2, W+2, Kp) zero-halo buffer in VMEM
    _, h, w, kp = x_ref.shape
    x = x_ref[0].astype(jnp.float32)
    scale = ab_ref[0:1, :].reshape(1, 1, kp)
    shift = ab_ref[1:2, :].reshape(1, 1, kp)
    y = jnp.maximum(x * scale + shift, 0.0)

    # conv2d(padding=1) zero-pads AFTER relu(bn(.)): build the halo on-chip as exact
    # zeros (no wrapper-side jnp.pad, no HBM round trip).
    ypad_ref[...] = jnp.zeros_like(ypad_ref)
    ypad_ref[1:h + 1, 1:w + 1, :] = y.astype(ypad_ref.dtype)

    # Nine K=Kp tap matmuls instead of a materialized (H*W, 9*Kp) im2col buffer.
    acc = None
    for kh in range(3):
        for kw in range(3):
            tap = ypad_ref[kh:kh + h, kw:kw + w, :].reshape(h * w, kp)
            d = jnp.dot(tap, w_ref[3 * kh + kw], preferred_element_type=jnp.float32)
            acc = d if acc is None else acc + d

    o_ref[...] = acc[None].astype(o_ref.dtype)
    st_ref[0, 0:1, :] = jnp.sum(acc, axis=0, keepdims=True)
    st_ref[0, 1:2, :] = jnp.sum(acc * acc, axis=0, keepdims=True)


def bn_relu_conv3x3(h1, ab, w_taps):
    n, hh, ww, kp = h1.shape
    gp = w_taps.shape[-1]
    return pl.pallas_call(
        _bn_relu_conv3x3_kernel,
        out_shape=(jax.ShapeDtypeStruct((n, hh * ww, gp), MATMUL_DTYPE),
                   jax.ShapeDtypeStruct((n, 2, gp), jnp.float32)),
        grid=(n,),
        in_specs=[
            pl.BlockSpec((1, hh, ww, kp), lambda i: (i, 0, 0, 0)),
            _const_spec((2, kp)),
            _const_spec((9, kp, gp)),
        ],
        out_specs=(pl.BlockSpec((1, hh * ww, gp), lambda i: (i, 0, 0)),
                   pl.BlockSpec((1, 2, gp), lambda i: (i, 0, 0))),
        scratch_shapes=[pltpu.VMEM((hh + 2, ww + 2, kp), MATMUL_DTYPE)],
        compiler_params=_compiler_params(("parallel",)),
    )(h1, ab, w_taps)


# --------------------------------- wrapper (glue) ------------------------------------

def _dense_block_forward_impl(x_nchw, layer_params):
    x = jnp.transpose(x_nchw, (0, 2, 3, 1)).astype(jnp.float32)   # NCHW -> NHWC
    n, hh, ww, cin = x.shape
    m = n * hh * ww
    growth = layer_params[0]["w2"].shape[-1]
    n_layers = len(layer_params)
    c_tot = cin + n_layers * growth
    c_slab = _round_up(c_tot, LANE)

    # Pre-allocated feature slab: each layer writes its `growth` new channels in place
    # instead of re-concatenating (re-copying) the whole feature map every layer.
    feat = jnp.zeros((n, hh, ww, c_slab), MATMUL_DTYPE).at[..., :cin].set(
        x.astype(MATMUL_DTYPE))

    # Running per-channel batch statistics (sum, sum of squares).  Channels already in
    # the slab never change, so their stats are computed exactly once; new channels'
    # stats come fused out of the kernels.
    # TODO(synk): the input's own per-channel reduction stays in plain JAX - layer 0's
    # BN1 scale/shift must exist before the first kernel can be launched.
    ch_sum = jnp.zeros((c_tot,), jnp.float32).at[:cin].set(jnp.sum(x, axis=(0, 1, 2)))
    ch_ssq = jnp.zeros((c_tot,), jnp.float32).at[:cin].set(jnp.sum(x * x, axis=(0, 1, 2)))

    # Row tile for the 1x1 stage: a divisor of M removes the per-layer pad/slice HBM
    # round trips; the masked pad path is only a fallback.
    tm = _pick_tm(m)
    pad_rows = tm is None
    if pad_rows:
        tm = min(2048, _round_up(m, 8))
    mp = _round_up(m, tm)

    c = cin
    for p in layer_params:
        cmid = p["w1"].shape[1]
        cp = _round_up(c, LANE)
        kp = _round_up(cmid, LANE)
        gp = _round_up(growth, LANE)

        # ---- norm1 -> relu1 -> conv1 (1x1), fused ----
        mean1 = ch_sum[:c] / m
        var1 = ch_ssq[:c] / m - mean1 * mean1          # biased var, like PyTorch BN fwd
        s1 = p["gamma1"] / jnp.sqrt(var1 + EPS)
        b1 = p["beta1"] - mean1 * s1
        ab1 = jnp.zeros((2, cp), jnp.float32).at[0, :c].set(s1).at[1, :c].set(b1)
        w1p = jnp.zeros((cp, kp), MATMUL_DTYPE).at[:c, :cmid].set(
            p["w1"].astype(MATMUL_DTYPE))

        x_flat = feat.reshape(m, c_slab)               # contiguous reshape (free)
        if pad_rows and mp != m:                       # fallback only
            x_flat = jnp.pad(x_flat, ((0, mp - m), (0, 0)))
        h1, st1 = bn_relu_conv1x1(x_flat, ab1, w1p, tm=tm,
                                  m_real=(m if pad_rows else None))
        if pad_rows and mp != m:
            h1 = h1[:m]
        h1 = h1.reshape(n, hh, ww, kp)                 # padded channels >= cmid are 0

        # ---- norm2 -> relu2 -> conv2 (3x3, padding=1), fused ----
        mean2 = jnp.sum(st1[:, 0, :cmid], axis=0) / m
        var2 = jnp.sum(st1[:, 1, :cmid], axis=0) / m - mean2 * mean2
        s2 = p["gamma2"] / jnp.sqrt(var2 + EPS)
        b2 = p["beta2"] - mean2 * s2
        ab2 = jnp.zeros((2, kp), jnp.float32).at[0, :cmid].set(s2).at[1, :cmid].set(b2)
        w2p = jnp.zeros((9, kp, gp), MATMUL_DTYPE).at[:, :cmid, :growth].set(
            p["w2"].astype(MATMUL_DTYPE))

        out3, st3 = bn_relu_conv3x3(h1, ab2, w2p)      # halo generated in-kernel

        new_feat = out3[:, :, :growth].reshape(n, hh, ww, growth)
        feat = feat.at[..., c:c + growth].set(new_feat.astype(feat.dtype))
        ch_sum = ch_sum.at[c:c + growth].set(jnp.sum(st3[:, 0, :growth], axis=0))
        ch_ssq = ch_ssq.at[c:c + growth].set(jnp.sum(st3[:, 1, :growth], axis=0))
        c += growth

    out = feat[..., :c_tot].astype(jnp.float32)
    return jnp.transpose(out, (0, 3, 1, 2))            # NHWC -> NCHW


dense_block_forward = jax.jit(_dense_block_forward_impl)


# ----------------------------- params + pure-JAX reference ---------------------------

def init_dense_block_params(key, num_layers, in_channels, growth_rate, bn_size):
    params = []
    cin = in_channels
    mid = bn_size * growth_rate
    for _ in range(num_layers):
        key, k1, k2, k3, k4, k5, k6 = jax.random.split(key, 7)
        params.append(dict(
            gamma1=jax.random.uniform(k1, (cin,), jnp.float32, 0.5, 1.5),
            beta1=jax.random.uniform(k2, (cin,), jnp.float32, -0.2, 0.2),
            # conv1 weight, PyTorch shape (mid, cin, 1, 1) stored as (cin, mid)
            w1=jax.random.normal(k3, (cin, mid), jnp.float32) * 0.2,
            gamma2=jax.random.uniform(k4, (mid,), jnp.float32, 0.5, 1.5),
            beta2=jax.random.uniform(k5, (mid,), jnp.float32, -0.2, 0.2),
            # conv2 weight, PyTorch shape (growth, mid, 3, 3) stored as (9, mid, growth)
            w2=jax.random.normal(k6, (9, mid, growth_rate), jnp.float32) * 0.1,
        ))
        cin += growth_rate
    return params


def _batch_stats(x_nhwc):
    mean = jnp.mean(x_nhwc, axis=(0, 1, 2))
    var = jnp.mean(jnp.square(x_nhwc - mean), axis=(0, 1, 2))  # biased, like PyTorch
    return mean, var


def dense_block_reference(x_nchw, layer_params):
    feat = jnp.transpose(x_nchw, (0, 2, 3, 1)).astype(jnp.float32)
    for p in layer_params:
        m1, v1 = _batch_stats(feat)
        h = (feat - m1) / jnp.sqrt(v1 + EPS) * p["gamma1"] + p["beta1"]
        h = jnp.maximum(h, 0.0)
        h = lax.conv_general_dilated(h, p["w1"][None, None], (1, 1), "VALID",
                                     dimension_numbers=("NHWC", "HWIO", "NHWC"),
                                     precision=lax.Precision.HIGHEST)
        m2, v2 = _batch_stats(h)
        h = (h - m2) / jnp.sqrt(v2 + EPS) * p["gamma2"] + p["beta2"]
        h = jnp.maximum(h, 0.0)
        mid, growth = p["w2"].shape[1], p["w2"].shape[2]
        h = lax.conv_general_dilated(h, p["w2"].reshape(3, 3, mid, growth), (1, 1), "SAME",
                                     dimension_numbers=("NHWC", "HWIO", "NHWC"),
                                     precision=lax.Precision.HIGHEST)
        feat = jnp.concatenate([feat, h], axis=-1)
    return jnp.transpose(feat, (0, 3, 1, 2))


if __name__ == "__main__":
    key = jax.random.PRNGKey(0)
    kx, kparams = jax.random.split(key)

    num_layers, in_channels, growth_rate, bn_size = 2, 8, 8, 2
    x = jax.random.normal(kx, (2, in_channels, 16, 16), jnp.float32)   # NCHW, like PyTorch
    params = init_dense_block_params(kparams, num_layers, in_channels, growth_rate, bn_size)

    out = jax.block_until_ready(dense_block_forward(x, params))
    ref = jax.block_until_ready(dense_block_reference(x, params))

    expected_c = in_channels + num_layers * growth_rate
    assert out.shape == (2, expected_c, 16, 16), out.shape
    tol = 1e-3 if MATMUL_DTYPE == jnp.float32 else 3e-2
    max_err = float(jnp.max(jnp.abs(out - ref)))
    assert jnp.allclose(out, ref, rtol=tol, atol=tol), max_err
    print("KERNEL_OK")
</pallas_src>

<mosaic_0001>
module attributes {stable_mosaic.version = 11 : i64} {
  func.func @_bn_relu_conv1x1_kernel(%arg0: i32, %arg1: memref<512x128xf32, #tpu.memory_space<vmem>>, %arg2: memref<2x128xf32, #tpu.memory_space<vmem>>, %arg3: memref<128x128xf32, #tpu.memory_space<vmem>>, %arg4: memref<512x128xf32, #tpu.memory_space<vmem>>, %arg5: memref<1x2x128xf32, #tpu.memory_space<vmem>>) attributes {dimension_semantics = [#tpu.dimension_semantics<parallel>], iteration_bounds = array<i64: 1>, scalar_prefetch = 0 : i64, scratch_operands = 0 : i64, tpu.core_type = #tpu.core_type<tc>, window_params = [{transform_indices = @transform_0, window_bounds = array<i64: 512, 128>}, {pipeline_mode = #tpu.pipeline_mode<synchronous>, transform_indices = @transform_1, window_bounds = array<i64: 2, 128>}, {pipeline_mode = #tpu.pipeline_mode<synchronous>, transform_indices = @transform_2, window_bounds = array<i64: 128, 128>}, {transform_indices = @transform_3, window_bounds = array<i64: 512, 128>}, {transform_indices = @transform_4, window_bounds = array<i64: 1, 2, 128>}]} {
    %c0 = arith.constant 0 : index
    %c0_0 = arith.constant 0 : index
    %0 = vector.load %arg1[%c0, %c0_0] : memref<512x128xf32, #tpu.memory_space<vmem>>, vector<512x128xf32>
    %c0_1 = arith.constant 0 : index
    %c0_2 = arith.constant 0 : index
    %1 = vector.load %arg2[%c0_1, %c0_2] : memref<2x128xf32, #tpu.memory_space<vmem>>, vector<1x128xf32>
    %2 = vector.broadcast %1 : vector<1x128xf32> to vector<512x128xf32>
    %3 = arith.mulf %0, %2 : vector<512x128xf32>
    %c1 = arith.constant 1 : index
    %c0_3 = arith.constant 0 : index
    %4 = vector.load %arg2[%c1, %c0_3] : memref<2x128xf32, #tpu.memory_space<vmem>>, vector<1x128xf32>
    %5 = vector.broadcast %4 : vector<1x128xf32> to vector<512x128xf32>
    %6 = arith.addf %3, %5 : vector<512x128xf32>
    %cst = arith.constant 0.000000e+00 : f32
    %7 = vector.broadcast %cst : f32 to vector<512x128xf32>
    %8 = arith.maximumf %6, %7 : vector<512x128xf32>
    %c0_4 = arith.constant 0 : index
    %c0_5 = arith.constant 0 : index
    %9 = vector.load %arg3[%c0_4, %c0_5] : memref<128x128xf32, #tpu.memory_space<vmem>>, vector<128x128xf32>
    %cst_6 = arith.constant dense<0.000000e+00> : vector<512x128xf32>
    %10 = tpu.matmul %8, %9, %cst_6 {dimension_numbers = #tpu.dot_dimension_numbers<[1], [0], [0], [1], [0, 0, 1, 1], [], []>} : vector<512x128xf32>, vector<128x128xf32>, vector<512x128xf32> -> vector<512x128xf32>
    %c0_7 = arith.constant 0 : index
    %c0_8 = arith.constant 0 : index
    %11 = vector.load %arg4[%c0_7, %c0_8] : memref<512x128xf32, #tpu.memory_space<vmem>>, vector<512x128xf32>
    tpu.vector_store %arg4[%c0_7, %c0_8], %10 {strides = array<i32>} : memref<512x128xf32, #tpu.memory_space<vmem>>, vector<512x128xf32>,
    %cst_9 = arith.constant dense<0.000000e+00> : vector<128xf32>
    %12 = vector.multi_reduction <add>, %10, %cst_9 [0] : vector<512x128xf32> to vector<128xf32>
    %13 = vector.shape_cast %12 : vector<128xf32> to vector<1x128xf32>
    %c0_10 = arith.constant 0 : index
    %c0_11 = arith.constant 0 : index
    %c0_12 = arith.constant 0 : index
    %14 = vector.load %arg5[%c0_10, %c0_11, %c0_12] : memref<1x2x128xf32, #tpu.memory_space<vmem>>, vector<1x1x128xf32>
    %15 = vector.shape_cast %14 : vector<1x1x128xf32> to vector<1x128xf32>
    %16 = vector.shape_cast %13 : vector<1x128xf32> to vector<1x1x128xf32>
    tpu.vector_store %arg5[%c0_10, %c0_11, %c0_12], %16 {strides = array<i32>} : memref<1x2x128xf32, #tpu.memory_space<vmem>>, vector<1x1x128xf32>,
    %17 = arith.mulf %10, %10 : vector<512x128xf32>
    %cst_13 = arith.constant dense<0.000000e+00> : vector<128xf32>
    %18 = vector.multi_reduction <add>, %17, %cst_13 [0] : vector<512x128xf32> to vector<128xf32>
    %19 = vector.shape_cast %18 : vector<128xf32> to vector<1x128xf32>
    %c0_14 = arith.constant 0 : index
    %c1_15 = arith.constant 1 : index
    %c0_16 = arith.constant 0 : index
    %20 = vector.load %arg5[%c0_14, %c1_15, %c0_16] : memref<1x2x128xf32, #tpu.memory_space<vmem>>, vector<1x1x128xf32>
    %21 = vector.shape_cast %20 : vector<1x1x128xf32> to vector<1x128xf32>
    %22 = vector.shape_cast %19 : vector<1x128xf32> to vector<1x1x128xf32>
    tpu.vector_store %arg5[%c0_14, %c1_15, %c0_16], %22 {strides = array<i32>} : memref<1x2x128xf32, #tpu.memory_space<vmem>>, vector<1x1x128xf32>,
    return
  }
  func.func @transform_0(%arg0: i32) -> (i32, i32) {
    %c0_i32 = arith.constant 0 : i32
    %c0_i32_0 = arith.constant 0 : i32
    return %arg0, %c0_i32 : i32, i32
  }
  func.func @transform_1(%arg0: i32) -> (i32, i32) {
    %c0_i32 = arith.constant 0 : i32
    %c0_i32_0 = arith.constant 0 : i32
    %c0_i32_1 = arith.constant 0 : i32
    return %c0_i32, %c0_i32_0 : i32, i32
  }
  func.func @transform_2(%arg0: i32) -> (i32, i32) {
    %c0_i32 = arith.constant 0 : i32
    %c0_i32_0 = arith.constant 0 : i32
    %c0_i32_1 = arith.constant 0 : i32
    return %c0_i32, %c0_i32_0 : i32, i32
  }
  func.func @transform_3(%arg0: i32) -> (i32, i32) {
    %c0_i32 = arith.constant 0 : i32
    %c0_i32_0 = arith.constant 0 : i32
    return %arg0, %c0_i32 : i32, i32
  }
  func.func @transform_4(%arg0: i32) -> (i32, i32, i32) {
    %c0_i32 = arith.constant 0 : i32
    %c0_i32_0 = arith.constant 0 : i32
    %c0_i32_1 = arith.constant 0 : i32
    return %arg0, %c0_i32, %c0_i32_0 : i32, i32, i32
  }
}

module attributes {stable_mosaic.version = 11 : i64} {
  func.func @_bn_relu_conv3x3_kernel(%arg0: i32, %arg1: memref<1x16x16x128xf32, #tpu.memory_space<vmem>>, %arg2: memref<2x128xf32, #tpu.memory_space<vmem>>, %arg3: memref<9x128x128xf32, #tpu.memory_space<vmem>>, %arg4: memref<1x256x128xf32, #tpu.memory_space<vmem>>, %arg5: memref<1x2x128xf32, #tpu.memory_space<vmem>>, %arg6: memref<18x18x128xf32, #tpu.memory_space<vmem>>) attributes {dimension_semantics = [#tpu.dimension_semantics<parallel>], iteration_bounds = array<i64: 2>, scalar_prefetch = 0 : i64, scratch_operands = 1 : i64, tpu.core_type = #tpu.core_type<tc>, window_params = [{transform_indices = @transform_0, window_bounds = array<i64: 1, 16, 16, 128>}, {pipeline_mode = #tpu.pipeline_mode<synchronous>, transform_indices = @transform_1, window_bounds = array<i64: 2, 128>}, {pipeline_mode = #tpu.pipeline_mode<synchronous>, transform_indices = @transform_2, window_bounds = array<i64: 9, 128, 128>}, {transform_indices = @transform_3, window_bounds = array<i64: 1, 256, 128>}, {transform_indices = @transform_4, window_bounds = array<i64: 1, 2, 128>}]} {
    %c0 = arith.constant 0 : index
    %c0_0 = arith.constant 0 : index
    %c0_1 = arith.constant 0 : index
    %c0_2 = arith.constant 0 : index
    %0 = vector.load %arg1[%c0, %c0_0, %c0_1, %c0_2] : memref<1x16x16x128xf32, #tpu.memory_space<vmem>>, vector<1x16x16x128xf32>
    %1 = vector.shape_cast %0 : vector<1x16x16x128xf32> to vector<16x16x128xf32>
    %c0_3 = arith.constant 0 : index
    %c0_4 = arith.constant 0 : index
    %2 = vector.load %arg2[%c0_3, %c0_4] : memref<2x128xf32, #tpu.memory_space<vmem>>, vector<1x128xf32>
    %3 = vector.shape_cast %2 : vector<1x128xf32> to vector<1x1x128xf32>
    %c1 = arith.constant 1 : index
    %c0_5 = arith.constant 0 : index
    %4 = vector.load %arg2[%c1, %c0_5] : memref<2x128xf32, #tpu.memory_space<vmem>>, vector<1x128xf32>
    %5 = vector.shape_cast %4 : vector<1x128xf32> to vector<1x1x128xf32>
    %6 = vector.broadcast %3 : vector<1x1x128xf32> to vector<16x16x128xf32>
    %7 = arith.mulf %1, %6 : vector<16x16x128xf32>
    %8 = vector.broadcast %5 : vector<1x1x128xf32> to vector<16x16x128xf32>
    %9 = arith.addf %7, %8 : vector<16x16x128xf32>
    %cst = arith.constant 0.000000e+00 : f32
    %10 = vector.broadcast %cst : f32 to vector<16x16x128xf32>
    %11 = arith.maximumf %9, %10 : vector<16x16x128xf32>
    %cst_6 = arith.constant 0.000000e+00 : f32
    %12 = vector.broadcast %cst_6 : f32 to vector<18x18x128xf32>
    %c0_7 = arith.constant 0 : index
    %c0_8 = arith.constant 0 : index
    %c0_9 = arith.constant 0 : index
    %13 = vector.load %arg6[%c0_7, %c0_8, %c0_9] : memref<18x18x128xf32, #tpu.memory_space<vmem>>, vector<18x18x128xf32>
    tpu.vector_store %arg6[%c0_7, %c0_8, %c0_9], %12 {strides = array<i32>} : memref<18x18x128xf32, #tpu.memory_space<vmem>>, vector<18x18x128xf32>,
    %c1_10 = arith.constant 1 : index
    %c1_11 = arith.constant 1 : index
    %c0_12 = arith.constant 0 : index
    %14 = vector.load %arg6[%c1_10, %c1_11, %c0_12] : memref<18x18x128xf32, #tpu.memory_space<vmem>>, vector<16x16x128xf32>
    tpu.vector_store %arg6[%c1_10, %c1_11, %c0_12], %11 {strides = array<i32>} : memref<18x18x128xf32, #tpu.memory_space<vmem>>, vector<16x16x128xf32>,
    %c0_13 = arith.constant 0 : index
    %c0_14 = arith.constant 0 : index
    %c0_15 = arith.constant 0 : index
    %15 = vector.load %arg6[%c0_13, %c0_14, %c0_15] : memref<18x18x128xf32, #tpu.memory_space<vmem>>, vector<16x16x128xf32>
    %16 = vector.shape_cast %15 : vector<16x16x128xf32> to vector<256x128xf32>
    %c0_16 = arith.constant 0 : index
    %c0_17 = arith.constant 0 : index
    %c0_18 = arith.constant 0 : index
    %17 = vector.load %arg3[%c0_16, %c0_17, %c0_18] : memref<9x128x128xf32, #tpu.memory_space<vmem>>, vector<1x128x128xf32>
    %18 = vector.shape_cast %17 : vector<1x128x128xf32> to vector<128x128xf32>
    %cst_19 = arith.constant dense<0.000000e+00> : vector<256x128xf32>
    %19 = tpu.matmul %16, %18, %cst_19 {dimension_numbers = #tpu.dot_dimension_numbers<[1], [0], [0], [1], [0, 0, 1, 1], [], []>} : vector<256x128xf32>, vector<128x128xf32>, vector<256x128xf32> -> vector<256x128xf32>
    %c0_20 = arith.constant 0 : index
    %c1_21 = arith.constant 1 : index
    %c0_22 = arith.constant 0 : index
    %20 = vector.load %arg6[%c0_20, %c1_21, %c0_22] : memref<18x18x128xf32, #tpu.memory_space<vmem>>, vector<16x16x128xf32>
    %21 = vector.shape_cast %20 : vector<16x16x128xf32> to vector<256x128xf32>
    %c1_23 = arith.constant 1 : index
    %c0_24 = arith.constant 0 : index
    %c0_25 = arith.constant 0 : index
    %22 = vector.load %arg3[%c1_23, %c0_24, %c0_25] : memref<9x128x128xf32, #tpu.memory_space<vmem>>, vector<1x128x128xf32>
    %23 = vector.shape_cast %22 : vector<1x128x128xf32> to vector<128x128xf32>
    %cst_26 = arith.constant dense<0.000000e+00> : vector<256x128xf32>
    %24 = tpu.matmul %21, %23, %cst_26 {dimension_numbers = #tpu.dot_dimension_numbers<[1], [0], [0], [1], [0, 0, 1, 1], [], []>} : vector<256x128xf32>, vector<128x128xf32>, vector<256x128xf32> -> vector<256x128xf32>
    %25 = arith.addf %19, %24 : vector<256x128xf32>
    %c0_27 = arith.constant 0 : index
    %c2 = arith.constant 2 : index
    %c0_28 = arith.constant 0 : index
    %26 = vector.load %arg6[%c0_27, %c2, %c0_28] : memref<18x18x128xf32, #tpu.memory_space<vmem>>, vector<16x16x128xf32>
    %27 = vector.shape_cast %26 : vector<16x16x128xf32> to vector<256x128xf32>
    %c2_29 = arith.constant 2 : index
    %c0_30 = arith.constant 0 : index
    %c0_31 = arith.constant 0 : index
    %28 = vector.load %arg3[%c2_29, %c0_30, %c0_31] : memref<9x128x128xf32, #tpu.memory_space<vmem>>, vector<1x128x128xf32>
    %29 = vector.shape_cast %28 : vector<1x128x128xf32> to vector<128x128xf32>
    %cst_32 = arith.constant dense<0.000000e+00> : vector<256x128xf32>
    %30 = tpu.matmul %27, %29, %cst_32 {dimension_numbers = #tpu.dot_dimension_numbers<[1], [0], [0], [1], [0, 0, 1, 1], [], []>} : vector<256x128xf32>, vector<128x128xf32>, vector<256x128xf32> -> vector<256x128xf32>
    %31 = arith.addf %25, %30 : vector<256x128xf32>
    %c1_33 = arith.constant 1 : index
    %c0_34 = arith.constant 0 : index
    %c0_35 = arith.constant 0 : index
    %32 = vector.load %arg6[%c1_33, %c0_34, %c0_35] : memref<18x18x128xf32, #tpu.memory_space<vmem>>, vector<16x16x128xf32>
    %33 = vector.shape_cast %32 : vector<16x16x128xf32> to vector<256x128xf32>
    %c3 = arith.constant 3 : index
    %c0_36 = arith.constant 0 : index
    %c0_37 = arith.constant 0 : index
    %34 = vector.load %arg3[%c3, %c0_36, %c0_37] : memref<9x128x128xf32, #tpu.memory_space<vmem>>, vector<1x128x128xf32>
    %35 = vector.shape_cast %34 : vector<1x128x128xf32> to vector<128x128xf32>
    %cst_38 = arith.constant dense<0.000000e+00> : vector<256x128xf32>
    %36 = tpu.matmul %33, %35, %cst_38 {dimension_numbers = #tpu.dot_dimension_numbers<[1], [0], [0], [1], [0, 0, 1, 1], [], []>} : vector<256x128xf32>, vector<128x128xf32>, vector<256x128xf32> -> vector<256x128xf32>
    %37 = arith.addf %31, %36 : vector<256x128xf32>
    %c1_39 = arith.constant 1 : index
    %c1_40 = arith.constant 1 : index
    %c0_41 = arith.constant 0 : index
    %38 = vector.load %arg6[%c1_39, %c1_40, %c0_41] : memref<18x18x128xf32, #tpu.memory_space<vmem>>, vector<16x16x128xf32>
    %39 = vector.shape_cast %38 : vector<16x16x128xf32> to vector<256x128xf32>
    %c4 = arith.constant 4 : index
    %c0_42 = arith.constant 0 : index
    %c0_43 = arith.constant 0 : index
    %40 = vector.load %arg3[%c4, %c0_42, %c0_43] : memref<9x128x128xf32, #tpu.memory_space<vmem>>, vector<1x128x128xf32>
    %41 = vector.shape_cast %40 : vector<1x128x128xf32> to vector<128x128xf32>
    %cst_44 = arith.constant dense<0.000000e+00> : vector<256x128xf32>
    %42 = tpu.matmul %39, %41, %cst_44 {dimension_numbers = #tpu.dot_dimension_numbers<[1], [0], [0], [1], [0, 0, 1, 1], [], []>} : vector<256x128xf32>, vector<128x128xf32>, vector<256x128xf32> -> vector<256x128xf32>
    %43 = arith.addf %37, %42 : vector<256x128xf32>
    %c1_45 = arith.constant 1 : index
    %c2_46 = arith.constant 2 : index
    %c0_47 = arith.constant 0 : index
    %44 = vector.load %arg6[%c1_45, %c2_46, %c0_47] : memref<18x18x128xf32, #tpu.memory_space<vmem>>, vector<16x16x128xf32>
    %45 = vector.shape_cast %44 : vector<16x16x128xf32> to vector<256x128xf32>
    %c5 = arith.constant 5 : index
    %c0_48 = arith.constant 0 : index
    %c0_49 = arith.constant 0 : index
    %46 = vector.load %arg3[%c5, %c0_48, %c0_49] : memref<9x128x128xf32, #tpu.memory_space<vmem>>, vector<1x128x128xf32>
    %47 = vector.shape_cast %46 : vector<1x128x128xf32> to vector<128x128xf32>
    %cst_50 = arith.constant dense<0.000000e+00> : vector<256x128xf32>
    %48 = tpu.matmul %45, %47, %cst_50 {dimension_numbers = #tpu.dot_dimension_numbers<[1], [0], [0], [1], [0, 0, 1, 1], [], []>} : vector<256x128xf32>, vector<128x128xf32>, vector<256x128xf32> -> vector<256x128xf32>
    %49 = arith.addf %43, %48 : vector<256x128xf32>
    %c2_51 = arith.constant 2 : index
    %c0_52 = arith.constant 0 : index
    %c0_53 = arith.constant 0 : index
    %50 = vector.load %arg6[%c2_51, %c0_52, %c0_53] : memref<18x18x128xf32, #tpu.memory_space<vmem>>, vector<16x16x128xf32>
    %51 = vector.shape_cast %50 : vector<16x16x128xf32> to vector<256x128xf32>
    %c6 = arith.constant 6 : index
    %c0_54 = arith.constant 0 : index
    %c0_55 = arith.constant 0 : index
    %52 = vector.load %arg3[%c6, %c0_54, %c0_55] : memref<9x128x128xf32, #tpu.memory_space<vmem>>, vector<1x128x128xf32>
    %53 = vector.shape_cast %52 : vector<1x128x128xf32> to vector<128x128xf32>
    %cst_56 = arith.constant dense<0.000000e+00> : vector<256x128xf32>
    %54 = tpu.matmul %51, %53, %cst_56 {dimension_numbers = #tpu.dot_dimension_numbers<[1], [0], [0], [1], [0, 0, 1, 1], [], []>} : vector<256x128xf32>, vector<128x128xf32>, vector<256x128xf32> -> vector<256x128xf32>
    %55 = arith.addf %49, %54 : vector<256x128xf32>
    %c2_57 = arith.constant 2 : index
    %c1_58 = arith.constant 1 : index
    %c0_59 = arith.constant 0 : index
    %56 = vector.load %arg6[%c2_57, %c1_58, %c0_59] : memref<18x18x128xf32, #tpu.memory_space<vmem>>, vector<16x16x128xf32>
    %57 = vector.shape_cast %56 : vector<16x16x128xf32> to vector<256x128xf32>
    %c7 = arith.constant 7 : index
    %c0_60 = arith.constant 0 : index
    %c0_61 = arith.constant 0 : index
    %58 = vector.load %arg3[%c7, %c0_60, %c0_61] : memref<9x128x128xf32, #tpu.memory_space<vmem>>, vector<1x128x128xf32>
    %59 = vector.shape_cast %58 : vector<1x128x128xf32> to vector<128x128xf32>
    %cst_62 = arith.constant dense<0.000000e+00> : vector<256x128xf32>
    %60 = tpu.matmul %57, %59, %cst_62 {dimension_numbers = #tpu.dot_dimension_numbers<[1], [0], [0], [1], [0, 0, 1, 1], [], []>} : vector<256x128xf32>, vector<128x128xf32>, vector<256x128xf32> -> vector<256x128xf32>
    %61 = arith.addf %55, %60 : vector<256x128xf32>
    %c2_63 = arith.constant 2 : index
    %c2_64 = arith.constant 2 : index
    %c0_65 = arith.constant 0 : index
    %62 = vector.load %arg6[%c2_63, %c2_64, %c0_65] : memref<18x18x128xf32, #tpu.memory_space<vmem>>, vector<16x16x128xf32>
    %63 = vector.shape_cast %62 : vector<16x16x128xf32> to vector<256x128xf32>
    %c8 = arith.constant 8 : index
    %c0_66 = arith.constant 0 : index
    %c0_67 = arith.constant 0 : index
    %64 = vector.load %arg3[%c8, %c0_66, %c0_67] : memref<9x128x128xf32, #tpu.memory_space<vmem>>, vector<1x128x128xf32>
    %65 = vector.shape_cast %64 : vector<1x128x128xf32> to vector<128x128xf32>
    %cst_68 = arith.constant dense<0.000000e+00> : vector<256x128xf32>
    %66 = tpu.matmul %63, %65, %cst_68 {dimension_numbers = #tpu.dot_dimension_numbers<[1], [0], [0], [1], [0, 0, 1, 1], [], []>} : vector<256x128xf32>, vector<128x128xf32>, vector<256x128xf32> -> vector<256x128xf32>
    %67 = arith.addf %61, %66 : vector<256x128xf32>
    %68 = vector.shape_cast %67 : vector<256x128xf32> to vector<1x256x128xf32>
    %c0_69 = arith.constant 0 : index
    %c0_70 = arith.constant 0 : index
    %c0_71 = arith.constant 0 : index
    %69 = vector.load %arg4[%c0_69, %c0_70, %c0_71] : memref<1x256x128xf32, #tpu.memory_space<vmem>>, vector<1x256x128xf32>
    tpu.vector_store %arg4[%c0_69, %c0_70, %c0_71], %68 {strides = array<i32>} : memref<1x256x128xf32, #tpu.memory_space<vmem>>, vector<1x256x128xf32>,
    %cst_72 = arith.constant dense<0.000000e+00> : vector<128xf32>
    %70 = vector.multi_reduction <add>, %67, %cst_72 [0] : vector<256x128xf32> to vector<128xf32>
    %71 = vector.shape_cast %70 : vector<128xf32> to vector<1x128xf32>
    %c0_73 = arith.constant 0 : index
    %c0_74 = arith.constant 0 : index
    %c0_75 = arith.constant 0 : index
    %72 = vector.load %arg5[%c0_73, %c0_74, %c0_75] : memref<1x2x128xf32, #tpu.memory_space<vmem>>, vector<1x1x128xf32>
    %73 = vector.shape_cast %72 : vector<1x1x128xf32> to vector<1x128xf32>
    %74 = vector.shape_cast %71 : vector<1x128xf32> to vector<1x1x128xf32>
    tpu.vector_store %arg5[%c0_73, %c0_74, %c0_75], %74 {strides = array<i32>} : memref<1x2x128xf32, #tpu.memory_space<vmem>>, vector<1x1x128xf32>,
    %75 = arith.mulf %67, %67 : vector<256x128xf32>
    %cst_76 = arith.constant dense<0.000000e+00> : vector<128xf32>
    %76 = vector.multi_reduction <add>, %75, %cst_76 [0] : vector<256x128xf32> to vector<128xf32>
    %77 = vector.shape_cast %76 : vector<128xf32> to vector<1x128xf32>
    %c0_77 = arith.constant 0 : index
    %c1_78 = arith.constant 1 : index
    %c0_79 = arith.constant 0 : index
    %78 = vector.load %arg5[%c0_77, %c1_78, %c0_79] : memref<1x2x128xf32, #tpu.memory_space<vmem>>, vector<1x1x128xf32>
    %79 = vector.shape_cast %78 : vector<1x1x128xf32> to vector<1x128xf32>
    %80 = vector.shape_cast %77 : vector<1x128xf32> to vector<1x1x128xf32>
    tpu.vector_store %arg5[%c0_77, %c1_78, %c0_79], %80 {strides = array<i32>} : memref<1x2x128xf32, #tpu.memory_space<vmem>>, vector<1x1x128xf32>,
    return
  }
  func.func @transform_0(%arg0: i32) -> (i32, i32, i32, i32) {
    %c0_i32 = arith.constant 0 : i32
    %c0_i32_0 = arith.constant 0 : i32
    %c0_i32_1 = arith.constant 0 : i32
    %c0_i32_2 = arith.constant 0 : i32
    return %arg0, %c0_i32, %c0_i32_0, %c0_i32_1 : i32, i32, i32, i32
  }
  func.func @transform_1(%arg0: i32) -> (i32, i32) {
    %c0_i32 = arith.constant 0 : i32
    %c0_i32_0 = arith.constant 0 : i32
    %c0_i32_1 = arith.constant 0 : i32
    return %c0_i32, %c0_i32_0 : i32, i32
  }
  func.func @transform_2(%arg0: i32) -> (i32, i32, i32) {
    %c0_i32 = arith.constant 0 : i32
    %c0_i32_0 = arith.constant 0 : i32
    %c0_i32_1 = arith.constant 0 : i32
    %c0_i32_2 = arith.constant 0 : i32
    return %c0_i32, %c0_i32_0, %c0_i32_1 : i32, i32, i32
  }
  func.func @transform_3(%arg0: i32) -> (i32, i32, i32) {
    %c0_i32 = arith.constant 0 : i32
    %c0_i32_0 = arith.constant 0 : i32
    %c0_i32_1 = arith.constant 0 : i32
    return %arg0, %c0_i32, %c0_i32_0 : i32, i32, i32
  }
  func.func @transform_4(%arg0: i32) -> (i32, i32, i32) {
    %c0_i32 = arith.constant 0 : i32
    %c0_i32_0 = arith.constant 0 : i32
    %c0_i32_1 = arith.constant 0 : i32
    return %arg0, %c0_i32, %c0_i32_0 : i32, i32, i32
  }
}

module attributes {stable_mosaic.version = 11 : i64} {
  func.func @_bn_relu_conv3x3_kernel(%arg0: i32, %arg1: memref<1x16x16x128xf32, #tpu.memory_space<vmem>>, %arg2: memref<2x128xf32, #tpu.memory_space<vmem>>, %arg3: memref<9x128x128xf32, #tpu.memory_space<vmem>>, %arg4: memref<1x256x128xf32, #tpu.memory_space<vmem>>, %arg5: memref<1x2x128xf32, #tpu.memory_space<vmem>>, %arg6: memref<18x18x128xf32, #tpu.memory_space<vmem>>) attributes {dimension_semantics = [#tpu.dimension_semantics<parallel>], iteration_bounds = array<i64: 2>, scalar_prefetch = 0 : i64, scratch_operands = 1 : i64, tpu.core_type = #tpu.core_type<tc>, window_params = [{transform_indices = @transform_0, window_bounds = array<i64: 1, 16, 16, 128>}, {pipeline_mode = #tpu.pipeline_mode<synchronous>, transform_indices = @transform_1, window_bounds = array<i64: 2, 128>}, {pipeline_mode = #tpu.pipeline_mode<synchronous>, transform_indices = @transform_2, window_bounds = array<i64: 9, 128, 128>}, {transform_indices = @transform_3, window_bounds = array<i64: 1, 256, 128>}, {transform_indices = @transform_4, window_bounds = array<i64: 1, 2, 128>}]} {
    %c0 = arith.constant 0 : index
    %c0_0 = arith.constant 0 : index
    %c0_1 = arith.constant 0 : index
    %c0_2 = arith.constant 0 : index
    %0 = vector.load %arg1[%c0, %c0_0, %c0_1, %c0_2] : memref<1x16x16x128xf32, #tpu.memory_space<vmem>>, vector<1x16x16x128xf32>
    %1 = vector.shape_cast %0 : vector<1x16x16x128xf32> to vector<16x16x128xf32>
    %c0_3 = arith.constant 0 : index
    %c0_4 = arith.constant 0 : index
    %2 = vector.load %arg2[%c0_3, %c0_4] : memref<2x128xf32, #tpu.memory_space<vmem>>, vector<1x128xf32>
    %3 = vector.shape_cast %2 : vector<1x128xf32> to vector<1x1x128xf32>
    %c1 = arith.constant 1 : index
    %c0_5 = arith.constant 0 : index
    %4 = vector.load %arg2[%c1, %c0_5] : memref<2x128xf32, #tpu.memory_space<vmem>>, vector<1x128xf32>
    %5 = vector.shape_cast %4 : vector<1x128xf32> to vector<1x1x128xf32>
    %6 = vector.broadcast %3 : vector<1x1x128xf32> to vector<16x16x128xf32>
    %7 = arith.mulf %1, %6 : vector<16x16x128xf32>
    %8 = vector.broadcast %5 : vector<1x1x128xf32> to vector<16x16x128xf32>
    %9 = arith.addf %7, %8 : vector<16x16x128xf32>
    %cst = arith.constant 0.000000e+00 : f32
    %10 = vector.broadcast %cst : f32 to vector<16x16x128xf32>
    %11 = arith.maximumf %9, %10 : vector<16x16x128xf32>
    %cst_6 = arith.constant 0.000000e+00 : f32
    %12 = vector.broadcast %cst_6 : f32 to vector<18x18x128xf32>
    %c0_7 = arith.constant 0 : index
    %c0_8 = arith.constant 0 : index
    %c0_9 = arith.constant 0 : index
    %13 = vector.load %arg6[%c0_7, %c0_8, %c0_9] : memref<18x18x128xf32, #tpu.memory_space<vmem>>, vector<18x18x128xf32>
    tpu.vector_store %arg6[%c0_7, %c0_8, %c0_9], %12 {strides = array<i32>} : memref<18x18x128xf32, #tpu.memory_space<vmem>>, vector<18x18x128xf32>,
    %c1_10 = arith.constant 1 : index
    %c1_11 = arith.constant 1 : index
    %c0_12 = arith.constant 0 : index
    %14 = vector.load %arg6[%c1_10, %c1_11, %c0_12] : memref<18x18x128xf32, #tpu.memory_space<vmem>>, vector<16x16x128xf32>
    tpu.vector_store %arg6[%c1_10, %c1_11, %c0_12], %11 {strides = array<i32>} : memref<18x18x128xf32, #tpu.memory_space<vmem>>, vector<16x16x128xf32>,
    %c0_13 = arith.constant 0 : index
    %c0_14 = arith.constant 0 : index
    %c0_15 = arith.constant 0 : index
    %15 = vector.load %arg6[%c0_13, %c0_14, %c0_15] : memref<18x18x128xf32, #tpu.memory_space<vmem>>, vector<16x16x128xf32>
    %16 = vector.shape_cast %15 : vector<16x16x128xf32> to vector<256x128xf32>
    %c0_16 = arith.constant 0 : index
    %c0_17 = arith.constant 0 : index
    %c0_18 = arith.constant 0 : index
    %17 = vector.load %arg3[%c0_16, %c0_17, %c0_18] : memref<9x128x128xf32, #tpu.memory_space<vmem>>, vector<1x128x128xf32>
    %18 = vector.shape_cast %17 : vector<1x128x128xf32> to vector<128x128xf32>
    %cst_19 = arith.constant dense<0.000000e+00> : vector<256x128xf32>
    %19 = tpu.matmul %16, %18, %cst_19 {dimension_numbers = #tpu.dot_dimension_numbers<[1], [0], [0], [1], [0, 0, 1, 1], [], []>} : vector<256x128xf32>, vector<128x128xf32>, vector<256x128xf32> -> vector<256x128xf32>
    %c0_20 = arith.constant 0 : index
    %c1_21 = arith.constant 1 : index
    %c0_22 = arith.constant 0 : index
    %20 = vector.load %arg6[%c0_20, %c1_21, %c0_22] : memref<18x18x128xf32, #tpu.memory_space<vmem>>, vector<16x16x128xf32>
    %21 = vector.shape_cast %20 : vector<16x16x128xf32> to vector<256x128xf32>
    %c1_23 = arith.constant 1 : index
    %c0_24 = arith.constant 0 : index
    %c0_25 = arith.constant 0 : index
    %22 = vector.load %arg3[%c1_23, %c0_24, %c0_25] : memref<9x128x128xf32, #tpu.memory_space<vmem>>, vector<1x128x128xf32>
    %23 = vector.shape_cast %22 : vector<1x128x128xf32> to vector<128x128xf32>
    %cst_26 = arith.constant dense<0.000000e+00> : vector<256x128xf32>
    %24 = tpu.matmul %21, %23, %cst_26 {dimension_numbers = #tpu.dot_dimension_numbers<[1], [0], [0], [1], [0, 0, 1, 1], [], []>} : vector<256x128xf32>, vector<128x128xf32>, vector<256x128xf32> -> vector<256x128xf32>
    %25 = arith.addf %19, %24 : vector<256x128xf32>
    %c0_27 = arith.constant 0 : index
    %c2 = arith.constant 2 : index
    %c0_28 = arith.constant 0 : index
    %26 = vector.load %arg6[%c0_27, %c2, %c0_28] : memref<18x18x128xf32, #tpu.memory_space<vmem>>, vector<16x16x128xf32>
    %27 = vector.shape_cast %26 : vector<16x16x128xf32> to vector<256x128xf32>
    %c2_29 = arith.constant 2 : index
    %c0_30 = arith.constant 0 : index
    %c0_31 = arith.constant 0 : index
    %28 = vector.load %arg3[%c2_29, %c0_30, %c0_31] : memref<9x128x128xf32, #tpu.memory_space<vmem>>, vector<1x128x128xf32>
    %29 = vector.shape_cast %28 : vector<1x128x128xf32> to vector<128x128xf32>
    %cst_32 = arith.constant dense<0.000000e+00> : vector<256x128xf32>
    %30 = tpu.matmul %27, %29, %cst_32 {dimension_numbers = #tpu.dot_dimension_numbers<[1], [0], [0], [1], [0, 0, 1, 1], [], []>} : vector<256x128xf32>, vector<128x128xf32>, vector<256x128xf32> -> vector<256x128xf32>
    %31 = arith.addf %25, %30 : vector<256x128xf32>
    %c1_33 = arith.constant 1 : index
    %c0_34 = arith.constant 0 : index
    %c0_35 = arith.constant 0 : index
    %32 = vector.load %arg6[%c1_33, %c0_34, %c0_35] : memref<18x18x128xf32, #tpu.memory_space<vmem>>, vector<16x16x128xf32>
    %33 = vector.shape_cast %32 : vector<16x16x128xf32> to vector<256x128xf32>
    %c3 = arith.constant 3 : index
    %c0_36 = arith.constant 0 : index
    %c0_37 = arith.constant 0 : index
    %34 = vector.load %arg3[%c3, %c0_36, %c0_37] : memref<9x128x128xf32, #tpu.memory_space<vmem>>, vector<1x128x128xf32>
    %35 = vector.shape_cast %34 : vector<1x128x128xf32> to vector<128x128xf32>
    %cst_38 = arith.constant dense<0.000000e+00> : vector<256x128xf32>
    %36 = tpu.matmul %33, %35, %cst_38 {dimension_numbers = #tpu.dot_dimension_numbers<[1], [0], [0], [1], [0, 0, 1, 1], [], []>} : vector<256x128xf32>, vector<128x128xf32>, vector<256x128xf32> -> vector<256x128xf32>
    %37 = arith.addf %31, %36 : vector<256x128xf32>
    %c1_39 = arith.constant 1 : index
    %c1_40 = arith.constant 1 : index
    %c0_41 = arith.constant 0 : index
    %38 = vector.load %arg6[%c1_39, %c1_40, %c0_41] : memref<18x18x128xf32, #tpu.memory_space<vmem>>, vector<16x16x128xf32>
    %39 = vector.shape_cast %38 : vector<16x16x128xf32> to vector<256x128xf32>
    %c4 = arith.constant 4 : index
    %c0_42 = arith.constant 0 : index
    %c0_43 = arith.constant 0 : index
    %40 = vector.load %arg3[%c4, %c0_42, %c0_43] : memref<9x128x128xf32, #tpu.memory_space<vmem>>, vector<1x128x128xf32>
    %41 = vector.shape_cast %40 : vector<1x128x128xf32> to vector<128x128xf32>
    %cst_44 = arith.constant dense<0.000000e+00> : vector<256x128xf32>
    %42 = tpu.matmul %39, %41, %cst_44 {dimension_numbers = #tpu.dot_dimension_numbers<[1], [0], [0], [1], [0, 0, 1, 1], [], []>} : vector<256x128xf32>, vector<128x128xf32>, vector<256x128xf32> -> vector<256x128xf32>
    %43 = arith.addf %37, %42 : vector<256x128xf32>
    %c1_45 = arith.constant 1 : index
    %c2_46 = arith.constant 2 : index
    %c0_47 = arith.constant 0 : index
    %44 = vector.load %arg6[%c1_45, %c2_46, %c0_47] : memref<18x18x128xf32, #tpu.memory_space<vmem>>, vector<16x16x128xf32>
    %45 = vector.shape_cast %44 : vector<16x16x128xf32> to vector<256x128xf32>
    %c5 = arith.constant 5 : index
    %c0_48 = arith.constant 0 : index
    %c0_49 = arith.constant 0 : index
    %46 = vector.load %arg3[%c5, %c0_48, %c0_49] : memref<9x128x128xf32, #tpu.memory_space<vmem>>, vector<1x128x128xf32>
    %47 = vector.shape_cast %46 : vector<1x128x128xf32> to vector<128x128xf32>
    %cst_50 = arith.constant dense<0.000000e+00> : vector<256x128xf32>
    %48 = tpu.matmul %45, %47, %cst_50 {dimension_numbers = #tpu.dot_dimension_numbers<[1], [0], [0], [1], [0, 0, 1, 1], [], []>} : vector<256x128xf32>, vector<128x128xf32>, vector<256x128xf32> -> vector<256x128xf32>
    %49 = arith.addf %43, %48 : vector<256x128xf32>
    %c2_51 = arith.constant 2 : index
    %c0_52 = arith.constant 0 : index
    %c0_53 = arith.constant 0 : index
    %50 = vector.load %arg6[%c2_51, %c0_52, %c0_53] : memref<18x18x128xf32, #tpu.memory_space<vmem>>, vector<16x16x128xf32>
    %51 = vector.shape_cast %50 : vector<16x16x128xf32> to vector<256x128xf32>
    %c6 = arith.constant 6 : index
    %c0_54 = arith.constant 0 : index
    %c0_55 = arith.constant 0 : index
    %52 = vector.load %arg3[%c6, %c0_54, %c0_55] : memref<9x128x128xf32, #tpu.memory_space<vmem>>, vector<1x128x128xf32>
    %53 = vector.shape_cast %52 : vector<1x128x128xf32> to vector<128x128xf32>
    %cst_56 = arith.constant dense<0.000000e+00> : vector<256x128xf32>
    %54 = tpu.matmul %51, %53, %cst_56 {dimension_numbers = #tpu.dot_dimension_numbers<[1], [0], [0], [1], [0, 0, 1, 1], [], []>} : vector<256x128xf32>, vector<128x128xf32>, vector<256x128xf32> -> vector<256x128xf32>
    %55 = arith.addf %49, %54 : vector<256x128xf32>
    %c2_57 = arith.constant 2 : index
    %c1_58 = arith.constant 1 : index
    %c0_59 = arith.constant 0 : index
    %56 = vector.load %arg6[%c2_57, %c1_58, %c0_59] : memref<18x18x128xf32, #tpu.memory_space<vmem>>, vector<16x16x128xf32>
    %57 = vector.shape_cast %56 : vector<16x16x128xf32> to vector<256x128xf32>
    %c7 = arith.constant 7 : index
    %c0_60 = arith.constant 0 : index
    %c0_61 = arith.constant 0 : index
    %58 = vector.load %arg3[%c7, %c0_60, %c0_61] : memref<9x128x128xf32, #tpu.memory_space<vmem>>, vector<1x128x128xf32>
    %59 = vector.shape_cast %58 : vector<1x128x128xf32> to vector<128x128xf32>
    %cst_62 = arith.constant dense<0.000000e+00> : vector<256x128xf32>
    %60 = tpu.matmul %57, %59, %cst_62 {dimension_numbers = #tpu.dot_dimension_numbers<[1], [0], [0], [1], [0, 0, 1, 1], [], []>} : vector<256x128xf32>, vector<128x128xf32>, vector<256x128xf32> -> vector<256x128xf32>
    %61 = arith.addf %55, %60 : vector<256x128xf32>
    %c2_63 = arith.constant 2 : index
    %c2_64 = arith.constant 2 : index
    %c0_65 = arith.constant 0 : index
    %62 = vector.load %arg6[%c2_63, %c2_64, %c0_65] : memref<18x18x128xf32, #tpu.memory_space<vmem>>, vector<16x16x128xf32>
    %63 = vector.shape_cast %62 : vector<16x16x128xf32> to vector<256x128xf32>
    %c8 = arith.constant 8 : index
    %c0_66 = arith.constant 0 : index
    %c0_67 = arith.constant 0 : index
    %64 = vector.load %arg3[%c8, %c0_66, %c0_67] : memref<9x128x128xf32, #tpu.memory_space<vmem>>, vector<1x128x128xf32>
    %65 = vector.shape_cast %64 : vector<1x128x128xf32> to vector<128x128xf32>
    %cst_68 = arith.constant dense<0.000000e+00> : vector<256x128xf32>
    %66 = tpu.matmul %63, %65, %cst_68 {dimension_numbers = #tpu.dot_dimension_numbers<[1], [0], [0], [1], [0, 0, 1, 1], [], []>} : vector<256x128xf32>, vector<128x128xf32>, vector<256x128xf32> -> vector<256x128xf32>
    %67 = arith.addf %61, %66 : vector<256x128xf32>
    %68 = vector.shape_cast %67 : vector<256x128xf32> to vector<1x256x128xf32>
    %c0_69 = arith.constant 0 : index
    %c0_70 = arith.constant 0 : index
    %c0_71 = arith.constant 0 : index
    %69 = vector.load %arg4[%c0_69, %c0_70, %c0_71] : memref<1x256x128xf32, #tpu.memory_space<vmem>>, vector<1x256x128xf32>
    tpu.vector_store %arg4[%c0_69, %c0_70, %c0_71], %68 {strides = array<i32>} : memref<1x256x128xf32, #tpu.memory_space<vmem>>, vector<1x256x128xf32>,
    %cst_72 = arith.constant dense<0.000000e+00> : vector<128xf32>
    %70 = vector.multi_reduction <add>, %67, %cst_72 [0] : vector<256x128xf32> to vector<128xf32>
    %71 = vector.shape_cast %70 : vector<128xf32> to vector<1x128xf32>
    %c0_73 = arith.constant 0 : index
    %c0_74 = arith.constant 0 : index
    %c0_75 = arith.constant 0 : index
    %72 = vector.load %arg5[%c0_73, %c0_74, %c0_75] : memref<1x2x128xf32, #tpu.memory_space<vmem>>, vector<1x1x128xf32>
    %73 = vector.shape_cast %72 : vector<1x1x128xf32> to vector<1x128xf32>
    %74 = vector.shape_cast %71 : vector<1x128xf32> to vector<1x1x128xf32>
    tpu.vector_store %arg5[%c0_73, %c0_74, %c0_75], %74 {strides = array<i32>} : memref<1x2x128xf32, #tpu.memory_space<vmem>>, vector<1x1x128xf32>,
    %75 = arith.mulf %67, %67 : vector<256x128xf32>
    %cst_76 = arith.constant dense<0.000000e+00> : vector<128xf32>
    %76 = vector.multi_reduction <add>, %75, %cst_76 [0] : vector<256x128xf32> to vector<128xf32>
    %77 = vector.shape_cast %76 : vector<128xf32> to vector<1x128xf32>
    %c0_77 = arith.constant 0 : index
    %c1_78 = arith.constant 1 : index
    %c0_79 = arith.constant 0 : index
    %78 = vector.load %arg5[%c0_77, %c1_78, %c0_79] : memref<1x2x128xf32, #tpu.memory_space<vmem>>, vector<1x1x128xf32>
    %79 = vector.shape_cast %78 : vector<1x1x128xf32> to vector<1x128xf32>
    %80 = vector.shape_cast %77 : vector<1x128xf32> to vector<1x1x128xf32>
    tpu.vector_store %arg5[%c0_77, %c1_78, %c0_79], %80 {strides = array<i32>} : memref<1x2x128xf32, #tpu.memory_space<vmem>>, vector<1x1x128xf32>,
    return
  }
  func.func @transform_0(%arg0: i32) -> (i32, i32, i32, i32) {
    %c0_i32 = arith.constant 0 : i32
    %c0_i32_0 = arith.constant 0 : i32
    %c0_i32_1 = arith.constant 0 : i32
    %c0_i32_2 = arith.constant 0 : i32
    return %arg0, %c0_i32, %c0_i32_0, %c0_i32_1 : i32, i32, i32, i32
  }
  func.func @transform_1(%arg0: i32) -> (i32, i32) {
    %c0_i32 = arith.constant 0 : i32
    %c0_i32_0 = arith.constant 0 : i32
    %c0_i32_1 = arith.constant 0 : i32
    return %c0_i32, %c0_i32_0 : i32, i32
  }
  func.func @transform_2(%arg0: i32) -> (i32, i32, i32) {
    %c0_i32 = arith.constant 0 : i32
    %c0_i32_0 = arith.constant 0 : i32
    %c0_i32_1 = arith.constant 0 : i32
    %c0_i32_2 = arith.constant 0 : i32
    return %c0_i32, %c0_i32_0, %c0_i32_1 : i32, i32, i32
  }
  func.func @transform_3(%arg0: i32) -> (i32, i32, i32) {
    %c0_i32 = arith.constant 0 : i32
    %c0_i32_0 = arith.constant 0 : i32
    %c0_i32_1 = arith.constant 0 : i32
    return %arg0, %c0_i32, %c0_i32_0 : i32, i32, i32
  }
  func.func @transform_4(%arg0: i32) -> (i32, i32, i32) {
    %c0_i32 = arith.constant 0 : i32
    %c0_i32_0 = arith.constant 0 : i32
    %c0_i32_1 = arith.constant 0 : i32
    return %arg0, %c0_i32, %c0_i32_0 : i32, i32, i32
  }
}

</mosaic_0001>

<bundles_post_ra>
// kernel: _dense_block_forward_impl.4
= control target key start
LH: loop header
LB: loop body
LE: loop exit
PB: predicated region body
PF: predicated region fallthrough
CT: control target
= control target key end

     0   :  { %s1710_s2 = inlined_call_operand.vmem [shape: f32[128,128], index: 2, kind: input, shape index: {}]   ;;  %s1711_s1 = inlined_call_operand.vmem [shape: f32[2,128], index: 1, kind: input, shape index: {}]   ;;  %s1712_s0 = inlined_call_operand.vmem [shape: f32[512,128], index: 0, kind: input, shape index: {}]   ;;  %s1713_s3 = inlined_call_operand.vmem [shape: f32[512,128], index: 3, kind: output, shape index: {0}]   ;;  %s1714_s4 = inlined_call_operand.vmem [shape: f32[1,2,128], index: 4, kind: output, shape index: {1}]  }
   0x1   :  { %v291_v0 = vld [vmem:[%s1710_s2 + $0x78] sm:$0xff]  ;;  %v290_v1 = vld [vmem:[%s1710_s2 + $0x70] sm:$0xff]  ;;  %v289_v2 = vld [vmem:[%s1710_s2 + $0x68] sm:$0xff] }
   0x2   :  { %292 = vmatpush.msra.mxu0 %v291_v0  ;;  %777 = vmatpush.msra.mxu1 %v291_v0  ;;  %v288_v3 = vld [vmem:[%s1710_s2 + $0x60] sm:$0xff]  ;;  %v287_v4 = vld [vmem:[%s1710_s2 + $0x58] sm:$0xff]  ;;  %v286_v5 = vld [vmem:[%s1710_s2 + $0x50] sm:$0xff] }
   0x3   :  { %778 = vmatpush.msra.mxu2 %v291_v0  ;;  %779 = vmatpush.msra.mxu3 %v291_v0  ;;  %v285_v6 = vld [vmem:[%s1710_s2 + $0x48] sm:$0xff]  ;;  %v284_v7 = vld [vmem:[%s1710_s2 + $0x40] sm:$0xff]  ;;  %v283_v8 = vld [vmem:[%s1710_s2 + $0x38] sm:$0xff] }
   0x4   :  { %293 = vmatpush.msra.mxu0 %v290_v1  ;;  %780 = vmatpush.msra.mxu1 %v290_v1  ;;  %v282_v9 = vld [vmem:[%s1710_s2 + $0x30] sm:$0xff]  ;;  %v885_v10 = vld [vmem:[%s1711_s1] ss:$0 sm:$0xff]  ;;  %v281_v12 = vld [vmem:[%s1710_s2 + $0x28] sm:$0xff] }
   0x5   :  { %781 = vmatpush.msra.mxu2 %v290_v1  ;;  %782 = vmatpush.msra.mxu3 %v290_v1  ;;  %v16_v11 = vld [vmem:[%s1712_s0] sm:$0xff]  ;;  %v279_v16 = vld [vmem:[%s1710_s2 + $0x18] sm:$0xff]  ;;  %v278_v17 = vld [vmem:[%s1710_s2 + $0x10] sm:$0xff] }
   0x6   :  { %294 = vmatpush.msra.mxu0 %v289_v2  ;;  %783 = vmatpush.msra.mxu1 %v289_v2  ;;  %v280_v13 = vld [vmem:[%s1710_s2 + $0x20] sm:$0xff]  ;;  %v82_v14 = vmul.f32 %v885_v10, %v16_v11  ;;  %v17_v19 = vld [vmem:[%s1712_s0 + $0x8] sm:$0xff]  ;;  %v18_v29 = vld [vmem:[%s1712_s0 + $0x10] sm:$0xff] }
   0x7   :  { %784 = vmatpush.msra.mxu2 %v289_v2  ;;  %785 = vmatpush.msra.mxu3 %v289_v2  ;;  %v900_v15 = vld [vmem:[%s1711_s1 + $0x1] ss:$0 sm:$0xff]  ;;  %v277_v21 = vld [vmem:[%s1710_s2 + $0x8] sm:$0xff]  ;;  %v83_v25 = vmul.f32 %v885_v10, %v17_v19  ;;  %v84_v33 = vmul.f32 %v885_v10, %v18_v29  ;;  %v19_v37 = vld [vmem:[%s1712_s0 + $0x18] sm:$0xff] }
   0x8   :  { %295 = vmatpush.msra.mxu0 %v288_v3  ;;  %786 = vmatpush.msra.mxu1 %v288_v3  ;;  %v148_v18 = vadd.f32 %v900_v15, %v82_v14  ;;  %v32_v20 = vld [vmem:[%s1712_s0 + $0x80] sm:$0xff]  ;;  %v33_v30 = vld [vmem:[%s1712_s0 + $0x88] sm:$0xff]  ;;  %v34_v38 = vld [vmem:[%s1712_s0 + $0x90] sm:$0xff]  ;;  %v85_v41 = vmul.f32 %v885_v10, %v19_v37 }
   0x9   :  { %787 = vmatpush.msra.mxu2 %v288_v3  ;;  %788 = vmatpush.msra.mxu3 %v288_v3  ;;  %v98_v22 = vmul.f32 %v885_v10, %v32_v20  ;;  %v276_v23 = vld [vmem:[%s1710_s2] sm:$0xff]  ;;  %v149_v28 = vadd.f32 %v900_v15, %v83_v25  ;;  %v99_v31 = vmul.f32 %v885_v10, %v33_v30  ;;  %v35_v46 = vld [vmem:[%s1712_s0 + $0x98] sm:$0xff]  ;;  %v21_v57 = vld [vmem:[%s1712_s0 + $0x28] sm:$0xff] }
   0xa   :  { %296 = vmatpush.msra.mxu0 %v287_v4  ;;  %789 = vmatpush.msra.mxu1 %v287_v4  ;;  %v212_v24 = vmax.f32 %v148_v18, 0.0  ;;  %v150_v36 = vadd.f32 %v900_v15, %v84_v33  ;;  %v100_v39 = vmul.f32 %v885_v10, %v34_v38  ;;  %v151_v44 = vadd.f32 %v900_v15, %v85_v41  ;;  %v20_v45 = vld [vmem:[%s1712_s0 + $0x20] sm:$0xff]  ;;  %v49_v60 = vld [vmem:[%s1712_s0 + $0x108] sm:$0xff]  ;;  %v23_v19 = vld [vmem:[%s1712_s0 + $0x38] sm:$0xff] }
   0xb   :  { %790 = vmatpush.msra.mxu2 %v287_v4  ;;  %791 = vmatpush.msra.mxu3 %v287_v4  ;;  %v164_v26 = vadd.f32 %v900_v15, %v98_v22  ;;  %v213_v32 = vmax.f32 %v149_v28, 0.0  ;;  %v165_v34 = vadd.f32 %v900_v15, %v99_v31  ;;  %v101_v47 = vmul.f32 %v885_v10, %v35_v46  ;;  %v48_v48 = vld [vmem:[%s1712_s0 + $0x100] sm:$0xff]  ;;  %v38_v20 = vld [vmem:[%s1712_s0 + $0xb0] sm:$0xff]  ;;  %v51_v22 = vld [vmem:[%s1712_s0 + $0x118] sm:$0xff] }
   0xc   :  { %297 = vmatpush.msra.mxu0 %v286_v5  ;;  %792 = vmatpush.msra.mxu1 %v286_v5  ;;  %v214_v40 = vmax.f32 %v150_v36, 0.0  ;;  %v166_v42 = vadd.f32 %v900_v15, %v100_v39  ;;  %v215_v49 = vmax.f32 %v151_v44, 0.0  ;;  %v86_v50 = vmul.f32 %v885_v10, %v20_v45  ;;  %v36_v58 = vld [vmem:[%s1712_s0 + $0xa0] sm:$0xff] }
   0xd   :  { %793 = vmatpush.msra.mxu2 %v286_v5  ;;  %794 = vmatpush.msra.mxu3 %v286_v5  ;;  %v228_v27 = vmax.f32 %v164_v26, 0.0  ;;  %v229_v35 = vmax.f32 %v165_v34, 0.0  ;;  %v167_v51 = vadd.f32 %v900_v15, %v101_v47  ;;  %v114_v52 = vmul.f32 %v885_v10, %v48_v48  ;;  %v22_v5 = vld [vmem:[%s1712_s0 + $0x30] sm:$0xff]  ;;  %v24_v30 = vld [vmem:[%s1712_s0 + $0x40] sm:$0xff]  ;;  %v25_v47 = vld [vmem:[%s1712_s0 + $0x48] sm:$0xff] }
   0xe   :  { %298 = vmatpush.msra.mxu0 %v285_v6  ;;  %795 = vmatpush.msra.mxu1 %v285_v6  ;;  %v230_v43 = vmax.f32 %v166_v42, 0.0  ;;  %v152_v55 = vadd.f32 %v900_v15, %v86_v50  ;;  %v102_v59 = vmul.f32 %v885_v10, %v36_v58  ;;  %v87_v62 = vmul.f32 %v885_v10, %v21_v57  ;;  %v64_v36 = vld [vmem:[%s1712_s0 + $0x180] sm:$0xff] }
   0xf   :  { %796 = vmatpush.msra.mxu2 %v285_v6  ;;  %797 = vmatpush.msra.mxu3 %v285_v6  ;;  %v231_v53 = vmax.f32 %v167_v51, 0.0  ;;  %v180_v54 = vadd.f32 %v900_v15, %v114_v52  ;;  %v115_v0 = vmul.f32 %v885_v10, %v49_v60  ;;  %v37_v6 = vld [vmem:[%s1712_s0 + $0xa8] sm:$0xff]  ;;  %v88_v11 = vmul.f32 %v885_v10, %v22_v5  ;;  %v40_v48 = vld [vmem:[%s1712_s0 + $0xc0] sm:$0xff] }
  0x10   :  { %299 = vmatpush.msra.mxu0 %v284_v7  ;;  %798 = vmatpush.msra.mxu1 %v284_v7  ;;  %v216_v61 = vmax.f32 %v152_v55, 0.0  ;;  %v168_v63 = vadd.f32 %v900_v15, %v102_v59  ;;  %v153_v3 = vadd.f32 %v900_v15, %v87_v62  ;;  %v117_v26 = vmul.f32 %v885_v10, %v51_v22  ;;  %v53_v51 = vld [vmem:[%s1712_s0 + $0x128] sm:$0xff]  ;;  %v67_v22 = vld [vmem:[%s1712_s0 + $0x198] sm:$0xff] }
  0x11   :  { %799 = vmatpush.msra.mxu2 %v284_v7  ;;  %800 = vmatpush.msra.mxu3 %v284_v7  ;;  %v244_v56 = vmax.f32 %v180_v54, 0.0  ;;  %v181_v2 = vadd.f32 %v900_v15, %v115_v0  ;;  %v103_v7 = vmul.f32 %v885_v10, %v37_v6  ;;  %v90_v34 = vmul.f32 %v885_v10, %v24_v30  ;;  %v65_v52 = vld [vmem:[%s1712_s0 + $0x188] sm:$0xff] }
  0x12   :  { %300 = vmatpush.msra.mxu0 %v283_v8  ;;  %801 = vmatpush.msra.mxu1 %v283_v8  ;;  %v232_v1 = vmax.f32 %v168_v63, 0.0  ;;  %v183_v28 = vadd.f32 %v900_v15, %v117_v26  ;;  %v119_v55 = vmul.f32 %v885_v10, %v53_v51  ;;  %v41_v0 = vld [vmem:[%s1712_s0 + $0xc8] sm:$0xff]  ;;  %v133_v26 = vmul.f32 %v885_v10, %v67_v22 }
  0x13   :  { %802 = vmatpush.msra.mxu2 %v283_v8  ;;  %803 = vmatpush.msra.mxu3 %v283_v8  ;;  %v245_v4 = vmax.f32 %v181_v2, 0.0  ;;  %v50_v8 = vld [vmem:[%s1712_s0 + $0x110] sm:$0xff]  ;;  %v156_v44 = vadd.f32 %v900_v15, %v90_v34  ;;  %v43_v34 = vld [vmem:[%s1712_s0 + $0xd8] sm:$0xff] }
  0x14   :  { %301 = vmatpush.msra.mxu0 %v282_v9  ;;  %804 = vmatpush.msra.mxu1 %v282_v9  ;;  %v247_v31 = vmax.f32 %v183_v28, 0.0  ;;  %v185_v58 = vadd.f32 %v900_v15, %v119_v55 }
  0x15   :  { %805 = vmatpush.msra.mxu2 %v282_v9  ;;  %806 = vmatpush.msra.mxu3 %v282_v9  ;;  %v217_v9 = vmax.f32 %v153_v3, 0.0  ;;  %v220_v50 = vmax.f32 %v156_v44, 0.0  ;;  %v54_v3 = vld [vmem:[%s1712_s0 + $0x130] sm:$0xff] }
  0x16   :  { %302 = vmatpush.msra.mxu0 %v281_v12  ;;  %807 = vmatpush.msra.mxu1 %v281_v12  ;;  %v249_v62 = vmax.f32 %v185_v58, 0.0 }
  0x17   :  { %808 = vmatpush.msra.mxu2 %v281_v12  ;;  %809 = vmatpush.msra.mxu3 %v281_v12  ;;  %v169_v12 = vadd.f32 %v900_v15, %v103_v7  ;;  %v120_v7 = vmul.f32 %v885_v10, %v54_v3 }
  0x18   :  { %303 = vmatpush.msra.mxu0 %v280_v13  ;;  %810 = vmatpush.msra.mxu1 %v280_v13 }
  0x19   :  { %811 = vmatpush.msra.mxu2 %v280_v13  ;;  %812 = vmatpush.msra.mxu3 %v280_v13  ;;  %v116_v13 = vmul.f32 %v885_v10, %v50_v8  ;;  %v233_v14 = vmax.f32 %v169_v12, 0.0 }
  0x1a   :  { %304 = vmatpush.msra.mxu0 %v279_v16  ;;  %813 = vmatpush.msra.mxu1 %v279_v16 }
  0x1b   :  { %814 = vmatpush.msra.mxu2 %v279_v16  ;;  %815 = vmatpush.msra.mxu3 %v279_v16  ;;  %v182_v16 = vadd.f32 %v900_v15, %v116_v13 }
  0x1c   :  { %305 = vmatpush.msra.mxu0 %v278_v17  ;;  %816 = vmatpush.msra.mxu1 %v278_v17 }
  0x1d   :  { %817 = vmatpush.msra.mxu2 %v278_v17  ;;  %818 = vmatpush.msra.mxu3 %v278_v17  ;;  %v154_v17 = vadd.f32 %v900_v15, %v88_v11  ;;  %v246_v18 = vmax.f32 %v182_v16, 0.0  ;;  %v186_v11 = vadd.f32 %v900_v15, %v120_v7 }
  0x1e   :  { %306 = vmatpush.msra.mxu0 %v277_v21  ;;  %819 = vmatpush.msra.mxu1 %v277_v21 }
  0x1f   :  { %820 = vmatpush.msra.mxu2 %v277_v21  ;;  %821 = vmatpush.msra.mxu3 %v277_v21  ;;  %v104_v21 = vmul.f32 %v885_v10, %v38_v20 }
  0x20   :  { %307 = vmatpush.msra.mxu0 %v276_v23  ;;  %822 = vmatpush.msra.mxu1 %v276_v23 }
  0x21   :  { %308 = vmatmul.f32.vlgmr.msra.gmra.mxu0 %v212_v24  ;;  %356 = vmatmul.f32.vlgmr.msra.gmra.mxu1 %v228_v27  ;;  %v89_v24 = vmul.f32 %v885_v10, %v23_v19  ;;  %v170_v25 = vadd.f32 %v900_v15, %v104_v21  ;;  %v55_v21 = vld [vmem:[%s1712_s0 + $0x138] sm:$0xff] }
  0x22   :  { %823 = vmatpush.msra.mxu2 %v276_v23  ;;  %824 = vmatpush.msra.mxu3 %v276_v23  ;;  %v218_v23 = vmax.f32 %v154_v17, 0.0  ;;  %v27_v17 = vld [vmem:[%s1712_s0 + $0x58] sm:$0xff] }
  0x23   :  { %404 = vmatmul.f32.vlgmr.msra.gmra.mxu2 %v244_v56  ;;  %v234_v27 = vmax.f32 %v170_v25, 0.0  ;;  %v155_v29 = vadd.f32 %v900_v15, %v89_v24  ;;  %v131_v56 = vmul.f32 %v885_v10, %v65_v52  ;;  %v121_v25 = vmul.f32 %v885_v10, %v55_v21 }
  0x25   :  { %v219_v37 = vmax.f32 %v155_v29, 0.0  ;;  %v197_v59 = vadd.f32 %v900_v15, %v131_v56  ;;  %v187_v28 = vadd.f32 %v900_v15, %v121_v25  ;;  %v199_v29 = vadd.f32 %v900_v15, %v133_v26 }
  0x27   :  { %v261_v63 = vmax.f32 %v197_v59, 0.0 }
  0x29   :  { %311 = vmatmul.f32.gmra.mxu0 %v213_v32  ;;  %359 = vmatmul.f32.gmra.mxu1 %v229_v35  ;;  %v39_v32 = vld [vmem:[%s1712_s0 + $0xb8] sm:$0xff]  ;;  %v52_v35 = vld [vmem:[%s1712_s0 + $0x120] sm:$0xff] }
  0x2a   :  { %v105_v33 = vmul.f32 %v885_v10, %v39_v32  ;;  %v118_v39 = vmul.f32 %v885_v10, %v52_v35  ;;  %v251_v32 = vmax.f32 %v187_v28, 0.0  ;;  %v109_v35 = vmul.f32 %v885_v10, %v43_v34 }
  0x2b   :  { %407 = vmatmul.f32.gmra.mxu2 %v245_v4  ;;  %v66_v4 = vld [vmem:[%s1712_s0 + $0x190] sm:$0xff] }
  0x2c   :  { %v171_v38 = vadd.f32 %v900_v15, %v105_v33  ;;  %v184_v42 = vadd.f32 %v900_v15, %v118_v39  ;;  %v132_v8 = vmul.f32 %v885_v10, %v66_v4  ;;  %v263_v33 = vmax.f32 %v199_v29, 0.0 }
  0x2e   :  { %v235_v41 = vmax.f32 %v171_v38, 0.0  ;;  %v248_v45 = vmax.f32 %v184_v42, 0.0  ;;  %v198_v12 = vadd.f32 %v900_v15, %v132_v8  ;;  %v68_v38 = vld [vmem:[%s1712_s0 + $0x1a0] sm:$0xff] }
  0x2f   :  { %v134_v42 = vmul.f32 %v885_v10, %v68_v38  ;;  %v72_v38 = vld [vmem:[%s1712_s0 + $0x1c0] sm:$0xff] }
  0x30   :  { %v262_v16 = vmax.f32 %v198_v12, 0.0 }
  0x31   :  { %314 = vmatmul.f32.gmra.mxu0 %v214_v40  ;;  %362 = vmatmul.f32.gmra.mxu1 %v230_v43  ;;  %v130_v40 = vmul.f32 %v885_v10, %v64_v36 }
  0x33   :  { %410 = vmatmul.f32.gmra.mxu2 %v246_v18  ;;  %v196_v43 = vadd.f32 %v900_v15, %v130_v40  ;;  %v42_v18 = vld [vmem:[%s1712_s0 + $0xd0] sm:$0xff]  ;;  %v175_v40 = vadd.f32 %v900_v15, %v109_v35  ;;  %v47_v35 = vld [vmem:[%s1712_s0 + $0xf8] sm:$0xff] }
  0x34   :  { %v108_v19 = vmul.f32 %v885_v10, %v42_v18 }
  0x35   :  { %v260_v46 = vmax.f32 %v196_v43, 0.0  ;;  %v239_v43 = vmax.f32 %v175_v40, 0.0 }
  0x36   :  { %v174_v24 = vadd.f32 %v900_v15, %v108_v19  ;;  %v31_v19 = vld [vmem:[%s1712_s0 + $0x78] sm:$0xff] }
  0x37   :  { %452 = vmatmul.f32.vlgmr.msra.gmra.mxu3 %v260_v46  ;;  %v97_v25 = vmul.f32 %v885_v10, %v31_v19 }
  0x39   :  { %317 = vmatmul.f32.gmra.mxu0 %v215_v49  ;;  %365 = vmatmul.f32.gmra.mxu1 %v231_v53  ;;  %v106_v49 = vmul.f32 %v885_v10, %v40_v48  ;;  %v91_v53 = vmul.f32 %v885_v10, %v25_v47 }
  0x3b   :  { %413 = vmatmul.f32.gmra.mxu2 %v247_v31  ;;  %v172_v54 = vadd.f32 %v900_v15, %v106_v49  ;;  %v157_v60 = vadd.f32 %v900_v15, %v91_v53  ;;  %v28_v31 = vld [vmem:[%s1712_s0 + $0x60] sm:$0xff]  ;;  %v29_v49 = vld [vmem:[%s1712_s0 + $0x68] sm:$0xff] }
  0x3c   :  { %v94_v36 = vmul.f32 %v885_v10, %v28_v31  ;;  %v57_v53 = vld [vmem:[%s1712_s0 + $0x148] sm:$0xff]  ;;  %v95_v55 = vmul.f32 %v885_v10, %v29_v49 }
  0x3d   :  { %v236_v57 = vmax.f32 %v172_v54, 0.0  ;;  %v221_v5 = vmax.f32 %v157_v60, 0.0  ;;  %v69_v54 = vld [vmem:[%s1712_s0 + $0x1a8] sm:$0xff] }
  0x3e   :  { %v160_v46 = vadd.f32 %v900_v15, %v94_v36  ;;  %v135_v58 = vmul.f32 %v885_v10, %v69_v54  ;;  %v113_v36 = vmul.f32 %v885_v10, %v47_v35  ;;  %v73_v49 = vld [vmem:[%s1712_s0 + $0x1c8] sm:$0xff] }
  0x3f   :  { %455 = vmatmul.f32.gmra.mxu3 %v261_v63  ;;  %v30_v63 = vld [vmem:[%s1712_s0 + $0x70] sm:$0xff] }
  0x40   :  { %v224_v52 = vmax.f32 %v160_v46, 0.0  ;;  %v96_v4 = vmul.f32 %v885_v10, %v30_v63  ;;  %v179_v40 = vadd.f32 %v900_v15, %v113_v36 }
  0x41   :  { %320 = vmatmul.f32.gmra.mxu0 %v216_v61  ;;  %368 = vmatmul.f32.gmra.mxu1 %v232_v1  ;;  %v26_v61 = vld [vmem:[%s1712_s0 + $0x50] sm:$0xff]  ;;  %v107_v1 = vmul.f32 %v885_v10, %v41_v0 }
  0x42   :  { %v92_v2 = vmul.f32 %v885_v10, %v26_v61  ;;  %v201_v61 = vadd.f32 %v900_v15, %v135_v58  ;;  %v62_v58 = vld [vmem:[%s1712_s0 + $0x170] sm:$0xff] }
  0x43   :  { %416 = vmatmul.f32.gmra.mxu2 %v248_v45  ;;  %v173_v6 = vadd.f32 %v900_v15, %v107_v1  ;;  %v200_v45 = vadd.f32 %v900_v15, %v134_v42  ;;  %v138_v42 = vmul.f32 %v885_v10, %v72_v38 }
  0x44   :  { %v158_v13 = vadd.f32 %v900_v15, %v92_v2  ;;  %v265_v1 = vmax.f32 %v201_v61, 0.0  ;;  %v45_v2 = vld [vmem:[%s1712_s0 + $0xe8] sm:$0xff] }
  0x45   :  { %v264_v48 = vmax.f32 %v200_v45, 0.0  ;;  %v111_v3 = vmul.f32 %v885_v10, %v45_v2  ;;  %v204_v45 = vadd.f32 %v900_v15, %v138_v42  ;;  %v78_v42 = vld [vmem:[%s1712_s0 + $0x1f0] sm:$0xff] }
  0x46   :  { %v222_v20 = vmax.f32 %v158_v13, 0.0 }
  0x47   :  { %458 = vmatmul.f32.gmra.mxu3 %v262_v16  ;;  %v177_v8 = vadd.f32 %v900_v15, %v111_v3  ;;  %v162_v16 = vadd.f32 %v900_v15, %v96_v4 }
  0x49   :  { %323 = vmatmul.f32.gmra.mxu0 %v217_v9  ;;  %371 = vmatmul.f32.gmra.mxu1 %v233_v14  ;;  %v237_v9 = vmax.f32 %v173_v6, 0.0  ;;  %v250_v14 = vmax.f32 %v186_v11, 0.0  ;;  %v70_v6 = vld [vmem:[%s1712_s0 + $0x1b0] sm:$0xff]  ;;  %v241_v12 = vmax.f32 %v177_v8, 0.0  ;;  %v226_v22 = vmax.f32 %v162_v16, 0.0  ;;  %v63_v8 = vld [vmem:[%s1712_s0 + $0x178] sm:$0xff] }
  0x4a   :  { %v136_v11 = vmul.f32 %v885_v10, %v70_v6 }
  0x4b   :  { %419 = vmatmul.f32.gmra.mxu2 %v249_v62  ;;  %v161_v62 = vadd.f32 %v900_v15, %v95_v55 }
  0x4d   :  { %v225_v7 = vmax.f32 %v161_v62, 0.0 }
  0x4f   :  { %461 = vmatmul.f32.gmra.mxu3 %v263_v33 }
  0x51   :  { %326 = vmatmul.f32.gmra.mxu0 %v218_v23  ;;  %374 = vmatmul.f32.gmra.mxu1 %v234_v27  ;;  %v93_v23 = vmul.f32 %v885_v10, %v27_v17  ;;  %v238_v27 = vmax.f32 %v174_v24, 0.0  ;;  %v71_v24 = vld [vmem:[%s1712_s0 + $0x1b8] sm:$0xff] }
  0x52   :  { %v137_v28 = vmul.f32 %v885_v10, %v71_v24 }
  0x53   :  { %422 = vmatmul.f32.gmra.mxu2 %v250_v14  ;;  %v159_v30 = vadd.f32 %v900_v15, %v93_v23  ;;  %v202_v14 = vadd.f32 %v900_v15, %v136_v11  ;;  %v59_v23 = vld [vmem:[%s1712_s0 + $0x158] sm:$0xff]  ;;  %v129_v11 = vmul.f32 %v885_v10, %v63_v8 }
  0x54   :  { %v203_v31 = vadd.f32 %v900_v15, %v137_v28 }
  0x55   :  { %v223_v39 = vmax.f32 %v159_v30, 0.0  ;;  %v266_v18 = vmax.f32 %v202_v14, 0.0 }
  0x56   :  { %v267_v34 = vmax.f32 %v203_v31, 0.0 }
  0x57   :  { %464 = vmatmul.f32.gmra.mxu3 %v264_v48  ;;  %v61_v48 = vld [vmem:[%s1712_s0 + $0x168] sm:$0xff] }
  0x59   :  { %329 = vmatmul.f32.gmra.mxu0 %v219_v37  ;;  %377 = vmatmul.f32.gmra.mxu1 %v235_v41  ;;  %v56_v37 = vld [vmem:[%s1712_s0 + $0x140] sm:$0xff] }
  0x5a   :  { %v122_v41 = vmul.f32 %v885_v10, %v56_v37  ;;  %v60_v37 = vld [vmem:[%s1712_s0 + $0x160] sm:$0xff] }
  0x5b   :  { %425 = vmatmul.f32.gmra.mxu2 %v251_v32  ;;  %v163_v32 = vadd.f32 %v900_v15, %v97_v25 }
  0x5c   :  { %v188_v44 = vadd.f32 %v900_v15, %v122_v41  ;;  %v126_v41 = vmul.f32 %v885_v10, %v60_v37 }
  0x5e   :  { %v252_v47 = vmax.f32 %v188_v44, 0.0  ;;  %v192_v44 = vadd.f32 %v900_v15, %v126_v41 }
  0x5f   :  { %467 = vmatmul.f32.gmra.mxu3 %v265_v1 }
  0x60   :  { %v256_v46 = vmax.f32 %v192_v44, 0.0 }
  0x61   :  { %332 = vmatmul.f32.gmra.mxu0 %v220_v50  ;;  %380 = vmatmul.f32.gmra.mxu1 %v236_v57  ;;  %v44_v50 = vld [vmem:[%s1712_s0 + $0xe0] sm:$0xff]  ;;  %v123_v57 = vmul.f32 %v885_v10, %v57_v53 }
  0x62   :  { %v110_v51 = vmul.f32 %v885_v10, %v44_v50  ;;  %v127_v50 = vmul.f32 %v885_v10, %v61_v48 }
  0x63   :  { %428 = vmatmul.f32.gmra.mxu2 %v252_v47  ;;  %v189_v60 = vadd.f32 %v900_v15, %v123_v57  ;;  %v268_v47 = vmax.f32 %v204_v45, 0.0 }
  0x64   :  { %v176_v56 = vadd.f32 %v900_v15, %v110_v51  ;;  %v139_v51 = vmul.f32 %v885_v10, %v73_v49  ;;  %v193_v54 = vadd.f32 %v900_v15, %v127_v50  ;;  %v79_v49 = vld [vmem:[%s1712_s0 + $0x1f8] sm:$0xff] }
  0x65   :  { %v253_v0 = vmax.f32 %v189_v60, 0.0  ;;  %v128_v60 = vmul.f32 %v885_v10, %v62_v58  ;;  %v145_v50 = vmul.f32 %v885_v10, %v79_v49 }
  0x66   :  { %v240_v59 = vmax.f32 %v176_v56, 0.0  ;;  %v205_v55 = vadd.f32 %v900_v15, %v139_v51  ;;  %v257_v56 = vmax.f32 %v193_v54, 0.0 }
  0x67   :  { %470 = vmatmul.f32.gmra.mxu3 %v266_v18  ;;  %v194_v3 = vadd.f32 %v900_v15, %v128_v60  ;;  %v195_v18 = vadd.f32 %v900_v15, %v129_v11 }
  0x68   :  { %v269_v57 = vmax.f32 %v205_v55, 0.0  ;;  %v211_v55 = vadd.f32 %v900_v15, %v145_v50 }
  0x69   :  { %335 = vmatmul.f32.gmra.mxu0 %v221_v5  ;;  %383 = vmatmul.f32.gmra.mxu1 %v237_v9  ;;  %v58_v5 = vld [vmem:[%s1712_s0 + $0x150] sm:$0xff]  ;;  %v258_v6 = vmax.f32 %v194_v3, 0.0 }
  0x6a   :  { %v124_v9 = vmul.f32 %v885_v10, %v58_v5 }
  0x6b   :  { %431 = vmatmul.f32.gmra.mxu2 %v253_v0 }
  0x6c   :  { %v190_v13 = vadd.f32 %v900_v15, %v124_v9  ;;  %v75_v9 = vld [vmem:[%s1712_s0 + $0x1d8] sm:$0xff] }
  0x6e   :  { %v254_v17 = vmax.f32 %v190_v13, 0.0 }
  0x6f   :  { %473 = vmatmul.f32.gmra.mxu3 %v267_v34 }
  0x71   :  { %338 = vmatmul.f32.gmra.mxu0 %v222_v20  ;;  %386 = vmatmul.f32.gmra.mxu1 %v238_v27  ;;  %v46_v20 = vld [vmem:[%s1712_s0 + $0xf0] sm:$0xff]  ;;  %v125_v27 = vmul.f32 %v885_v10, %v59_v23  ;;  %v76_v23 = vld [vmem:[%s1712_s0 + $0x1e0] sm:$0xff] }
  0x72   :  { %v112_v21 = vmul.f32 %v885_v10, %v46_v20  ;;  %v142_v24 = vmul.f32 %v885_v10, %v76_v23 }
  0x73   :  { %434 = vmatmul.f32.gmra.mxu2 %v254_v17  ;;  %v191_v30 = vadd.f32 %v900_v15, %v125_v27 }
  0x74   :  { %v178_v26 = vadd.f32 %v900_v15, %v112_v21  ;;  %v259_v21 = vmax.f32 %v195_v18, 0.0 }
  0x75   :  { %v255_v33 = vmax.f32 %v191_v30, 0.0 }
  0x76   :  { %v242_v29 = vmax.f32 %v178_v26, 0.0 }
  0x77   :  { %476 = vmatmul.f32.gmra.mxu3 %v268_v47 }
  0x79   :  { %341 = vmatmul.f32.gmra.mxu0 %v223_v39  ;;  %389 = vmatmul.f32.gmra.mxu1 %v239_v43  ;;  %v227_v39 = vmax.f32 %v163_v32, 0.0  ;;  %v243_v43 = vmax.f32 %v179_v40, 0.0  ;;  %v77_v32 = vld [vmem:[%s1712_s0 + $0x1e8] sm:$0xff] }
  0x7b   :  { %437 = vmatmul.f32.gmra.mxu2 %v255_v33  ;;  %v143_v33 = vmul.f32 %v885_v10, %v77_v32 }
  0x7f   :  { %479 = vmatmul.f32.gmra.mxu3 %v269_v57 }
  0x81   :  { %344 = vmatmul.f32.gmra.mxu0 %v224_v52  ;;  %392 = vmatmul.f32.gmra.mxu1 %v240_v59  ;;  %v74_v59 = vld [vmem:[%s1712_s0 + $0x1d0] sm:$0xff] }
  0x82   :  { %v140_v61 = vmul.f32 %v885_v10, %v74_v59 }
  0x83   :  { %440 = vmatmul.f32.gmra.mxu2 %v256_v46 }
  0x84   :  { %v206_v4 = vadd.f32 %v900_v15, %v140_v61 }
  0x89   :  { %347 = vmatmul.f32.gmra.mxu0 %v225_v7  ;;  %395 = vmatmul.f32.gmra.mxu1 %v241_v12  ;;  %v270_v7 = vmax.f32 %v206_v4, 0.0  ;;  %v141_v12 = vmul.f32 %v885_v10, %v75_v9 }
  0x8b   :  { %443 = vmatmul.f32.gmra.mxu2 %v257_v56  ;;  %482 = vmatmul.f32.gmra.mxu3 %v270_v7  ;;  %v207_v19 = vadd.f32 %v900_v15, %v141_v12 }
  0x91   :  { %350 = vmatmul.f32.gmra.mxu0 %v226_v22  ;;  %398 = vmatmul.f32.gmra.mxu1 %v242_v29  ;;  %v271_v22 = vmax.f32 %v207_v19, 0.0  ;;  %v208_v29 = vadd.f32 %v900_v15, %v142_v24 }
  0x93   :  { %446 = vmatmul.f32.gmra.mxu2 %v258_v6  ;;  %485 = vmatmul.f32.gmra.mxu3 %v271_v22  ;;  %v272_v31 = vmax.f32 %v208_v29, 0.0 }
  0x99   :  { %353 = vmatmul.f32.gmra.mxu0 %v227_v39  ;;  %401 = vmatmul.f32.gmra.mxu1 %v243_v43  ;;  %v209_v39 = vadd.f32 %v900_v15, %v143_v33  ;;  %v144_v43 = vmul.f32 %v885_v10, %v78_v42  ;;  %v275_v10 = vmax.f32 %v211_v55, 0.0 }
  0x9b   :  { %449 = vmatmul.f32.gmra.mxu2 %v259_v21  ;;  %488 = vmatmul.f32.gmra.mxu3 %v272_v31  ;;  %v273_v41 = vmax.f32 %v209_v39, 0.0  ;;  %v210_v47 = vadd.f32 %v900_v15, %v144_v43 }
  0x9d   :  { %v274_v48 = vmax.f32 %v210_v47, 0.0 }
  0x9e   :  { %v309_v52 = vpop.f32.mrf.mxu0  ;;  %v1188_v53 = vpop.f32.mrf.mxu1 }
  0x9f   :  { %501 = vst [vmem:[%s1713_s3] sm:$0xff] %v309_v52  ;;  %v635_v0 = vmul.f32 %v309_v52, %v309_v52 }
  0xa0   :  { %517 = vst [vmem:[%s1713_s3 + $0x80] sm:$0xff] %v1188_v53 }
  0xa3   :  { %491 = vmatmul.f32.gmra.mxu3 %v273_v41 }
  0xa6   :  { %v312_v62 = vpop.f32.mrf.mxu0  ;;  %v1207_v63 = vpop.f32.mrf.mxu1 }
  0xa7   :  { %502 = vst [vmem:[%s1713_s3 + $0x8] sm:$0xff] %v312_v62  ;;  %v565_v1 = vadd.f32 %v312_v62, %v309_v52  ;;  %v636_v2 = vmul.f32 %v312_v62, %v312_v62  ;;  %v1262_v38 = vpop.f32.mrf.mxu2 }
  0xa8   :  { %518 = vst [vmem:[%s1713_s3 + $0x88] sm:$0xff] %v1207_v63 }
  0xa9   :  { %v699_v5 = vadd.f32 %v636_v2, %v635_v0  ;;  %533 = vst [vmem:[%s1713_s3 + $0x100] sm:$0xff] %v1262_v38 }
  0xab   :  { %494 = vmatmul.f32.gmra.mxu3 %v274_v48 }
  0xae   :  { %v315_v13 = vpop.f32.mrf.mxu0  ;;  %v1226_v14 = vpop.f32.mrf.mxu1 }
  0xaf   :  { %503 = vst [vmem:[%s1713_s3 + $0x10] sm:$0xff] %v315_v13  ;;  %v566_v16 = vadd.f32 %v565_v1, %v315_v13  ;;  %v637_v17 = vmul.f32 %v315_v13, %v315_v13  ;;  %v1287_v46 = vpop.f32.mrf.mxu2 }
  0xb0   :  { %519 = vst [vmem:[%s1713_s3 + $0x90] sm:$0xff] %v1226_v14 }
  0xb1   :  { %v700_v20 = vadd.f32 %v699_v5, %v637_v17  ;;  %534 = vst [vmem:[%s1713_s3 + $0x108] sm:$0xff] %v1287_v46 }
  0xb3   :  { %497 = vmatmul.f32.gmra.mxu3 %v275_v10 }
  0xb6   :  { %v318_v25 = vpop.f32.mrf.mxu0  ;;  %v1241_v26 = vpop.f32.mrf.mxu1 }
  0xb7   :  { %504 = vst [vmem:[%s1713_s3 + $0x18] sm:$0xff] %v318_v25  ;;  %v567_v27 = vadd.f32 %v566_v16, %v318_v25  ;;  %v638_v28 = vmul.f32 %v318_v25, %v318_v25  ;;  %v1307_v54 = vpop.f32.mrf.mxu2 }
  0xb8   :  { %520 = vst [vmem:[%s1713_s3 + $0x98] sm:$0xff] %v1241_v26 }
  0xb9   :  { %v701_v30 = vadd.f32 %v700_v20, %v638_v28  ;;  %535 = vst [vmem:[%s1713_s3 + $0x110] sm:$0xff] %v1307_v54 }
  0xba   :  { %v1340_v61 = vpop.f32.mrf.mxu3 }
  0xbb   :  { %549 = vst [vmem:[%s1713_s3 + $0x180] sm:$0xff] %v1340_v61 }
  0xbe   :  { %v321_v34 = vpop.f32.mrf.mxu0  ;;  %v1255_v35 = vpop.f32.mrf.mxu1 }
  0xbf   :  { %505 = vst [vmem:[%s1713_s3 + $0x20] sm:$0xff] %v321_v34  ;;  %v1260_v36 = vadd.f32 %v567_v27, %v321_v34  ;;  %v639_v37 = vmul.f32 %v321_v34, %v321_v34  ;;  %v1323_v15 = vpop.f32.mrf.mxu2 }
  0xc0   :  { %521 = vst [vmem:[%s1713_s3 + $0xa0] sm:$0xff] %v1255_v35 }
  0xc1   :  { %v1269_v40 = vadd.f32 %v701_v30, %v639_v37  ;;  %536 = vst [vmem:[%s1713_s3 + $0x118] sm:$0xff] %v1323_v15 }
  0xc2   :  { %v1361_v2 = vpop.f32.mrf.mxu3 }
  0xc3   :  { %550 = vst [vmem:[%s1713_s3 + $0x188] sm:$0xff] %v1361_v2 }
  0xc6   :  { %v1279_v44 = vpop.f32.mrf.mxu0  ;;  %v1281_v45 = vpop.f32.mrf.mxu1 }
  0xc7   :  { %506 = vst [vmem:[%s1713_s3 + $0x28] sm:$0xff] %v1279_v44  ;;  %v1338_v60 = vpop.f32.mrf.mxu2  ;;  %v640_v18 = vmul.f32 %v1279_v44, %v1279_v44  ;;  %v569_v19 = vadd.f32 %v1260_v36, %v1279_v44 }
  0xc8   :  { %522 = vst [vmem:[%s1713_s3 + $0xa8] sm:$0xff] %v1281_v45 }
  0xc9   :  { %537 = vst [vmem:[%s1713_s3 + $0x120] sm:$0xff] %v1338_v60  ;;  %v703_v21 = vadd.f32 %v1269_v40, %v640_v18 }
  0xca   :  { %v1382_v6 = vpop.f32.mrf.mxu3 }
  0xcb   :  { %551 = vst [vmem:[%s1713_s3 + $0x190] sm:$0xff] %v1382_v6 }
  0xce   :  { %v327_v51 = vpop.f32.mrf.mxu0  ;;  %v1302_v52 = vpop.f32.mrf.mxu1 }
  0xcf   :  { %507 = vst [vmem:[%s1713_s3 + $0x30] sm:$0xff] %v327_v51  ;;  %v1359_v1 = vpop.f32.mrf.mxu2  ;;  %v641_v20 = vmul.f32 %v327_v51, %v327_v51  ;;  %v570_v22 = vadd.f32 %v569_v19, %v327_v51 }
  0xd0   :  { %523 = vst [vmem:[%s1713_s3 + $0xb0] sm:$0xff] %v1302_v52 }
  0xd1   :  { %538 = vst [vmem:[%s1713_s3 + $0x128] sm:$0xff] %v1359_v1  ;;  %v704_v27 = vadd.f32 %v703_v21, %v641_v20 }
  0xd2   :  { %v1403_v11 = vpop.f32.mrf.mxu3 }
  0xd3   :  { %552 = vst [vmem:[%s1713_s3 + $0x198] sm:$0xff] %v1403_v11 }
  0xd6   :  { %v330_v56 = vpop.f32.mrf.mxu0  ;;  %v1318_v57 = vpop.f32.mrf.mxu1 }
  0xd7   :  { %508 = vst [vmem:[%s1713_s3 + $0x38] sm:$0xff] %v330_v56  ;;  %v1380_v5 = vpop.f32.mrf.mxu2  ;;  %v642_v23 = vmul.f32 %v330_v56, %v330_v56  ;;  %v571_v28 = vadd.f32 %v570_v22, %v330_v56 }
  0xd8   :  { %524 = vst [vmem:[%s1713_s3 + $0xb8] sm:$0xff] %v1318_v57 }
  0xd9   :  { %539 = vst [vmem:[%s1713_s3 + $0x130] sm:$0xff] %v1380_v5  ;;  %v705_v32 = vadd.f32 %v704_v27, %v642_v23 }
  0xda   :  { %v1424_v17 = vpop.f32.mrf.mxu3 }
  0xdb   :  { %553 = vst [vmem:[%s1713_s3 + $0x1a0] sm:$0xff] %v1424_v17 }
  0xde   :  { %v333_v58 = vpop.f32.mrf.mxu0  ;;  %v1333_v59 = vpop.f32.mrf.mxu1 }
  0xdf   :  { %509 = vst [vmem:[%s1713_s3 + $0x40] sm:$0xff] %v333_v58  ;;  %v1401_v9 = vpop.f32.mrf.mxu2  ;;  %v643_v29 = vmul.f32 %v333_v58, %v333_v58  ;;  %v572_v33 = vadd.f32 %v571_v28, %v333_v58 }
  0xe0   :  { %525 = vst [vmem:[%s1713_s3 + $0xc0] sm:$0xff] %v1333_v59 }
  0xe1   :  { %540 = vst [vmem:[%s1713_s3 + $0x138] sm:$0xff] %v1401_v9  ;;  %v706_v36 = vadd.f32 %v705_v32, %v643_v29  ;;  %v652_v32 = vmul.f32 %v1207_v63, %v1207_v63 }
  0xe2   :  { %v1450_v31 = vpop.f32.mrf.mxu3 }
  0xe3   :  { %554 = vst [vmem:[%s1713_s3 + $0x1a8] sm:$0xff] %v1450_v31 }
  0xe6   :  { %v336_v62 = vpop.f32.mrf.mxu0  ;;  %v1354_v0 = vpop.f32.mrf.mxu1 }
  0xe7   :  { %510 = vst [vmem:[%s1713_s3 + $0x48] sm:$0xff] %v336_v62  ;;  %v1422_v16 = vpop.f32.mrf.mxu2  ;;  %v644_v34 = vmul.f32 %v336_v62, %v336_v62  ;;  %v573_v37 = vadd.f32 %v572_v33, %v336_v62 }
  0xe8   :  { %526 = vst [vmem:[%s1713_s3 + $0xc8] sm:$0xff] %v1354_v0 }
  0xe9   :  { %541 = vst [vmem:[%s1713_s3 + $0x140] sm:$0xff] %v1422_v16  ;;  %v707_v40 = vadd.f32 %v706_v36, %v644_v34 }
  0xea   :  { %v1471_v51 = vpop.f32.mrf.mxu3 }
  0xeb   :  { %555 = vst [vmem:[%s1713_s3 + $0x1b0] sm:$0xff] %v1471_v51 }
  0xee   :  { %v339_v3 = vpop.f32.mrf.mxu0  ;;  %v1375_v4 = vpop.f32.mrf.mxu1 }
  0xef   :  { %511 = vst [vmem:[%s1713_s3 + $0x50] sm:$0xff] %v339_v3  ;;  %v1448_v30 = vpop.f32.mrf.mxu2  ;;  %v645_v39 = vmul.f32 %v339_v3, %v339_v3  ;;  %v574_v41 = vadd.f32 %v573_v37, %v339_v3 }
  0xf0   :  { %527 = vst [vmem:[%s1713_s3 + $0xd0] sm:$0xff] %v1375_v4 }
  0xf1   :  { %542 = vst [vmem:[%s1713_s3 + $0x148] sm:$0xff] %v1448_v30  ;;  %v708_v47 = vadd.f32 %v707_v40, %v645_v39  ;;  %v654_v39 = vmul.f32 %v1241_v26, %v1241_v26 }
  0xf2   :  { %v1492_v27 = vpop.f32.mrf.mxu3 }
  0xf3   :  { %556 = vst [vmem:[%s1713_s3 + $0x1b8] sm:$0xff] %v1492_v27 }
  0xf6   :  { %v342_v7 = vpop.f32.mrf.mxu0  ;;  %v1396_v8 = vpop.f32.mrf.mxu1 }
  0xf7   :  { %512 = vst [vmem:[%s1713_s3 + $0x58] sm:$0xff] %v342_v7  ;;  %v646_v42 = vmul.f32 %v342_v7, %v342_v7  ;;  %v575_v48 = vadd.f32 %v574_v41, %v342_v7  ;;  %v1469_v50 = vpop.f32.mrf.mxu2 }
  0xf8   :  { %528 = vst [vmem:[%s1713_s3 + $0xd8] sm:$0xff] %v1396_v8 }
  0xf9   :  { %v709_v55 = vadd.f32 %v708_v47, %v646_v42  ;;  %543 = vst [vmem:[%s1713_s3 + $0x150] sm:$0xff] %v1469_v50 }
  0xfe   :  { %v345_v12 = vpop.f32.mrf.mxu0  ;;  %v1417_v13 = vpop.f32.mrf.mxu1 }
  0xff   :  { %513 = vst [vmem:[%s1713_s3 + $0x60] sm:$0xff] %v345_v12  ;;  %v647_v49 = vmul.f32 %v345_v12, %v345_v12  ;;  %v576_v10 = vadd.f32 %v575_v48, %v345_v12  ;;  %v1490_v23 = vpop.f32.mrf.mxu2 }
 0x100   :  { %529 = vst [vmem:[%s1713_s3 + $0xe0] sm:$0xff] %v1417_v13 }
 0x101   :  { %v710_v58 = vadd.f32 %v709_v55, %v647_v49  ;;  %544 = vst [vmem:[%s1713_s3 + $0x158] sm:$0xff] %v1490_v23  ;;  %v657_v55 = vmul.f32 %v1302_v52, %v1302_v52 }
 0x106   :  { %v348_v24 = vpop.f32.mrf.mxu0  ;;  %v1443_v25 = vpop.f32.mrf.mxu1 }
 0x107   :  { %514 = vst [vmem:[%s1713_s3 + $0x68] sm:$0xff] %v348_v24  ;;  %v648_v56 = vmul.f32 %v348_v24, %v348_v24  ;;  %v577_v62 = vadd.f32 %v576_v10, %v348_v24  ;;  %v651_v24 = vmul.f32 %v1188_v53, %v1188_v53  ;;  %v1518_v42 = vpop.f32.mrf.mxu2 }
 0x108   :  { %530 = vst [vmem:[%s1713_s3 + $0xe8] sm:$0xff] %v1443_v25 }
 0x109   :  { %v711_v7 = vadd.f32 %v710_v58, %v648_v56  ;;  %545 = vst [vmem:[%s1713_s3 + $0x160] sm:$0xff] %v1518_v42 }
 0x10e   :  { %v351_v43 = vpop.f32.mrf.mxu0  ;;  %v1464_v44 = vpop.f32.mrf.mxu1 }
 0x10f   :  { %515 = vst [vmem:[%s1713_s3 + $0x70] sm:$0xff] %v351_v43  ;;  %v649_v3 = vmul.f32 %v351_v43, %v351_v43  ;;  %v578_v18 = vadd.f32 %v577_v62, %v351_v43  ;;  %v1520_v43 = vpop.f32.mrf.mxu3 }
 0x110   :  { %531 = vst [vmem:[%s1713_s3 + $0xf0] sm:$0xff] %v1464_v44 }
 0x111   :  { %v712_v12 = vadd.f32 %v711_v7, %v649_v3  ;;  %557 = vst [vmem:[%s1713_s3 + $0x1c0] sm:$0xff] %v1520_v43  ;;  %v1542_v3 = vpop.f32.mrf.mxu2 }
 0x112   :  { %546 = vst [vmem:[%s1713_s3 + $0x168] sm:$0xff] %v1542_v3 }
 0x116   :  { %v354_v19 = vpop.f32.mrf.mxu0  ;;  %v1485_v20 = vpop.f32.mrf.mxu1 }
 0x117   :  { %516 = vst [vmem:[%s1713_s3 + $0x78] sm:$0xff] %v354_v19  ;;  %v579_v21 = vadd.f32 %v578_v18, %v354_v19  ;;  %v650_v22 = vmul.f32 %v354_v19, %v354_v19  ;;  %v1544_v7 = vpop.f32.mrf.mxu3 }
 0x118   :  { %532 = vst [vmem:[%s1713_s3 + $0xf8] sm:$0xff] %v1485_v20 }
 0x119   :  { %v580_v28 = vadd.f32 %v579_v21, %v1188_v53  ;;  %v713_v29 = vadd.f32 %v712_v12, %v650_v22  ;;  %v653_v53 = vmul.f32 %v1226_v14, %v1226_v14  ;;  %558 = vst [vmem:[%s1713_s3 + $0x1c8] sm:$0xff] %v1544_v7  ;;  %v661_v21 = vmul.f32 %v1375_v4, %v1375_v4 }
 0x11b   :  { %v581_v33 = vadd.f32 %v580_v28, %v1207_v63  ;;  %v714_v34 = vadd.f32 %v713_v29, %v651_v24  ;;  %v655_v63 = vmul.f32 %v1255_v35, %v1255_v35  ;;  %v662_v28 = vmul.f32 %v1396_v8, %v1396_v8 }
 0x11d   :  { %v582_v36 = vadd.f32 %v581_v33, %v1226_v14  ;;  %v715_v37 = vadd.f32 %v714_v34, %v652_v32  ;;  %v1566_v32 = vpop.f32.mrf.mxu2 }
 0x11e   :  { %547 = vst [vmem:[%s1713_s3 + $0x170] sm:$0xff] %v1566_v32 }
 0x11f   :  { %v583_v40 = vadd.f32 %v582_v36, %v1241_v26  ;;  %v716_v41 = vadd.f32 %v715_v37, %v653_v53  ;;  %v656_v26 = vmul.f32 %v1281_v45, %v1281_v45  ;;  %v1568_v33 = vpop.f32.mrf.mxu3  ;;  %v664_v36 = vmul.f32 %v1443_v25, %v1443_v25 }
 0x120   :  { %559 = vst [vmem:[%s1713_s3 + $0x1d0] sm:$0xff] %v1568_v33 }
 0x121   :  { %v584_v14 = vadd.f32 %v583_v40, %v1255_v35  ;;  %v717_v47 = vadd.f32 %v716_v41, %v654_v39  ;;  %v658_v35 = vmul.f32 %v1318_v57, %v1318_v57  ;;  %v665_v40 = vmul.f32 %v1464_v44, %v1464_v44 }
 0x123   :  { %v585_v48 = vadd.f32 %v584_v14, %v1281_v45  ;;  %v718_v49 = vadd.f32 %v717_v47, %v655_v63  ;;  %v659_v45 = vmul.f32 %v1333_v59, %v1333_v59 }
 0x125   :  { %v719_v10 = vadd.f32 %v718_v49, %v656_v26  ;;  %v586_v56 = vadd.f32 %v585_v48, %v1302_v52  ;;  %v450_v14 = vpop.f32.mrf.mxu2 }
 0x126   :  { %548 = vst [vmem:[%s1713_s3 + $0x178] sm:$0xff] %v450_v14 }
 0x127   :  { %v587_v58 = vadd.f32 %v586_v56, %v1318_v57  ;;  %v720_v62 = vadd.f32 %v719_v10, %v657_v55  ;;  %v660_v57 = vmul.f32 %v1354_v0, %v1354_v0  ;;  %v1590_v47 = vpop.f32.mrf.mxu3  ;;  %v669_v55 = vmul.f32 %v1307_v54, %v1307_v54 }
 0x128   :  { %560 = vst [vmem:[%s1713_s3 + $0x1d8] sm:$0xff] %v1590_v47 }
 0x129   :  { %v588_v52 = vadd.f32 %v587_v58, %v1333_v59  ;;  %v721_v18 = vadd.f32 %v720_v62, %v658_v35 }
 0x12b   :  { %v589_v19 = vadd.f32 %v588_v52, %v1354_v0  ;;  %v722_v12 = vadd.f32 %v721_v18, %v659_v45  ;;  %v672_v52 = vmul.f32 %v1359_v1, %v1359_v1 }
 0x12d   :  { %v590_v22 = vadd.f32 %v589_v19, %v1375_v4  ;;  %v723_v24 = vadd.f32 %v722_v12, %v660_v57  ;;  %v663_v4 = vmul.f32 %v1417_v13, %v1417_v13  ;;  %v673_v57 = vmul.f32 %v1380_v5, %v1380_v5 }
 0x12f   :  { %v591_v59 = vadd.f32 %v590_v22, %v1396_v8  ;;  %v724_v29 = vadd.f32 %v723_v24, %v661_v21  ;;  %v1611_v62 = vpop.f32.mrf.mxu3  ;;  %v674_v21 = vmul.f32 %v1401_v9, %v1401_v9 }
 0x130   :  { %561 = vst [vmem:[%s1713_s3 + $0x1e0] sm:$0xff] %v1611_v62 }
 0x131   :  { %v725_v0 = vadd.f32 %v724_v29, %v662_v28  ;;  %v592_v34 = vadd.f32 %v591_v59, %v1417_v13  ;;  %v666_v13 = vmul.f32 %v1485_v20, %v1485_v20 }
 0x133   :  { %v726_v8 = vadd.f32 %v725_v0, %v663_v4  ;;  %v593_v53 = vadd.f32 %v592_v34, %v1443_v25  ;;  %v667_v25 = vmul.f32 %v1262_v38, %v1262_v38  ;;  %v677_v0 = vmul.f32 %v1469_v50, %v1469_v50 }
 0x135   :  { %v727_v37 = vadd.f32 %v726_v8, %v664_v36  ;;  %v594_v39 = vadd.f32 %v593_v53, %v1464_v44  ;;  %v668_v44 = vmul.f32 %v1287_v46, %v1287_v46  ;;  %v678_v53 = vmul.f32 %v1490_v23, %v1490_v23 }
 0x137   :  { %v728_v41 = vadd.f32 %v727_v37, %v665_v40  ;;  %v595_v63 = vadd.f32 %v594_v39, %v1485_v20  ;;  %v679_v39 = vmul.f32 %v1518_v42, %v1518_v42 }
 0x139   :  { %v596_v26 = vadd.f32 %v595_v63, %v1262_v38  ;;  %v729_v48 = vadd.f32 %v728_v41, %v666_v13  ;;  %v670_v38 = vmul.f32 %v1323_v15, %v1323_v15  ;;  %v680_v13 = vmul.f32 %v1542_v3, %v1542_v3 }
 0x13a   :  { %v681_v63 = vmul.f32 %v1566_v32, %v1566_v32 }
 0x13b   :  { %v597_v20 = vadd.f32 %v596_v26, %v1287_v46  ;;  %v730_v49 = vadd.f32 %v729_v48, %v667_v25  ;;  %v671_v46 = vmul.f32 %v1338_v60, %v1338_v60  ;;  %v682_v25 = vmul.f32 %v450_v14, %v450_v14 }
 0x13d   :  { %v598_v10 = vadd.f32 %v597_v20, %v1307_v54  ;;  %v731_v56 = vadd.f32 %v730_v49, %v668_v44  ;;  %v684_v49 = vmul.f32 %v1361_v2, %v1361_v2 }
 0x13f   :  { %v599_v35 = vadd.f32 %v598_v10, %v1323_v15  ;;  %v732_v58 = vadd.f32 %v731_v56, %v669_v55 }
 0x141   :  { %v600_v45 = vadd.f32 %v599_v35, %v1338_v60  ;;  %v733_v54 = vadd.f32 %v732_v58, %v670_v38  ;;  %v1629_v60 = vpop.f32.mrf.mxu3  ;;  %v686_v38 = vmul.f32 %v1403_v11, %v1403_v11 }
 0x142   :  { %562 = vst [vmem:[%s1713_s3 + $0x1e8] sm:$0xff] %v1629_v60 }
 0x143   :  { %v601_v18 = vadd.f32 %v600_v45, %v1359_v1  ;;  %v734_v15 = vadd.f32 %v733_v54, %v671_v46  ;;  %v675_v1 = vmul.f32 %v1422_v16, %v1422_v16 }
 0x145   :  { %v735_v19 = vadd.f32 %v734_v15, %v672_v52  ;;  %v602_v12 = vadd.f32 %v601_v18, %v1380_v5  ;;  %v676_v5 = vmul.f32 %v1448_v30, %v1448_v30 }
 0x147   :  { %v603_v22 = vadd.f32 %v602_v12, %v1401_v9  ;;  %v736_v24 = vadd.f32 %v735_v19, %v673_v57 }
 0x149   :  { %v604_v59 = vadd.f32 %v603_v22, %v1422_v16  ;;  %v737_v28 = vadd.f32 %v736_v24, %v674_v21  ;;  %v495_v16 = vpop.f32.mrf.mxu3 }
 0x14a   :  { %563 = vst [vmem:[%s1713_s3 + $0x1f0] sm:$0xff] %v495_v16 }
 0x14b   :  { %v605_v29 = vadd.f32 %v604_v59, %v1448_v30  ;;  %v738_v9 = vadd.f32 %v737_v28, %v675_v1  ;;  %v694_v28 = vmul.f32 %v1590_v47, %v1590_v47 }
 0x14d   :  { %v606_v34 = vadd.f32 %v605_v29, %v1469_v50  ;;  %v739_v4 = vadd.f32 %v738_v9, %v676_v5  ;;  %v695_v9 = vmul.f32 %v1611_v62, %v1611_v62 }
 0x14f   :  { %v607_v8 = vadd.f32 %v606_v34, %v1490_v23  ;;  %v740_v36 = vadd.f32 %v739_v4, %v677_v0  ;;  %v696_v34 = vmul.f32 %v1629_v60, %v1629_v60 }
 0x151   :  { %v741_v37 = vadd.f32 %v740_v36, %v678_v53  ;;  %v608_v30 = vadd.f32 %v607_v8, %v1518_v42  ;;  %v498_v44 = vpop.f32.mrf.mxu3  ;;  %v683_v42 = vmul.f32 %v1340_v61, %v1340_v61  ;;  %v697_v8 = vmul.f32 %v495_v16, %v495_v16 }
 0x152   :  { %564 = vst [vmem:[%s1713_s3 + $0x1f8] sm:$0xff] %v498_v44  ;;  %v698_v53 = vmul.f32 %v498_v44, %v498_v44 }
 0x153   :  { %v742_v40 = vadd.f32 %v741_v37, %v679_v39  ;;  %v609_v50 = vadd.f32 %v608_v30, %v1542_v3 }
 0x155   :  { %v743_v41 = vadd.f32 %v742_v40, %v680_v13  ;;  %v610_v23 = vadd.f32 %v609_v50, %v1566_v32 }
 0x157   :  { %v744_v26 = vadd.f32 %v743_v41, %v681_v63  ;;  %v611_v48 = vadd.f32 %v610_v23, %v450_v14  ;;  %v685_v14 = vmul.f32 %v1382_v6, %v1382_v6 }
 0x159   :  { %v612_v20 = vadd.f32 %v611_v48, %v1340_v61  ;;  %v745_v3 = vadd.f32 %v744_v26, %v682_v25  ;;  %v687_v61 = vmul.f32 %v1424_v17, %v1424_v17 }
 0x15b   :  { %v613_v55 = vadd.f32 %v612_v20, %v1361_v2  ;;  %v746_v32 = vadd.f32 %v745_v3, %v683_v42  ;;  %v688_v2 = vmul.f32 %v1450_v31, %v1450_v31 }
 0x15d   :  { %v614_v10 = vadd.f32 %v613_v55, %v1382_v6  ;;  %v747_v56 = vadd.f32 %v746_v32, %v684_v49  ;;  %v689_v6 = vmul.f32 %v1471_v51, %v1471_v51 }
 0x15f   :  { %v615_v35 = vadd.f32 %v614_v10, %v1403_v11  ;;  %v748_v58 = vadd.f32 %v747_v56, %v685_v14  ;;  %v690_v11 = vmul.f32 %v1492_v27, %v1492_v27 }
 0x161   :  { %v616_v46 = vadd.f32 %v615_v35, %v1424_v17  ;;  %v749_v45 = vadd.f32 %v748_v58, %v686_v38  ;;  %v691_v17 = vmul.f32 %v1520_v43, %v1520_v43 }
 0x163   :  { %v617_v54 = vadd.f32 %v616_v46, %v1450_v31  ;;  %v750_v52 = vadd.f32 %v749_v45, %v687_v61  ;;  %v692_v31 = vmul.f32 %v1544_v7, %v1544_v7 }
 0x165   :  { %v751_v18 = vadd.f32 %v750_v52, %v688_v2  ;;  %v618_v15 = vadd.f32 %v617_v54, %v1471_v51  ;;  %v693_v51 = vmul.f32 %v1568_v33, %v1568_v33 }
 0x167   :  { %v619_v57 = vadd.f32 %v618_v15, %v1492_v27  ;;  %v752_v19 = vadd.f32 %v751_v18, %v689_v6 }
 0x169   :  { %v620_v12 = vadd.f32 %v619_v57, %v1520_v43  ;;  %v753_v21 = vadd.f32 %v752_v19, %v690_v11 }
 0x16b   :  { %v621_v22 = vadd.f32 %v620_v12, %v1544_v7  ;;  %v754_v24 = vadd.f32 %v753_v21, %v691_v17 }
 0x16d   :  { %v622_v1 = vadd.f32 %v621_v22, %v1568_v33  ;;  %v755_v59 = vadd.f32 %v754_v24, %v692_v31 }
 0x16f   :  { %v623_v27 = vadd.f32 %v622_v1, %v1590_v47  ;;  %v756_v5 = vadd.f32 %v755_v59, %v693_v51 }
 0x171   :  { %v757_v43 = vadd.f32 %v756_v5, %v694_v28  ;;  %v624_v29 = vadd.f32 %v623_v27, %v1611_v62 }
 0x173   :  { %v758_v7 = vadd.f32 %v757_v43, %v695_v9  ;;  %v625_v0 = vadd.f32 %v624_v29, %v1629_v60 }
 0x175   :  { %v759_v33 = vadd.f32 %v758_v7, %v696_v34  ;;  %v626_v4 = vadd.f32 %v625_v0, %v495_v16 }
 0x177   :  { %v760_v36 = vadd.f32 %v759_v33, %v697_v8  ;;  %v627_v37 = vadd.f32 %v626_v4, %v498_v44 }
 0x179   :  { %v628_v47 = vrot.slane %v627_v37, 4  ;;  %v761_v30 = vadd.f32 %v760_v36, %v698_v53 }
 0x17b   :  { %v629_v39 = vadd.f32 %v628_v47, %v627_v37  ;;  %v762_v40 = vrot.slane %v761_v30, 4 }
 0x17d   :  { %v630_v50 = vrot.slane %v629_v39, 2  ;;  %v763_v13 = vadd.f32 %v762_v40, %v761_v30 }
 0x17f   :  { %v631_v41 = vadd.f32 %v630_v50, %v629_v39  ;;  %v764_v62 = vrot.slane %v763_v13, 2 }
 0x181   :  { %v632_v23 = vrot.slane %v631_v41, 1  ;;  %v765_v63 = vadd.f32 %v764_v62, %v763_v13 }
 0x183   :  { %v633_v25 = vadd.f32 %v632_v23, %v631_v41  ;;  %v766_v26 = vrot.slane %v765_v63, 1 }
 0x185   :  { %634 = vst [vmem:[%s1714_s4] sm:$0x1] %v633_v25  ;;  %v767_v60 = vadd.f32 %v766_v26, %v765_v63 }
 0x187   :  { %768 = vst [vmem:[%s1714_s4 + $0x1] sm:$0x1] %v767_v60 }

// kernel: _dense_block_forward_impl.5
= control target key start
LH: loop header
LB: loop body
LE: loop exit
PB: predicated region body
PF: predicated region fallthrough
CT: control target
= control target key end

     0   :  { %s2574_s15 = smov 0   ;;  %s3590_s0 = inlined_call_operand.vmem [shape: f32[2,16,16,128], index: 0, kind: input, shape index: {}]   ;;  %s3591_s1 = inlined_call_operand.vmem [shape: f32[2,128], index: 1, kind: input, shape index: {}]   ;;  %s3592_s2 = inlined_call_operand.vmem [shape: f32[9,128,128], index: 2, kind: input, shape index: {}]   ;;  %s3593_s3 = inlined_call_operand.vmem [shape: f32[2,256,128], index: 3, kind: output, shape index: {0}]   ;;  %s3594_s4 = inlined_call_operand.vmem [shape: f32[2,2,128], index: 4, kind: output, shape index: {1}]  }
   0x1 LB: > { %s2336_s16 = sadd.s32 4294967295, %s2546_s15   ;;  %p2340_p0 = scmp.ge.s32.totalorder %s2546_s15, 1  ;;  %s2546_s15 = sphi %s2574_s15, %s15_s15  }
   0x2   : > { %p165_p1 = scmp.lt.s32.totalorder %s2546_s15, 3 }
   0x4   : > { %p166_p2 = pnand %p2340_p0, %p165_p1 }
   0x5   : > { %p195_p3 = scmp.lt.s32.totalorder (!%p166_p2), %s2336_s16, 1 }
   0x6   : > { %169 = sbr.rel (%p166_p2) target bundleno = 766 (0x2fe), region = 32 }
   0xb   : > { %v2361_v0 = vld [vmem:[%s3592_s2 + $0xf8] sm:$0xff]  ;;  %v2360_v1 = vld [vmem:[%s3592_s2 + $0xf0] sm:$0xff]  ;;  %v2548_v2 = vmov 0.0   ;;  %v2359_v3 = vld [vmem:[%s3592_s2 + $0xe8] sm:$0xff]  ;;  %s3596_s16 = smov (!%p195_p3, %s2336_s16), 1 }
   0xc   : > { %2478 = vmatpush.msra.mxu1 %v2361_v0  ;;  %2479 = vmatpush.msra.mxu2 %v2361_v0  ;;  %353 = vst [vmem:[#allocation2 + $0x60] sm:$0xff] %v2548_v2  ;;  %v2358_v4 = vld [vmem:[%s3592_s2 + $0xe0] sm:$0xff]  ;;  %s2476_s25 = sshll.u32 %s3596_s16, 8  ;;  %v2357_v5 = vld [vmem:[%s3592_s2 + $0xd8] sm:$0xff]  ;;  %v2356_v9 = vld [vmem:[%s3592_s2 + $0xd0] sm:$0xff] }
   0xd   : > { %2480 = vmatpush.msra.mxu3 %v2361_v0  ;;  %525 = vmatpush.msra.mxu0 %v2361_v0  ;;  %354 = vst [vmem:[#allocation2 + $0x68] sm:$0xff] %v2548_v2  ;;  %s2609_s30 = scalar_lea.vmem %s3590_s0, %s2476_s25  ;;  %v2616_v7 = vld [vmem:[%s3591_s1] ss:$0 sm:$0xff]  ;;  %v2621_v8 = vld [vmem:[%s3591_s1 + $0x1] ss:$0 sm:$0xff]  ;;  %v2355_v11 = vld [vmem:[%s3592_s2 + $0xc8] sm:$0xff]  ;;  %s3518_s6 = scalar_lea.vmem %s3593_s3, %s2476_s25 }
   0xe   : > { %2481 = vmatpush.msra.mxu1 %v2360_v1  ;;  %2482 = vmatpush.msra.mxu2 %v2360_v1  ;;  %341 = vst [vmem:[#allocation2] sm:$0xff] %v2548_v2  ;;  %v215_v6 = vld [vmem:[%s2609_s30 + $0x30] sm:$0xff]  ;;  %v2354_v13 = vld [vmem:[%s3592_s2 + $0xc0] sm:$0xff]  ;;  %v2353_v15 = vld [vmem:[%s3592_s2 + $0xb8] sm:$0xff]  ;;  %s2345_s25 = sshll.u32 %s3596_s16, 1 }
   0xf   : > { %2483 = vmatpush.msra.mxu3 %v2360_v1  ;;  %526 = vmatpush.msra.mxu0 %v2360_v1  ;;  %342 = vst [vmem:[#allocation2 + $0x8] sm:$0xff] %v2548_v2  ;;  %v250_v10 = vmul.f32 %v2616_v7, %v215_v6  ;;  %v2352_v16 = vld [vmem:[%s3592_s2 + $0xb0] sm:$0xff]  ;;  %v2351_v18 = vld [vmem:[%s3592_s2 + $0xa8] sm:$0xff]  ;;  %v2350_v20 = vld [vmem:[%s3592_s2 + $0xa0] sm:$0xff]  ;;  %s208_s9 = scalar_lea.vmem %s3594_s4, %s2345_s25 }
  0x10   : > { %2484 = vmatpush.msra.mxu1 %v2359_v3  ;;  %2485 = vmatpush.msra.mxu2 %v2359_v3  ;;  %344 = vst [vmem:[#allocation2 + $0x18] sm:$0xff] %v2548_v2  ;;  %v223_v17 = vld [vmem:[%s2609_s30 + $0x70] sm:$0xff]  ;;  %v2349_v22 = vld [vmem:[%s3592_s2 + $0x98] sm:$0xff]  ;;  %v2347_v28 = vld [vmem:[%s3592_s2 + $0x88] sm:$0xff] }
  0x11   : > { %2486 = vmatpush.msra.mxu3 %v2359_v3  ;;  %527 = vmatpush.msra.mxu0 %v2359_v3  ;;  %345 = vst [vmem:[#allocation2 + $0x20] sm:$0xff] %v2548_v2  ;;  %v283_v12 = vadd.f32 %v2621_v8, %v250_v10  ;;  %v231_v19 = vld [vmem:[%s2609_s30 + $0xb0] sm:$0xff]  ;;  %v258_v21 = vmul.f32 %v2616_v7, %v223_v17  ;;  %v216_v26 = vld [vmem:[%s2609_s30 + $0x38] sm:$0xff]  ;;  %v2346_v31 = vld [vmem:[%s3592_s2 + $0x80] sm:$0xff] }
  0x12   : > { %2487 = vmatpush.msra.mxu1 %v2358_v4  ;;  %2488 = vmatpush.msra.mxu2 %v2358_v4  ;;  %343 = vst [vmem:[#allocation2 + $0x10] sm:$0x3] %v2548_v2  ;;  %v266_v23 = vmul.f32 %v2616_v7, %v231_v19  ;;  %v2348_v24 = vld [vmem:[%s3592_s2 + $0x90] sm:$0xff]  ;;  %v224_v27 = vld [vmem:[%s2609_s30 + $0x78] sm:$0xff]  ;;  %v251_v33 = vmul.f32 %v2616_v7, %v216_v26  ;;  %v217_v44 = vld [vmem:[%s2609_s30 + $0x40] sm:$0xff] }
  0x13   : > { %2489 = vmatpush.msra.mxu3 %v2358_v4  ;;  %528 = vmatpush.msra.mxu0 %v2358_v4  ;;  %346 = vst [vmem:[#allocation2 + $0x28] sm:$0x3] %v2548_v2  ;;  %v2640_v14 = vmax.f32 %v283_v12, 0.0  ;;  %v2678_v25 = vadd.f32 %v2621_v8, %v258_v21  ;;  %v232_v30 = vld [vmem:[%s2609_s30 + $0xb8] sm:$0xff]  ;;  %v259_v34 = vmul.f32 %v2616_v7, %v224_v27  ;;  %v2376_v40 = vld [vmem:[%s3592_s2 + $0x170] sm:$0xff]  ;;  %v225_v45 = vld [vmem:[%s2609_s30 + $0x80] sm:$0xff] }
  0x14   : > { %2490 = vmatpush.msra.mxu1 %v2357_v5  ;;  %2491 = vmatpush.msra.mxu2 %v2357_v5  ;;  %347 = vst [vmem:[#allocation2 + $0x30] sm:$0xff] %v2548_v2  ;;  %v2688_v29 = vadd.f32 %v2621_v8, %v266_v23  ;;  %v2377_v35 = vld [vmem:[%s3592_s2 + $0x178] sm:$0xff]  ;;  %v267_v37 = vmul.f32 %v2616_v7, %v232_v30  ;;  %v474_v43 = vld [vmem:[%s3592_s2 + $0x70] sm:$0xff]  ;;  %v2375_v47 = vld [vmem:[%s3592_s2 + $0x168] sm:$0xff] }
  0x15   : > { %2492 = vmatpush.msra.mxu3 %v2357_v5  ;;  %529 = vmatpush.msra.mxu0 %v2357_v5  ;;  %348 = vst [vmem:[#allocation2 + $0x38] sm:$0xff] %v2548_v2  ;;  %v323_v32 = vmax.f32 %v2678_v25, 0.0  ;;  %v475_v38 = vld [vmem:[%s3592_s2 + $0x78] sm:$0xff]  ;;  %v284_v41 = vadd.f32 %v2621_v8, %v251_v33  ;;  %v2722_v42 = vadd.f32 %v2621_v8, %v259_v34  ;;  %v2392_v46 = vld [vmem:[%s3592_s2 + $0x1f0] sm:$0xff]  ;;  %v473_v50 = vld [vmem:[%s3592_s2 + $0x68] sm:$0xff] }
  0x16   : > { %2493 = vmatpush.msra.mxu1 %v2356_v9  ;;  %2494 = vmatpush.msra.mxu2 %v2356_v9  ;;  %349 = vst [vmem:[#allocation2 + $0x40] sm:$0x3] %v2548_v2  ;;  %v331_v36 = vmax.f32 %v2688_v29, 0.0  ;;  %v2393_v39 = vld [vmem:[%s3592_s2 + $0x1f8] sm:$0xff]  ;;  %v2740_v48 = vadd.f32 %v2621_v8, %v267_v37  ;;  %v476_v49 = vld [vmem:[#allocation2 + $0x1] sm:$0xff]  ;;  %v252_v56 = vmul.f32 %v2616_v7, %v217_v44  ;;  %v2408_v62 = vld [vmem:[%s3592_s2 + $0x270] sm:$0xff] }
  0x17   : > { %2495 = vmatpush.msra.mxu3 %v2356_v9  ;;  %530 = vmatpush.msra.mxu0 %v2356_v9  ;;  %350 = vst [vmem:[#allocation2 + $0x48] sm:$0xff] %v2548_v2  ;;  %v233_v51 = vld [vmem:[%s2609_s30 + $0xc0] sm:$0xff]  ;;  %v2748_v52 = vmax.f32 %v284_v41, 0.0  ;;  %v324_v53 = vmax.f32 %v2722_v42, 0.0  ;;  %v2391_v54 = vld [vmem:[%s3592_s2 + $0x1e8] sm:$0xff]  ;;  %v2409_v55 = vld [vmem:[%s3592_s2 + $0x278] sm:$0xff]  ;;  %v260_v57 = vmul.f32 %v2616_v7, %v225_v45 }
  0x18   : > { %2496 = vmatpush.msra.mxu1 %v2355_v11  ;;  %2497 = vmatpush.msra.mxu2 %v2355_v11  ;;  %351 = vst [vmem:[#allocation2 + $0x50] sm:$0xff] %v2548_v2  ;;  %v332_v58 = vmax.f32 %v2740_v48, 0.0  ;;  %v2374_v59 = vld [vmem:[%s3592_s2 + $0x160] sm:$0xff]  ;;  %v268_v61 = vmul.f32 %v2616_v7, %v233_v51  ;;  %v285_v0 = vadd.f32 %v2621_v8, %v252_v56  ;;  %v2373_v4 = vld [vmem:[%s3592_s2 + $0x158] sm:$0xff]  ;;  %v218_v5 = vld [vmem:[%s2609_s30 + $0x48] sm:$0xff] }
  0x19   : > { %2498 = vmatpush.msra.mxu3 %v2355_v11  ;;  %531 = vmatpush.msra.mxu0 %v2355_v11  ;;  %402 = vst [vmem:[#allocation2 + $0x61] sm:$0xff] %v2640_v14  ;;  %v2390_v60 = vld [vmem:[%s3592_s2 + $0x1e0] sm:$0xff]  ;;  %v2780_v1 = vadd.f32 %v2621_v8, %v260_v57  ;;  %v2389_v6 = vld [vmem:[%s3592_s2 + $0x1d8] sm:$0xff]  ;;  %v2407_v9 = vld [vmem:[%s3592_s2 + $0x268] sm:$0xff] }
  0x1a   : > { %2499 = vmatpush.msra.mxu1 %v2354_v13  ;;  %2500 = vmatpush.msra.mxu2 %v2354_v13  ;;  %352 = vst [vmem:[#allocation2 + $0x58] sm:$0x3] %v2548_v2  ;;  %v209_v63 = vld [vmem:[%s2609_s30] sm:$0xff]  ;;  %v226_v10 = vld [vmem:[%s2609_s30 + $0x88] sm:$0xff]  ;;  %v2801_v11 = vadd.f32 %v2621_v8, %v268_v61  ;;  %v471_v12 = vld [vmem:[%s3592_s2 + $0x58] sm:$0xff]  ;;  %v2816_v19 = vmax.f32 %v285_v0, 0.0 }
  0x1b   : > { %2501 = vmatpush.msra.mxu3 %v2354_v13  ;;  %532 = vmatpush.msra.mxu0 %v2354_v13  ;;  %355 = vst [vmem:[#allocation2 + $0x70] sm:$0x3] %v2548_v2  ;;  %v472_v3 = vld [vmem:[%s3592_s2 + $0x60] sm:$0xff]  ;;  %v2372_v13 = vld [vmem:[%s3592_s2 + $0x150] sm:$0xff]  ;;  %v261_v23 = vmul.f32 %v2616_v7, %v226_v10  ;;  %v2371_v27 = vld [vmem:[%s3592_s2 + $0x148] sm:$0xff] }
  0x1c   : > { %2502 = vmatpush.msra.mxu1 %v2353_v15  ;;  %2503 = vmatpush.msra.mxu2 %v2353_v15  ;;  %356 = vst [vmem:[#allocation2 + $0x78] sm:$0xff] %v2548_v2  ;;  %v2388_v17 = vld [vmem:[%s3592_s2 + $0x1d0] sm:$0xff]  ;;  %v2406_v21 = vld [vmem:[%s3592_s2 + $0x260] sm:$0xff]  ;;  %v333_v26 = vmax.f32 %v2801_v11, 0.0  ;;  %v2405_v33 = vld [vmem:[%s3592_s2 + $0x258] sm:$0xff] }
  0x1d   : > { %2504 = vmatpush.msra.mxu3 %v2353_v15  ;;  %533 = vmatpush.msra.mxu0 %v2353_v15  ;;  %357 = vst [vmem:[#allocation2 + $0x80] sm:$0xff] %v2548_v2  ;;  %v244_v15 = vmul.f32 %v2616_v7, %v209_v63  ;;  %v210_v34 = vld [vmem:[%s2609_s30 + $0x8] sm:$0xff]  ;;  %v294_v37 = vadd.f32 %v2621_v8, %v261_v23  ;;  %v2386_v41 = vld [vmem:[%s3592_s2 + $0x1c0] sm:$0xff]  ;;  %v227_v44 = vld [vmem:[%s2609_s30 + $0x90] sm:$0xff] }
  0x1e   : > { %2505 = vmatpush.msra.mxu1 %v2352_v16  ;;  %2506 = vmatpush.msra.mxu2 %v2352_v16  ;;  %358 = vst [vmem:[#allocation2 + $0x88] sm:$0x3] %v2548_v2  ;;  %v235_v51 = vld [vmem:[%s2609_s30 + $0xd0] sm:$0xff]  ;;  %v467_v61 = vld [vmem:[%s3592_s2 + $0x38] sm:$0xff]  ;;  %v2382_v23 = vld [vmem:[%s3592_s2 + $0x1a0] sm:$0xff] }
  0x1f   : > { %2507 = vmatpush.msra.mxu3 %v2352_v16  ;;  %534 = vmatpush.msra.mxu0 %v2352_v16  ;;  %359 = vst [vmem:[#allocation2 + $0x90] sm:$0xff] %v2548_v2  ;;  %v477_v16 = vld [vmem:[#allocation2 + $0x9] sm:$0xff]  ;;  %v2887_v56 = vmax.f32 %v294_v37, 0.0  ;;  %v270_v0 = vmul.f32 %v2616_v7, %v235_v51  ;;  %v228_v25 = vld [vmem:[%s2609_s30 + $0x98] sm:$0xff]  ;;  %v464_v48 = vld [vmem:[%s3592_s2 + $0x20] sm:$0xff] }
  0x20   : > { %2508 = vmatpush.msra.mxu1 %v2351_v18  ;;  %2509 = vmatpush.msra.mxu2 %v2351_v18  ;;  %360 = vst [vmem:[#allocation2 + $0x98] sm:$0xff] %v2548_v2  ;;  %v2400_v42 = vld [vmem:[%s3592_s2 + $0x230] sm:$0xff] }
  0x21   : > { %2510 = vmatpush.msra.mxu3 %v2351_v18  ;;  %535 = vmatpush.msra.mxu0 %v2351_v18  ;;  %361 = vst [vmem:[#allocation2 + $0xa0] sm:$0x3] %v2548_v2  ;;  %v234_v18 = vld [vmem:[%s2609_s30 + $0xc8] sm:$0xff]  ;;  %v2942_v29 = vadd.f32 %v2621_v8, %v270_v0  ;;  %v462_v51 = vld [vmem:[%s3592_s2 + $0x10] sm:$0xff] }
  0x22   : > { %2511 = vmatpush.msra.mxu1 %v2350_v20  ;;  %2512 = vmatpush.msra.mxu2 %v2350_v20  ;;  %362 = vst [vmem:[#allocation2 + $0xa8] sm:$0xff] %v2548_v2  ;;  %v269_v30 = vmul.f32 %v2616_v7, %v234_v18  ;;  %v236_v18 = vld [vmem:[%s2609_s30 + $0xd8] sm:$0xff]  ;;  %v461_v0 = vld [vmem:[%s3592_s2 + $0x8] sm:$0xff] }
  0x23   : > { %2513 = vmatpush.msra.mxu3 %v2350_v20  ;;  %363 = vst [vmem:[#allocation2 + $0xb0] sm:$0xff] %v2548_v2  ;;  %536 = vmatpush.msra.mxu0 %v2350_v20  ;;  %v325_v20 = vmax.f32 %v2780_v1, 0.0  ;;  %v221_v1 = vld [vmem:[%s2609_s30 + $0x60] sm:$0xff] }
  0x24   : > { %2514 = vmatpush.msra.mxu1 %v2349_v22  ;;  %2515 = vmatpush.msra.mxu2 %v2349_v22  ;;  %364 = vst [vmem:[#allocation2 + $0xb8] sm:$0x3] %v2548_v2 }
  0x25   : > { %2516 = vmatpush.msra.mxu3 %v2349_v22  ;;  %365 = vst [vmem:[#allocation2 + $0xc0] sm:$0xff] %v2548_v2  ;;  %537 = vmatpush.msra.mxu0 %v2349_v22  ;;  %v253_v22 = vmul.f32 %v2616_v7, %v218_v5  ;;  %v2402_v5 = vld [vmem:[%s3592_s2 + $0x240] sm:$0xff] }
  0x26   : > { %2517 = vmatpush.msra.mxu1 %v2348_v24  ;;  %2518 = vmatpush.msra.mxu2 %v2348_v24  ;;  %366 = vst [vmem:[#allocation2 + $0xc8] sm:$0xff] %v2548_v2 }
  0x27   : > { %2519 = vmatpush.msra.mxu3 %v2348_v24  ;;  %367 = vst [vmem:[#allocation2 + $0xd0] sm:$0x3] %v2548_v2  ;;  %538 = vmatpush.msra.mxu0 %v2348_v24  ;;  %v470_v24 = vld [vmem:[%s3592_s2 + $0x50] sm:$0xff] }
  0x28   : > { %2520 = vmatpush.msra.mxu1 %v2347_v28  ;;  %2521 = vmatpush.msra.mxu2 %v2347_v28  ;;  %368 = vst [vmem:[#allocation2 + $0xd8] sm:$0xff] %v2548_v2 }
  0x29   : > { %2522 = vmatpush.msra.mxu3 %v2347_v28  ;;  %369 = vst [vmem:[#allocation2 + $0xe0] sm:$0xff] %v2548_v2  ;;  %539 = vmatpush.msra.mxu0 %v2347_v28  ;;  %v277_v28 = vadd.f32 %v2621_v8, %v244_v15  ;;  %v2367_v15 = vld [vmem:[%s3592_s2 + $0x128] sm:$0xff] }
  0x2a   : > { %2523 = vmatpush.msra.mxu1 %v2346_v31  ;;  %2524 = vmatpush.msra.mxu2 %v2346_v31  ;;  %370 = vst [vmem:[#allocation2 + $0xe8] sm:$0x3] %v2548_v2 }
  0x2b   : > { %565 = vmatmul.f32.vlgmr.msra.gmra.mxu1 %v2640_v14  ;;  %371 = vst [vmem:[#allocation2 + $0xf0] sm:$0xff] %v2548_v2  ;;  %589 = vmatmul.f32.vlgmr.msra.gmra.mxu2 %v323_v32  ;;  %v2867_v45 = vmax.f32 %v277_v28, 0.0 }
  0x2c   : > { %372 = vst [vmem:[#allocation2 + $0xf8] sm:$0xff] %v2548_v2  ;;  %800 = vmatpush.msrb.mxu2 %v2377_v35  ;;  %2525 = vmatpush.msra.mxu3 %v2346_v31  ;;  %v286_v35 = vadd.f32 %v2621_v8, %v253_v22  ;;  %v2366_v22 = vld [vmem:[%s3592_s2 + $0x120] sm:$0xff] }
  0x2d   : > { %373 = vst [vmem:[#allocation2 + $0x100] sm:$0x3] %v2548_v2  ;;  %613 = vmatmul.f32.vlgmr.msra.gmra.mxu3 %v331_v36  ;;  %638 = vmatpush.msrb.mxu1 %v475_v38  ;;  %v469_v38 = vld [vmem:[%s3592_s2 + $0x48] sm:$0xff] }
  0x2e   : > { %374 = vst [vmem:[#allocation2 + $0x108] sm:$0xff] %v2548_v2  ;;  %994 = vmatpush.msrb.mxu3 %v2393_v39  ;;  %801 = vmatpush.msrb.mxu2 %v2376_v40  ;;  %v2370_v39 = vld [vmem:[%s3592_s2 + $0x140] sm:$0xff]  ;;  %v219_v40 = vld [vmem:[%s2609_s30 + $0x50] sm:$0xff] }
  0x2f   : > { %375 = vst [vmem:[#allocation2 + $0x110] sm:$0xff] %v2548_v2  ;;  %639 = vmatpush.msrb.mxu1 %v474_v43  ;;  %540 = vmatpush.msra.mxu0 %v2346_v31  ;;  %v2387_v31 = vld [vmem:[%s3592_s2 + $0x1c8] sm:$0xff]  ;;  %v2404_v43 = vld [vmem:[%s3592_s2 + $0x250] sm:$0xff]  ;;  %v254_v57 = vmul.f32 %v2616_v7, %v219_v40 }
  0x30   : > { %376 = vst [vmem:[#allocation2 + $0x118] sm:$0x3] %v2548_v2  ;;  %995 = vmatpush.msrb.mxu3 %v2392_v46  ;;  %802 = vmatpush.msrb.mxu2 %v2375_v47  ;;  %v2870_v46 = vadd.f32 %v2621_v8, %v269_v30  ;;  %v468_v47 = vld [vmem:[%s3592_s2 + $0x40] sm:$0xff]  ;;  %v263_v30 = vmul.f32 %v2616_v7, %v228_v25 }
  0x31   : > { %377 = vst [vmem:[#allocation2 + $0x120] sm:$0xff] %v2548_v2  ;;  %541 = vmatmul.f32.vlgmr.msra.gmra.mxu0 %v476_v49  ;;  %640 = vmatpush.msrb.mxu1 %v473_v50  ;;  %v2369_v49 = vld [vmem:[%s3592_s2 + $0x138] sm:$0xff]  ;;  %v245_v50 = vmul.f32 %v2616_v7, %v210_v34 }
  0x32   : > { %378 = vst [vmem:[#allocation2 + $0x128] sm:$0xff] %v2548_v2  ;;  %996 = vmatpush.msrb.mxu3 %v2391_v54  ;;  %1188 = vmatpush.msrb.mxu0 %v2409_v55  ;;  %v2385_v54 = vld [vmem:[%s3592_s2 + $0x1b8] sm:$0xff]  ;;  %v2885_v55 = vmax.f32 %v286_v35, 0.0  ;;  %v2399_v35 = vld [vmem:[%s3592_s2 + $0x228] sm:$0xff]  ;;  %v296_v11 = vadd.f32 %v2621_v8, %v263_v30 }
  0x33   : > { %379 = vst [vmem:[#allocation2 + $0x130] sm:$0x3] %v2548_v2  ;;  %568 = vmatmul.f32.gmra.mxu1 %v2748_v52  ;;  %592 = vmatmul.f32.gmra.mxu2 %v324_v53  ;;  %v278_v63 = vadd.f32 %v2621_v8, %v245_v50  ;;  %v2381_v34 = vld [vmem:[%s3592_s2 + $0x198] sm:$0xff]  ;;  %v237_v50 = vld [vmem:[%s2609_s30 + $0xe0] sm:$0xff] }
  0x34   : > { %380 = vst [vmem:[#allocation2 + $0x138] sm:$0xff] %v2548_v2  ;;  %803 = vmatpush.msrb.mxu2 %v2374_v59  ;;  %997 = vmatpush.msrb.mxu3 %v2390_v60  ;;  %v262_v59 = vmul.f32 %v2616_v7, %v227_v44  ;;  %v2403_v60 = vld [vmem:[%s3592_s2 + $0x248] sm:$0xff]  ;;  %v2457_v30 = vld [vmem:[%s3592_s2 + $0x3f8] sm:$0xff] }
  0x35   : > { %381 = vst [vmem:[#allocation2 + $0x140] sm:$0xff] %v2548_v2  ;;  %616 = vmatmul.f32.gmra.mxu3 %v332_v58  ;;  %1189 = vmatpush.msrb.mxu0 %v2408_v62  ;;  %v334_v62 = vmax.f32 %v2870_v46, 0.0  ;;  %v230_v46 = vld [vmem:[%s2609_s30 + $0xa8] sm:$0xff] }
  0x36   : > { %382 = vst [vmem:[#allocation2 + $0x148] sm:$0x3] %v2548_v2  ;;  %641 = vmatpush.msrb.mxu1 %v472_v3  ;;  %804 = vmatpush.msrb.mxu2 %v2373_v4  ;;  %v2368_v3 = vld [vmem:[%s3592_s2 + $0x130] sm:$0xff]  ;;  %v295_v10 = vadd.f32 %v2621_v8, %v262_v59  ;;  %v222_v59 = vld [vmem:[%s2609_s30 + $0x68] sm:$0xff] }
  0x37   : > { %383 = vst [vmem:[#allocation2 + $0x150] sm:$0xff] %v2548_v2  ;;  %998 = vmatpush.msrb.mxu3 %v2389_v6  ;;  %1190 = vmatpush.msrb.mxu0 %v2407_v9  ;;  %v2384_v4 = vld [vmem:[%s3592_s2 + $0x1b0] sm:$0xff]  ;;  %v287_v9 = vadd.f32 %v2621_v8, %v254_v57 }
  0x38   : > { %384 = vst [vmem:[#allocation2 + $0x158] sm:$0xff] %v2548_v2  ;;  %642 = vmatpush.msrb.mxu1 %v471_v12  ;;  %805 = vmatpush.msrb.mxu2 %v2372_v13  ;;  %v211_v6 = vld [vmem:[%s2609_s30 + $0x10] sm:$0xff]  ;;  %v220_v12 = vld [vmem:[%s2609_s30 + $0x58] sm:$0xff] }
  0x39   : > { %385 = vst [vmem:[#allocation2 + $0x160] sm:$0x3] %v2548_v2  ;;  %544 = vmatmul.f32.gmra.mxu0 %v477_v16  ;;  %999 = vmatpush.msrb.mxu3 %v2388_v17  ;;  %v466_v13 = vld [vmem:[%s3592_s2 + $0x30] sm:$0xff]  ;;  %v2401_v16 = vld [vmem:[%s3592_s2 + $0x238] sm:$0xff]  ;;  %v2939_v17 = vmax.f32 %v278_v63, 0.0  ;;  %v255_v28 = vmul.f32 %v2616_v7, %v220_v12  ;;  %v3035_v63 = vmax.f32 %v296_v11, 0.0 }
  0x3a   : > { %386 = vst [vmem:[#allocation2 + $0x168] sm:$0xff] %v2548_v2  ;;  %1191 = vmatpush.msrb.mxu0 %v2406_v21  ;;  %643 = vmatpush.msrb.mxu1 %v470_v24  ;;  %v465_v21 = vld [vmem:[%s3592_s2 + $0x28] sm:$0xff]  ;;  %v2959_v24 = vmax.f32 %v287_v9, 0.0 }
  0x3b   : > { %387 = vst [vmem:[#allocation2 + $0x170] sm:$0xff] %v2548_v2  ;;  %571 = vmatmul.f32.gmra.mxu1 %v2816_v19  ;;  %595 = vmatmul.f32.gmra.mxu2 %v325_v20  ;;  %v288_v37 = vadd.f32 %v2621_v8, %v255_v28  ;;  %v238_v12 = vld [vmem:[%s2609_s30 + $0xe8] sm:$0xff] }
  0x3c   : > { %388 = vst [vmem:[#allocation2 + $0x178] sm:$0x3] %v2548_v2  ;;  %806 = vmatpush.msrb.mxu2 %v2371_v27  ;;  %1000 = vmatpush.msrb.mxu3 %v2387_v31  ;;  %v2961_v27 = vmax.f32 %v295_v10, 0.0  ;;  %v257_v10 = vmul.f32 %v2616_v7, %v222_v59  ;;  %v2395_v28 = vld [vmem:[%s3592_s2 + $0x208] sm:$0xff] }
  0x3d   : > { %389 = vst [vmem:[#allocation2 + $0x180] sm:$0xff] %v2548_v2  ;;  %619 = vmatmul.f32.gmra.mxu3 %v333_v26  ;;  %1192 = vmatpush.msrb.mxu0 %v2405_v33  ;;  %v2365_v33 = vld [vmem:[%s3592_s2 + $0x118] sm:$0xff]  ;;  %v2423_v59 = vld [vmem:[%s3592_s2 + $0x2e8] sm:$0xff] }
  0x3e   : > { %390 = vst [vmem:[#allocation2 + $0x188] sm:$0xff] %v2548_v2  ;;  %644 = vmatpush.msrb.mxu1 %v469_v38  ;;  %807 = vmatpush.msrb.mxu2 %v2370_v39  ;;  %v463_v38 = vld [vmem:[%s3592_s2 + $0x18] sm:$0xff]  ;;  %v2364_v39 = vld [vmem:[%s3592_s2 + $0x110] sm:$0xff] }
  0x3f   : > { %391 = vst [vmem:[#allocation2 + $0x190] sm:$0x3] %v2548_v2  ;;  %1001 = vmatpush.msrb.mxu3 %v2386_v41  ;;  %1193 = vmatpush.msrb.mxu0 %v2404_v43  ;;  %v2380_v41 = vld [vmem:[%s3592_s2 + $0x190] sm:$0xff]  ;;  %v2398_v43 = vld [vmem:[%s3592_s2 + $0x220] sm:$0xff] }
  0x40   : > { %392 = vst [vmem:[#allocation2 + $0x198] sm:$0xff] %v2548_v2  ;;  %645 = vmatpush.msrb.mxu1 %v468_v47  ;;  %808 = vmatpush.msrb.mxu2 %v2369_v49  ;;  %v256_v47 = vmul.f32 %v2616_v7, %v221_v1 }
  0x41   : > { %393 = vst [vmem:[#allocation2 + $0x1a0] sm:$0xff] %v2548_v2  ;;  %547 = vmatmul.f32.gmra.mxu0 %v2867_v45  ;;  %1002 = vmatpush.msrb.mxu3 %v2385_v54  ;;  %v2363_v54 = vld [vmem:[%s3592_s2 + $0x108] sm:$0xff] }
  0x42   : > { %394 = vst [vmem:[#allocation2 + $0x1a8] sm:$0x3] %v2548_v2  ;;  %1194 = vmatpush.msrb.mxu0 %v2403_v60  ;;  %646 = vmatpush.msrb.mxu1 %v467_v61  ;;  %v2379_v60 = vld [vmem:[%s3592_s2 + $0x188] sm:$0xff]  ;;  %v3033_v61 = vmax.f32 %v288_v37, 0.0 }
  0x43   : > { %410 = vst [vmem:[#allocation2 + $0xc1] sm:$0xff] %v323_v32  ;;  %574 = vmatmul.f32.gmra.mxu1 %v2885_v55  ;;  %598 = vmatmul.f32.gmra.mxu2 %v2887_v56  ;;  %v2383_v32 = vld [vmem:[%s3592_s2 + $0x1a8] sm:$0xff] }
  0x44   : > { %418 = vst [vmem:[#allocation2 + $0x121] sm:$0xff] %v331_v36  ;;  %809 = vmatpush.msrb.mxu2 %v2368_v3  ;;  %1003 = vmatpush.msrb.mxu3 %v2384_v4  ;;  %v246_v36 = vmul.f32 %v2616_v7, %v211_v6  ;;  %v272_v4 = vmul.f32 %v2616_v7, %v237_v50  ;;  %v751_v50 = vld [vmem:[#allocation2 + $0x2] sm:$0xff] }
  0x45   : > { %403 = vst [vmem:[#allocation2 + $0x69] sm:$0xff] %v2748_v52  ;;  %622 = vmatmul.f32.gmra.mxu3 %v334_v62  ;;  %1195 = vmatpush.msrb.mxu0 %v2402_v5  ;;  %v213_v5 = vld [vmem:[%s2609_s30 + $0x20] sm:$0xff]  ;;  %v289_v6 = vadd.f32 %v2621_v8, %v256_v47  ;;  %v2424_v47 = vld [vmem:[%s3592_s2 + $0x2f0] sm:$0xff] }
  0x46   : > { %411 = vst [vmem:[#allocation2 + $0xc9] sm:$0xff] %v324_v53  ;;  %647 = vmatpush.msrb.mxu1 %v466_v13  ;;  %810 = vmatpush.msrb.mxu2 %v2367_v15  ;;  %v271_v53 = vmul.f32 %v2616_v7, %v236_v18  ;;  %v279_v31 = vadd.f32 %v2621_v8, %v246_v36  ;;  %v2362_v13 = vld [vmem:[%s3592_s2 + $0x100] sm:$0xff] }
  0x47   : > { %419 = vst [vmem:[#allocation2 + $0x129] sm:$0xff] %v332_v58  ;;  %1004 = vmatpush.msrb.mxu3 %v2383_v32  ;;  %1196 = vmatpush.msrb.mxu0 %v2401_v16  ;;  %v335_v58 = vmax.f32 %v2942_v29, 0.0  ;;  %v2378_v15 = vld [vmem:[%s3592_s2 + $0x180] sm:$0xff]  ;;  %v265_v32 = vmul.f32 %v2616_v7, %v230_v46  ;;  %v2396_v16 = vld [vmem:[%s3592_s2 + $0x210] sm:$0xff]  ;;  %v214_v29 = vld [vmem:[%s2609_s30 + $0x28] sm:$0xff]  ;;  %v248_v36 = vmul.f32 %v2616_v7, %v213_v5 }
  0x48   : > { %404 = vst [vmem:[#allocation2 + $0x79] sm:$0xff] %v2816_v19  ;;  %648 = vmatpush.msrb.mxu1 %v465_v21  ;;  %811 = vmatpush.msrb.mxu2 %v2366_v22  ;;  %v3005_v40 = vadd.f32 %v2621_v8, %v271_v53  ;;  %v3014_v44 = vmax.f32 %v279_v31, 0.0  ;;  %v460_v18 = vld [vmem:[%s3592_s2] sm:$0xff]  ;;  %v2441_v21 = vld [vmem:[%s3592_s2 + $0x378] sm:$0xff]  ;;  %v305_v22 = vadd.f32 %v2621_v8, %v272_v4 }
  0x49   : > { %412 = vst [vmem:[#allocation2 + $0xd9] sm:$0xff] %v325_v20  ;;  %550 = vmatmul.f32.gmra.mxu0 %v2939_v17  ;;  %1005 = vmatpush.msrb.mxu3 %v2382_v23  ;;  %v212_v20 = vld [vmem:[%s2609_s30 + $0x18] sm:$0xff]  ;;  %v273_v23 = vmul.f32 %v2616_v7, %v238_v12  ;;  %v290_v53 = vadd.f32 %v2621_v8, %v257_v10  ;;  %v2422_v4 = vld [vmem:[%s3592_s2 + $0x2e0] sm:$0xff] }
  0x4a   : > { %420 = vst [vmem:[#allocation2 + $0x139] sm:$0xff] %v333_v26  ;;  %1197 = vmatpush.msrb.mxu0 %v2400_v42  ;;  %649 = vmatpush.msrb.mxu1 %v464_v48  ;;  %v229_v26 = vld [vmem:[%s2609_s30 + $0xa0] sm:$0xff]  ;;  %v247_v49 = vmul.f32 %v2616_v7, %v212_v20  ;;  %v336_v3 = vmax.f32 %v3005_v40, 0.0  ;;  %v3086_v42 = vmax.f32 %v289_v6, 0.0  ;;  %v2425_v31 = vld [vmem:[%s3592_s2 + $0x2f8] sm:$0xff]  ;;  %v281_v1 = vadd.f32 %v2621_v8, %v248_v36  ;;  %v2436_v36 = vld [vmem:[%s3592_s2 + $0x350] sm:$0xff] }
  0x4b   : > { %405 = vst [vmem:[#allocation2 + $0x81] sm:$0xff] %v2885_v55  ;;  %577 = vmatmul.f32.gmra.mxu1 %v2959_v24  ;;  %601 = vmatmul.f32.gmra.mxu2 %v2961_v27  ;;  %v264_v57 = vmul.f32 %v2616_v7, %v229_v26  ;;  %v337_v20 = vmax.f32 %v305_v22, 0.0  ;;  %v3107_v37 = vmax.f32 %v290_v53, 0.0  ;;  %v2473_v26 = vld [vmem:[%s3592_s2 + $0x478] sm:$0xff]  ;;  %v2470_v6 = vld [vmem:[%s3592_s2 + $0x460] sm:$0xff] }
  0x4c   : > { %413 = vst [vmem:[#allocation2 + $0xe1] sm:$0xff] %v2887_v56  ;;  %812 = vmatpush.msrb.mxu2 %v2365_v33  ;;  %1006 = vmatpush.msrb.mxu3 %v2381_v34  ;;  %v280_v9 = vadd.f32 %v2621_v8, %v247_v49  ;;  %v298_v34 = vadd.f32 %v2621_v8, %v265_v32  ;;  %v2472_v49 = vld [vmem:[%s3592_s2 + $0x470] sm:$0xff]  ;;  %v2437_v12 = vld [vmem:[%s3592_s2 + $0x358] sm:$0xff] }
  0x4d   : > { %396 = vst [vmem:[#allocation2 + $0x19] sm:$0xff] %v2867_v45  ;;  %625 = vmatmul.f32.gmra.mxu3 %v335_v58  ;;  %1198 = vmatpush.msrb.mxu0 %v2399_v35  ;;  %v297_v25 = vadd.f32 %v2621_v8, %v264_v57  ;;  %v306_v35 = vadd.f32 %v2621_v8, %v273_v23  ;;  %v2455_v57 = vld [vmem:[%s3592_s2 + $0x3e8] sm:$0xff]  ;;  %v2469_v32 = vld [vmem:[%s3592_s2 + $0x458] sm:$0xff] }
  0x4e   : > { %421 = vst [vmem:[#allocation2 + $0x141] sm:$0xff] %v334_v62  ;;  %650 = vmatpush.msrb.mxu1 %v463_v38  ;;  %813 = vmatpush.msrb.mxu2 %v2364_v39  ;;  %v2397_v62 = vld [vmem:[%s3592_s2 + $0x218] sm:$0xff]  ;;  %v3088_v48 = vmax.f32 %v280_v9, 0.0  ;;  %v3113_v38 = vmax.f32 %v298_v34, 0.0  ;;  %v3118_v39 = vmax.f32 %v281_v1, 0.0  ;;  %v952_v23 = vld [vmem:[#allocation2 + $0x68] sm:$0xff] }
  0x4f   : > { %406 = vst [vmem:[#allocation2 + $0x91] sm:$0xff] %v2959_v24  ;;  %1007 = vmatpush.msrb.mxu3 %v2380_v41  ;;  %1199 = vmatpush.msrb.mxu0 %v2398_v43  ;;  %v3095_v33 = vmax.f32 %v297_v25, 0.0  ;;  %v338_v40 = vmax.f32 %v306_v35, 0.0  ;;  %v2456_v43 = vld [vmem:[%s3592_s2 + $0x3f0] sm:$0xff]  ;;  %v953_v53 = vld [vmem:[#allocation2 + $0x78] sm:$0xff] }
  0x50   : > { %414 = vst [vmem:[#allocation2 + $0xf1] sm:$0xff] %v2961_v27  ;;  %651 = vmatpush.msrb.mxu1 %v462_v51  ;;  %814 = vmatpush.msrb.mxu2 %v2363_v54  ;;  %v2439_v54 = vld [vmem:[%s3592_s2 + $0x368] sm:$0xff] }
  0x51   : > { %397 = vst [vmem:[#allocation2 + $0x21] sm:$0xff] %v2939_v17  ;;  %553 = vmatmul.f32.gmra.mxu0 %v3014_v44  ;;  %1008 = vmatpush.msrb.mxu3 %v2379_v60  ;;  %v752_v60 = vld [vmem:[#allocation2 + $0xa] sm:$0xff] }
  0x52   : > { %422 = vst [vmem:[#allocation2 + $0x151] sm:$0xff] %v335_v58  ;;  %1200 = vmatpush.msrb.mxu0 %v2397_v62  ;;  %652 = vmatpush.msrb.mxu1 %v461_v0  ;;  %v249_v58 = vmul.f32 %v2616_v7, %v214_v29  ;;  %v2394_v7 = vld [vmem:[%s3592_s2 + $0x200] sm:$0xff]  ;;  %v2471_v62 = vld [vmem:[%s3592_s2 + $0x468] sm:$0xff] }
  0x53   : > { %407 = vst [vmem:[#allocation2 + $0x99] sm:$0xff] %v3033_v61  ;;  %580 = vmatmul.f32.gmra.mxu1 %v3033_v61  ;;  %604 = vmatmul.f32.gmra.mxu2 %v3035_v63  ;;  %v951_v29 = vld [vmem:[#allocation2 + $0x60] sm:$0xff] }
  0x54   : > { %415 = vst [vmem:[#allocation2 + $0xf9] sm:$0xff] %v3035_v63  ;;  %815 = vmatpush.msrb.mxu2 %v2362_v13  ;;  %1009 = vmatpush.msrb.mxu3 %v2378_v15  ;;  %v282_v11 = vadd.f32 %v2621_v8, %v249_v58  ;;  %v2440_v8 = vld [vmem:[%s3592_s2 + $0x370] sm:$0xff]  ;;  %v945_v51 = vld [vmem:[#allocation2 + $0x18] sm:$0xff]  ;;  %v2451_v58 = vld [vmem:[%s3592_s2 + $0x3c8] sm:$0xff] }
  0x55   : > { %398 = vst [vmem:[#allocation2 + $0x31] sm:$0xff] %v3014_v44  ;;  %628 = vmatmul.f32.gmra.mxu3 %v336_v3  ;;  %1201 = vmatpush.msrb.mxu0 %v2396_v16  ;;  %v2421_v13 = vld [vmem:[%s3592_s2 + $0x2d8] sm:$0xff]  ;;  %v954_v35 = vld [vmem:[#allocation2 + $0x80] sm:$0xff] }
  0x56   : > { %423 = vst [vmem:[#allocation2 + $0x159] sm:$0xff] %v336_v3  ;;  %653 = vmatpush.msrb.mxu1 %v460_v18  ;;  %1577 = vmatpush.msra.mxu2 %v2441_v21  ;;  %v3125_v41 = vmax.f32 %v282_v11, 0.0  ;;  %v2452_v18 = vld [vmem:[%s3592_s2 + $0x3d0] sm:$0xff]  ;;  %v2467_v11 = vld [vmem:[%s3592_s2 + $0x448] sm:$0xff] }
  0x57   : > { %408 = vst [vmem:[#allocation2 + $0xa9] sm:$0xff] %v3086_v42  ;;  %1202 = vmatpush.msrb.mxu0 %v2395_v28  ;;  %1771 = vmatpush.msra.mxu3 %v2457_v30  ;;  %v2420_v21 = vld [vmem:[%s3592_s2 + $0x2d0] sm:$0xff] }
  0x58   : > { %416 = vst [vmem:[#allocation2 + $0x109] sm:$0xff] %v3095_v33  ;;  %1382 = vmatpush.msra.mxu1 %v2425_v31  ;;  %1578 = vmatpush.msra.mxu2 %v2440_v8  ;;  %v946_v46 = vld [vmem:[#allocation2 + $0x20] sm:$0xff]  ;;  %v2468_v28 = vld [vmem:[%s3592_s2 + $0x450] sm:$0xff] }
  0x59   : > { %399 = vst [vmem:[#allocation2 + $0x39] sm:$0xff] %v3088_v48  ;;  %556 = vmatmul.f32.gmra.mxu0 %v3088_v48  ;;  %1772 = vmatpush.msra.mxu3 %v2456_v43  ;;  %v753_v0 = vld [vmem:[#allocation2 + $0x1a] sm:$0xff] }
  0x5a   : > { %424 = vst [vmem:[#allocation2 + $0x169] sm:$0xff] %v337_v20  ;;  %1203 = vmatpush.msrb.mxu0 %v2394_v7  ;;  %1383 = vmatpush.msra.mxu1 %v2424_v47  ;;  %v2434_v43 = vld [vmem:[%s3592_s2 + $0x340] sm:$0xff] }
  0x5b   : > { %583 = vmatmul.f32.gmra.mxu1 %v3086_v42  ;;  %607 = vmatmul.f32.gmra.mxu2 %v3095_v33  ;;  %409 = vst [vmem:[#allocation2 + $0xb1] sm:$0xff] %v3107_v37  ;;  %v2450_v47 = vld [vmem:[%s3592_s2 + $0x3c0] sm:$0xff] }
  0x5c   : > { %417 = vst [vmem:[#allocation2 + $0x111] sm:$0xff] %v3113_v38  ;;  %1965 = vmatpush.msra.mxu0 %v2473_v26  ;;  %1579 = vmatpush.msra.mxu2 %v2439_v54  ;;  %v947_v3 = vld [vmem:[#allocation2 + $0x30] sm:$0xff] }
  0x5d   : > { %631 = vmatmul.f32.gmra.mxu3 %v337_v20  ;;  %400 = vst [vmem:[#allocation2 + $0x49] sm:$0xff] %v3118_v39  ;;  %1384 = vmatpush.msra.mxu1 %v2423_v59  ;;  %v760_v20 = vld [vmem:[#allocation2 + $0x6a] sm:$0xff]  ;;  %v956_v59 = vld [vmem:[#allocation2 + $0x98] sm:$0xff] }
  0x5e   : > { %425 = vst [vmem:[#allocation2 + $0x171] sm:$0xff] %v338_v40  ;;  %1966 = vmatpush.msra.mxu0 %v2472_v49  ;;  %1773 = vmatpush.msra.mxu3 %v2455_v57  ;;  %v762_v57 = vld [vmem:[#allocation2 + $0x82] sm:$0xff] }
  0x5f   : > { %401 = vst [vmem:[#allocation2 + $0x51] sm:$0xff] %v3125_v41  ;;  %1385 = vmatpush.msra.mxu1 %v2422_v4  ;;  %v2449_v4 = vld [vmem:[%s3592_s2 + $0x3b8] sm:$0xff] }
  0x60   : > { %1967 = vmatpush.msra.mxu0 %v2471_v62  ;;  %v948_v5 = vld [vmem:[#allocation2 + $0x38] sm:$0xff] }
  0x61   : > { %559 = vmatmul.f32.gmra.mxu0 %v3118_v39  ;;  %v755_v9 = vld [vmem:[#allocation2 + $0x32] sm:$0xff]  ;;  %1386 = vmatpush.msra.mxu1 %v2421_v13  ;;  %v756_v15 = vld [vmem:[#allocation2 + $0x3a] sm:$0xff] }
  0x62   : > { %1968 = vmatpush.msra.mxu0 %v2470_v6 }
  0x63   : > { %586 = vmatmul.f32.gmra.mxu1 %v3107_v37  ;;  %610 = vmatmul.f32.gmra.mxu2 %v3113_v38 }
  0x64   : > { %v949_v10 = vld [vmem:[#allocation2 + $0x48] sm:$0xff]  ;;  %1969 = vmatpush.msra.mxu0 %v2469_v32  ;;  %1387 = vmatpush.msra.mxu1 %v2420_v21 }
  0x65   : > { %634 = vmatmul.f32.gmra.mxu3 %v338_v40 }
  0x66   : > { %v950_v25 = vld [vmem:[#allocation2 + $0x50] sm:$0xff]  ;;  %1970 = vmatpush.msra.mxu0 %v2468_v28 }
  0x67   : > { %v757_v16 = vld [vmem:[#allocation2 + $0x4a] sm:$0xff]  ;;  %v758_v22 = vld [vmem:[#allocation2 + $0x52] sm:$0xff] }
  0x68   : > { %1971 = vmatpush.msra.mxu0 %v2467_v11 }
  0x69   : > { %562 = vmatmul.f32.gmra.mxu0 %v3125_v41 }
  0x6b   : > { %654 = vmatmul.f32.vlgmr.msrb.gmra.mxu1 %v2548_v2  ;;  %816 = vmatmul.f32.vlgmr.msrb.gmra.mxu2 %v751_v50 }
  0x6d   : > { %1010 = vmatmul.f32.vlgmr.msrb.gmra.mxu3 %v945_v51 }
  0x71   : > { %1204 = vmatmul.f32.vlgmr.msrb.gmra.mxu0 %v2867_v45  ;;  %v2438_v45 = vld [vmem:[%s3592_s2 + $0x360] sm:$0xff] }
  0x72   : > { %1580 = vmatpush.msra.mxu2 %v2438_v45  ;;  %v763_v45 = vld [vmem:[#allocation2 + $0x92] sm:$0xff] }
  0x73   : > { %657 = vmatmul.f32.gmra.mxu1 %v2548_v2  ;;  %819 = vmatmul.f32.gmra.mxu2 %v752_v60  ;;  %v2454_v2 = vld [vmem:[%s3592_s2 + $0x3e0] sm:$0xff] }
  0x74   : > { %1774 = vmatpush.msra.mxu3 %v2454_v2  ;;  %1581 = vmatpush.msra.mxu2 %v2437_v12  ;;  %v2466_v60 = vld [vmem:[%s3592_s2 + $0x440] sm:$0xff]  ;;  %v2433_v2 = vld [vmem:[%s3592_s2 + $0x338] sm:$0xff]  ;;  %v958_v12 = vld [vmem:[#allocation2 + $0xb0] sm:$0xff] }
  0x75   : > { %1013 = vmatmul.f32.gmra.mxu3 %v946_v46  ;;  %1972 = vmatpush.msra.mxu0 %v2466_v60  ;;  %v1155_v60 = vld [vmem:[#allocation2 + $0xd9] sm:$0xff] }
  0x76   : > { %1582 = vmatpush.msra.mxu2 %v2436_v36  ;;  %v2448_v36 = vld [vmem:[%s3592_s2 + $0x3b0] sm:$0xff] }
  0x79   : > { %1207 = vmatmul.f32.gmra.mxu0 %v2939_v17  ;;  %v754_v17 = vld [vmem:[#allocation2 + $0x22] sm:$0xff] }
  0x7b   : > { %660 = vmatmul.f32.gmra.mxu1 %v945_v51  ;;  %822 = vmatmul.f32.gmra.mxu2 %v753_v0 }
  0x7d   : > { %1016 = vmatmul.f32.gmra.mxu3 %v947_v3 }
  0x81   : > { %1210 = vmatmul.f32.gmra.mxu0 %v3014_v44  ;;  %v2453_v44 = vld [vmem:[%s3592_s2 + $0x3d8] sm:$0xff] }
  0x82   : > { %1775 = vmatpush.msra.mxu3 %v2453_v44  ;;  %v2465_v44 = vld [vmem:[%s3592_s2 + $0x438] sm:$0xff] }
  0x83   : > { %663 = vmatmul.f32.gmra.mxu1 %v946_v46  ;;  %825 = vmatmul.f32.gmra.mxu2 %v754_v17 }
  0x84   : > { %1776 = vmatpush.msra.mxu3 %v2452_v18  ;;  %1973 = vmatpush.msra.mxu0 %v2465_v44 }
  0x85   : > { %1019 = vmatmul.f32.gmra.mxu3 %v948_v5 }
  0x86   : > { %1777 = vmatpush.msra.mxu3 %v2451_v58 }
  0x88   : > { %1778 = vmatpush.msra.mxu3 %v2450_v47 }
  0x89   : > { %1213 = vmatmul.f32.gmra.mxu0 %v3088_v48  ;;  %v759_v48 = vld [vmem:[#allocation2 + $0x62] sm:$0xff] }
  0x8a   : > { %1779 = vmatpush.msra.mxu3 %v2449_v4 }
  0x8b   : > { %666 = vmatmul.f32.gmra.mxu1 %v947_v3  ;;  %828 = vmatmul.f32.gmra.mxu2 %v755_v9 }
  0x8c   : > { %1780 = vmatpush.msra.mxu3 %v2448_v36 }
  0x8d   : > { %1022 = vmatmul.f32.gmra.mxu3 %v949_v10 }
  0x91   : > { %1216 = vmatmul.f32.gmra.mxu0 %v3118_v39 }
  0x93   : > { %669 = vmatmul.f32.gmra.mxu1 %v948_v5  ;;  %831 = vmatmul.f32.gmra.mxu2 %v756_v15 }
  0x95   : > { %1025 = vmatmul.f32.gmra.mxu3 %v950_v25 }
  0x99   : > { %1219 = vmatmul.f32.gmra.mxu0 %v3125_v41  ;;  %v761_v41 = vld [vmem:[#allocation2 + $0x7a] sm:$0xff] }
  0x9b   : > { %672 = vmatmul.f32.gmra.mxu1 %v949_v10  ;;  %834 = vmatmul.f32.gmra.mxu2 %v757_v16  ;;  %v764_v10 = vld [vmem:[#allocation2 + $0x9a] sm:$0xff]  ;;  %v765_v16 = vld [vmem:[#allocation2 + $0xaa] sm:$0xff] }
  0x9d   : > { %1028 = vmatmul.f32.gmra.mxu3 %v951_v29 }
  0xa1   : > { %1222 = vmatmul.f32.gmra.mxu0 %v2640_v14  ;;  %v2435_v14 = vld [vmem:[%s3592_s2 + $0x348] sm:$0xff] }
  0xa2   : > { %1583 = vmatpush.msra.mxu2 %v2435_v14  ;;  %v2464_v14 = vld [vmem:[%s3592_s2 + $0x430] sm:$0xff] }
  0xa3   : > { %675 = vmatmul.f32.gmra.mxu1 %v950_v25  ;;  %837 = vmatmul.f32.gmra.mxu2 %v758_v22  ;;  %v1153_v22 = vld [vmem:[#allocation2 + $0xc1] sm:$0xff] }
  0xa4   : > { %1584 = vmatpush.msra.mxu2 %v2434_v43  ;;  %1974 = vmatpush.msra.mxu0 %v2464_v14  ;;  %v2431_v43 = vld [vmem:[%s3592_s2 + $0x328] sm:$0xff] }
  0xa5   : > { %1031 = vmatmul.f32.gmra.mxu3 %v952_v23 }
  0xa6   : > { %1585 = vmatpush.msra.mxu2 %v2433_v2 }
  0xa8   : > { %v3198_v30 = vpop.f32.mrf.mxu1 }
  0xa9   : > { %1225 = vmatmul.f32.gmra.mxu0 %v2748_v52  ;;  %v2419_v52 = vld [vmem:[%s3592_s2 + $0x2c8] sm:$0xff] }
  0xaa   : > { %1388 = vmatpush.msra.mxu1 %v2419_v52 }
  0xab   : > { %678 = vmatmul.f32.gmra.mxu1 %v951_v29  ;;  %840 = vmatmul.f32.gmra.mxu2 %v759_v48  ;;  %v2432_v29 = vld [vmem:[%s3592_s2 + $0x330] sm:$0xff] }
  0xac   : > { %1586 = vmatpush.msra.mxu2 %v2432_v29  ;;  %v766_v48 = vld [vmem:[#allocation2 + $0xb2] sm:$0xff] }
  0xad   : > { %1034 = vmatmul.f32.gmra.mxu3 %v953_v53 }
  0xae   : > { %v3207_v31 = vpop.f32.mrf.mxu2  ;;  %v3209_v34 = vpop.f32.mrf.mxu0  ;;  %1587 = vmatpush.msra.mxu2 %v2431_v43 }
  0xb0   : > { %v3214_v1 = vpop.f32.mrf.mxu1  ;;  %v3216_v7 = vpop.f32.mrf.mxu3 }
  0xb1   : > { %1228 = vmatmul.f32.gmra.mxu0 %v2816_v19  ;;  %v955_v19 = vld [vmem:[#allocation2 + $0x90] sm:$0xff] }
  0xb3   : > { %681 = vmatmul.f32.gmra.mxu1 %v952_v23  ;;  %843 = vmatmul.f32.gmra.mxu2 %v760_v20  ;;  %v1154_v20 = vld [vmem:[#allocation2 + $0xc9] sm:$0xff] }
  0xb5   : > { %1037 = vmatmul.f32.gmra.mxu3 %v954_v35 }
  0xb6   : > { %v3222_v26 = vpop.f32.mrf.mxu2  ;;  %v3224_v39 = vpop.f32.mrf.mxu0 }
  0xb8   : > { %v3226_v8 = vpop.f32.mrf.mxu1  ;;  %v3228_v40 = vpop.f32.mrf.mxu3 }
  0xb9   : > { %1231 = vmatmul.f32.gmra.mxu0 %v2885_v55  ;;  %v2418_v55 = vld [vmem:[%s3592_s2 + $0x2c0] sm:$0xff] }
  0xba   : > { %1389 = vmatpush.msra.mxu1 %v2418_v55  ;;  %v2447_v55 = vld [vmem:[%s3592_s2 + $0x3a8] sm:$0xff] }
  0xbb   : > { %684 = vmatmul.f32.gmra.mxu1 %v953_v53  ;;  %846 = vmatmul.f32.gmra.mxu2 %v761_v41  ;;  %v960_v53 = vld [vmem:[#allocation2 + $0xc8] sm:$0xff] }
  0xbc   : > { %v767_v41 = vld [vmem:[#allocation2 + $0xc2] sm:$0xff]  ;;  %1781 = vmatpush.msra.mxu3 %v2447_v55 }
  0xbd   : > { %1040 = vmatmul.f32.gmra.mxu3 %v955_v19 }
  0xbe   : > { %v3237_v49 = vpop.f32.mrf.mxu2  ;;  %v3239_v50 = vpop.f32.mrf.mxu0 }
  0xc0   : > { %v3244_v51 = vpop.f32.mrf.mxu1  ;;  %v3246_v54 = vpop.f32.mrf.mxu3 }
  0xc1   : > { %1234 = vmatmul.f32.gmra.mxu0 %v2959_v24  ;;  %v957_v24 = vld [vmem:[#allocation2 + $0xa8] sm:$0xff] }
  0xc3   : > { %687 = vmatmul.f32.gmra.mxu1 %v954_v35  ;;  %849 = vmatmul.f32.gmra.mxu2 %v762_v57 }
  0xc5   : > { %1043 = vmatmul.f32.gmra.mxu3 %v956_v59 }
  0xc6   : > { %v3252_v46 = vpop.f32.mrf.mxu2  ;;  %v3254_v62 = vpop.f32.mrf.mxu0 }
  0xc8   : > { %v3256_v0 = vpop.f32.mrf.mxu1  ;;  %v3258_v3 = vpop.f32.mrf.mxu3 }
  0xc9   : > { %1237 = vmatmul.f32.gmra.mxu0 %v3033_v61  ;;  %v2417_v61 = vld [vmem:[%s3592_s2 + $0x2b8] sm:$0xff] }
  0xca   : > { %1390 = vmatpush.msra.mxu1 %v2417_v61  ;;  %v768_v61 = vld [vmem:[#allocation2 + $0xca] sm:$0xff] }
  0xcb   : > { %690 = vmatmul.f32.gmra.mxu1 %v955_v19  ;;  %852 = vmatmul.f32.gmra.mxu2 %v763_v45  ;;  %v961_v19 = vld [vmem:[#allocation2 + $0xd8] sm:$0xff] }
  0xcd   : > { %1046 = vmatmul.f32.gmra.mxu3 %v957_v24 }
  0xce   : > { %v3267_v17 = vpop.f32.mrf.mxu2  ;;  %v3269_v5 = vpop.f32.mrf.mxu0 }
  0xd0   : > { %v3274_v6 = vpop.f32.mrf.mxu1  ;;  %v3276_v9 = vpop.f32.mrf.mxu3 }
  0xd1   : > { %1240 = vmatmul.f32.gmra.mxu0 %v3086_v42  ;;  %v959_v42 = vld [vmem:[#allocation2 + $0xc0] sm:$0xff] }
  0xd3   : > { %693 = vmatmul.f32.gmra.mxu1 %v956_v59  ;;  %855 = vmatmul.f32.gmra.mxu2 %v764_v10 }
  0xd5   : > { %1049 = vmatmul.f32.gmra.mxu3 %v958_v12 }
  0xd6   : > { %v3282_v13 = vpop.f32.mrf.mxu2  ;;  %v3284_v15 = vpop.f32.mrf.mxu0 }
  0xd8   : > { %v3286_v25 = vpop.f32.mrf.mxu1  ;;  %v3288_v32 = vpop.f32.mrf.mxu3 }
  0xd9   : > { %1243 = vmatmul.f32.gmra.mxu0 %v3107_v37  ;;  %v2416_v37 = vld [vmem:[%s3592_s2 + $0x2b0] sm:$0xff] }
  0xda   : > { %1391 = vmatpush.msra.mxu1 %v2416_v37 }
  0xdb   : > { %696 = vmatmul.f32.gmra.mxu1 %v957_v24  ;;  %858 = vmatmul.f32.gmra.mxu2 %v765_v16  ;;  %v2415_v24 = vld [vmem:[%s3592_s2 + $0x2a8] sm:$0xff] }
  0xdc   : > { %1392 = vmatpush.msra.mxu1 %v2415_v24  ;;  %v2463_v16 = vld [vmem:[%s3592_s2 + $0x428] sm:$0xff] }
  0xdd   : > { %1052 = vmatmul.f32.gmra.mxu3 %v959_v42  ;;  %1975 = vmatpush.msra.mxu0 %v2463_v16 }
  0xde   : > { %v3297_v18 = vpop.f32.mrf.mxu2  ;;  %v3299_v21 = vpop.f32.mrf.mxu0 }
  0xe0   : > { %v3304_v23 = vpop.f32.mrf.mxu1  ;;  %v3306_v28 = vpop.f32.mrf.mxu3 }
  0xe1   : > { %1246 = vmatmul.f32.gmra.mxu0 %v1153_v22 }
  0xe3   : > { %699 = vmatmul.f32.gmra.mxu1 %v958_v12  ;;  %861 = vmatmul.f32.gmra.mxu2 %v766_v48  ;;  %v769_v48 = vld [vmem:[#allocation2 + $0xda] sm:$0xff] }
  0xe5   : > { %1055 = vmatmul.f32.gmra.mxu3 %v960_v53 }
  0xe6   : > { %v3311_v58 = vpop.f32.mrf.mxu2  ;;  %v3313_v52 = vpop.f32.mrf.mxu0 }
  0xe8   : > { %v3315_v35 = vpop.f32.mrf.mxu3  ;;  %v655_v11 = vpop.f32.mrf.mxu1 }
  0xe9   : > { %1249 = vmatmul.f32.gmra.mxu0 %v1154_v20  ;;  %v656_v47 = vadd.f32 %v655_v11, %v3209_v34  ;;  %v962_v34 = vld [vmem:[#allocation2 + $0xe0] sm:$0xff]  ;;  %v963_v20 = vld [vmem:[#allocation2 + $0xf0] sm:$0xff] }
  0xeb   : > { %702 = vmatmul.f32.gmra.mxu1 %v959_v42  ;;  %864 = vmatmul.f32.gmra.mxu2 %v767_v41  ;;  %v2446_v41 = vld [vmem:[%s3592_s2 + $0x3a0] sm:$0xff] }
  0xec   : > { %1782 = vmatpush.msra.mxu3 %v2446_v41 }
  0xed   : > { %1058 = vmatmul.f32.gmra.mxu3 %v961_v19 }
  0xee   : > { %v817_v57 = vpop.f32.mrf.mxu2  ;;  %v1205_v59 = vpop.f32.mrf.mxu0 }
  0xef   : > { %v913_v45 = vadd.f32 %v817_v57, %v656_v47 }
  0xf0   : > { %v658_v2 = vpop.f32.mrf.mxu1  ;;  %v1011_v4 = vpop.f32.mrf.mxu3 }
  0xf1   : > { %v1107_v10 = vadd.f32 %v1011_v4, %v913_v45  ;;  %1252 = vmatmul.f32.gmra.mxu0 %v1155_v60  ;;  %v659_v44 = vadd.f32 %v658_v2, %v3224_v39  ;;  %v2430_v39 = vld [vmem:[%s3592_s2 + $0x320] sm:$0xff] }
  0xf2   : > { %1588 = vmatpush.msra.mxu2 %v2430_v39  ;;  %v2462_v2 = vld [vmem:[%s3592_s2 + $0x420] sm:$0xff] }
  0xf3   : > { %v3327_v12 = vadd.f32 %v1205_v59, %v1107_v10  ;;  %705 = vmatmul.f32.gmra.mxu1 %v960_v53  ;;  %867 = vmatmul.f32.gmra.mxu2 %v768_v61  ;;  %v770_v59 = vld [vmem:[#allocation2 + $0xe2] sm:$0xff] }
  0xf4   : > { %1976 = vmatpush.msra.mxu0 %v2462_v2  ;;  %v967_v2 = vld [vmem:[#allocation2 + $0x120] sm:$0xff] }
  0xf5   : > { %1061 = vmatmul.f32.gmra.mxu3 %v962_v34 }
  0xf6   : > { %v820_v42 = vpop.f32.mrf.mxu2  ;;  %v1208_v29 = vpop.f32.mrf.mxu0 }
  0xf7   : > { %v914_v36 = vadd.f32 %v820_v42, %v659_v44  ;;  %v771_v42 = vld [vmem:[#allocation2 + $0xf2] sm:$0xff] }
  0xf8   : > { %v661_v22 = vpop.f32.mrf.mxu1  ;;  %v1014_v37 = vpop.f32.mrf.mxu3 }
  0xf9   : > { %v1108_v14 = vadd.f32 %v1014_v37, %v914_v36  ;;  %1255 = vmatmul.f32.gmra.mxu0 %v2887_v56  ;;  %v662_v11 = vadd.f32 %v661_v22, %v3239_v50  ;;  %v964_v50 = vld [vmem:[#allocation2 + $0xf8] sm:$0xff] }
  0xfa   : > { %v2445_v22 = vld [vmem:[%s3592_s2 + $0x398] sm:$0xff] }
  0xfb   : > { %v3334_v53 = vadd.f32 %v1208_v29, %v1108_v14  ;;  %708 = vmatmul.f32.gmra.mxu1 %v961_v19  ;;  %870 = vmatmul.f32.gmra.mxu2 %v769_v48  ;;  %v2414_v19 = vld [vmem:[%s3592_s2 + $0x2a0] sm:$0xff]  ;;  %v965_v29 = vld [vmem:[#allocation2 + $0x108] sm:$0xff]  ;;  %v2413_v14 = vld [vmem:[%s3592_s2 + $0x298] sm:$0xff] }
  0xfc   : > { %1393 = vmatpush.msra.mxu1 %v2414_v19  ;;  %1783 = vmatpush.msra.mxu3 %v2445_v22 }
  0xfd   : > { %1064 = vmatmul.f32.gmra.mxu3 %v963_v20 }
  0xfe   : > { %v823_v43 = vpop.f32.mrf.mxu2  ;;  %v1211_v47 = vpop.f32.mrf.mxu0  ;;  %1394 = vmatpush.msra.mxu1 %v2413_v14 }
  0xff   : > { %v915_v56 = vadd.f32 %v823_v43, %v662_v11  ;;  %v772_v11 = vld [vmem:[#allocation2 + $0xfa] sm:$0xff] }
 0x100   : > { %v664_v55 = vpop.f32.mrf.mxu1  ;;  %v1017_v57 = vpop.f32.mrf.mxu3 }
 0x101   : > { %v1109_v60 = vadd.f32 %v1017_v57, %v915_v56  ;;  %1258 = vmatmul.f32.gmra.mxu0 %v2961_v27  ;;  %v665_v24 = vadd.f32 %v664_v55, %v3254_v62  ;;  %v2429_v62 = vld [vmem:[%s3592_s2 + $0x318] sm:$0xff] }
 0x102   : > { %1589 = vmatpush.msra.mxu2 %v2429_v62  ;;  %v2461_v56 = vld [vmem:[%s3592_s2 + $0x418] sm:$0xff] }
 0x103   : > { %v3347_v45 = vadd.f32 %v1211_v47, %v1109_v60  ;;  %711 = vmatmul.f32.gmra.mxu1 %v962_v34  ;;  %873 = vmatmul.f32.gmra.mxu2 %v770_v59  ;;  %v774_v62 = vld [vmem:[#allocation2 + $0x112] sm:$0xff] }
 0x104   : > { %1977 = vmatpush.msra.mxu0 %v2461_v56 }
 0x105   : > { %1067 = vmatmul.f32.gmra.mxu3 %v964_v50 }
 0x106   : > { %v826_v4 = vpop.f32.mrf.mxu2  ;;  %v1214_v61 = vpop.f32.mrf.mxu0 }
 0x107   : > { %v916_v10 = vadd.f32 %v826_v4, %v665_v24  ;;  %v773_v24 = vld [vmem:[#allocation2 + $0x10a] sm:$0xff] }
 0x108   : > { %v667_v44 = vpop.f32.mrf.mxu1  ;;  %v1020_v16 = vpop.f32.mrf.mxu3 }
 0x109   : > { %v1110_v27 = vadd.f32 %v1020_v16, %v916_v10  ;;  %1261 = vmatmul.f32.gmra.mxu0 %v3035_v63  ;;  %v668_v36 = vadd.f32 %v667_v44, %v3269_v5  ;;  %v966_v5 = vld [vmem:[#allocation2 + $0x110] sm:$0xff] }
 0x10b   : > { %v3354_v34 = vadd.f32 %v1214_v61, %v1110_v27  ;;  %714 = vmatmul.f32.gmra.mxu1 %v963_v20  ;;  %876 = vmatmul.f32.gmra.mxu2 %v771_v42  ;;  %v2444_v61 = vld [vmem:[%s3592_s2 + $0x390] sm:$0xff] }
 0x10c   : > { %1784 = vmatpush.msra.mxu3 %v2444_v61  ;;  %v2412_v42 = vld [vmem:[%s3592_s2 + $0x290] sm:$0xff] }
 0x10d   : > { %1070 = vmatmul.f32.gmra.mxu3 %v965_v29  ;;  %1395 = vmatpush.msra.mxu1 %v2412_v42 }
 0x10e   : > { %v829_v37 = vpop.f32.mrf.mxu2  ;;  %v1217_v48 = vpop.f32.mrf.mxu0 }
 0x10f   : > { %v917_v63 = vadd.f32 %v829_v37, %v668_v36 }
 0x110   : > { %v670_v20 = vpop.f32.mrf.mxu1  ;;  %v1023_v39 = vpop.f32.mrf.mxu3 }
 0x111   : > { %v1111_v41 = vadd.f32 %v1023_v39, %v917_v63  ;;  %1264 = vmatmul.f32.gmra.mxu0 %v3095_v33  ;;  %v671_v47 = vadd.f32 %v670_v20, %v3284_v15  ;;  %v2428_v15 = vld [vmem:[%s3592_s2 + $0x310] sm:$0xff] }
 0x112   : > { %1590 = vmatpush.msra.mxu2 %v2428_v15  ;;  %v1162_v20 = vld [vmem:[#allocation2 + $0x129] sm:$0xff] }
 0x113   : > { %v3367_v43 = vadd.f32 %v1217_v48, %v1111_v41  ;;  %717 = vmatmul.f32.gmra.mxu1 %v964_v50  ;;  %879 = vmatmul.f32.gmra.mxu2 %v772_v11  ;;  %v2460_v48 = vld [vmem:[%s3592_s2 + $0x410] sm:$0xff] }
 0x114   : > { %1978 = vmatpush.msra.mxu0 %v2460_v48 }
 0x115   : > { %1073 = vmatmul.f32.gmra.mxu3 %v966_v5 }
 0x116   : > { %v832_v19 = vpop.f32.mrf.mxu2  ;;  %v1220_v55 = vpop.f32.mrf.mxu0 }
 0x117   : > { %v918_v57 = vadd.f32 %v832_v19, %v671_v47  ;;  %v775_v47 = vld [vmem:[#allocation2 + $0x122] sm:$0xff] }
 0x118   : > { %v673_v59 = vpop.f32.mrf.mxu1  ;;  %v1026_v60 = vpop.f32.mrf.mxu3 }
 0x119   : > { %v1112_v33 = vadd.f32 %v1026_v60, %v918_v57  ;;  %1267 = vmatmul.f32.gmra.mxu0 %v3113_v38  ;;  %v674_v4 = vadd.f32 %v673_v59, %v3299_v21  ;;  %v1161_v38 = vld [vmem:[#allocation2 + $0x121] sm:$0xff] }
 0x11a   : > { %v968_v21 = vld [vmem:[#allocation2 + $0x128] sm:$0xff] }
 0x11b   : > { %v3374_v50 = vadd.f32 %v1220_v55, %v1112_v33  ;;  %720 = vmatmul.f32.gmra.mxu1 %v965_v29  ;;  %882 = vmatmul.f32.gmra.mxu2 %v773_v24  ;;  %v2443_v57 = vld [vmem:[%s3592_s2 + $0x388] sm:$0xff]  ;;  %v1163_v24 = vld [vmem:[#allocation2 + $0x139] sm:$0xff]  ;;  %v239_v33 = vld [vmem:[%s2609_s30 + $0xf0] sm:$0xff] }
 0x11c   : > { %1785 = vmatpush.msra.mxu3 %v2443_v57  ;;  %v2426_v57 = vld [vmem:[%s3592_s2 + $0x300] sm:$0xff] }
 0x11d   : > { %1076 = vmatmul.f32.gmra.mxu3 %v967_v2 }
 0x11e   : > { %v835_v10 = vpop.f32.mrf.mxu2  ;;  %v1223_v44 = vpop.f32.mrf.mxu0 }
 0x11f   : > { %v919_v16 = vadd.f32 %v835_v10, %v674_v4  ;;  %v2537_v4 = vld [vmem:[%s3591_s1] ss:$0 sm:$0xff] }
 0x120   : > { %v676_v27 = vpop.f32.mrf.mxu1  ;;  %v1029_v29 = vpop.f32.mrf.mxu3 }
 0x121   : > { %v1113_v36 = vadd.f32 %v1029_v29, %v919_v16  ;;  %1270 = vmatmul.f32.gmra.mxu0 %v1161_v38  ;;  %v677_v37 = vadd.f32 %v676_v27, %v3313_v52  ;;  %v2427_v52 = vld [vmem:[%s3592_s2 + $0x308] sm:$0xff]  ;;  %v2538_v16 = vld [vmem:[%s3591_s1 + $0x1] ss:$0 sm:$0xff] }
 0x122   : > { %1591 = vmatpush.msra.mxu2 %v2427_v52  ;;  %v970_v27 = vld [vmem:[#allocation2 + $0x140] sm:$0xff]  ;;  %v971_v52 = vld [vmem:[#allocation2 + $0x150] sm:$0xff] }
 0x123   : > { %v3386_v22 = vadd.f32 %v1223_v44, %v1113_v36  ;;  %723 = vmatmul.f32.gmra.mxu1 %v966_v5  ;;  %885 = vmatmul.f32.gmra.mxu2 %v774_v62  ;;  %v969_v5 = vld [vmem:[#allocation2 + $0x138] sm:$0xff]  ;;  %v776_v44 = vld [vmem:[#allocation2 + $0x12a] sm:$0xff] }
 0x124   : > { %1592 = vmatpush.msra.mxu2 %v2426_v57  ;;  %v1167_v57 = vld [vmem:[#allocation2 + $0x169] sm:$0xff] }
 0x125   : > { %1079 = vmatmul.f32.gmra.mxu3 %v968_v21 }
 0x126   : > { %v838_v63 = vpop.f32.mrf.mxu2  ;;  %v1226_v14 = vpop.f32.mrf.mxu0 }
 0x127   : > { %v920_v39 = vadd.f32 %v838_v63, %v677_v37  ;;  %v2459_v37 = vld [vmem:[%s3592_s2 + $0x408] sm:$0xff] }
 0x128   : > { %v679_v11 = vpop.f32.mrf.mxu1  ;;  %v1032_v41 = vpop.f32.mrf.mxu3  ;;  %1979 = vmatpush.msra.mxu0 %v2459_v37 }
 0x129   : > { %v1114_v56 = vadd.f32 %v1032_v41, %v920_v39  ;;  %1273 = vmatmul.f32.gmra.mxu0 %v1162_v20  ;;  %v680_v55 = vadd.f32 %v679_v11, %v3198_v30  ;;  %v274_v30 = vmul.f32 %v2537_v4, %v239_v33  ;;  %v240_v20 = vld [vmem:[%s2609_s30 + $0xf8] sm:$0xff] }
 0x12b   : > { %v3392_v19 = vadd.f32 %v1226_v14, %v1114_v56  ;;  %726 = vmatmul.f32.gmra.mxu1 %v967_v2  ;;  %888 = vmatmul.f32.gmra.mxu2 %v775_v47  ;;  %v2411_v2 = vld [vmem:[%s3592_s2 + $0x288] sm:$0xff]  ;;  %v3411_v42 = vadd.f32 %v2538_v16, %v274_v30  ;;  %v777_v47 = vld [vmem:[#allocation2 + $0x13a] sm:$0xff] }
 0x12c   : > { %1396 = vmatpush.msra.mxu1 %v2411_v2  ;;  %v1164_v14 = vld [vmem:[#allocation2 + $0x141] sm:$0xff] }
 0x12d   : > { %1082 = vmatmul.f32.gmra.mxu3 %v969_v5  ;;  %v339_v62 = vmax.f32 %v3411_v42, 0.0  ;;  %v1722_v42 = vld [vmem:[#allocation2 + $0x31] sm:$0xff] }
 0x12e   : > { %v841_v59 = vpop.f32.mrf.mxu2  ;;  %v1229_v60 = vpop.f32.mrf.mxu0 }
 0x12f   : > { %v921_v15 = vadd.f32 %v841_v59, %v680_v55  ;;  %426 = vst [vmem:[#allocation2 + $0x181] sm:$0xff] %v339_v62 }
 0x130   : > { %v682_v61 = vpop.f32.mrf.mxu1  ;;  %v1035_v10 = vpop.f32.mrf.mxu3 }
 0x131   : > { %v1115_v38 = vadd.f32 %v1035_v10, %v921_v15  ;;  %1276 = vmatmul.f32.gmra.mxu0 %v1163_v24  ;;  %v683_v36 = vadd.f32 %v682_v61, %v3214_v1  ;;  %v2442_v24 = vld [vmem:[%s3592_s2 + $0x380] sm:$0xff]  ;;  %v1165_v15 = vld [vmem:[#allocation2 + $0x151] sm:$0xff] }
 0x132   : > { %1786 = vmatpush.msra.mxu3 %v2442_v24 }
 0x133   : > { %v3413_v29 = vadd.f32 %v1229_v60, %v1115_v38  ;;  %729 = vmatmul.f32.gmra.mxu1 %v968_v21  ;;  %891 = vmatmul.f32.gmra.mxu2 %v776_v44  ;;  %v275_v21 = vmul.f32 %v2537_v4, %v240_v20  ;;  %v2410_v4 = vld [vmem:[%s3592_s2 + $0x280] sm:$0xff]  ;;  %v972_v44 = vld [vmem:[#allocation2 + $0x158] sm:$0xff] }
 0x134   : > { %1397 = vmatpush.msra.mxu1 %v2410_v4 }
 0x135   : > { %1085 = vmatmul.f32.gmra.mxu3 %v970_v27  ;;  %v3423_v1 = vadd.f32 %v2538_v16, %v275_v21  ;;  %v779_v21 = vld [vmem:[#allocation2 + $0x152] sm:$0xff] }
 0x136   : > { %v844_v48 = vpop.f32.mrf.mxu2  ;;  %v1232_v63 = vpop.f32.mrf.mxu0 }
 0x137   : > { %v922_v39 = vadd.f32 %v844_v48, %v683_v36  ;;  %v340_v59 = vmax.f32 %v3423_v1, 0.0  ;;  %v2458_v36 = vld [vmem:[%s3592_s2 + $0x400] sm:$0xff] }
 0x138   : > { %v685_v11 = vpop.f32.mrf.mxu1  ;;  %v1038_v41 = vpop.f32.mrf.mxu3  ;;  %1980 = vmatpush.msra.mxu0 %v2458_v36  ;;  %v781_v36 = vld [vmem:[#allocation2 + $0x16a] sm:$0xff]  ;;  %v1723_v1 = vld [vmem:[#allocation2 + $0x39] sm:$0xff] }
 0x139   : > { %v1116_v56 = vadd.f32 %v1038_v41, %v922_v39  ;;  %1279 = vmatmul.f32.gmra.mxu0 %v1164_v14  ;;  %v686_v60 = vadd.f32 %v685_v11, %v3226_v8  ;;  %427 = vst [vmem:[#allocation2 + $0x189] sm:$0xff] %v340_v59  ;;  %v778_v8 = vld [vmem:[#allocation2 + $0x142] sm:$0xff] }
 0x13a   : > { %v973_v41 = vld [vmem:[#allocation2 + $0x168] sm:$0xff] }
 0x13b   : > { %v3425_v55 = vadd.f32 %v1232_v63, %v1116_v56  ;;  %732 = vmatmul.f32.gmra.mxu1 %v969_v5  ;;  %894 = vmatmul.f32.gmra.mxu2 %v777_v47  ;;  %v1166_v63 = vld [vmem:[#allocation2 + $0x159] sm:$0xff] }
 0x13d   : > { %1088 = vmatmul.f32.gmra.mxu3 %v971_v52 }
 0x13e   : > { %v847_v33 = vpop.f32.mrf.mxu2  ;;  %v1235_v5 = vpop.f32.mrf.mxu0 }
 0x13f   : > { %v923_v2 = vadd.f32 %v847_v33, %v686_v60 }
 0x140   : > { %v688_v30 = vpop.f32.mrf.mxu1  ;;  %v1041_v61 = vpop.f32.mrf.mxu3 }
 0x141   : > { %v1117_v10 = vadd.f32 %v1041_v61, %v923_v2  ;;  %1282 = vmatmul.f32.gmra.mxu0 %v1165_v15  ;;  %v689_v16 = vadd.f32 %v688_v30, %v3244_v51  ;;  %v974_v2 = vld [vmem:[#allocation2 + $0x170] sm:$0xff] }
 0x142   : > { %v1168_v61 = vld [vmem:[#allocation2 + $0x171] sm:$0xff] }
 0x143   : > { %v3440_v38 = vadd.f32 %v1235_v5, %v1117_v10  ;;  %735 = vmatmul.f32.gmra.mxu1 %v970_v27  ;;  %897 = vmatmul.f32.gmra.mxu2 %v778_v8  ;;  %v780_v5 = vld [vmem:[#allocation2 + $0x15a] sm:$0xff] }
 0x145   : > { %1091 = vmatmul.f32.gmra.mxu3 %v972_v44 }
 0x146   : > { %v850_v37 = vpop.f32.mrf.mxu2  ;;  %v1238_v48 = vpop.f32.mrf.mxu0 }
 0x147   : > { %v924_v14 = vadd.f32 %v850_v37, %v689_v16 }
 0x148   : > { %v691_v20 = vpop.f32.mrf.mxu1  ;;  %v1044_v39 = vpop.f32.mrf.mxu3 }
 0x149   : > { %v1118_v11 = vadd.f32 %v1044_v39, %v924_v14  ;;  %1285 = vmatmul.f32.gmra.mxu0 %v1166_v63  ;;  %v692_v51 = vadd.f32 %v691_v20, %v3256_v0 }
 0x14b   : > { %v3446_v27 = vadd.f32 %v1238_v48, %v1118_v11  ;;  %738 = vmatmul.f32.gmra.mxu1 %v971_v52  ;;  %900 = vmatmul.f32.gmra.mxu2 %v779_v21  ;;  %v975_v48 = vld [vmem:[#allocation2 + $0x180] sm:$0xff]  ;;  %v782_v11 = vld [vmem:[#allocation2 + $0x172] sm:$0xff] }
 0x14d   : > { %1094 = vmatmul.f32.gmra.mxu3 %v973_v41 }
 0x14e   : > { %v853_v47 = vpop.f32.mrf.mxu2  ;;  %v1241_v56 = vpop.f32.mrf.mxu0 }
 0x14f   : > { %v925_v60 = vadd.f32 %v853_v47, %v692_v51  ;;  %v976_v47 = vld [vmem:[#allocation2 + $0x188] sm:$0xff] }
 0x150   : > { %v694_v24 = vpop.f32.mrf.mxu1  ;;  %v1047_v33 = vpop.f32.mrf.mxu3 }
 0x151   : > { %v1119_v15 = vadd.f32 %v1047_v33, %v925_v60  ;;  %1288 = vmatmul.f32.gmra.mxu0 %v1167_v57  ;;  %v695_v52 = vadd.f32 %v694_v24, %v3274_v6 }
 0x153   : > { %v3449_v4 = vadd.f32 %v1241_v56, %v1119_v15  ;;  %741 = vmatmul.f32.gmra.mxu1 %v972_v44  ;;  %903 = vmatmul.f32.gmra.mxu2 %v780_v5  ;;  %v1333_v5 = vld [vmem:[#allocation2 + $0x1a] sm:$0xff]  ;;  %v1528_v15 = vld [vmem:[#allocation2 + $0x30] sm:$0xff] }
 0x155   : > { %1097 = vmatmul.f32.gmra.mxu3 %v974_v2 }
 0x156   : > { %v856_v30 = vpop.f32.mrf.mxu2  ;;  %v1244_v0 = vpop.f32.mrf.mxu0 }
 0x157   : > { %v926_v8 = vadd.f32 %v856_v30, %v695_v52 }
 0x158   : > { %v697_v10 = vpop.f32.mrf.mxu1  ;;  %v1050_v16 = vpop.f32.mrf.mxu3 }
 0x159   : > { %v1120_v37 = vadd.f32 %v1050_v16, %v926_v8  ;;  %1291 = vmatmul.f32.gmra.mxu0 %v1168_v61  ;;  %v698_v44 = vadd.f32 %v697_v10, %v3286_v25  ;;  %v1334_v16 = vld [vmem:[#allocation2 + $0x22] sm:$0xff] }
 0x15b   : > { %v3452_v63 = vadd.f32 %v1244_v0, %v1120_v37  ;;  %744 = vmatmul.f32.gmra.mxu1 %v973_v41  ;;  %906 = vmatmul.f32.gmra.mxu2 %v781_v36  ;;  %v1916_v0 = vld [vmem:[#allocation2 + $0x32] sm:$0xff] }
 0x15c   : > { %v1529_v36 = vld [vmem:[#allocation2 + $0x38] sm:$0xff] }
 0x15d   : > { %1100 = vmatmul.f32.gmra.mxu3 %v975_v48 }
 0x15e   : > { %v859_v14 = vpop.f32.mrf.mxu2  ;;  %v1247_v6 = vpop.f32.mrf.mxu0 }
 0x15f   : > { %v927_v20 = vadd.f32 %v859_v14, %v698_v44  ;;  %v1917_v14 = vld [vmem:[#allocation2 + $0x3a] sm:$0xff] }
 0x160   : > { %v700_v39 = vpop.f32.mrf.mxu1  ;;  %v1053_v21 = vpop.f32.mrf.mxu3 }
 0x161   : > { %v1121_v51 = vadd.f32 %v1053_v21, %v927_v20  ;;  %1294 = vmatmul.f32.gmra.mxu0 %v339_v62  ;;  %v701_v41 = vadd.f32 %v700_v39, %v3304_v23  ;;  %v1530_v21 = vld [vmem:[#allocation2 + $0x48] sm:$0xff] }
 0x163   : > { %v3457_v56 = vadd.f32 %v1247_v6, %v1121_v51  ;;  %747 = vmatmul.f32.gmra.mxu1 %v974_v2  ;;  %909 = vmatmul.f32.gmra.mxu2 %v782_v11  ;;  %v1724_v51 = vld [vmem:[#allocation2 + $0x49] sm:$0xff] }
 0x165   : > { %1103 = vmatmul.f32.gmra.mxu3 %v976_v47 }
 0x166   : > { %v862_v25 = vpop.f32.mrf.mxu2  ;;  %v1250_v57 = vpop.f32.mrf.mxu0 }
 0x167   : > { %v928_v60 = vadd.f32 %v862_v25, %v701_v41 }
 0x168   : > { %v703_v24 = vpop.f32.mrf.mxu1  ;;  %v1056_v33 = vpop.f32.mrf.mxu3 }
 0x169   : > { %v1122_v52 = vadd.f32 %v1056_v33, %v928_v60  ;;  %1297 = vmatmul.f32.gmra.mxu0 %v340_v59  ;;  %v704_v2 = vadd.f32 %v703_v24, %v3207_v31 }
 0x16b   : > { %v3462_v62 = vadd.f32 %v1250_v57, %v1122_v52  ;;  %1398 = vmatmul.f32.vlgmr.msra.gmra.mxu1 %v1333_v5  ;;  %1593 = vmatmul.f32.vlgmr.msra.gmra.mxu2 %v1528_v15  ;;  %v1918_v57 = vld [vmem:[#allocation2 + $0x4a] sm:$0xff] }
 0x16c   : > { %v1531_v5 = vld [vmem:[#allocation2 + $0x50] sm:$0xff] }
 0x16d   : > { %1787 = vmatmul.f32.vlgmr.msra.gmra.mxu3 %v1722_v42  ;;  %v1725_v52 = vld [vmem:[#allocation2 + $0x51] sm:$0xff] }
 0x16e   : > { %v865_v23 = vpop.f32.mrf.mxu2  ;;  %v1253_v30 = vpop.f32.mrf.mxu0 }
 0x16f   : > { %v929_v61 = vadd.f32 %v865_v23, %v704_v2 }
 0x170   : > { %v706_v8 = vpop.f32.mrf.mxu1  ;;  %v1059_v10 = vpop.f32.mrf.mxu3 }
 0x171   : > { %v1123_v37 = vadd.f32 %v1059_v10, %v929_v61  ;;  %1981 = vmatmul.f32.vlgmr.msra.gmra.mxu0 %v1916_v0  ;;  %v707_v48 = vadd.f32 %v706_v8, %v3222_v26  ;;  %v1532_v10 = vld [vmem:[#allocation2 + $0x60] sm:$0xff] }
 0x173   : > { %v3465_v59 = vadd.f32 %v1253_v30, %v1123_v37  ;;  %1401 = vmatmul.f32.gmra.mxu1 %v1334_v16  ;;  %1596 = vmatmul.f32.gmra.mxu2 %v1529_v36  ;;  %v1919_v30 = vld [vmem:[#allocation2 + $0x52] sm:$0xff]  ;;  %v1726_v36 = vld [vmem:[#allocation2 + $0x61] sm:$0xff] }
 0x175   : > { %1790 = vmatmul.f32.gmra.mxu3 %v1723_v1 }
 0x176   : > { %v868_v31 = vpop.f32.mrf.mxu2  ;;  %v1256_v44 = vpop.f32.mrf.mxu0 }
 0x177   : > { %v930_v6 = vadd.f32 %v868_v31, %v707_v48  ;;  %v1920_v31 = vld [vmem:[#allocation2 + $0x62] sm:$0xff] }
 0x178   : > { %v709_v20 = vpop.f32.mrf.mxu1  ;;  %v1062_v39 = vpop.f32.mrf.mxu3 }
 0x179   : > { %v1124_v11 = vadd.f32 %v1062_v39, %v930_v6  ;;  %1984 = vmatmul.f32.gmra.mxu0 %v1917_v14  ;;  %v710_v41 = vadd.f32 %v709_v20, %v3237_v49  ;;  %v1533_v20 = vld [vmem:[#allocation2 + $0x68] sm:$0xff] }
 0x17b   : > { %v3468_v47 = vadd.f32 %v1256_v44, %v1124_v11  ;;  %1404 = vmatmul.f32.gmra.mxu1 %v1916_v0  ;;  %1599 = vmatmul.f32.gmra.mxu2 %v1530_v21  ;;  %v1727_v21 = vld [vmem:[#allocation2 + $0x69] sm:$0xff] }
 0x17d   : > { %1793 = vmatmul.f32.gmra.mxu3 %v1724_v51 }
 0x17e   : > { %v871_v25 = vpop.f32.mrf.mxu2  ;;  %v1259_v26 = vpop.f32.mrf.mxu0 }
 0x17f   : > { %v931_v60 = vadd.f32 %v871_v25, %v710_v41  ;;  %v1921_v25 = vld [vmem:[#allocation2 + $0x6a] sm:$0xff] }
 0x180   : > { %v712_v24 = vpop.f32.mrf.mxu1  ;;  %v1065_v33 = vpop.f32.mrf.mxu3 }
 0x181   : > { %v1125_v15 = vadd.f32 %v1065_v33, %v931_v60  ;;  %1987 = vmatmul.f32.gmra.mxu0 %v1918_v57  ;;  %v713_v2 = vadd.f32 %v712_v24, %v3252_v46  ;;  %v1534_v24 = vld [vmem:[#allocation2 + $0x78] sm:$0xff] }
 0x183   : > { %v3471_v42 = vadd.f32 %v1259_v26, %v1125_v15  ;;  %1407 = vmatmul.f32.gmra.mxu1 %v1917_v14  ;;  %1602 = vmatmul.f32.gmra.mxu2 %v1531_v5  ;;  %v1728_v5 = vld [vmem:[#allocation2 + $0x79] sm:$0xff] }
 0x185   : > { %1796 = vmatmul.f32.gmra.mxu3 %v1725_v52 }
 0x186   : > { %v874_v23 = vpop.f32.mrf.mxu2  ;;  %v1262_v49 = vpop.f32.mrf.mxu0 }
 0x187   : > { %v932_v0 = vadd.f32 %v874_v23, %v713_v2  ;;  %v1922_v23 = vld [vmem:[#allocation2 + $0x7a] sm:$0xff] }
 0x188   : > { %v715_v61 = vpop.f32.mrf.mxu1  ;;  %v1068_v8 = vpop.f32.mrf.mxu3 }
 0x189   : > { %v1126_v16 = vadd.f32 %v1068_v8, %v932_v0  ;;  %1990 = vmatmul.f32.gmra.mxu0 %v1919_v30  ;;  %v716_v1 = vadd.f32 %v715_v61, %v3267_v17  ;;  %v1535_v61 = vld [vmem:[#allocation2 + $0x80] sm:$0xff] }
 0x18b   : > { %v3474_v37 = vadd.f32 %v1262_v49, %v1126_v16  ;;  %1410 = vmatmul.f32.gmra.mxu1 %v1918_v57  ;;  %1605 = vmatmul.f32.gmra.mxu2 %v1532_v10  ;;  %v1729_v10 = vld [vmem:[#allocation2 + $0x81] sm:$0xff] }
 0x18d   : > { %1799 = vmatmul.f32.gmra.mxu3 %v1726_v36 }
 0x18e   : > { %v877_v48 = vpop.f32.mrf.mxu2  ;;  %v1265_v46 = vpop.f32.mrf.mxu0 }
 0x18f   : > { %v933_v44 = vadd.f32 %v877_v48, %v716_v1  ;;  %v1923_v48 = vld [vmem:[#allocation2 + $0x82] sm:$0xff] }
 0x190   : > { %v718_v14 = vpop.f32.mrf.mxu1  ;;  %v1071_v6 = vpop.f32.mrf.mxu3 }
 0x191   : > { %v1127_v39 = vadd.f32 %v1071_v6, %v933_v44  ;;  %1993 = vmatmul.f32.gmra.mxu0 %v1920_v31  ;;  %v719_v51 = vadd.f32 %v718_v14, %v3282_v13  ;;  %v1536_v14 = vld [vmem:[#allocation2 + $0x90] sm:$0xff] }
 0x193   : > { %v3477_v11 = vadd.f32 %v1265_v46, %v1127_v39  ;;  %1413 = vmatmul.f32.gmra.mxu1 %v1919_v30  ;;  %1608 = vmatmul.f32.gmra.mxu2 %v1533_v20  ;;  %v1730_v20 = vld [vmem:[#allocation2 + $0x91] sm:$0xff] }
 0x195   : > { %1802 = vmatmul.f32.gmra.mxu3 %v1727_v21 }
 0x196   : > { %v880_v41 = vpop.f32.mrf.mxu2  ;;  %v1268_v17 = vpop.f32.mrf.mxu0 }
 0x197   : > { %v934_v26 = vadd.f32 %v880_v41, %v719_v51  ;;  %v1924_v41 = vld [vmem:[#allocation2 + $0x92] sm:$0xff] }
 0x198   : > { %v721_v57 = vpop.f32.mrf.mxu1  ;;  %v1074_v60 = vpop.f32.mrf.mxu3 }
 0x199   : > { %v1128_v33 = vadd.f32 %v1074_v60, %v934_v26  ;;  %1996 = vmatmul.f32.gmra.mxu0 %v1921_v25  ;;  %v722_v52 = vadd.f32 %v721_v57, %v3297_v18  ;;  %v1537_v57 = vld [vmem:[#allocation2 + $0x98] sm:$0xff] }
 0x19b   : > { %v3480_v15 = vadd.f32 %v1268_v17, %v1128_v33  ;;  %1416 = vmatmul.f32.gmra.mxu1 %v1920_v31  ;;  %1611 = vmatmul.f32.gmra.mxu2 %v1534_v24  ;;  %v1731_v24 = vld [vmem:[#allocation2 + $0x99] sm:$0xff] }
 0x19d   : > { %1805 = vmatmul.f32.gmra.mxu3 %v1728_v5 }
 0x19e   : > { %v883_v2 = vpop.f32.mrf.mxu2  ;;  %v1271_v13 = vpop.f32.mrf.mxu0 }
 0x19f   : > { %v935_v49 = vadd.f32 %v883_v2, %v722_v52  ;;  %v1925_v2 = vld [vmem:[#allocation2 + $0x9a] sm:$0xff] }
 0x1a0   : > { %v724_v30 = vpop.f32.mrf.mxu1  ;;  %v1077_v0 = vpop.f32.mrf.mxu3 }
 0x1a1   : > { %v1129_v8 = vadd.f32 %v1077_v0, %v935_v49  ;;  %1999 = vmatmul.f32.gmra.mxu0 %v1922_v23  ;;  %v725_v36 = vadd.f32 %v724_v30, %v3311_v58  ;;  %v1538_v30 = vld [vmem:[#allocation2 + $0xa8] sm:$0xff] }
 0x1a3   : > { %v3483_v16 = vadd.f32 %v1271_v13, %v1129_v8  ;;  %1419 = vmatmul.f32.gmra.mxu1 %v1921_v25  ;;  %1614 = vmatmul.f32.gmra.mxu2 %v1535_v61  ;;  %v1732_v61 = vld [vmem:[#allocation2 + $0xa9] sm:$0xff] }
 0x1a5   : > { %1808 = vmatmul.f32.gmra.mxu3 %v1729_v10 }
 0x1a6   : > { %v886_v1 = vpop.f32.mrf.mxu2  ;;  %v1274_v18 = vpop.f32.mrf.mxu0 }
 0x1a7   : > { %v936_v46 = vadd.f32 %v886_v1, %v725_v36  ;;  %v1926_v1 = vld [vmem:[#allocation2 + $0xaa] sm:$0xff] }
 0x1a8   : > { %v727_v31 = vpop.f32.mrf.mxu1  ;;  %v1080_v44 = vpop.f32.mrf.mxu3 }
 0x1a9   : > { %v1130_v6 = vadd.f32 %v1080_v44, %v936_v46  ;;  %2002 = vmatmul.f32.gmra.mxu0 %v1923_v48  ;;  %v728_v21 = vadd.f32 %v727_v31, %v3216_v7  ;;  %v1539_v31 = vld [vmem:[#allocation2 + $0xb0] sm:$0xff] }
 0x1ab   : > { %v3486_v39 = vadd.f32 %v1274_v18, %v1130_v6  ;;  %1422 = vmatmul.f32.gmra.mxu1 %v1922_v23  ;;  %1617 = vmatmul.f32.gmra.mxu2 %v1536_v14  ;;  %v1733_v14 = vld [vmem:[#allocation2 + $0xb1] sm:$0xff] }
 0x1ad   : > { %1811 = vmatmul.f32.gmra.mxu3 %v1730_v20 }
 0x1ae   : > { %v889_v51 = vpop.f32.mrf.mxu2  ;;  %v1277_v58 = vpop.f32.mrf.mxu0 }
 0x1af   : > { %v937_v17 = vadd.f32 %v889_v51, %v728_v21  ;;  %v1927_v51 = vld [vmem:[#allocation2 + $0xb2] sm:$0xff] }
 0x1b0   : > { %v730_v25 = vpop.f32.mrf.mxu1  ;;  %v1083_v26 = vpop.f32.mrf.mxu3 }
 0x1b1   : > { %v1131_v60 = vadd.f32 %v1083_v26, %v937_v17  ;;  %2005 = vmatmul.f32.gmra.mxu0 %v1924_v41  ;;  %v731_v5 = vadd.f32 %v730_v25, %v3228_v40  ;;  %v1540_v25 = vld [vmem:[#allocation2 + $0xc0] sm:$0xff] }
 0x1b3   : > { %v3489_v33 = vadd.f32 %v1277_v58, %v1131_v60  ;;  %1425 = vmatmul.f32.gmra.mxu1 %v1923_v48  ;;  %1620 = vmatmul.f32.gmra.mxu2 %v1537_v57  ;;  %v1734_v57 = vld [vmem:[#allocation2 + $0xc1] sm:$0xff] }
 0x1b5   : > { %1814 = vmatmul.f32.gmra.mxu3 %v1731_v24 }
 0x1b6   : > { %v892_v52 = vpop.f32.mrf.mxu2  ;;  %v1280_v7 = vpop.f32.mrf.mxu0 }
 0x1b7   : > { %v938_v13 = vadd.f32 %v892_v52, %v731_v5  ;;  %v1928_v52 = vld [vmem:[#allocation2 + $0xc2] sm:$0xff] }
 0x1b8   : > { %v733_v23 = vpop.f32.mrf.mxu1  ;;  %v1086_v49 = vpop.f32.mrf.mxu3 }
 0x1b9   : > { %v1132_v0 = vadd.f32 %v1086_v49, %v938_v13  ;;  %2008 = vmatmul.f32.gmra.mxu0 %v1925_v2  ;;  %v734_v10 = vadd.f32 %v733_v23, %v3246_v54  ;;  %v1541_v23 = vld [vmem:[#allocation2 + $0xc8] sm:$0xff] }
 0x1bb   : > { %v3492_v8 = vadd.f32 %v1280_v7, %v1132_v0  ;;  %1428 = vmatmul.f32.gmra.mxu1 %v1924_v41  ;;  %1623 = vmatmul.f32.gmra.mxu2 %v1538_v30  ;;  %v1735_v30 = vld [vmem:[#allocation2 + $0xc9] sm:$0xff] }
 0x1bd   : > { %1817 = vmatmul.f32.gmra.mxu3 %v1732_v61 }
 0x1be   : > { %v895_v36 = vpop.f32.mrf.mxu2  ;;  %v1283_v40 = vpop.f32.mrf.mxu0 }
 0x1bf   : > { %v939_v18 = vadd.f32 %v895_v36, %v734_v10  ;;  %v1929_v36 = vld [vmem:[#allocation2 + $0xca] sm:$0xff] }
 0x1c0   : > { %v736_v48 = vpop.f32.mrf.mxu1  ;;  %v1089_v46 = vpop.f32.mrf.mxu3 }
 0x1c1   : > { %v1133_v44 = vadd.f32 %v1089_v46, %v939_v18  ;;  %2011 = vmatmul.f32.gmra.mxu0 %v1926_v1  ;;  %v737_v20 = vadd.f32 %v736_v48, %v3258_v3  ;;  %v1542_v48 = vld [vmem:[#allocation2 + $0xd8] sm:$0xff] }
 0x1c3   : > { %v3495_v6 = vadd.f32 %v1283_v40, %v1133_v44  ;;  %1431 = vmatmul.f32.gmra.mxu1 %v1925_v2  ;;  %1626 = vmatmul.f32.gmra.mxu2 %v1539_v31  ;;  %v1736_v31 = vld [vmem:[#allocation2 + $0xd9] sm:$0xff] }
 0x1c5   : > { %1820 = vmatmul.f32.gmra.mxu3 %v1733_v14 }
 0x1c6   : > { %v898_v21 = vpop.f32.mrf.mxu2  ;;  %v1286_v54 = vpop.f32.mrf.mxu0 }
 0x1c7   : > { %v940_v58 = vadd.f32 %v898_v21, %v737_v20  ;;  %v1930_v21 = vld [vmem:[#allocation2 + $0xda] sm:$0xff] }
 0x1c8   : > { %v739_v41 = vpop.f32.mrf.mxu1  ;;  %v1092_v17 = vpop.f32.mrf.mxu3 }
 0x1c9   : > { %v1134_v26 = vadd.f32 %v1092_v17, %v940_v58  ;;  %2014 = vmatmul.f32.gmra.mxu0 %v1927_v51  ;;  %v740_v24 = vadd.f32 %v739_v41, %v3276_v9  ;;  %v1543_v41 = vld [vmem:[#allocation2 + $0xe0] sm:$0xff] }
 0x1cb   : > { %v3498_v60 = vadd.f32 %v1286_v54, %v1134_v26  ;;  %1434 = vmatmul.f32.gmra.mxu1 %v1926_v1  ;;  %1629 = vmatmul.f32.gmra.mxu2 %v1540_v25  ;;  %v1737_v25 = vld [vmem:[#allocation2 + $0xe1] sm:$0xff] }
 0x1cd   : > { %1823 = vmatmul.f32.gmra.mxu3 %v1734_v57 }
 0x1ce   : > { %v901_v5 = vpop.f32.mrf.mxu2  ;;  %v1289_v3 = vpop.f32.mrf.mxu0 }
 0x1cf   : > { %v941_v7 = vadd.f32 %v901_v5, %v740_v24  ;;  %v1931_v5 = vld [vmem:[#allocation2 + $0xe2] sm:$0xff] }
 0x1d0   : > { %v742_v2 = vpop.f32.mrf.mxu1  ;;  %v1095_v13 = vpop.f32.mrf.mxu3 }
 0x1d1   : > { %v1135_v49 = vadd.f32 %v1095_v13, %v941_v7  ;;  %2017 = vmatmul.f32.gmra.mxu0 %v1928_v52  ;;  %v743_v61 = vadd.f32 %v742_v2, %v3288_v32  ;;  %v1544_v2 = vld [vmem:[#allocation2 + $0xf0] sm:$0xff] }
 0x1d3   : > { %v3501_v0 = vadd.f32 %v1289_v3, %v1135_v49  ;;  %1437 = vmatmul.f32.gmra.mxu1 %v1927_v51  ;;  %1632 = vmatmul.f32.gmra.mxu2 %v1541_v23  ;;  %v1738_v23 = vld [vmem:[#allocation2 + $0xf1] sm:$0xff] }
 0x1d5   : > { %1826 = vmatmul.f32.gmra.mxu3 %v1735_v30 }
 0x1d6   : > { %v904_v10 = vpop.f32.mrf.mxu2  ;;  %v1292_v9 = vpop.f32.mrf.mxu0 }
 0x1d7   : > { %v942_v40 = vadd.f32 %v904_v10, %v743_v61  ;;  %v1932_v10 = vld [vmem:[#allocation2 + $0xf2] sm:$0xff] }
 0x1d8   : > { %v745_v1 = vpop.f32.mrf.mxu1  ;;  %v1098_v18 = vpop.f32.mrf.mxu3 }
 0x1d9   : > { %v1136_v46 = vadd.f32 %v1098_v18, %v942_v40  ;;  %2020 = vmatmul.f32.gmra.mxu0 %v1929_v36  ;;  %v746_v14 = vadd.f32 %v745_v1, %v3306_v28  ;;  %v1545_v1 = vld [vmem:[#allocation2 + $0xf8] sm:$0xff] }
 0x1db   : > { %v3504_v44 = vadd.f32 %v1292_v9, %v1136_v46  ;;  %1440 = vmatmul.f32.gmra.mxu1 %v1928_v52  ;;  %1635 = vmatmul.f32.gmra.mxu2 %v1542_v48  ;;  %v1739_v48 = vld [vmem:[#allocation2 + $0xf9] sm:$0xff] }
 0x1dd   : > { %1829 = vmatmul.f32.gmra.mxu3 %v1736_v31 }
 0x1de   : > { %v907_v20 = vpop.f32.mrf.mxu2  ;;  %v1295_v32 = vpop.f32.mrf.mxu0 }
 0x1df   : > { %v943_v54 = vadd.f32 %v907_v20, %v746_v14  ;;  %v1933_v20 = vld [vmem:[#allocation2 + $0xfa] sm:$0xff] }
 0x1e0   : > { %v748_v51 = vpop.f32.mrf.mxu1  ;;  %v1101_v58 = vpop.f32.mrf.mxu3 }
 0x1e1   : > { %v1137_v17 = vadd.f32 %v1101_v58, %v943_v54  ;;  %2023 = vmatmul.f32.gmra.mxu0 %v1930_v21  ;;  %v749_v57 = vadd.f32 %v748_v51, %v3315_v35  ;;  %v1546_v51 = vld [vmem:[#allocation2 + $0x108] sm:$0xff] }
 0x1e3   : > { %v3507_v26 = vadd.f32 %v1295_v32, %v1137_v17  ;;  %1443 = vmatmul.f32.gmra.mxu1 %v1929_v36  ;;  %1638 = vmatmul.f32.gmra.mxu2 %v1543_v41  ;;  %v1740_v41 = vld [vmem:[#allocation2 + $0x109] sm:$0xff] }
 0x1e5   : > { %1832 = vmatmul.f32.gmra.mxu3 %v1737_v25 }
 0x1e6   : > { %v910_v24 = vpop.f32.mrf.mxu2  ;;  %v1298_v28 = vpop.f32.mrf.mxu0 }
 0x1e7   : > { %v944_v3 = vadd.f32 %v910_v24, %v749_v57 }
 0x1e8   : > { %v1104_v52 = vpop.f32.mrf.mxu3  ;;  %v1399_v7 = vpop.f32.mrf.mxu1 }
 0x1e9   : > { %v1138_v13 = vadd.f32 %v1104_v52, %v944_v3  ;;  %2026 = vmatmul.f32.gmra.mxu0 %v1931_v5  ;;  %v1495_v30 = vadd.f32 %v1399_v7, %v3327_v12  ;;  %v1934_v3 = vld [vmem:[#allocation2 + $0x10a] sm:$0xff] }
 0x1eb   : > { %v3510_v49 = vadd.f32 %v1298_v28, %v1138_v13  ;;  %1446 = vmatmul.f32.gmra.mxu1 %v1930_v21  ;;  %1641 = vmatmul.f32.gmra.mxu2 %v1544_v2 }
 0x1ed   : > { %1835 = vmatmul.f32.gmra.mxu3 %v1738_v23  ;;  %v1547_v23 = vld [vmem:[#allocation2 + $0x110] sm:$0xff] }
 0x1ee   : > { %v1594_v35 = vpop.f32.mrf.mxu2  ;;  %v1982_v61 = vpop.f32.mrf.mxu0 }
 0x1ef   : > { %v1690_v9 = vadd.f32 %v1594_v35, %v1495_v30  ;;  %v1741_v35 = vld [vmem:[#allocation2 + $0x111] sm:$0xff] }
 0x1f0   : > { %v1402_v36 = vpop.f32.mrf.mxu1  ;;  %v1788_v40 = vpop.f32.mrf.mxu3 }
 0x1f1   : > { %v1884_v18 = vadd.f32 %v1788_v40, %v1690_v9  ;;  %2029 = vmatmul.f32.gmra.mxu0 %v1932_v10  ;;  %v1496_v12 = vadd.f32 %v1402_v36, %v3334_v53 }
 0x1f3   : > { %v2078_v46 = vadd.f32 %v1982_v61, %v1884_v18  ;;  %1449 = vmatmul.f32.gmra.mxu1 %v1931_v5  ;;  %1644 = vmatmul.f32.gmra.mxu2 %v1545_v1  ;;  %v1935_v1 = vld [vmem:[#allocation2 + $0x112] sm:$0xff] }
 0x1f5   : > { %2110 = vst [vmem:[%s3518_s6] sm:$0xff] %v2078_v46  ;;  %1838 = vmatmul.f32.gmra.mxu3 %v1739_v48  ;;  %v2180_v25 = vmul.f32 %v2078_v46, %v2078_v46 }
 0x1f6   : > { %v1597_v31 = vpop.f32.mrf.mxu2  ;;  %v1985_v14 = vpop.f32.mrf.mxu0 }
 0x1f7   : > { %v1691_v32 = vadd.f32 %v1597_v31, %v1496_v12  ;;  %v1548_v31 = vld [vmem:[#allocation2 + $0x120] sm:$0xff] }
 0x1f8   : > { %v1405_v21 = vpop.f32.mrf.mxu1  ;;  %v1791_v54 = vpop.f32.mrf.mxu3 }
 0x1f9   : > { %v1885_v58 = vadd.f32 %v1791_v54, %v1691_v32  ;;  %2032 = vmatmul.f32.gmra.mxu0 %v1933_v20  ;;  %v1497_v57 = vadd.f32 %v1405_v21, %v3347_v45  ;;  %v1742_v32 = vld [vmem:[#allocation2 + $0x121] sm:$0xff] }
 0x1fb   : > { %v2079_v17 = vadd.f32 %v1985_v14, %v1885_v58  ;;  %1452 = vmatmul.f32.gmra.mxu1 %v1932_v10  ;;  %1647 = vmatmul.f32.gmra.mxu2 %v1546_v51 }
 0x1fd   : > { %2111 = vst [vmem:[%s3518_s6 + $0x8] sm:$0xff] %v2079_v17  ;;  %v2142_v53 = vadd.f32 %v2079_v17, %v2078_v46  ;;  %v2181_v24 = vmul.f32 %v2079_v17, %v2079_v17  ;;  %1841 = vmatmul.f32.gmra.mxu3 %v1740_v41  ;;  %v1936_v41 = vld [vmem:[#allocation2 + $0x122] sm:$0xff] }
 0x1fe   : > { %v1600_v28 = vpop.f32.mrf.mxu2  ;;  %v1988_v5 = vpop.f32.mrf.mxu0 }
 0x1ff   : > { %v2212_v52 = vadd.f32 %v2181_v24, %v2180_v25  ;;  %v1692_v7 = vadd.f32 %v1600_v28, %v1497_v57  ;;  %v1549_v24 = vld [vmem:[#allocation2 + $0x128] sm:$0xff] }
 0x200   : > { %v1408_v2 = vpop.f32.mrf.mxu1  ;;  %v1794_v13 = vpop.f32.mrf.mxu3 }
 0x201   : > { %v1886_v30 = vadd.f32 %v1794_v13, %v1692_v7  ;;  %2035 = vmatmul.f32.gmra.mxu0 %v1934_v3  ;;  %v1498_v45 = vadd.f32 %v1408_v2, %v3354_v34 }
 0x203   : > { %v2080_v61 = vadd.f32 %v1988_v5, %v1886_v30  ;;  %1455 = vmatmul.f32.gmra.mxu1 %v1933_v20  ;;  %1650 = vmatmul.f32.gmra.mxu2 %v1547_v23  ;;  %v1743_v5 = vld [vmem:[#allocation2 + $0x129] sm:$0xff] }
 0x204   : > { %v1937_v23 = vld [vmem:[#allocation2 + $0x12a] sm:$0xff] }
 0x205   : > { %2112 = vst [vmem:[%s3518_s6 + $0x10] sm:$0xff] %v2080_v61  ;;  %v2143_v10 = vadd.f32 %v2142_v53, %v2080_v61  ;;  %v2182_v9 = vmul.f32 %v2080_v61, %v2080_v61  ;;  %1844 = vmatmul.f32.gmra.mxu3 %v1741_v35 }
 0x206   : > { %v1603_v36 = vpop.f32.mrf.mxu2  ;;  %v1991_v40 = vpop.f32.mrf.mxu0 }
 0x207   : > { %v2213_v18 = vadd.f32 %v2212_v52, %v2182_v9  ;;  %v1693_v48 = vadd.f32 %v1603_v36, %v1498_v45  ;;  %v1744_v36 = vld [vmem:[#allocation2 + $0x139] sm:$0xff] }
 0x208   : > { %v1411_v46 = vpop.f32.mrf.mxu1  ;;  %v1797_v12 = vpop.f32.mrf.mxu3 }
 0x209   : > { %v1887_v14 = vadd.f32 %v1797_v12, %v1693_v48  ;;  %2038 = vmatmul.f32.gmra.mxu0 %v1935_v1  ;;  %v1499_v34 = vadd.f32 %v1411_v46, %v3367_v43  ;;  %v1938_v12 = vld [vmem:[#allocation2 + $0x13a] sm:$0xff] }
 0x20b   : > { %v2081_v20 = vadd.f32 %v1991_v40, %v1887_v14  ;;  %1458 = vmatmul.f32.gmra.mxu1 %v1934_v3  ;;  %1653 = vmatmul.f32.gmra.mxu2 %v1548_v31 }
 0x20d   : > { %2113 = vst [vmem:[%s3518_s6 + $0x18] sm:$0xff] %v2081_v20  ;;  %v2144_v21 = vadd.f32 %v2143_v10, %v2081_v20  ;;  %v2183_v54 = vmul.f32 %v2081_v20, %v2081_v20  ;;  %1847 = vmatmul.f32.gmra.mxu3 %v1742_v32  ;;  %v1550_v10 = vld [vmem:[#allocation2 + $0x138] sm:$0xff] }
 0x20e   : > { %v1606_v51 = vpop.f32.mrf.mxu2  ;;  %v1994_v58 = vpop.f32.mrf.mxu0 }
 0x20f   : > { %v2214_v17 = vadd.f32 %v2213_v18, %v2183_v54  ;;  %v1694_v25 = vadd.f32 %v1606_v51, %v1499_v34  ;;  %v1551_v34 = vld [vmem:[#allocation2 + $0x140] sm:$0xff] }
 0x210   : > { %v1414_v57 = vpop.f32.mrf.mxu1  ;;  %v1800_v53 = vpop.f32.mrf.mxu3  ;;  %v1745_v54 = vld [vmem:[#allocation2 + $0x141] sm:$0xff] }
 0x211   : > { %v1888_v28 = vadd.f32 %v1800_v53, %v1694_v25  ;;  %2041 = vmatmul.f32.gmra.mxu0 %v1936_v41  ;;  %v1500_v43 = vadd.f32 %v1414_v57, %v3374_v50  ;;  %v1939_v57 = vld [vmem:[#allocation2 + $0x142] sm:$0xff] }
 0x213   : > { %v2082_v3 = vadd.f32 %v1994_v58, %v1888_v28  ;;  %1461 = vmatmul.f32.gmra.mxu1 %v1935_v1  ;;  %1656 = vmatmul.f32.gmra.mxu2 %v1549_v24 }
 0x215   : > { %2114 = vst [vmem:[%s3518_s6 + $0x20] sm:$0xff] %v2082_v3  ;;  %v2145_v52 = vadd.f32 %v2144_v21, %v2082_v3  ;;  %v2184_v7 = vmul.f32 %v2082_v3, %v2082_v3  ;;  %1850 = vmatmul.f32.gmra.mxu3 %v1743_v5  ;;  %v1552_v3 = vld [vmem:[#allocation2 + $0x150] sm:$0xff] }
 0x216   : > { %v1609_v2 = vpop.f32.mrf.mxu2  ;;  %v1997_v13 = vpop.f32.mrf.mxu0 }
 0x217   : > { %v2215_v30 = vadd.f32 %v2214_v17, %v2184_v7  ;;  %v1695_v35 = vadd.f32 %v1609_v2, %v1500_v43 }
 0x218   : > { %v1417_v61 = vpop.f32.mrf.mxu1  ;;  %v1803_v45 = vpop.f32.mrf.mxu3 }
 0x219   : > { %v1889_v9 = vadd.f32 %v1803_v45, %v1695_v35  ;;  %2044 = vmatmul.f32.gmra.mxu0 %v1937_v23  ;;  %v1501_v50 = vadd.f32 %v1417_v61, %v3386_v22  ;;  %v1940_v35 = vld [vmem:[#allocation2 + $0x152] sm:$0xff] }
 0x21b   : > { %v2083_v40 = vadd.f32 %v1997_v13, %v1889_v9  ;;  %1464 = vmatmul.f32.gmra.mxu1 %v1936_v41  ;;  %1659 = vmatmul.f32.gmra.mxu2 %v1550_v10 }
 0x21d   : > { %2115 = vst [vmem:[%s3518_s6 + $0x28] sm:$0xff] %v2083_v40  ;;  %v2146_v1 = vadd.f32 %v2145_v52, %v2083_v40  ;;  %v2185_v18 = vmul.f32 %v2083_v40, %v2083_v40  ;;  %1853 = vmatmul.f32.gmra.mxu3 %v1744_v36  ;;  %v1746_v52 = vld [vmem:[#allocation2 + $0x151] sm:$0xff] }
 0x21e   : > { %v1612_v48 = vpop.f32.mrf.mxu2  ;;  %v2000_v46 = vpop.f32.mrf.mxu0  ;;  %v1553_v36 = vld [vmem:[#allocation2 + $0x158] sm:$0xff] }
 0x21f   : > { %v2216_v31 = vadd.f32 %v2215_v30, %v2185_v18  ;;  %v1696_v14 = vadd.f32 %v1612_v48, %v1501_v50  ;;  %v1747_v50 = vld [vmem:[#allocation2 + $0x159] sm:$0xff] }
 0x220   : > { %v1420_v32 = vpop.f32.mrf.mxu1  ;;  %v1806_v20 = vpop.f32.mrf.mxu3 }
 0x221   : > { %v1890_v21 = vadd.f32 %v1806_v20, %v1696_v14  ;;  %2047 = vmatmul.f32.gmra.mxu0 %v1938_v12  ;;  %v1502_v22 = vadd.f32 %v1420_v32, %v3392_v19 }
 0x223   : > { %v2084_v51 = vadd.f32 %v2000_v46, %v1890_v21  ;;  %1467 = vmatmul.f32.gmra.mxu1 %v1937_v23  ;;  %1662 = vmatmul.f32.gmra.mxu2 %v1551_v34  ;;  %v1554_v21 = vld [vmem:[#allocation2 + $0x168] sm:$0xff] }
 0x225   : > { %2116 = vst [vmem:[%s3518_s6 + $0x30] sm:$0xff] %v2084_v51  ;;  %v2147_v58 = vadd.f32 %v2146_v1, %v2084_v51  ;;  %v2186_v41 = vmul.f32 %v2084_v51, %v2084_v51  ;;  %1856 = vmatmul.f32.gmra.mxu3 %v1745_v54  ;;  %v1748_v51 = vld [vmem:[#allocation2 + $0x169] sm:$0xff] }
 0x226   : > { %v1615_v17 = vpop.f32.mrf.mxu2  ;;  %v2003_v25 = vpop.f32.mrf.mxu0 }
 0x227   : > { %v2217_v53 = vadd.f32 %v2216_v31, %v2186_v41  ;;  %v1697_v24 = vadd.f32 %v1615_v17, %v1502_v22  ;;  %v1941_v31 = vld [vmem:[#allocation2 + $0x15a] sm:$0xff] }
 0x228   : > { %v1423_v28 = vpop.f32.mrf.mxu1  ;;  %v1809_v5 = vpop.f32.mrf.mxu3 }
 0x229   : > { %v1891_v43 = vadd.f32 %v1809_v5, %v1697_v24  ;;  %2050 = vmatmul.f32.gmra.mxu0 %v1939_v57  ;;  %v1503_v19 = vadd.f32 %v1423_v28, %v3413_v29 }
 0x22b   : > { %v2085_v7 = vadd.f32 %v2003_v25, %v1891_v43  ;;  %1470 = vmatmul.f32.gmra.mxu1 %v1938_v12  ;;  %1665 = vmatmul.f32.gmra.mxu2 %v1552_v3  ;;  %v1555_v3 = vld [vmem:[#allocation2 + $0x170] sm:$0xff] }
 0x22d   : > { %2117 = vst [vmem:[%s3518_s6 + $0x38] sm:$0xff] %v2085_v7  ;;  %v2148_v2 = vadd.f32 %v2147_v58, %v2085_v7  ;;  %v2187_v13 = vmul.f32 %v2085_v7, %v2085_v7  ;;  %1859 = vmatmul.f32.gmra.mxu3 %v1746_v52  ;;  %v1749_v52 = vld [vmem:[#allocation2 + $0x171] sm:$0xff] }
 0x22e   : > { %v1618_v23 = vpop.f32.mrf.mxu2  ;;  %v2006_v30 = vpop.f32.mrf.mxu0 }
 0x22f   : > { %v2218_v61 = vadd.f32 %v2217_v53, %v2187_v13  ;;  %v1698_v45 = vadd.f32 %v1618_v23, %v1503_v19 }
 0x230   : > { %v1426_v10 = vpop.f32.mrf.mxu1  ;;  %v1812_v9 = vpop.f32.mrf.mxu3 }
 0x231   : > { %v1892_v40 = vadd.f32 %v1812_v9, %v1698_v45  ;;  %2053 = vmatmul.f32.gmra.mxu0 %v1940_v35  ;;  %v1504_v29 = vadd.f32 %v1426_v10, %v3425_v55  ;;  %v1556_v9 = vld [vmem:[#allocation2 + $0x180] sm:$0xff] }
 0x233   : > { %v2086_v1 = vadd.f32 %v2006_v30, %v1892_v40  ;;  %1473 = vmatmul.f32.gmra.mxu1 %v1939_v57  ;;  %1668 = vmatmul.f32.gmra.mxu2 %v1553_v36  ;;  %v1942_v57 = vld [vmem:[#allocation2 + $0x16a] sm:$0xff]  ;;  %v1943_v30 = vld [vmem:[#allocation2 + $0x172] sm:$0xff]  ;;  %v1750_v40 = vld [vmem:[#allocation2 + $0x181] sm:$0xff] }
 0x235   : > { %2118 = vst [vmem:[%s3518_s6 + $0x40] sm:$0xff] %v2086_v1  ;;  %v2149_v18 = vadd.f32 %v2148_v2, %v2086_v1  ;;  %v2188_v48 = vmul.f32 %v2086_v1, %v2086_v1  ;;  %1862 = vmatmul.f32.gmra.mxu3 %v1747_v50 }
 0x236   : > { %v1621_v46 = vpop.f32.mrf.mxu2  ;;  %v2009_v12 = vpop.f32.mrf.mxu0 }
 0x237   : > { %v2219_v14 = vadd.f32 %v2218_v61, %v2188_v48  ;;  %v1699_v32 = vadd.f32 %v1621_v46, %v1504_v29  ;;  %v1944_v46 = vld [vmem:[#allocation2 + $0x182] sm:$0xff] }
 0x238   : > { %v1429_v20 = vpop.f32.mrf.mxu1  ;;  %v1815_v34 = vpop.f32.mrf.mxu3 }
 0x239   : > { %v1893_v54 = vadd.f32 %v1815_v34, %v1699_v32  ;;  %2056 = vmatmul.f32.gmra.mxu0 %v1941_v31  ;;  %v1505_v55 = vadd.f32 %v1429_v20, %v3440_v38  ;;  %v1557_v20 = vld [vmem:[#allocation2 + $0x188] sm:$0xff] }
 0x23b   : > { %v2087_v22 = vadd.f32 %v2009_v12, %v1893_v54  ;;  %1476 = vmatmul.f32.gmra.mxu1 %v1940_v35  ;;  %1671 = vmatmul.f32.gmra.mxu2 %v1554_v21  ;;  %v1751_v21 = vld [vmem:[#allocation2 + $0x189] sm:$0xff] }
 0x23d   : > { %2119 = vst [vmem:[%s3518_s6 + $0x48] sm:$0xff] %v2087_v22  ;;  %v2150_v58 = vadd.f32 %v2149_v18, %v2087_v22  ;;  %v2189_v41 = vmul.f32 %v2087_v22, %v2087_v22  ;;  %1865 = vmatmul.f32.gmra.mxu3 %v1748_v51 }
 0x23e   : > { %v1624_v17 = vpop.f32.mrf.mxu2  ;;  %v2012_v25 = vpop.f32.mrf.mxu0 }
 0x23f   : > { %v2220_v53 = vadd.f32 %v2219_v14, %v2189_v41  ;;  %v1700_v24 = vadd.f32 %v1624_v17, %v1505_v55  ;;  %v1945_v41 = vld [vmem:[#allocation2 + $0x18a] sm:$0xff] }
 0x240   : > { %v1432_v28 = vpop.f32.mrf.mxu1  ;;  %v1818_v5 = vpop.f32.mrf.mxu3 }
 0x241   : > { %v1894_v43 = vadd.f32 %v1818_v5, %v1700_v24  ;;  %2059 = vmatmul.f32.gmra.mxu0 %v1942_v57  ;;  %v1506_v38 = vadd.f32 %v1432_v28, %v3446_v27  ;;  %v1752_v28 = vld [vmem:[#allocation2 + $0x199] sm:$0xff] }
 0x243   : > { %v2088_v7 = vadd.f32 %v2012_v25, %v1894_v43  ;;  %1479 = vmatmul.f32.gmra.mxu1 %v1941_v31  ;;  %1674 = vmatmul.f32.gmra.mxu2 %v1555_v3  ;;  %v2539_v3 = vld [vmem:[#allocation2] sm:$0xff] }
 0x245   : > { %2120 = vst [vmem:[%s3518_s6 + $0x50] sm:$0xff] %v2088_v7  ;;  %v2151_v19 = vadd.f32 %v2150_v58, %v2088_v7  ;;  %v2190_v2 = vmul.f32 %v2088_v7, %v2088_v7  ;;  %1868 = vmatmul.f32.gmra.mxu3 %v1749_v52 }
 0x246   : > { %v1627_v13 = vpop.f32.mrf.mxu2  ;;  %v2015_v23 = vpop.f32.mrf.mxu0 }
 0x247   : > { %v2221_v35 = vadd.f32 %v2220_v53, %v2190_v2  ;;  %v1701_v61 = vadd.f32 %v1627_v13, %v1506_v38 }
 0x248   : > { %v1435_v45 = vpop.f32.mrf.mxu1  ;;  %v1821_v10 = vpop.f32.mrf.mxu3 }
 0x249   : > { %v1895_v36 = vadd.f32 %v1821_v10, %v1701_v61  ;;  %2062 = vmatmul.f32.gmra.mxu0 %v1943_v30  ;;  %v1507_v27 = vadd.f32 %v1435_v45, %v3449_v4  ;;  %v1753_v61 = vld [vmem:[#allocation2 + $0x1a1] sm:$0xff] }
 0x24b   : > { %v2089_v50 = vadd.f32 %v2015_v23, %v1895_v36  ;;  %1482 = vmatmul.f32.gmra.mxu1 %v1942_v57  ;;  %1677 = vmatmul.f32.gmra.mxu2 %v1556_v9 }
 0x24d   : > { %2121 = vst [vmem:[%s3518_s6 + $0x58] sm:$0xff] %v2089_v50  ;;  %v2152_v1 = vadd.f32 %v2151_v19, %v2089_v50  ;;  %v2191_v29 = vmul.f32 %v2089_v50, %v2089_v50  ;;  %1871 = vmatmul.f32.gmra.mxu3 %v1750_v40  ;;  %v1946_v19 = vld [vmem:[#allocation2 + $0x19a] sm:$0xff]  ;;  %v1947_v50 = vld [vmem:[#allocation2 + $0x1a2] sm:$0xff] }
 0x24e   : > { %v1630_v18 = vpop.f32.mrf.mxu2  ;;  %v2018_v48 = vpop.f32.mrf.mxu0 }
 0x24f   : > { %v2222_v12 = vadd.f32 %v2221_v35, %v2191_v29  ;;  %v1702_v31 = vadd.f32 %v1630_v18, %v1507_v27 }
 0x250   : > { %v1438_v14 = vpop.f32.mrf.mxu1  ;;  %v1824_v32 = vpop.f32.mrf.mxu3 }
 0x251   : > { %v1896_v34 = vadd.f32 %v1824_v32, %v1702_v31  ;;  %2065 = vmatmul.f32.gmra.mxu0 %v1944_v46  ;;  %v1508_v4 = vadd.f32 %v1438_v14, %v3452_v63 }
 0x253   : > { %v2090_v54 = vadd.f32 %v2018_v48, %v1896_v34  ;;  %1485 = vmatmul.f32.gmra.mxu1 %v1943_v30  ;;  %1680 = vmatmul.f32.gmra.mxu2 %v1557_v20 }
 0x255   : > { %2122 = vst [vmem:[%s3518_s6 + $0x60] sm:$0xff] %v2090_v54  ;;  %v2153_v51 = vadd.f32 %v2152_v1, %v2090_v54  ;;  %v2192_v22 = vmul.f32 %v2090_v54, %v2090_v54  ;;  %1874 = vmatmul.f32.gmra.mxu3 %v1751_v21 }
 0x256   : > { %v1633_v55 = vpop.f32.mrf.mxu2  ;;  %v2021_v58 = vpop.f32.mrf.mxu0 }
 0x257   : > { %v2223_v17 = vadd.f32 %v2222_v12, %v2192_v22  ;;  %v1703_v25 = vadd.f32 %v1633_v55, %v1508_v4 }
 0x258   : > { %v1441_v57 = vpop.f32.mrf.mxu1  ;;  %v1827_v53 = vpop.f32.mrf.mxu3 }
 0x259   : > { %v1897_v24 = vadd.f32 %v1827_v53, %v1703_v25  ;;  %2068 = vmatmul.f32.gmra.mxu0 %v1945_v41  ;;  %v1509_v63 = vadd.f32 %v1441_v57, %v3457_v56 }
 0x25b   : > { %v2091_v5 = vadd.f32 %v2021_v58, %v1897_v24  ;;  %1488 = vmatmul.f32.gmra.mxu1 %v1944_v46  ;;  %1683 = vmatmul.f32.gmra.mxu2 %v2539_v3 }
 0x25d   : > { %2123 = vst [vmem:[%s3518_s6 + $0x68] sm:$0xff] %v2091_v5  ;;  %v2154_v43 = vadd.f32 %v2153_v51, %v2091_v5  ;;  %v2193_v52 = vmul.f32 %v2091_v5, %v2091_v5  ;;  %1877 = vmatmul.f32.gmra.mxu3 %v1752_v28 }
 0x25e   : > { %v1636_v7 = vpop.f32.mrf.mxu2  ;;  %v2024_v38 = vpop.f32.mrf.mxu0 }
 0x25f   : > { %v2224_v2 = vadd.f32 %v2223_v17, %v2193_v52  ;;  %v1704_v13 = vadd.f32 %v1636_v7, %v1509_v63 }
 0x260   : > { %v1444_v23 = vpop.f32.mrf.mxu1  ;;  %v1830_v30 = vpop.f32.mrf.mxu3 }
 0x261   : > { %v1898_v35 = vadd.f32 %v1830_v30, %v1704_v13  ;;  %2071 = vmatmul.f32.gmra.mxu0 %v1946_v19  ;;  %v1510_v56 = vadd.f32 %v1444_v23, %v3462_v62 }
 0x263   : > { %v2092_v45 = vadd.f32 %v2024_v38, %v1898_v35  ;;  %1491 = vmatmul.f32.gmra.mxu1 %v1945_v41  ;;  %1686 = vmatmul.f32.gmra.mxu2 %v2539_v3 }
 0x265   : > { %2124 = vst [vmem:[%s3518_s6 + $0x70] sm:$0xff] %v2092_v45  ;;  %v2155_v10 = vadd.f32 %v2154_v43, %v2092_v45  ;;  %v2194_v9 = vmul.f32 %v2092_v45, %v2092_v45  ;;  %1880 = vmatmul.f32.gmra.mxu3 %v1753_v61 }
 0x266   : > { %v1639_v36 = vpop.f32.mrf.mxu2  ;;  %v2027_v40 = vpop.f32.mrf.mxu0 }
 0x267   : > { %v2225_v27 = vadd.f32 %v2224_v2, %v2194_v9  ;;  %v1705_v1 = vadd.f32 %v1639_v36, %v1510_v56 }
 0x268   : > { %v1447_v29 = vpop.f32.mrf.mxu1  ;;  %v1833_v18 = vpop.f32.mrf.mxu3 }
 0x269   : > { %v1899_v48 = vadd.f32 %v1833_v18, %v1705_v1  ;;  %2074 = vmatmul.f32.gmra.mxu0 %v1947_v50  ;;  %v1511_v12 = vadd.f32 %v1447_v29, %v3465_v59 }
 0x26b   : > { %v2093_v46 = vadd.f32 %v2027_v40, %v1899_v48 }
 0x26d   : > { %2125 = vst [vmem:[%s3518_s6 + $0x78] sm:$0xff] %v2093_v46  ;;  %v2156_v62 = vadd.f32 %v2155_v10, %v2093_v46  ;;  %v2195_v31 = vmul.f32 %v2093_v46, %v2093_v46 }
 0x26e   : > { %v1642_v14 = vpop.f32.mrf.mxu2  ;;  %v2030_v32 = vpop.f32.mrf.mxu0 }
 0x26f   : > { %v2226_v20 = vadd.f32 %v2225_v27, %v2195_v31  ;;  %v1706_v34 = vadd.f32 %v1642_v14, %v1511_v12 }
 0x270   : > { %v1450_v21 = vpop.f32.mrf.mxu1  ;;  %v1836_v54 = vpop.f32.mrf.mxu3 }
 0x271   : > { %v1900_v4 = vadd.f32 %v1836_v54, %v1706_v34  ;;  %v1512_v22 = vadd.f32 %v1450_v21, %v3468_v47 }
 0x273   : > { %v2094_v51 = vadd.f32 %v2030_v32, %v1900_v4 }
 0x275   : > { %2126 = vst [vmem:[%s3518_s6 + $0x80] sm:$0xff] %v2094_v51  ;;  %v2157_v55 = vadd.f32 %v2156_v62, %v2094_v51  ;;  %v2196_v58 = vmul.f32 %v2094_v51, %v2094_v51 }
 0x276   : > { %v1645_v41 = vpop.f32.mrf.mxu2  ;;  %v2033_v17 = vpop.f32.mrf.mxu0 }
 0x277   : > { %v2227_v59 = vadd.f32 %v2226_v20, %v2196_v58  ;;  %v1707_v25 = vadd.f32 %v1645_v41, %v1512_v22 }
 0x278   : > { %v1453_v57 = vpop.f32.mrf.mxu1  ;;  %v1839_v53 = vpop.f32.mrf.mxu3 }
 0x279   : > { %v1901_v24 = vadd.f32 %v1839_v53, %v1707_v25  ;;  %v1513_v5 = vadd.f32 %v1453_v57, %v3471_v42 }
 0x27b   : > { %v2095_v28 = vadd.f32 %v2033_v17, %v1901_v24 }
 0x27d   : > { %2127 = vst [vmem:[%s3518_s6 + $0x88] sm:$0xff] %v2095_v28  ;;  %v2158_v3 = vadd.f32 %v2157_v55, %v2095_v28  ;;  %v2197_v63 = vmul.f32 %v2095_v28, %v2095_v28 }
 0x27e   : > { %v1648_v43 = vpop.f32.mrf.mxu2  ;;  %v2036_v52 = vpop.f32.mrf.mxu0 }
 0x27f   : > { %v2228_v47 = vadd.f32 %v2227_v59, %v2197_v63  ;;  %v1708_v7 = vadd.f32 %v1648_v43, %v1513_v5 }
 0x280   : > { %v1456_v38 = vpop.f32.mrf.mxu1  ;;  %v1842_v19 = vpop.f32.mrf.mxu3 }
 0x281   : > { %v1902_v2 = vadd.f32 %v1842_v19, %v1708_v7  ;;  %v1514_v23 = vadd.f32 %v1456_v38, %v3474_v37 }
 0x283   : > { %v2096_v13 = vadd.f32 %v2036_v52, %v1902_v2 }
 0x285   : > { %2128 = vst [vmem:[%s3518_s6 + $0x90] sm:$0xff] %v2096_v13  ;;  %v2159_v30 = vadd.f32 %v2158_v3, %v2096_v13  ;;  %v2198_v35 = vmul.f32 %v2096_v13, %v2096_v13 }
 0x286   : > { %v1651_v61 = vpop.f32.mrf.mxu2  ;;  %v2039_v45 = vpop.f32.mrf.mxu0 }
 0x287   : > { %v2229_v42 = vadd.f32 %v2228_v47, %v2198_v35  ;;  %v1709_v56 = vadd.f32 %v1651_v61, %v1514_v23 }
 0x288   : > { %v1459_v10 = vpop.f32.mrf.mxu1  ;;  %v1845_v9 = vpop.f32.mrf.mxu3 }
 0x289   : > { %v1903_v36 = vadd.f32 %v1845_v9, %v1709_v56  ;;  %v1515_v50 = vadd.f32 %v1459_v10, %v3477_v11 }
 0x28b   : > { %v2097_v40 = vadd.f32 %v2039_v45, %v1903_v36 }
 0x28d   : > { %2129 = vst [vmem:[%s3518_s6 + $0x98] sm:$0xff] %v2097_v40  ;;  %v2160_v27 = vadd.f32 %v2159_v30, %v2097_v40  ;;  %v2199_v1 = vmul.f32 %v2097_v40, %v2097_v40 }
 0x28e   : > { %v1654_v29 = vpop.f32.mrf.mxu2  ;;  %v2042_v18 = vpop.f32.mrf.mxu0 }
 0x28f   : > { %v2230_v37 = vadd.f32 %v2229_v42, %v2199_v1  ;;  %v1710_v48 = vadd.f32 %v1654_v29, %v1515_v50 }
 0x290   : > { %v1462_v46 = vpop.f32.mrf.mxu1  ;;  %v1848_v12 = vpop.f32.mrf.mxu3 }
 0x291   : > { %v1904_v62 = vadd.f32 %v1848_v12, %v1710_v48  ;;  %v1516_v14 = vadd.f32 %v1462_v46, %v3480_v15 }
 0x293   : > { %v2098_v31 = vadd.f32 %v2042_v18, %v1904_v62 }
 0x295   : > { %2130 = vst [vmem:[%s3518_s6 + $0xa0] sm:$0xff] %v2098_v31  ;;  %v2161_v32 = vadd.f32 %v2160_v27, %v2098_v31  ;;  %v2200_v20 = vmul.f32 %v2098_v31, %v2098_v31 }
 0x296   : > { %v1657_v34 = vpop.f32.mrf.mxu2  ;;  %v2045_v21 = vpop.f32.mrf.mxu0 }
 0x297   : > { %v2231_v11 = vadd.f32 %v2230_v37, %v2200_v20  ;;  %v1711_v54 = vadd.f32 %v1657_v34, %v1516_v14 }
 0x298   : > { %v1465_v4 = vpop.f32.mrf.mxu1  ;;  %v1851_v51 = vpop.f32.mrf.mxu3 }
 0x299   : > { %v1905_v22 = vadd.f32 %v1851_v51, %v1711_v54  ;;  %v1517_v58 = vadd.f32 %v1465_v4, %v3483_v16 }
 0x29b   : > { %v2099_v55 = vadd.f32 %v2045_v21, %v1905_v22 }
 0x29d   : > { %2131 = vst [vmem:[%s3518_s6 + $0xa8] sm:$0xff] %v2099_v55  ;;  %v2162_v41 = vadd.f32 %v2161_v32, %v2099_v55  ;;  %v2201_v17 = vmul.f32 %v2099_v55, %v2099_v55 }
 0x29e   : > { %v1660_v59 = vpop.f32.mrf.mxu2  ;;  %v2048_v25 = vpop.f32.mrf.mxu0 }
 0x29f   : > { %v2232_v15 = vadd.f32 %v2231_v11, %v2201_v17  ;;  %v1712_v57 = vadd.f32 %v1660_v59, %v1517_v58 }
 0x2a0   : > { %v1468_v53 = vpop.f32.mrf.mxu1  ;;  %v1854_v24 = vpop.f32.mrf.mxu3 }
 0x2a1   : > { %v1906_v28 = vadd.f32 %v1854_v24, %v1712_v57  ;;  %v1518_v3 = vadd.f32 %v1468_v53, %v3486_v39 }
 0x2a3   : > { %v2100_v5 = vadd.f32 %v2048_v25, %v1906_v28 }
 0x2a5   : > { %2132 = vst [vmem:[%s3518_s6 + $0xb0] sm:$0xff] %v2100_v5  ;;  %v2163_v63 = vadd.f32 %v2162_v41, %v2100_v5  ;;  %v2202_v43 = vmul.f32 %v2100_v5, %v2100_v5 }
 0x2a6   : > { %v1663_v52 = vpop.f32.mrf.mxu2  ;;  %v2051_v47 = vpop.f32.mrf.mxu0 }
 0x2a7   : > { %v2233_v16 = vadd.f32 %v2232_v15, %v2202_v43  ;;  %v1713_v7 = vadd.f32 %v1663_v52, %v1518_v3 }
 0x2a8   : > { %v1471_v38 = vpop.f32.mrf.mxu1  ;;  %v1857_v19 = vpop.f32.mrf.mxu3 }
 0x2a9   : > { %v1907_v2 = vadd.f32 %v1857_v19, %v1713_v7  ;;  %v1519_v23 = vadd.f32 %v1471_v38, %v3489_v33 }
 0x2ab   : > { %v2101_v13 = vadd.f32 %v2051_v47, %v1907_v2 }
 0x2ad   : > { %2133 = vst [vmem:[%s3518_s6 + $0xb8] sm:$0xff] %v2101_v13  ;;  %v2164_v30 = vadd.f32 %v2163_v63, %v2101_v13  ;;  %v2203_v35 = vmul.f32 %v2101_v13, %v2101_v13 }
 0x2ae   : > { %v1666_v61 = vpop.f32.mrf.mxu2  ;;  %v2054_v45 = vpop.f32.mrf.mxu0 }
 0x2af   : > { %v2234_v39 = vadd.f32 %v2233_v16, %v2203_v35  ;;  %v1714_v42 = vadd.f32 %v1666_v61, %v1519_v23 }
 0x2b0   : > { %v1474_v56 = vpop.f32.mrf.mxu1  ;;  %v1860_v10 = vpop.f32.mrf.mxu3 }
 0x2b1   : > { %v1908_v9 = vadd.f32 %v1860_v10, %v1714_v42  ;;  %v1520_v40 = vadd.f32 %v1474_v56, %v3492_v8 }
 0x2b3   : > { %v2102_v36 = vadd.f32 %v2054_v45, %v1908_v9 }
 0x2b5   : > { %2134 = vst [vmem:[%s3518_s6 + $0xc0] sm:$0xff] %v2102_v36  ;;  %v2165_v50 = vadd.f32 %v2164_v30, %v2102_v36  ;;  %v2204_v27 = vmul.f32 %v2102_v36, %v2102_v36 }
 0x2b6   : > { %v1669_v1 = vpop.f32.mrf.mxu2  ;;  %v2057_v29 = vpop.f32.mrf.mxu0 }
 0x2b7   : > { %v2235_v33 = vadd.f32 %v2234_v39, %v2204_v27  ;;  %v1715_v18 = vadd.f32 %v1669_v1, %v1520_v40 }
 0x2b8   : > { %v1477_v37 = vpop.f32.mrf.mxu1  ;;  %v1863_v48 = vpop.f32.mrf.mxu3 }
 0x2b9   : > { %v1909_v46 = vadd.f32 %v1863_v48, %v1715_v18  ;;  %v1521_v62 = vadd.f32 %v1477_v37, %v3495_v6 }
 0x2bb   : > { %v2103_v12 = vadd.f32 %v2057_v29, %v1909_v46 }
 0x2bd   : > { %2135 = vst [vmem:[%s3518_s6 + $0xc8] sm:$0xff] %v2103_v12  ;;  %v2166_v31 = vadd.f32 %v2165_v50, %v2103_v12  ;;  %v2205_v14 = vmul.f32 %v2103_v12, %v2103_v12 }
 0x2be   : > { %v1672_v32 = vpop.f32.mrf.mxu2  ;;  %v2060_v20 = vpop.f32.mrf.mxu0 }
 0x2bf   : > { %v2236_v8 = vadd.f32 %v2235_v33, %v2205_v14  ;;  %v1716_v34 = vadd.f32 %v1672_v32, %v1521_v62 }
 0x2c0   : > { %v1480_v21 = vpop.f32.mrf.mxu1  ;;  %v1866_v11 = vpop.f32.mrf.mxu3 }
 0x2c1   : > { %v1910_v54 = vadd.f32 %v1866_v11, %v1716_v34  ;;  %v1522_v51 = vadd.f32 %v1480_v21, %v3498_v60 }
 0x2c3   : > { %v2104_v4 = vadd.f32 %v2060_v20, %v1910_v54 }
 0x2c5   : > { %2136 = vst [vmem:[%s3518_s6 + $0xd0] sm:$0xff] %v2104_v4  ;;  %v2167_v22 = vadd.f32 %v2166_v31, %v2104_v4  ;;  %v2206_v55 = vmul.f32 %v2104_v4, %v2104_v4 }
 0x2c6   : > { %v1675_v58 = vpop.f32.mrf.mxu2  ;;  %v2063_v41 = vpop.f32.mrf.mxu0 }
 0x2c7   : > { %v2237_v6 = vadd.f32 %v2236_v8, %v2206_v55  ;;  %v1717_v17 = vadd.f32 %v1675_v58, %v1522_v51 }
 0x2c8   : > { %v1483_v59 = vpop.f32.mrf.mxu1  ;;  %v1869_v25 = vpop.f32.mrf.mxu3 }
 0x2c9   : > { %v1911_v15 = vadd.f32 %v1869_v25, %v1717_v17  ;;  %v1523_v53 = vadd.f32 %v1483_v59, %v3501_v0 }
 0x2cb   : > { %v2105_v57 = vadd.f32 %v2063_v41, %v1911_v15 }
 0x2cd   : > { %2137 = vst [vmem:[%s3518_s6 + $0xd8] sm:$0xff] %v2105_v57  ;;  %v2168_v24 = vadd.f32 %v2167_v22, %v2105_v57  ;;  %v2207_v28 = vmul.f32 %v2105_v57, %v2105_v57 }
 0x2ce   : > { %v1678_v5 = vpop.f32.mrf.mxu2  ;;  %v2066_v3 = vpop.f32.mrf.mxu0 }
 0x2cf   : > { %v2238_v60 = vadd.f32 %v2237_v6, %v2207_v28  ;;  %v1718_v63 = vadd.f32 %v1678_v5, %v1523_v53 }
 0x2d0   : > { %v1486_v43 = vpop.f32.mrf.mxu1  ;;  %v1872_v52 = vpop.f32.mrf.mxu3 }
 0x2d1   : > { %v1912_v47 = vadd.f32 %v1872_v52, %v1718_v63  ;;  %v1524_v7 = vadd.f32 %v1486_v43, %v3504_v44 }
 0x2d3   : > { %v2106_v16 = vadd.f32 %v2066_v3, %v1912_v47 }
 0x2d5   : > { %2138 = vst [vmem:[%s3518_s6 + $0xe0] sm:$0xff] %v2106_v16  ;;  %v2169_v38 = vadd.f32 %v2168_v24, %v2106_v16  ;;  %v2208_v19 = vmul.f32 %v2106_v16, %v2106_v16 }
 0x2d6   : > { %v1681_v2 = vpop.f32.mrf.mxu2  ;;  %v2069_v13 = vpop.f32.mrf.mxu0 }
 0x2d7   : > { %v2239_v0 = vadd.f32 %v2238_v60, %v2208_v19  ;;  %v1719_v23 = vadd.f32 %v1681_v2, %v1524_v7 }
 0x2d8   : > { %v1489_v30 = vpop.f32.mrf.mxu1  ;;  %v1875_v35 = vpop.f32.mrf.mxu3 }
 0x2d9   : > { %v1913_v61 = vadd.f32 %v1875_v35, %v1719_v23  ;;  %v1525_v39 = vadd.f32 %v1489_v30, %v3507_v26 }
 0x2db   : > { %v2107_v45 = vadd.f32 %v2069_v13, %v1913_v61 }
 0x2dd   : > { %2139 = vst [vmem:[%s3518_s6 + $0xe8] sm:$0xff] %v2107_v45  ;;  %v2170_v42 = vadd.f32 %v2169_v38, %v2107_v45  ;;  %v2209_v56 = vmul.f32 %v2107_v45, %v2107_v45 }
 0x2de   : > { %v1684_v10 = vpop.f32.mrf.mxu2  ;;  %v2072_v9 = vpop.f32.mrf.mxu0 }
 0x2df   : > { %v2240_v44 = vadd.f32 %v2239_v0, %v2209_v56  ;;  %v1720_v36 = vadd.f32 %v1684_v10, %v1525_v39 }
 0x2e0   : > { %v1878_v40 = vpop.f32.mrf.mxu3  ;;  %v1492_v27 = vpop.f32.mrf.mxu1 }
 0x2e1   : > { %v1914_v50 = vadd.f32 %v1878_v40, %v1720_v36  ;;  %v1526_v29 = vadd.f32 %v1492_v27, %v3510_v49 }
 0x2e3   : > { %v2108_v1 = vadd.f32 %v2072_v9, %v1914_v50 }
 0x2e5   : > { %2140 = vst [vmem:[%s3518_s6 + $0xf0] sm:$0xff] %v2108_v1  ;;  %v2171_v33 = vadd.f32 %v2170_v42, %v2108_v1  ;;  %v2210_v18 = vmul.f32 %v2108_v1, %v2108_v1 }
 0x2e6   : > { %v1687_v37 = vpop.f32.mrf.mxu2  ;;  %v2075_v12 = vpop.f32.mrf.mxu0 }
 0x2e7   : > { %v2241_v26 = vadd.f32 %v2240_v44, %v2210_v18  ;;  %v1721_v48 = vadd.f32 %v1687_v37, %v1526_v29 }
 0x2e8   : > { %v1881_v46 = vpop.f32.mrf.mxu3 }
 0x2e9   : > { %v1915_v62 = vadd.f32 %v1881_v46, %v1721_v48 }
 0x2eb   : > { %v2109_v31 = vadd.f32 %v2075_v12, %v1915_v62 }
 0x2ed   : > { %2141 = vst [vmem:[%s3518_s6 + $0xf8] sm:$0xff] %v2109_v31  ;;  %v2172_v14 = vadd.f32 %v2171_v33, %v2109_v31  ;;  %v2211_v32 = vmul.f32 %v2109_v31, %v2109_v31 }
 0x2ef   : > { %v2173_v20 = vrot.slane %v2172_v14, 4  ;;  %v2242_v8 = vadd.f32 %v2241_v26, %v2211_v32 }
 0x2f1   : > { %v2174_v34 = vadd.f32 %v2173_v20, %v2172_v14  ;;  %v2243_v21 = vrot.slane %v2242_v8, 4 }
 0x2f3   : > { %v2175_v11 = vrot.slane %v2174_v34, 2  ;;  %v2244_v49 = vadd.f32 %v2243_v21, %v2242_v8 }
 0x2f5   : > { %v2176_v54 = vadd.f32 %v2175_v11, %v2174_v34  ;;  %v2245_v4 = vrot.slane %v2244_v49, 2 }
 0x2f7   : > { %v2177_v51 = vrot.slane %v2176_v54, 1  ;;  %v2246_v22 = vadd.f32 %v2245_v4, %v2244_v49 }
 0x2f9   : > { %v2178_v55 = vadd.f32 %v2177_v51, %v2176_v54  ;;  %v2247_v58 = vrot.slane %v2246_v22, 1 }
 0x2fb   : > { %2179 = vst [vmem:[%s208_s9] sm:$0x1] %v2178_v55  ;;  %v2248_v41 = vadd.f32 %v2247_v58, %v2246_v22 }
 0x2fd   : > { %2249 = vst [vmem:[%s208_s9 + $0x1] sm:$0x1] %v2248_v41 }
 0x2fe PF: > { %s15_s15 = sadd.s32 1, %s2546_s15  }
 0x2ff   : > { %p12_p4 = scmp.ge.s32.totalorder %s15_s15, 4  }
 0x301   :  { %14 = sbr.rel (!%p12_p4) target bundleno = 1 (0x1), region = 84 }

// kernel: _dense_block_forward_impl.7
= control target key start
LH: loop header
LB: loop body
LE: loop exit
PB: predicated region body
PF: predicated region fallthrough
CT: control target
= control target key end

     0   :  { %10 = vsyncpa [#allocation4], 0  ;;  %s3767_s0 = inlined_call_operand.vmem [shape: f32[2,16,16,128], index: 0, kind: input, shape index: {}]   ;;  %s3768_s1 = inlined_call_operand.vmem [shape: f32[2,128], index: 1, kind: input, shape index: {}]   ;;  %s3769_s2 = inlined_call_operand.vmem [shape: f32[9,128,128], index: 2, kind: input, shape index: {}]   ;;  %s3770_s3 = inlined_call_operand.vmem [shape: f32[2,256,128], index: 3, kind: output, shape index: {0}]   ;;  %s3771_s4 = inlined_call_operand.hbm [shape: f32[2,2,128], index: 4, kind: output, shape index: {1}]  }
   0x1   :  { %12 = vsyncpa [#allocation4 + $0x1], 0  ;;  %s2684_s15 = smov 0   ;;  %s2686_s16 = smov 0  }
   0x2   :  { %s2688_s17 = smov 0   ;;  %s2690_s18 = smov 0  }
   0x3 LB: > { %s2705_s19 = sadd.s32 4294967295, %s2656_s18   ;;  %s2358_s20 = sadd.s32 4294967294, %s2656_s18   ;;  %s2656_s18 = sphi %s2690_s18, %s3777_s18   ;;  %s2652_s17 = sphi %s2688_s17, %s3776_s17   ;;  %s2648_s16 = sphi %s2686_s16, %s3775_s16   ;;  %s2644_s15 = sphi %s2684_s15, %s3774_s15  }
   0x4   : > { %s2709_s21 = sadd.s32 1, %s2656_s18   ;;  %s119_s22 = sadd.s32 1, %s2652_s17 }
   0x5   : > { %s116_s23 = ssub.s32 %s2656_s18, %s2709_s21  ;;  %p129_p0 = scmp.ne.s32.totalorder %s2652_s17, %s2648_s16 }
   0x6   : > { %p117_p1 = scmp.eq.s32.totalorder %s116_s23, 0  ;;  %p130_p2 = scmp.eq.s32.totalorder %s2705_s19, 1 }
   0x7   : > { %p135_p3 = scmp.ne.s32.totalorder %s2648_s16, %s2644_s15  ;;  %p136_p4 = scmp.eq.s32.totalorder %s2358_s20, 1 }
   0x8   : > { %s2720_s24 = scalar_select %p117_p1, %s2652_s17, %s119_s22  }
   0x9   : > { %p2722_p5 = por %p130_p2, %p129_p0  ;;  %p2726_p6 = por %p136_p4, %p135_p3 }
   0xa   : > { %p2361_p7 = scmp.ge.s32.totalorder %s2656_s18, 1  ;;  %p168_p8 = scmp.lt.s32.totalorder %s2656_s18, 3 }
   0xc   : > { %p169_p9 = pnand %p2361_p7, %p168_p8 }
   0xd   : > { %p199_p10 = scmp.lt.s32.totalorder (!%p169_p9), %s2705_s19, 1  ;;  %s2496_s8 = sshll.u32 (!%p169_p9), %s2705_s19, 1 }
   0xe   : > { %172 = sbr.rel (%p169_p9) target bundleno = 776 (0x308), region = 32  ;;  %s2269_s12 = scalar_lea.hbm (!%p169_p9), %s3771_s4, %s2496_s8 }
   0xf   : > { %s2614_s29 = scalar_lea.hbm (!%p169_p9), %s3771_s4, 4 }
  0x13   : > { %v2382_v0 = vld [vmem:[%s3769_s2 + $0xf8] sm:$0xff]  ;;  %v2381_v1 = vld [vmem:[%s3769_s2 + $0xf0] sm:$0xff]  ;;  %v2658_v2 = vmov 0.0   ;;  %v2380_v3 = vld [vmem:[%s3769_s2 + $0xe8] sm:$0xff]  ;;  %s2744_s7 = scalar_select %p199_p10, %s2705_s19, 1 }
  0x14   : > { %2501 = vmatpush.msra.mxu1 %v2382_v0  ;;  %2502 = vmatpush.msra.mxu2 %v2382_v0  ;;  %353 = vst [vmem:[#allocation2 + $0x60] sm:$0xff] %v2658_v2  ;;  %v2379_v4 = vld [vmem:[%s3769_s2 + $0xe0] sm:$0xff]  ;;  %v2378_v5 = vld [vmem:[%s3769_s2 + $0xd8] sm:$0xff]  ;;  %v2377_v9 = vld [vmem:[%s3769_s2 + $0xd0] sm:$0xff] }
  0x15   : > { %2503 = vmatpush.msra.mxu3 %v2382_v0  ;;  %525 = vmatpush.msra.mxu0 %v2382_v0  ;;  %354 = vst [vmem:[#allocation2 + $0x68] sm:$0xff] %v2658_v2  ;;  %s2499_s10 = sshll.u32 %s2744_s7, 8  ;;  %v2768_v7 = vld [vmem:[%s3768_s1] ss:$0 sm:$0xff]  ;;  %v2773_v8 = vld [vmem:[%s3768_s1 + $0x1] ss:$0 sm:$0xff] }
  0x16   : > { %2504 = vmatpush.msra.mxu1 %v2381_v1  ;;  %2505 = vmatpush.msra.mxu2 %v2381_v1  ;;  %341 = vst [vmem:[#allocation2] sm:$0xff] %v2658_v2  ;;  %s2761_s20 = scalar_lea.vmem %s3767_s0, %s2499_s10  ;;  %v2376_v11 = vld [vmem:[%s3769_s2 + $0xc8] sm:$0xff]  ;;  %v2375_v13 = vld [vmem:[%s3769_s2 + $0xc0] sm:$0xff]  ;;  %v2374_v15 = vld [vmem:[%s3769_s2 + $0xb8] sm:$0xff]  ;;  %s3670_s6 = scalar_lea.vmem %s3770_s3, %s2499_s10 }
  0x17   : > { %2506 = vmatpush.msra.mxu3 %v2381_v1  ;;  %526 = vmatpush.msra.mxu0 %v2381_v1  ;;  %342 = vst [vmem:[#allocation2 + $0x8] sm:$0xff] %v2658_v2  ;;  %v215_v6 = vld [vmem:[%s2761_s20 + $0x30] sm:$0xff]  ;;  %v2372_v18 = vld [vmem:[%s3769_s2 + $0xa8] sm:$0xff]  ;;  %v2371_v20 = vld [vmem:[%s3769_s2 + $0xa0] sm:$0xff]  ;;  %s196_s7 = sand.u32 1, %s2648_s16  }
  0x18   : > { %2507 = vmatpush.msra.mxu1 %v2380_v3  ;;  %2508 = vmatpush.msra.mxu2 %v2380_v3  ;;  %344 = vst [vmem:[#allocation2 + $0x18] sm:$0xff] %v2658_v2  ;;  %v250_v10 = vmul.f32 %v2768_v7, %v215_v6  ;;  %v2373_v16 = vld [vmem:[%s3769_s2 + $0xb0] sm:$0xff]  ;;  %v2370_v22 = vld [vmem:[%s3769_s2 + $0x98] sm:$0xff]  ;;  %v2368_v28 = vld [vmem:[%s3769_s2 + $0x88] sm:$0xff]  ;;  %s2362_s10 = sshll.u32 %s196_s7, 1  ;;  %s2256_s19 = scalar_lea.sflag [#allocation4], %s196_s7 }
  0x19   : > { %2509 = vmatpush.msra.mxu3 %v2380_v3  ;;  %527 = vmatpush.msra.mxu0 %v2380_v3  ;;  %345 = vst [vmem:[#allocation2 + $0x20] sm:$0xff] %v2658_v2  ;;  %v223_v17 = vld [vmem:[%s2761_s20 + $0x70] sm:$0xff]  ;;  %v216_v26 = vld [vmem:[%s2761_s20 + $0x38] sm:$0xff]  ;;  %v2367_v31 = vld [vmem:[%s3769_s2 + $0x80] sm:$0xff]  ;;  %s198_s13 = scalar_lea.vmem [#allocation3], %s2362_s10 }
  0x1a   : > { %2510 = vmatpush.msra.mxu1 %v2379_v4  ;;  %2511 = vmatpush.msra.mxu2 %v2379_v4  ;;  %343 = vst [vmem:[#allocation2 + $0x10] sm:$0x3] %v2658_v2  ;;  %v283_v12 = vadd.f32 %v2773_v8, %v250_v10  ;;  %v231_v19 = vld [vmem:[%s2761_s20 + $0xb0] sm:$0xff]  ;;  %v258_v21 = vmul.f32 %v2768_v7, %v223_v17  ;;  %v224_v27 = vld [vmem:[%s2761_s20 + $0x78] sm:$0xff]  ;;  %v217_v44 = vld [vmem:[%s2761_s20 + $0x40] sm:$0xff]  ;;  %s2271_s14 = sshll.u32 %s198_s13, 4  ;;  %s2272_s14 = int_to_ptr.vmem [resolvable:$true] %s2271_s14 }
  0x1b   : > { %2512 = vmatpush.msra.mxu3 %v2379_v4  ;;  %528 = vmatpush.msra.mxu0 %v2379_v4  ;;  %346 = vst [vmem:[#allocation2 + $0x28] sm:$0x3] %v2658_v2  ;;  %v266_v23 = vmul.f32 %v2768_v7, %v231_v19  ;;  %v2369_v24 = vld [vmem:[%s3769_s2 + $0x90] sm:$0xff]  ;;  %v232_v30 = vld [vmem:[%s2761_s20 + $0xb8] sm:$0xff]  ;;  %v251_v33 = vmul.f32 %v2768_v7, %v216_v26  ;;  %v225_v45 = vld [vmem:[%s2761_s20 + $0x80] sm:$0xff] }
  0x1c   : > { %2513 = vmatpush.msra.mxu1 %v2378_v5  ;;  %2514 = vmatpush.msra.mxu2 %v2378_v5  ;;  %347 = vst [vmem:[#allocation2 + $0x30] sm:$0xff] %v2658_v2  ;;  %v2792_v14 = vmax.f32 %v283_v12, 0.0  ;;  %v2830_v25 = vadd.f32 %v2773_v8, %v258_v21  ;;  %v259_v34 = vmul.f32 %v2768_v7, %v224_v27  ;;  %v2398_v35 = vld [vmem:[%s3769_s2 + $0x178] sm:$0xff]  ;;  %v2397_v40 = vld [vmem:[%s3769_s2 + $0x170] sm:$0xff]  ;;  %v2396_v47 = vld [vmem:[%s3769_s2 + $0x168] sm:$0xff] }
  0x1d   : > { %2515 = vmatpush.msra.mxu3 %v2378_v5  ;;  %529 = vmatpush.msra.mxu0 %v2378_v5  ;;  %348 = vst [vmem:[#allocation2 + $0x38] sm:$0xff] %v2658_v2  ;;  %v2840_v29 = vadd.f32 %v2773_v8, %v266_v23  ;;  %v267_v37 = vmul.f32 %v2768_v7, %v232_v30  ;;  %v475_v38 = vld [vmem:[%s3769_s2 + $0x78] sm:$0xff]  ;;  %v474_v43 = vld [vmem:[%s3769_s2 + $0x70] sm:$0xff]  ;;  %v473_v50 = vld [vmem:[%s3769_s2 + $0x68] sm:$0xff] }
  0x1e   : > { %2516 = vmatpush.msra.mxu1 %v2377_v9  ;;  %2517 = vmatpush.msra.mxu2 %v2377_v9  ;;  %349 = vst [vmem:[#allocation2 + $0x40] sm:$0x3] %v2658_v2  ;;  %v323_v32 = vmax.f32 %v2830_v25, 0.0  ;;  %v2414_v39 = vld [vmem:[%s3769_s2 + $0x1f8] sm:$0xff]  ;;  %v284_v41 = vadd.f32 %v2773_v8, %v251_v33  ;;  %v2874_v42 = vadd.f32 %v2773_v8, %v259_v34  ;;  %v2413_v46 = vld [vmem:[%s3769_s2 + $0x1f0] sm:$0xff]  ;;  %v476_v49 = vld [vmem:[#allocation2 + $0x1] sm:$0xff] }
  0x1f   : > { %2518 = vmatpush.msra.mxu3 %v2377_v9  ;;  %530 = vmatpush.msra.mxu0 %v2377_v9  ;;  %350 = vst [vmem:[#allocation2 + $0x48] sm:$0xff] %v2658_v2  ;;  %v331_v36 = vmax.f32 %v2840_v29, 0.0  ;;  %v2892_v48 = vadd.f32 %v2773_v8, %v267_v37  ;;  %v233_v51 = vld [vmem:[%s2761_s20 + $0xc0] sm:$0xff]  ;;  %v2412_v54 = vld [vmem:[%s3769_s2 + $0x1e8] sm:$0xff]  ;;  %v2430_v55 = vld [vmem:[%s3769_s2 + $0x278] sm:$0xff]  ;;  %v252_v56 = vmul.f32 %v2768_v7, %v217_v44 }
  0x20   : > { %2519 = vmatpush.msra.mxu1 %v2376_v11  ;;  %2520 = vmatpush.msra.mxu2 %v2376_v11  ;;  %351 = vst [vmem:[#allocation2 + $0x50] sm:$0xff] %v2658_v2  ;;  %v2900_v52 = vmax.f32 %v284_v41, 0.0  ;;  %v324_v53 = vmax.f32 %v2874_v42, 0.0  ;;  %v260_v57 = vmul.f32 %v2768_v7, %v225_v45  ;;  %v2395_v59 = vld [vmem:[%s3769_s2 + $0x160] sm:$0xff]  ;;  %v268_v61 = vmul.f32 %v2768_v7, %v233_v51  ;;  %v2429_v62 = vld [vmem:[%s3769_s2 + $0x270] sm:$0xff]  ;;  %v2394_v4 = vld [vmem:[%s3769_s2 + $0x158] sm:$0xff] }
  0x21   : > { %2521 = vmatpush.msra.mxu3 %v2376_v11  ;;  %531 = vmatpush.msra.mxu0 %v2376_v11  ;;  %402 = vst [vmem:[#allocation2 + $0x61] sm:$0xff] %v2792_v14  ;;  %v332_v58 = vmax.f32 %v2892_v48, 0.0  ;;  %v2411_v60 = vld [vmem:[%s3769_s2 + $0x1e0] sm:$0xff]  ;;  %v285_v0 = vadd.f32 %v2773_v8, %v252_v56  ;;  %v218_v5 = vld [vmem:[%s2761_s20 + $0x48] sm:$0xff]  ;;  %v2410_v6 = vld [vmem:[%s3769_s2 + $0x1d8] sm:$0xff] }
  0x22   : > { %2522 = vmatpush.msra.mxu1 %v2375_v13  ;;  %2523 = vmatpush.msra.mxu2 %v2375_v13  ;;  %352 = vst [vmem:[#allocation2 + $0x58] sm:$0x3] %v2658_v2  ;;  %v209_v63 = vld [vmem:[%s2761_s20] sm:$0xff]  ;;  %v2932_v1 = vadd.f32 %v2773_v8, %v260_v57  ;;  %v2428_v9 = vld [vmem:[%s3769_s2 + $0x268] sm:$0xff]  ;;  %v2953_v11 = vadd.f32 %v2773_v8, %v268_v61  ;;  %v471_v12 = vld [vmem:[%s3769_s2 + $0x58] sm:$0xff] }
  0x23   : > { %2524 = vmatpush.msra.mxu3 %v2375_v13  ;;  %532 = vmatpush.msra.mxu0 %v2375_v13  ;;  %355 = vst [vmem:[#allocation2 + $0x70] sm:$0x3] %v2658_v2  ;;  %v472_v3 = vld [vmem:[%s3769_s2 + $0x60] sm:$0xff]  ;;  %v226_v10 = vld [vmem:[%s2761_s20 + $0x88] sm:$0xff]  ;;  %v2393_v13 = vld [vmem:[%s3769_s2 + $0x150] sm:$0xff]  ;;  %v2968_v19 = vmax.f32 %v285_v0, 0.0 }
  0x24   : > { %2525 = vmatpush.msra.mxu1 %v2374_v15  ;;  %2526 = vmatpush.msra.mxu2 %v2374_v15  ;;  %356 = vst [vmem:[#allocation2 + $0x78] sm:$0xff] %v2658_v2  ;;  %v2409_v17 = vld [vmem:[%s3769_s2 + $0x1d0] sm:$0xff]  ;;  %v2427_v21 = vld [vmem:[%s3769_s2 + $0x260] sm:$0xff]  ;;  %v261_v23 = vmul.f32 %v2768_v7, %v226_v10  ;;  %v333_v26 = vmax.f32 %v2953_v11, 0.0  ;;  %v2392_v27 = vld [vmem:[%s3769_s2 + $0x148] sm:$0xff] }
  0x25   : > { %2527 = vmatpush.msra.mxu3 %v2374_v15  ;;  %533 = vmatpush.msra.mxu0 %v2374_v15  ;;  %357 = vst [vmem:[#allocation2 + $0x80] sm:$0xff] %v2658_v2  ;;  %v244_v15 = vmul.f32 %v2768_v7, %v209_v63  ;;  %v2426_v33 = vld [vmem:[%s3769_s2 + $0x258] sm:$0xff]  ;;  %v210_v34 = vld [vmem:[%s2761_s20 + $0x8] sm:$0xff]  ;;  %v2407_v41 = vld [vmem:[%s3769_s2 + $0x1c0] sm:$0xff] }
  0x26   : > { %2528 = vmatpush.msra.mxu1 %v2373_v16  ;;  %2529 = vmatpush.msra.mxu2 %v2373_v16  ;;  %358 = vst [vmem:[#allocation2 + $0x88] sm:$0x3] %v2658_v2  ;;  %v294_v37 = vadd.f32 %v2773_v8, %v261_v23  ;;  %v227_v44 = vld [vmem:[%s2761_s20 + $0x90] sm:$0xff]  ;;  %v467_v61 = vld [vmem:[%s3769_s2 + $0x38] sm:$0xff]  ;;  %v2403_v23 = vld [vmem:[%s3769_s2 + $0x1a0] sm:$0xff] }
  0x27   : > { %2530 = vmatpush.msra.mxu3 %v2373_v16  ;;  %534 = vmatpush.msra.mxu0 %v2373_v16  ;;  %359 = vst [vmem:[#allocation2 + $0x90] sm:$0xff] %v2658_v2  ;;  %v477_v16 = vld [vmem:[#allocation2 + $0x9] sm:$0xff]  ;;  %v228_v25 = vld [vmem:[%s2761_s20 + $0x98] sm:$0xff]  ;;  %v464_v48 = vld [vmem:[%s3769_s2 + $0x20] sm:$0xff] }
  0x28   : > { %2531 = vmatpush.msra.mxu1 %v2372_v18  ;;  %2532 = vmatpush.msra.mxu2 %v2372_v18  ;;  %360 = vst [vmem:[#allocation2 + $0x98] sm:$0xff] %v2658_v2  ;;  %v235_v51 = vld [vmem:[%s2761_s20 + $0xd0] sm:$0xff]  ;;  %v3039_v56 = vmax.f32 %v294_v37, 0.0 }
  0x29   : > { %2533 = vmatpush.msra.mxu3 %v2372_v18  ;;  %535 = vmatpush.msra.mxu0 %v2372_v18  ;;  %361 = vst [vmem:[#allocation2 + $0xa0] sm:$0x3] %v2658_v2  ;;  %v234_v18 = vld [vmem:[%s2761_s20 + $0xc8] sm:$0xff]  ;;  %v270_v0 = vmul.f32 %v2768_v7, %v235_v51  ;;  %v2421_v42 = vld [vmem:[%s3769_s2 + $0x230] sm:$0xff] }
  0x2a   : > { %2534 = vmatpush.msra.mxu1 %v2371_v20  ;;  %2535 = vmatpush.msra.mxu2 %v2371_v20  ;;  %362 = vst [vmem:[#allocation2 + $0xa8] sm:$0xff] %v2658_v2  ;;  %v269_v30 = vmul.f32 %v2768_v7, %v234_v18  ;;  %v236_v18 = vld [vmem:[%s2761_s20 + $0xd8] sm:$0xff]  ;;  %v462_v51 = vld [vmem:[%s3769_s2 + $0x10] sm:$0xff] }
  0x2b   : > { %2536 = vmatpush.msra.mxu3 %v2371_v20  ;;  %363 = vst [vmem:[#allocation2 + $0xb0] sm:$0xff] %v2658_v2  ;;  %536 = vmatpush.msra.mxu0 %v2371_v20  ;;  %v325_v20 = vmax.f32 %v2932_v1, 0.0  ;;  %v3094_v29 = vadd.f32 %v2773_v8, %v270_v0  ;;  %v221_v1 = vld [vmem:[%s2761_s20 + $0x60] sm:$0xff]  ;;  %v461_v0 = vld [vmem:[%s3769_s2 + $0x8] sm:$0xff] }
  0x2c   : > { %2537 = vmatpush.msra.mxu1 %v2370_v22  ;;  %2538 = vmatpush.msra.mxu2 %v2370_v22  ;;  %364 = vst [vmem:[#allocation2 + $0xb8] sm:$0x3] %v2658_v2 }
  0x2d   : > { %2539 = vmatpush.msra.mxu3 %v2370_v22  ;;  %365 = vst [vmem:[#allocation2 + $0xc0] sm:$0xff] %v2658_v2  ;;  %537 = vmatpush.msra.mxu0 %v2370_v22  ;;  %v253_v22 = vmul.f32 %v2768_v7, %v218_v5  ;;  %v2423_v5 = vld [vmem:[%s3769_s2 + $0x240] sm:$0xff] }
  0x2e   : > { %2540 = vmatpush.msra.mxu1 %v2369_v24  ;;  %2541 = vmatpush.msra.mxu2 %v2369_v24  ;;  %366 = vst [vmem:[#allocation2 + $0xc8] sm:$0xff] %v2658_v2 }
  0x2f   : > { %2542 = vmatpush.msra.mxu3 %v2369_v24  ;;  %367 = vst [vmem:[#allocation2 + $0xd0] sm:$0x3] %v2658_v2  ;;  %538 = vmatpush.msra.mxu0 %v2369_v24  ;;  %v470_v24 = vld [vmem:[%s3769_s2 + $0x50] sm:$0xff] }
  0x30   : > { %2543 = vmatpush.msra.mxu1 %v2368_v28  ;;  %2544 = vmatpush.msra.mxu2 %v2368_v28  ;;  %368 = vst [vmem:[#allocation2 + $0xd8] sm:$0xff] %v2658_v2 }
  0x31   : > { %2545 = vmatpush.msra.mxu3 %v2368_v28  ;;  %369 = vst [vmem:[#allocation2 + $0xe0] sm:$0xff] %v2658_v2  ;;  %539 = vmatpush.msra.mxu0 %v2368_v28  ;;  %v277_v28 = vadd.f32 %v2773_v8, %v244_v15  ;;  %v2388_v15 = vld [vmem:[%s3769_s2 + $0x128] sm:$0xff] }
  0x32   : > { %2546 = vmatpush.msra.mxu1 %v2367_v31  ;;  %2547 = vmatpush.msra.mxu2 %v2367_v31  ;;  %370 = vst [vmem:[#allocation2 + $0xe8] sm:$0x3] %v2658_v2 }
  0x33   : > { %565 = vmatmul.f32.vlgmr.msra.gmra.mxu1 %v2792_v14  ;;  %371 = vst [vmem:[#allocation2 + $0xf0] sm:$0xff] %v2658_v2  ;;  %589 = vmatmul.f32.vlgmr.msra.gmra.mxu2 %v323_v32  ;;  %v3019_v45 = vmax.f32 %v277_v28, 0.0 }
  0x34   : > { %372 = vst [vmem:[#allocation2 + $0xf8] sm:$0xff] %v2658_v2  ;;  %800 = vmatpush.msrb.mxu2 %v2398_v35  ;;  %2548 = vmatpush.msra.mxu3 %v2367_v31  ;;  %v286_v35 = vadd.f32 %v2773_v8, %v253_v22  ;;  %v2387_v22 = vld [vmem:[%s3769_s2 + $0x120] sm:$0xff] }
  0x35   : > { %373 = vst [vmem:[#allocation2 + $0x100] sm:$0x3] %v2658_v2  ;;  %613 = vmatmul.f32.vlgmr.msra.gmra.mxu3 %v331_v36  ;;  %638 = vmatpush.msrb.mxu1 %v475_v38  ;;  %v469_v38 = vld [vmem:[%s3769_s2 + $0x48] sm:$0xff] }
  0x36   : > { %374 = vst [vmem:[#allocation2 + $0x108] sm:$0xff] %v2658_v2  ;;  %994 = vmatpush.msrb.mxu3 %v2414_v39  ;;  %801 = vmatpush.msrb.mxu2 %v2397_v40  ;;  %v2391_v39 = vld [vmem:[%s3769_s2 + $0x140] sm:$0xff]  ;;  %v219_v40 = vld [vmem:[%s2761_s20 + $0x50] sm:$0xff] }
  0x37   : > { %375 = vst [vmem:[#allocation2 + $0x110] sm:$0xff] %v2658_v2  ;;  %639 = vmatpush.msrb.mxu1 %v474_v43  ;;  %540 = vmatpush.msra.mxu0 %v2367_v31  ;;  %v2408_v31 = vld [vmem:[%s3769_s2 + $0x1c8] sm:$0xff]  ;;  %v2425_v43 = vld [vmem:[%s3769_s2 + $0x250] sm:$0xff]  ;;  %v254_v57 = vmul.f32 %v2768_v7, %v219_v40 }
  0x38   : > { %376 = vst [vmem:[#allocation2 + $0x118] sm:$0x3] %v2658_v2  ;;  %995 = vmatpush.msrb.mxu3 %v2413_v46  ;;  %802 = vmatpush.msrb.mxu2 %v2396_v47  ;;  %v3022_v46 = vadd.f32 %v2773_v8, %v269_v30  ;;  %v468_v47 = vld [vmem:[%s3769_s2 + $0x40] sm:$0xff]  ;;  %v263_v30 = vmul.f32 %v2768_v7, %v228_v25 }
  0x39   : > { %377 = vst [vmem:[#allocation2 + $0x120] sm:$0xff] %v2658_v2  ;;  %541 = vmatmul.f32.vlgmr.msra.gmra.mxu0 %v476_v49  ;;  %640 = vmatpush.msrb.mxu1 %v473_v50  ;;  %v2390_v49 = vld [vmem:[%s3769_s2 + $0x138] sm:$0xff]  ;;  %v245_v50 = vmul.f32 %v2768_v7, %v210_v34 }
  0x3a   : > { %378 = vst [vmem:[#allocation2 + $0x128] sm:$0xff] %v2658_v2  ;;  %996 = vmatpush.msrb.mxu3 %v2412_v54  ;;  %1188 = vmatpush.msrb.mxu0 %v2430_v55  ;;  %v2406_v54 = vld [vmem:[%s3769_s2 + $0x1b8] sm:$0xff]  ;;  %v3037_v55 = vmax.f32 %v286_v35, 0.0  ;;  %v2420_v35 = vld [vmem:[%s3769_s2 + $0x228] sm:$0xff]  ;;  %v296_v11 = vadd.f32 %v2773_v8, %v263_v30 }
  0x3b   : > { %379 = vst [vmem:[#allocation2 + $0x130] sm:$0x3] %v2658_v2  ;;  %568 = vmatmul.f32.gmra.mxu1 %v2900_v52  ;;  %592 = vmatmul.f32.gmra.mxu2 %v324_v53  ;;  %v278_v63 = vadd.f32 %v2773_v8, %v245_v50  ;;  %v2402_v34 = vld [vmem:[%s3769_s2 + $0x198] sm:$0xff]  ;;  %v237_v50 = vld [vmem:[%s2761_s20 + $0xe0] sm:$0xff] }
  0x3c   : > { %380 = vst [vmem:[#allocation2 + $0x138] sm:$0xff] %v2658_v2  ;;  %803 = vmatpush.msrb.mxu2 %v2395_v59  ;;  %997 = vmatpush.msrb.mxu3 %v2411_v60  ;;  %v262_v59 = vmul.f32 %v2768_v7, %v227_v44  ;;  %v2424_v60 = vld [vmem:[%s3769_s2 + $0x248] sm:$0xff]  ;;  %v2478_v30 = vld [vmem:[%s3769_s2 + $0x3f8] sm:$0xff] }
  0x3d   : > { %381 = vst [vmem:[#allocation2 + $0x140] sm:$0xff] %v2658_v2  ;;  %616 = vmatmul.f32.gmra.mxu3 %v332_v58  ;;  %1189 = vmatpush.msrb.mxu0 %v2429_v62  ;;  %v334_v62 = vmax.f32 %v3022_v46, 0.0  ;;  %v230_v46 = vld [vmem:[%s2761_s20 + $0xa8] sm:$0xff] }
  0x3e   : > { %382 = vst [vmem:[#allocation2 + $0x148] sm:$0x3] %v2658_v2  ;;  %641 = vmatpush.msrb.mxu1 %v472_v3  ;;  %804 = vmatpush.msrb.mxu2 %v2394_v4  ;;  %v2389_v3 = vld [vmem:[%s3769_s2 + $0x130] sm:$0xff]  ;;  %v295_v10 = vadd.f32 %v2773_v8, %v262_v59  ;;  %v222_v59 = vld [vmem:[%s2761_s20 + $0x68] sm:$0xff] }
  0x3f   : > { %383 = vst [vmem:[#allocation2 + $0x150] sm:$0xff] %v2658_v2  ;;  %998 = vmatpush.msrb.mxu3 %v2410_v6  ;;  %1190 = vmatpush.msrb.mxu0 %v2428_v9  ;;  %v2405_v4 = vld [vmem:[%s3769_s2 + $0x1b0] sm:$0xff]  ;;  %v287_v9 = vadd.f32 %v2773_v8, %v254_v57 }
  0x40   : > { %384 = vst [vmem:[#allocation2 + $0x158] sm:$0xff] %v2658_v2  ;;  %642 = vmatpush.msrb.mxu1 %v471_v12  ;;  %805 = vmatpush.msrb.mxu2 %v2393_v13  ;;  %v211_v6 = vld [vmem:[%s2761_s20 + $0x10] sm:$0xff]  ;;  %v220_v12 = vld [vmem:[%s2761_s20 + $0x58] sm:$0xff] }
  0x41   : > { %385 = vst [vmem:[#allocation2 + $0x160] sm:$0x3] %v2658_v2  ;;  %544 = vmatmul.f32.gmra.mxu0 %v477_v16  ;;  %999 = vmatpush.msrb.mxu3 %v2409_v17  ;;  %v466_v13 = vld [vmem:[%s3769_s2 + $0x30] sm:$0xff]  ;;  %v2422_v16 = vld [vmem:[%s3769_s2 + $0x238] sm:$0xff]  ;;  %v3091_v17 = vmax.f32 %v278_v63, 0.0  ;;  %v255_v28 = vmul.f32 %v2768_v7, %v220_v12  ;;  %v3187_v63 = vmax.f32 %v296_v11, 0.0 }
  0x42   : > { %386 = vst [vmem:[#allocation2 + $0x168] sm:$0xff] %v2658_v2  ;;  %1191 = vmatpush.msrb.mxu0 %v2427_v21  ;;  %643 = vmatpush.msrb.mxu1 %v470_v24  ;;  %v465_v21 = vld [vmem:[%s3769_s2 + $0x28] sm:$0xff]  ;;  %v3111_v24 = vmax.f32 %v287_v9, 0.0 }
  0x43   : > { %387 = vst [vmem:[#allocation2 + $0x170] sm:$0xff] %v2658_v2  ;;  %571 = vmatmul.f32.gmra.mxu1 %v2968_v19  ;;  %595 = vmatmul.f32.gmra.mxu2 %v325_v20  ;;  %v288_v37 = vadd.f32 %v2773_v8, %v255_v28  ;;  %v238_v12 = vld [vmem:[%s2761_s20 + $0xe8] sm:$0xff] }
  0x44   : > { %388 = vst [vmem:[#allocation2 + $0x178] sm:$0x3] %v2658_v2  ;;  %806 = vmatpush.msrb.mxu2 %v2392_v27  ;;  %1000 = vmatpush.msrb.mxu3 %v2408_v31  ;;  %v3113_v27 = vmax.f32 %v295_v10, 0.0  ;;  %v257_v10 = vmul.f32 %v2768_v7, %v222_v59  ;;  %v2416_v28 = vld [vmem:[%s3769_s2 + $0x208] sm:$0xff] }
  0x45   : > { %389 = vst [vmem:[#allocation2 + $0x180] sm:$0xff] %v2658_v2  ;;  %619 = vmatmul.f32.gmra.mxu3 %v333_v26  ;;  %1192 = vmatpush.msrb.mxu0 %v2426_v33  ;;  %v2386_v33 = vld [vmem:[%s3769_s2 + $0x118] sm:$0xff]  ;;  %v2444_v59 = vld [vmem:[%s3769_s2 + $0x2e8] sm:$0xff] }
  0x46   : > { %390 = vst [vmem:[#allocation2 + $0x188] sm:$0xff] %v2658_v2  ;;  %644 = vmatpush.msrb.mxu1 %v469_v38  ;;  %807 = vmatpush.msrb.mxu2 %v2391_v39  ;;  %v463_v38 = vld [vmem:[%s3769_s2 + $0x18] sm:$0xff]  ;;  %v2385_v39 = vld [vmem:[%s3769_s2 + $0x110] sm:$0xff] }
  0x47   : > { %391 = vst [vmem:[#allocation2 + $0x190] sm:$0x3] %v2658_v2  ;;  %1001 = vmatpush.msrb.mxu3 %v2407_v41  ;;  %1193 = vmatpush.msrb.mxu0 %v2425_v43  ;;  %v2401_v41 = vld [vmem:[%s3769_s2 + $0x190] sm:$0xff]  ;;  %v2419_v43 = vld [vmem:[%s3769_s2 + $0x220] sm:$0xff] }
  0x48   : > { %392 = vst [vmem:[#allocation2 + $0x198] sm:$0xff] %v2658_v2  ;;  %645 = vmatpush.msrb.mxu1 %v468_v47  ;;  %808 = vmatpush.msrb.mxu2 %v2390_v49  ;;  %v256_v47 = vmul.f32 %v2768_v7, %v221_v1 }
  0x49   : > { %393 = vst [vmem:[#allocation2 + $0x1a0] sm:$0xff] %v2658_v2  ;;  %547 = vmatmul.f32.gmra.mxu0 %v3019_v45  ;;  %1002 = vmatpush.msrb.mxu3 %v2406_v54  ;;  %v2384_v54 = vld [vmem:[%s3769_s2 + $0x108] sm:$0xff] }
  0x4a   : > { %394 = vst [vmem:[#allocation2 + $0x1a8] sm:$0x3] %v2658_v2  ;;  %1194 = vmatpush.msrb.mxu0 %v2424_v60  ;;  %646 = vmatpush.msrb.mxu1 %v467_v61  ;;  %v2400_v60 = vld [vmem:[%s3769_s2 + $0x188] sm:$0xff]  ;;  %v3185_v61 = vmax.f32 %v288_v37, 0.0 }
  0x4b   : > { %410 = vst [vmem:[#allocation2 + $0xc1] sm:$0xff] %v323_v32  ;;  %574 = vmatmul.f32.gmra.mxu1 %v3037_v55  ;;  %598 = vmatmul.f32.gmra.mxu2 %v3039_v56  ;;  %v2404_v32 = vld [vmem:[%s3769_s2 + $0x1a8] sm:$0xff] }
  0x4c   : > { %418 = vst [vmem:[#allocation2 + $0x121] sm:$0xff] %v331_v36  ;;  %809 = vmatpush.msrb.mxu2 %v2389_v3  ;;  %1003 = vmatpush.msrb.mxu3 %v2405_v4  ;;  %v246_v36 = vmul.f32 %v2768_v7, %v211_v6  ;;  %v272_v4 = vmul.f32 %v2768_v7, %v237_v50  ;;  %v751_v50 = vld [vmem:[#allocation2 + $0x2] sm:$0xff] }
  0x4d   : > { %403 = vst [vmem:[#allocation2 + $0x69] sm:$0xff] %v2900_v52  ;;  %622 = vmatmul.f32.gmra.mxu3 %v334_v62  ;;  %1195 = vmatpush.msrb.mxu0 %v2423_v5  ;;  %v213_v5 = vld [vmem:[%s2761_s20 + $0x20] sm:$0xff]  ;;  %v289_v6 = vadd.f32 %v2773_v8, %v256_v47  ;;  %v2445_v47 = vld [vmem:[%s3769_s2 + $0x2f0] sm:$0xff] }
  0x4e   : > { %411 = vst [vmem:[#allocation2 + $0xc9] sm:$0xff] %v324_v53  ;;  %647 = vmatpush.msrb.mxu1 %v466_v13  ;;  %810 = vmatpush.msrb.mxu2 %v2388_v15  ;;  %v271_v53 = vmul.f32 %v2768_v7, %v236_v18  ;;  %v279_v31 = vadd.f32 %v2773_v8, %v246_v36  ;;  %v2383_v13 = vld [vmem:[%s3769_s2 + $0x100] sm:$0xff] }
  0x4f   : > { %419 = vst [vmem:[#allocation2 + $0x129] sm:$0xff] %v332_v58  ;;  %1004 = vmatpush.msrb.mxu3 %v2404_v32  ;;  %1196 = vmatpush.msrb.mxu0 %v2422_v16  ;;  %v335_v58 = vmax.f32 %v3094_v29, 0.0  ;;  %v2399_v15 = vld [vmem:[%s3769_s2 + $0x180] sm:$0xff]  ;;  %v265_v32 = vmul.f32 %v2768_v7, %v230_v46  ;;  %v2417_v16 = vld [vmem:[%s3769_s2 + $0x210] sm:$0xff]  ;;  %v214_v29 = vld [vmem:[%s2761_s20 + $0x28] sm:$0xff]  ;;  %v248_v36 = vmul.f32 %v2768_v7, %v213_v5 }
  0x50   : > { %404 = vst [vmem:[#allocation2 + $0x79] sm:$0xff] %v2968_v19  ;;  %648 = vmatpush.msrb.mxu1 %v465_v21  ;;  %811 = vmatpush.msrb.mxu2 %v2387_v22  ;;  %v3157_v40 = vadd.f32 %v2773_v8, %v271_v53  ;;  %v3166_v44 = vmax.f32 %v279_v31, 0.0  ;;  %v460_v18 = vld [vmem:[%s3769_s2] sm:$0xff]  ;;  %v2462_v21 = vld [vmem:[%s3769_s2 + $0x378] sm:$0xff]  ;;  %v305_v22 = vadd.f32 %v2773_v8, %v272_v4 }
  0x51   : > { %412 = vst [vmem:[#allocation2 + $0xd9] sm:$0xff] %v325_v20  ;;  %550 = vmatmul.f32.gmra.mxu0 %v3091_v17  ;;  %1005 = vmatpush.msrb.mxu3 %v2403_v23  ;;  %v212_v20 = vld [vmem:[%s2761_s20 + $0x18] sm:$0xff]  ;;  %v273_v23 = vmul.f32 %v2768_v7, %v238_v12  ;;  %v290_v53 = vadd.f32 %v2773_v8, %v257_v10  ;;  %v2443_v4 = vld [vmem:[%s3769_s2 + $0x2e0] sm:$0xff] }
  0x52   : > { %420 = vst [vmem:[#allocation2 + $0x139] sm:$0xff] %v333_v26  ;;  %1197 = vmatpush.msrb.mxu0 %v2421_v42  ;;  %649 = vmatpush.msrb.mxu1 %v464_v48  ;;  %v229_v26 = vld [vmem:[%s2761_s20 + $0xa0] sm:$0xff]  ;;  %v247_v49 = vmul.f32 %v2768_v7, %v212_v20  ;;  %v336_v3 = vmax.f32 %v3157_v40, 0.0  ;;  %v3238_v42 = vmax.f32 %v289_v6, 0.0  ;;  %v2446_v31 = vld [vmem:[%s3769_s2 + $0x2f8] sm:$0xff]  ;;  %v281_v1 = vadd.f32 %v2773_v8, %v248_v36  ;;  %v2457_v36 = vld [vmem:[%s3769_s2 + $0x350] sm:$0xff] }
  0x53   : > { %405 = vst [vmem:[#allocation2 + $0x81] sm:$0xff] %v3037_v55  ;;  %577 = vmatmul.f32.gmra.mxu1 %v3111_v24  ;;  %601 = vmatmul.f32.gmra.mxu2 %v3113_v27  ;;  %v264_v57 = vmul.f32 %v2768_v7, %v229_v26  ;;  %v337_v20 = vmax.f32 %v305_v22, 0.0  ;;  %v3259_v37 = vmax.f32 %v290_v53, 0.0  ;;  %v2494_v26 = vld [vmem:[%s3769_s2 + $0x478] sm:$0xff]  ;;  %v2491_v6 = vld [vmem:[%s3769_s2 + $0x460] sm:$0xff] }
  0x54   : > { %413 = vst [vmem:[#allocation2 + $0xe1] sm:$0xff] %v3039_v56  ;;  %812 = vmatpush.msrb.mxu2 %v2386_v33  ;;  %1006 = vmatpush.msrb.mxu3 %v2402_v34  ;;  %v280_v9 = vadd.f32 %v2773_v8, %v247_v49  ;;  %v298_v34 = vadd.f32 %v2773_v8, %v265_v32  ;;  %v2493_v49 = vld [vmem:[%s3769_s2 + $0x470] sm:$0xff]  ;;  %v2458_v12 = vld [vmem:[%s3769_s2 + $0x358] sm:$0xff] }
  0x55   : > { %396 = vst [vmem:[#allocation2 + $0x19] sm:$0xff] %v3019_v45  ;;  %625 = vmatmul.f32.gmra.mxu3 %v335_v58  ;;  %1198 = vmatpush.msrb.mxu0 %v2420_v35  ;;  %v297_v25 = vadd.f32 %v2773_v8, %v264_v57  ;;  %v306_v35 = vadd.f32 %v2773_v8, %v273_v23  ;;  %v2476_v57 = vld [vmem:[%s3769_s2 + $0x3e8] sm:$0xff]  ;;  %v2490_v32 = vld [vmem:[%s3769_s2 + $0x458] sm:$0xff] }
  0x56   : > { %421 = vst [vmem:[#allocation2 + $0x141] sm:$0xff] %v334_v62  ;;  %650 = vmatpush.msrb.mxu1 %v463_v38  ;;  %813 = vmatpush.msrb.mxu2 %v2385_v39  ;;  %v2418_v62 = vld [vmem:[%s3769_s2 + $0x218] sm:$0xff]  ;;  %v3240_v48 = vmax.f32 %v280_v9, 0.0  ;;  %v3265_v38 = vmax.f32 %v298_v34, 0.0  ;;  %v3270_v39 = vmax.f32 %v281_v1, 0.0  ;;  %v952_v23 = vld [vmem:[#allocation2 + $0x68] sm:$0xff] }
  0x57   : > { %406 = vst [vmem:[#allocation2 + $0x91] sm:$0xff] %v3111_v24  ;;  %1007 = vmatpush.msrb.mxu3 %v2401_v41  ;;  %1199 = vmatpush.msrb.mxu0 %v2419_v43  ;;  %v3247_v33 = vmax.f32 %v297_v25, 0.0  ;;  %v338_v40 = vmax.f32 %v306_v35, 0.0  ;;  %v2477_v43 = vld [vmem:[%s3769_s2 + $0x3f0] sm:$0xff]  ;;  %v953_v53 = vld [vmem:[#allocation2 + $0x78] sm:$0xff] }
  0x58   : > { %414 = vst [vmem:[#allocation2 + $0xf1] sm:$0xff] %v3113_v27  ;;  %651 = vmatpush.msrb.mxu1 %v462_v51  ;;  %814 = vmatpush.msrb.mxu2 %v2384_v54  ;;  %v2460_v54 = vld [vmem:[%s3769_s2 + $0x368] sm:$0xff] }
  0x59   : > { %397 = vst [vmem:[#allocation2 + $0x21] sm:$0xff] %v3091_v17  ;;  %553 = vmatmul.f32.gmra.mxu0 %v3166_v44  ;;  %1008 = vmatpush.msrb.mxu3 %v2400_v60  ;;  %v752_v60 = vld [vmem:[#allocation2 + $0xa] sm:$0xff] }
  0x5a   : > { %422 = vst [vmem:[#allocation2 + $0x151] sm:$0xff] %v335_v58  ;;  %1200 = vmatpush.msrb.mxu0 %v2418_v62  ;;  %652 = vmatpush.msrb.mxu1 %v461_v0  ;;  %v249_v58 = vmul.f32 %v2768_v7, %v214_v29  ;;  %v2415_v7 = vld [vmem:[%s3769_s2 + $0x200] sm:$0xff]  ;;  %v2492_v62 = vld [vmem:[%s3769_s2 + $0x468] sm:$0xff] }
  0x5b   : > { %407 = vst [vmem:[#allocation2 + $0x99] sm:$0xff] %v3185_v61  ;;  %580 = vmatmul.f32.gmra.mxu1 %v3185_v61  ;;  %604 = vmatmul.f32.gmra.mxu2 %v3187_v63  ;;  %v951_v29 = vld [vmem:[#allocation2 + $0x60] sm:$0xff] }
  0x5c   : > { %415 = vst [vmem:[#allocation2 + $0xf9] sm:$0xff] %v3187_v63  ;;  %815 = vmatpush.msrb.mxu2 %v2383_v13  ;;  %1009 = vmatpush.msrb.mxu3 %v2399_v15  ;;  %v282_v11 = vadd.f32 %v2773_v8, %v249_v58  ;;  %v2461_v8 = vld [vmem:[%s3769_s2 + $0x370] sm:$0xff]  ;;  %v945_v51 = vld [vmem:[#allocation2 + $0x18] sm:$0xff]  ;;  %v2472_v58 = vld [vmem:[%s3769_s2 + $0x3c8] sm:$0xff] }
  0x5d   : > { %398 = vst [vmem:[#allocation2 + $0x31] sm:$0xff] %v3166_v44  ;;  %628 = vmatmul.f32.gmra.mxu3 %v336_v3  ;;  %1201 = vmatpush.msrb.mxu0 %v2417_v16  ;;  %v2442_v13 = vld [vmem:[%s3769_s2 + $0x2d8] sm:$0xff]  ;;  %v954_v35 = vld [vmem:[#allocation2 + $0x80] sm:$0xff] }
  0x5e   : > { %423 = vst [vmem:[#allocation2 + $0x159] sm:$0xff] %v336_v3  ;;  %653 = vmatpush.msrb.mxu1 %v460_v18  ;;  %1577 = vmatpush.msra.mxu2 %v2462_v21  ;;  %v3277_v41 = vmax.f32 %v282_v11, 0.0  ;;  %v2473_v18 = vld [vmem:[%s3769_s2 + $0x3d0] sm:$0xff]  ;;  %v2488_v11 = vld [vmem:[%s3769_s2 + $0x448] sm:$0xff] }
  0x5f   : > { %408 = vst [vmem:[#allocation2 + $0xa9] sm:$0xff] %v3238_v42  ;;  %1202 = vmatpush.msrb.mxu0 %v2416_v28  ;;  %1771 = vmatpush.msra.mxu3 %v2478_v30  ;;  %v2441_v21 = vld [vmem:[%s3769_s2 + $0x2d0] sm:$0xff] }
  0x60   : > { %416 = vst [vmem:[#allocation2 + $0x109] sm:$0xff] %v3247_v33  ;;  %1382 = vmatpush.msra.mxu1 %v2446_v31  ;;  %1578 = vmatpush.msra.mxu2 %v2461_v8  ;;  %v946_v46 = vld [vmem:[#allocation2 + $0x20] sm:$0xff]  ;;  %v2489_v28 = vld [vmem:[%s3769_s2 + $0x450] sm:$0xff] }
  0x61   : > { %399 = vst [vmem:[#allocation2 + $0x39] sm:$0xff] %v3240_v48  ;;  %556 = vmatmul.f32.gmra.mxu0 %v3240_v48  ;;  %1772 = vmatpush.msra.mxu3 %v2477_v43  ;;  %v753_v0 = vld [vmem:[#allocation2 + $0x1a] sm:$0xff] }
  0x62   : > { %424 = vst [vmem:[#allocation2 + $0x169] sm:$0xff] %v337_v20  ;;  %1203 = vmatpush.msrb.mxu0 %v2415_v7  ;;  %1383 = vmatpush.msra.mxu1 %v2445_v47  ;;  %v2455_v43 = vld [vmem:[%s3769_s2 + $0x340] sm:$0xff] }
  0x63   : > { %583 = vmatmul.f32.gmra.mxu1 %v3238_v42  ;;  %607 = vmatmul.f32.gmra.mxu2 %v3247_v33  ;;  %409 = vst [vmem:[#allocation2 + $0xb1] sm:$0xff] %v3259_v37  ;;  %v2471_v47 = vld [vmem:[%s3769_s2 + $0x3c0] sm:$0xff] }
  0x64   : > { %417 = vst [vmem:[#allocation2 + $0x111] sm:$0xff] %v3265_v38  ;;  %1965 = vmatpush.msra.mxu0 %v2494_v26  ;;  %1579 = vmatpush.msra.mxu2 %v2460_v54  ;;  %v947_v3 = vld [vmem:[#allocation2 + $0x30] sm:$0xff] }
  0x65   : > { %631 = vmatmul.f32.gmra.mxu3 %v337_v20  ;;  %400 = vst [vmem:[#allocation2 + $0x49] sm:$0xff] %v3270_v39  ;;  %1384 = vmatpush.msra.mxu1 %v2444_v59  ;;  %v760_v20 = vld [vmem:[#allocation2 + $0x6a] sm:$0xff]  ;;  %v956_v59 = vld [vmem:[#allocation2 + $0x98] sm:$0xff] }
  0x66   : > { %425 = vst [vmem:[#allocation2 + $0x171] sm:$0xff] %v338_v40  ;;  %1966 = vmatpush.msra.mxu0 %v2493_v49  ;;  %1773 = vmatpush.msra.mxu3 %v2476_v57  ;;  %v762_v57 = vld [vmem:[#allocation2 + $0x82] sm:$0xff] }
  0x67   : > { %401 = vst [vmem:[#allocation2 + $0x51] sm:$0xff] %v3277_v41  ;;  %1385 = vmatpush.msra.mxu1 %v2443_v4  ;;  %v2470_v4 = vld [vmem:[%s3769_s2 + $0x3b8] sm:$0xff] }
  0x68   : > { %1967 = vmatpush.msra.mxu0 %v2492_v62  ;;  %v948_v5 = vld [vmem:[#allocation2 + $0x38] sm:$0xff] }
  0x69   : > { %559 = vmatmul.f32.gmra.mxu0 %v3270_v39  ;;  %v755_v9 = vld [vmem:[#allocation2 + $0x32] sm:$0xff]  ;;  %1386 = vmatpush.msra.mxu1 %v2442_v13  ;;  %v756_v15 = vld [vmem:[#allocation2 + $0x3a] sm:$0xff] }
  0x6a   : > { %1968 = vmatpush.msra.mxu0 %v2491_v6 }
  0x6b   : > { %586 = vmatmul.f32.gmra.mxu1 %v3259_v37  ;;  %610 = vmatmul.f32.gmra.mxu2 %v3265_v38 }
  0x6c   : > { %v949_v10 = vld [vmem:[#allocation2 + $0x48] sm:$0xff]  ;;  %1969 = vmatpush.msra.mxu0 %v2490_v32  ;;  %1387 = vmatpush.msra.mxu1 %v2441_v21 }
  0x6d   : > { %634 = vmatmul.f32.gmra.mxu3 %v338_v40 }
  0x6e   : > { %v950_v25 = vld [vmem:[#allocation2 + $0x50] sm:$0xff]  ;;  %1970 = vmatpush.msra.mxu0 %v2489_v28 }
  0x6f   : > { %v757_v16 = vld [vmem:[#allocation2 + $0x4a] sm:$0xff]  ;;  %v758_v22 = vld [vmem:[#allocation2 + $0x52] sm:$0xff] }
  0x70   : > { %1971 = vmatpush.msra.mxu0 %v2488_v11 }
  0x71   : > { %562 = vmatmul.f32.gmra.mxu0 %v3277_v41 }
  0x73   : > { %654 = vmatmul.f32.vlgmr.msrb.gmra.mxu1 %v2658_v2  ;;  %816 = vmatmul.f32.vlgmr.msrb.gmra.mxu2 %v751_v50 }
  0x75   : > { %1010 = vmatmul.f32.vlgmr.msrb.gmra.mxu3 %v945_v51 }
  0x79   : > { %1204 = vmatmul.f32.vlgmr.msrb.gmra.mxu0 %v3019_v45  ;;  %v2459_v45 = vld [vmem:[%s3769_s2 + $0x360] sm:$0xff] }
  0x7a   : > { %1580 = vmatpush.msra.mxu2 %v2459_v45  ;;  %v763_v45 = vld [vmem:[#allocation2 + $0x92] sm:$0xff] }
  0x7b   : > { %657 = vmatmul.f32.gmra.mxu1 %v2658_v2  ;;  %819 = vmatmul.f32.gmra.mxu2 %v752_v60  ;;  %v2475_v2 = vld [vmem:[%s3769_s2 + $0x3e0] sm:$0xff] }
  0x7c   : > { %1774 = vmatpush.msra.mxu3 %v2475_v2  ;;  %1581 = vmatpush.msra.mxu2 %v2458_v12  ;;  %v2487_v60 = vld [vmem:[%s3769_s2 + $0x440] sm:$0xff]  ;;  %v2454_v2 = vld [vmem:[%s3769_s2 + $0x338] sm:$0xff]  ;;  %v958_v12 = vld [vmem:[#allocation2 + $0xb0] sm:$0xff] }
  0x7d   : > { %1013 = vmatmul.f32.gmra.mxu3 %v946_v46  ;;  %1972 = vmatpush.msra.mxu0 %v2487_v60  ;;  %v1155_v60 = vld [vmem:[#allocation2 + $0xd9] sm:$0xff] }
  0x7e   : > { %1582 = vmatpush.msra.mxu2 %v2457_v36  ;;  %v2469_v36 = vld [vmem:[%s3769_s2 + $0x3b0] sm:$0xff] }
  0x81   : > { %1207 = vmatmul.f32.gmra.mxu0 %v3091_v17  ;;  %v754_v17 = vld [vmem:[#allocation2 + $0x22] sm:$0xff] }
  0x83   : > { %660 = vmatmul.f32.gmra.mxu1 %v945_v51  ;;  %822 = vmatmul.f32.gmra.mxu2 %v753_v0 }
  0x85   : > { %1016 = vmatmul.f32.gmra.mxu3 %v947_v3 }
  0x89   : > { %1210 = vmatmul.f32.gmra.mxu0 %v3166_v44  ;;  %v2474_v44 = vld [vmem:[%s3769_s2 + $0x3d8] sm:$0xff] }
  0x8a   : > { %1775 = vmatpush.msra.mxu3 %v2474_v44  ;;  %v2486_v44 = vld [vmem:[%s3769_s2 + $0x438] sm:$0xff] }
  0x8b   : > { %663 = vmatmul.f32.gmra.mxu1 %v946_v46  ;;  %825 = vmatmul.f32.gmra.mxu2 %v754_v17 }
  0x8c   : > { %1776 = vmatpush.msra.mxu3 %v2473_v18  ;;  %1973 = vmatpush.msra.mxu0 %v2486_v44 }
  0x8d   : > { %1019 = vmatmul.f32.gmra.mxu3 %v948_v5 }
  0x8e   : > { %1777 = vmatpush.msra.mxu3 %v2472_v58 }
  0x90   : > { %1778 = vmatpush.msra.mxu3 %v2471_v47 }
  0x91   : > { %1213 = vmatmul.f32.gmra.mxu0 %v3240_v48  ;;  %v759_v48 = vld [vmem:[#allocation2 + $0x62] sm:$0xff] }
  0x92   : > { %1779 = vmatpush.msra.mxu3 %v2470_v4 }
  0x93   : > { %666 = vmatmul.f32.gmra.mxu1 %v947_v3  ;;  %828 = vmatmul.f32.gmra.mxu2 %v755_v9 }
  0x94   : > { %1780 = vmatpush.msra.mxu3 %v2469_v36 }
  0x95   : > { %1022 = vmatmul.f32.gmra.mxu3 %v949_v10 }
  0x99   : > { %1216 = vmatmul.f32.gmra.mxu0 %v3270_v39 }
  0x9b   : > { %669 = vmatmul.f32.gmra.mxu1 %v948_v5  ;;  %831 = vmatmul.f32.gmra.mxu2 %v756_v15 }
  0x9d   : > { %1025 = vmatmul.f32.gmra.mxu3 %v950_v25 }
  0xa1   : > { %1219 = vmatmul.f32.gmra.mxu0 %v3277_v41  ;;  %v761_v41 = vld [vmem:[#allocation2 + $0x7a] sm:$0xff] }
  0xa3   : > { %672 = vmatmul.f32.gmra.mxu1 %v949_v10  ;;  %834 = vmatmul.f32.gmra.mxu2 %v757_v16  ;;  %v764_v10 = vld [vmem:[#allocation2 + $0x9a] sm:$0xff]  ;;  %v765_v16 = vld [vmem:[#allocation2 + $0xaa] sm:$0xff] }
  0xa5   : > { %1028 = vmatmul.f32.gmra.mxu3 %v951_v29 }
  0xa9   : > { %1222 = vmatmul.f32.gmra.mxu0 %v2792_v14  ;;  %v2456_v14 = vld [vmem:[%s3769_s2 + $0x348] sm:$0xff] }
  0xaa   : > { %1583 = vmatpush.msra.mxu2 %v2456_v14  ;;  %v2485_v14 = vld [vmem:[%s3769_s2 + $0x430] sm:$0xff] }
  0xab   : > { %675 = vmatmul.f32.gmra.mxu1 %v950_v25  ;;  %837 = vmatmul.f32.gmra.mxu2 %v758_v22  ;;  %v1153_v22 = vld [vmem:[#allocation2 + $0xc1] sm:$0xff] }
  0xac   : > { %1584 = vmatpush.msra.mxu2 %v2455_v43  ;;  %1974 = vmatpush.msra.mxu0 %v2485_v14  ;;  %v2452_v43 = vld [vmem:[%s3769_s2 + $0x328] sm:$0xff] }
  0xad   : > { %1031 = vmatmul.f32.gmra.mxu3 %v952_v23 }
  0xae   : > { %1585 = vmatpush.msra.mxu2 %v2454_v2 }
  0xb0   : > { %v3350_v30 = vpop.f32.mrf.mxu1 }
  0xb1   : > { %1225 = vmatmul.f32.gmra.mxu0 %v2900_v52  ;;  %v2440_v52 = vld [vmem:[%s3769_s2 + $0x2c8] sm:$0xff] }
  0xb2   : > { %1388 = vmatpush.msra.mxu1 %v2440_v52 }
  0xb3   : > { %678 = vmatmul.f32.gmra.mxu1 %v951_v29  ;;  %840 = vmatmul.f32.gmra.mxu2 %v759_v48  ;;  %v2453_v29 = vld [vmem:[%s3769_s2 + $0x330] sm:$0xff] }
  0xb4   : > { %1586 = vmatpush.msra.mxu2 %v2453_v29  ;;  %v766_v48 = vld [vmem:[#allocation2 + $0xb2] sm:$0xff] }
  0xb5   : > { %1034 = vmatmul.f32.gmra.mxu3 %v953_v53 }
  0xb6   : > { %v3359_v31 = vpop.f32.mrf.mxu2  ;;  %v3361_v34 = vpop.f32.mrf.mxu0  ;;  %1587 = vmatpush.msra.mxu2 %v2452_v43 }
  0xb8   : > { %v3366_v1 = vpop.f32.mrf.mxu1  ;;  %v3368_v7 = vpop.f32.mrf.mxu3 }
  0xb9   : > { %1228 = vmatmul.f32.gmra.mxu0 %v2968_v19  ;;  %v955_v19 = vld [vmem:[#allocation2 + $0x90] sm:$0xff] }
  0xbb   : > { %681 = vmatmul.f32.gmra.mxu1 %v952_v23  ;;  %843 = vmatmul.f32.gmra.mxu2 %v760_v20  ;;  %v1154_v20 = vld [vmem:[#allocation2 + $0xc9] sm:$0xff] }
  0xbd   : > { %1037 = vmatmul.f32.gmra.mxu3 %v954_v35 }
  0xbe   : > { %v3374_v26 = vpop.f32.mrf.mxu2  ;;  %v3376_v39 = vpop.f32.mrf.mxu0 }
  0xc0   : > { %v3378_v8 = vpop.f32.mrf.mxu1  ;;  %v3380_v40 = vpop.f32.mrf.mxu3 }
  0xc1   : > { %1231 = vmatmul.f32.gmra.mxu0 %v3037_v55  ;;  %v2439_v55 = vld [vmem:[%s3769_s2 + $0x2c0] sm:$0xff] }
  0xc2   : > { %1389 = vmatpush.msra.mxu1 %v2439_v55  ;;  %v2468_v55 = vld [vmem:[%s3769_s2 + $0x3a8] sm:$0xff] }
  0xc3   : > { %684 = vmatmul.f32.gmra.mxu1 %v953_v53  ;;  %846 = vmatmul.f32.gmra.mxu2 %v761_v41  ;;  %v960_v53 = vld [vmem:[#allocation2 + $0xc8] sm:$0xff] }
  0xc4   : > { %v767_v41 = vld [vmem:[#allocation2 + $0xc2] sm:$0xff]  ;;  %1781 = vmatpush.msra.mxu3 %v2468_v55 }
  0xc5   : > { %1040 = vmatmul.f32.gmra.mxu3 %v955_v19 }
  0xc6   : > { %v3389_v49 = vpop.f32.mrf.mxu2  ;;  %v3391_v50 = vpop.f32.mrf.mxu0 }
  0xc8   : > { %v3396_v51 = vpop.f32.mrf.mxu1  ;;  %v3398_v54 = vpop.f32.mrf.mxu3 }
  0xc9   : > { %1234 = vmatmul.f32.gmra.mxu0 %v3111_v24  ;;  %v957_v24 = vld [vmem:[#allocation2 + $0xa8] sm:$0xff] }
  0xcb   : > { %687 = vmatmul.f32.gmra.mxu1 %v954_v35  ;;  %849 = vmatmul.f32.gmra.mxu2 %v762_v57 }
  0xcd   : > { %1043 = vmatmul.f32.gmra.mxu3 %v956_v59 }
  0xce   : > { %v3404_v46 = vpop.f32.mrf.mxu2  ;;  %v3406_v62 = vpop.f32.mrf.mxu0 }
  0xd0   : > { %v3408_v0 = vpop.f32.mrf.mxu1  ;;  %v3410_v3 = vpop.f32.mrf.mxu3 }
  0xd1   : > { %1237 = vmatmul.f32.gmra.mxu0 %v3185_v61  ;;  %v2438_v61 = vld [vmem:[%s3769_s2 + $0x2b8] sm:$0xff] }
  0xd2   : > { %1390 = vmatpush.msra.mxu1 %v2438_v61  ;;  %v768_v61 = vld [vmem:[#allocation2 + $0xca] sm:$0xff] }
  0xd3   : > { %690 = vmatmul.f32.gmra.mxu1 %v955_v19  ;;  %852 = vmatmul.f32.gmra.mxu2 %v763_v45  ;;  %v961_v19 = vld [vmem:[#allocation2 + $0xd8] sm:$0xff] }
  0xd5   : > { %1046 = vmatmul.f32.gmra.mxu3 %v957_v24 }
  0xd6   : > { %v3419_v17 = vpop.f32.mrf.mxu2  ;;  %v3421_v5 = vpop.f32.mrf.mxu0 }
  0xd8   : > { %v3426_v6 = vpop.f32.mrf.mxu1  ;;  %v3428_v9 = vpop.f32.mrf.mxu3 }
  0xd9   : > { %1240 = vmatmul.f32.gmra.mxu0 %v3238_v42  ;;  %v959_v42 = vld [vmem:[#allocation2 + $0xc0] sm:$0xff] }
  0xdb   : > { %693 = vmatmul.f32.gmra.mxu1 %v956_v59  ;;  %855 = vmatmul.f32.gmra.mxu2 %v764_v10 }
  0xdd   : > { %1049 = vmatmul.f32.gmra.mxu3 %v958_v12 }
  0xde   : > { %v3434_v13 = vpop.f32.mrf.mxu2  ;;  %v3436_v15 = vpop.f32.mrf.mxu0 }
  0xe0   : > { %v3438_v25 = vpop.f32.mrf.mxu1  ;;  %v3440_v32 = vpop.f32.mrf.mxu3 }
  0xe1   : > { %1243 = vmatmul.f32.gmra.mxu0 %v3259_v37  ;;  %v2437_v37 = vld [vmem:[%s3769_s2 + $0x2b0] sm:$0xff] }
  0xe2   : > { %1391 = vmatpush.msra.mxu1 %v2437_v37 }
  0xe3   : > { %696 = vmatmul.f32.gmra.mxu1 %v957_v24  ;;  %858 = vmatmul.f32.gmra.mxu2 %v765_v16  ;;  %v2436_v24 = vld [vmem:[%s3769_s2 + $0x2a8] sm:$0xff] }
  0xe4   : > { %1392 = vmatpush.msra.mxu1 %v2436_v24  ;;  %v2484_v16 = vld [vmem:[%s3769_s2 + $0x428] sm:$0xff] }
  0xe5   : > { %1052 = vmatmul.f32.gmra.mxu3 %v959_v42  ;;  %1975 = vmatpush.msra.mxu0 %v2484_v16 }
  0xe6   : > { %v3449_v18 = vpop.f32.mrf.mxu2  ;;  %v3451_v21 = vpop.f32.mrf.mxu0 }
  0xe8   : > { %v3456_v23 = vpop.f32.mrf.mxu1  ;;  %v3458_v28 = vpop.f32.mrf.mxu3 }
  0xe9   : > { %1246 = vmatmul.f32.gmra.mxu0 %v1153_v22 }
  0xeb   : > { %699 = vmatmul.f32.gmra.mxu1 %v958_v12  ;;  %861 = vmatmul.f32.gmra.mxu2 %v766_v48  ;;  %v769_v48 = vld [vmem:[#allocation2 + $0xda] sm:$0xff] }
  0xed   : > { %1055 = vmatmul.f32.gmra.mxu3 %v960_v53 }
  0xee   : > { %v3463_v58 = vpop.f32.mrf.mxu2  ;;  %v3465_v52 = vpop.f32.mrf.mxu0 }
  0xf0   : > { %v3467_v35 = vpop.f32.mrf.mxu3  ;;  %v655_v11 = vpop.f32.mrf.mxu1 }
  0xf1   : > { %1249 = vmatmul.f32.gmra.mxu0 %v1154_v20  ;;  %v656_v47 = vadd.f32 %v655_v11, %v3361_v34  ;;  %v962_v34 = vld [vmem:[#allocation2 + $0xe0] sm:$0xff]  ;;  %v963_v20 = vld [vmem:[#allocation2 + $0xf0] sm:$0xff] }
  0xf3   : > { %702 = vmatmul.f32.gmra.mxu1 %v959_v42  ;;  %864 = vmatmul.f32.gmra.mxu2 %v767_v41  ;;  %v2467_v41 = vld [vmem:[%s3769_s2 + $0x3a0] sm:$0xff] }
  0xf4   : > { %1782 = vmatpush.msra.mxu3 %v2467_v41 }
  0xf5   : > { %1058 = vmatmul.f32.gmra.mxu3 %v961_v19 }
  0xf6   : > { %v817_v57 = vpop.f32.mrf.mxu2  ;;  %v1205_v59 = vpop.f32.mrf.mxu0 }
  0xf7   : > { %v913_v45 = vadd.f32 %v817_v57, %v656_v47 }
  0xf8   : > { %v658_v2 = vpop.f32.mrf.mxu1  ;;  %v1011_v4 = vpop.f32.mrf.mxu3 }
  0xf9   : > { %v1107_v10 = vadd.f32 %v1011_v4, %v913_v45  ;;  %1252 = vmatmul.f32.gmra.mxu0 %v1155_v60  ;;  %v659_v44 = vadd.f32 %v658_v2, %v3376_v39  ;;  %v2451_v39 = vld [vmem:[%s3769_s2 + $0x320] sm:$0xff] }
  0xfa   : > { %1588 = vmatpush.msra.mxu2 %v2451_v39  ;;  %v2483_v2 = vld [vmem:[%s3769_s2 + $0x420] sm:$0xff] }
  0xfb   : > { %v3479_v12 = vadd.f32 %v1205_v59, %v1107_v10  ;;  %705 = vmatmul.f32.gmra.mxu1 %v960_v53  ;;  %867 = vmatmul.f32.gmra.mxu2 %v768_v61  ;;  %v770_v59 = vld [vmem:[#allocation2 + $0xe2] sm:$0xff] }
  0xfc   : > { %1976 = vmatpush.msra.mxu0 %v2483_v2  ;;  %v967_v2 = vld [vmem:[#allocation2 + $0x120] sm:$0xff] }
  0xfd   : > { %1061 = vmatmul.f32.gmra.mxu3 %v962_v34 }
  0xfe   : > { %v820_v42 = vpop.f32.mrf.mxu2  ;;  %v1208_v29 = vpop.f32.mrf.mxu0 }
  0xff   : > { %v914_v36 = vadd.f32 %v820_v42, %v659_v44  ;;  %v771_v42 = vld [vmem:[#allocation2 + $0xf2] sm:$0xff] }
 0x100   : > { %v661_v22 = vpop.f32.mrf.mxu1  ;;  %v1014_v37 = vpop.f32.mrf.mxu3 }
 0x101   : > { %v1108_v14 = vadd.f32 %v1014_v37, %v914_v36  ;;  %1255 = vmatmul.f32.gmra.mxu0 %v3039_v56  ;;  %v662_v11 = vadd.f32 %v661_v22, %v3391_v50  ;;  %v964_v50 = vld [vmem:[#allocation2 + $0xf8] sm:$0xff] }
 0x102   : > { %v2466_v22 = vld [vmem:[%s3769_s2 + $0x398] sm:$0xff] }
 0x103   : > { %v3486_v53 = vadd.f32 %v1208_v29, %v1108_v14  ;;  %708 = vmatmul.f32.gmra.mxu1 %v961_v19  ;;  %870 = vmatmul.f32.gmra.mxu2 %v769_v48  ;;  %v2435_v19 = vld [vmem:[%s3769_s2 + $0x2a0] sm:$0xff]  ;;  %v965_v29 = vld [vmem:[#allocation2 + $0x108] sm:$0xff]  ;;  %v2434_v14 = vld [vmem:[%s3769_s2 + $0x298] sm:$0xff] }
 0x104   : > { %1393 = vmatpush.msra.mxu1 %v2435_v19  ;;  %1783 = vmatpush.msra.mxu3 %v2466_v22 }
 0x105   : > { %1064 = vmatmul.f32.gmra.mxu3 %v963_v20 }
 0x106   : > { %v823_v43 = vpop.f32.mrf.mxu2  ;;  %v1211_v47 = vpop.f32.mrf.mxu0  ;;  %1394 = vmatpush.msra.mxu1 %v2434_v14 }
 0x107   : > { %v915_v56 = vadd.f32 %v823_v43, %v662_v11  ;;  %v772_v11 = vld [vmem:[#allocation2 + $0xfa] sm:$0xff] }
 0x108   : > { %v664_v55 = vpop.f32.mrf.mxu1  ;;  %v1017_v57 = vpop.f32.mrf.mxu3 }
 0x109   : > { %v1109_v60 = vadd.f32 %v1017_v57, %v915_v56  ;;  %1258 = vmatmul.f32.gmra.mxu0 %v3113_v27  ;;  %v665_v24 = vadd.f32 %v664_v55, %v3406_v62  ;;  %v2450_v62 = vld [vmem:[%s3769_s2 + $0x318] sm:$0xff] }
 0x10a   : > { %1589 = vmatpush.msra.mxu2 %v2450_v62  ;;  %v2482_v56 = vld [vmem:[%s3769_s2 + $0x418] sm:$0xff] }
 0x10b   : > { %v3499_v45 = vadd.f32 %v1211_v47, %v1109_v60  ;;  %711 = vmatmul.f32.gmra.mxu1 %v962_v34  ;;  %873 = vmatmul.f32.gmra.mxu2 %v770_v59  ;;  %v774_v62 = vld [vmem:[#allocation2 + $0x112] sm:$0xff] }
 0x10c   : > { %1977 = vmatpush.msra.mxu0 %v2482_v56 }
 0x10d   : > { %1067 = vmatmul.f32.gmra.mxu3 %v964_v50 }
 0x10e   : > { %v826_v4 = vpop.f32.mrf.mxu2  ;;  %v1214_v61 = vpop.f32.mrf.mxu0 }
 0x10f   : > { %v916_v10 = vadd.f32 %v826_v4, %v665_v24  ;;  %v773_v24 = vld [vmem:[#allocation2 + $0x10a] sm:$0xff] }
 0x110   : > { %v667_v44 = vpop.f32.mrf.mxu1  ;;  %v1020_v16 = vpop.f32.mrf.mxu3 }
 0x111   : > { %v1110_v27 = vadd.f32 %v1020_v16, %v916_v10  ;;  %1261 = vmatmul.f32.gmra.mxu0 %v3187_v63  ;;  %v668_v36 = vadd.f32 %v667_v44, %v3421_v5  ;;  %v966_v5 = vld [vmem:[#allocation2 + $0x110] sm:$0xff] }
 0x113   : > { %v3506_v34 = vadd.f32 %v1214_v61, %v1110_v27  ;;  %714 = vmatmul.f32.gmra.mxu1 %v963_v20  ;;  %876 = vmatmul.f32.gmra.mxu2 %v771_v42  ;;  %v2465_v61 = vld [vmem:[%s3769_s2 + $0x390] sm:$0xff] }
 0x114   : > { %1784 = vmatpush.msra.mxu3 %v2465_v61  ;;  %v2433_v42 = vld [vmem:[%s3769_s2 + $0x290] sm:$0xff] }
 0x115   : > { %1070 = vmatmul.f32.gmra.mxu3 %v965_v29  ;;  %1395 = vmatpush.msra.mxu1 %v2433_v42 }
 0x116   : > { %v829_v37 = vpop.f32.mrf.mxu2  ;;  %v1217_v48 = vpop.f32.mrf.mxu0 }
 0x117   : > { %v917_v63 = vadd.f32 %v829_v37, %v668_v36 }
 0x118   : > { %v670_v20 = vpop.f32.mrf.mxu1  ;;  %v1023_v39 = vpop.f32.mrf.mxu3 }
 0x119   : > { %v1111_v41 = vadd.f32 %v1023_v39, %v917_v63  ;;  %1264 = vmatmul.f32.gmra.mxu0 %v3247_v33  ;;  %v671_v47 = vadd.f32 %v670_v20, %v3436_v15  ;;  %v2449_v15 = vld [vmem:[%s3769_s2 + $0x310] sm:$0xff] }
 0x11a   : > { %1590 = vmatpush.msra.mxu2 %v2449_v15  ;;  %v1162_v20 = vld [vmem:[#allocation2 + $0x129] sm:$0xff] }
 0x11b   : > { %v3519_v43 = vadd.f32 %v1217_v48, %v1111_v41  ;;  %717 = vmatmul.f32.gmra.mxu1 %v964_v50  ;;  %879 = vmatmul.f32.gmra.mxu2 %v772_v11  ;;  %v2481_v48 = vld [vmem:[%s3769_s2 + $0x410] sm:$0xff] }
 0x11c   : > { %1978 = vmatpush.msra.mxu0 %v2481_v48 }
 0x11d   : > { %1073 = vmatmul.f32.gmra.mxu3 %v966_v5 }
 0x11e   : > { %v832_v19 = vpop.f32.mrf.mxu2  ;;  %v1220_v55 = vpop.f32.mrf.mxu0 }
 0x11f   : > { %v918_v57 = vadd.f32 %v832_v19, %v671_v47  ;;  %v775_v47 = vld [vmem:[#allocation2 + $0x122] sm:$0xff] }
 0x120   : > { %v673_v59 = vpop.f32.mrf.mxu1  ;;  %v1026_v60 = vpop.f32.mrf.mxu3 }
 0x121   : > { %v1112_v33 = vadd.f32 %v1026_v60, %v918_v57  ;;  %1267 = vmatmul.f32.gmra.mxu0 %v3265_v38  ;;  %v674_v4 = vadd.f32 %v673_v59, %v3451_v21  ;;  %v1161_v38 = vld [vmem:[#allocation2 + $0x121] sm:$0xff] }
 0x122   : > { %v968_v21 = vld [vmem:[#allocation2 + $0x128] sm:$0xff] }
 0x123   : > { %v3526_v50 = vadd.f32 %v1220_v55, %v1112_v33  ;;  %720 = vmatmul.f32.gmra.mxu1 %v965_v29  ;;  %882 = vmatmul.f32.gmra.mxu2 %v773_v24  ;;  %v2464_v57 = vld [vmem:[%s3769_s2 + $0x388] sm:$0xff]  ;;  %v1163_v24 = vld [vmem:[#allocation2 + $0x139] sm:$0xff]  ;;  %v239_v33 = vld [vmem:[%s2761_s20 + $0xf0] sm:$0xff] }
 0x124   : > { %1785 = vmatpush.msra.mxu3 %v2464_v57  ;;  %v2447_v57 = vld [vmem:[%s3769_s2 + $0x300] sm:$0xff] }
 0x125   : > { %1076 = vmatmul.f32.gmra.mxu3 %v967_v2 }
 0x126   : > { %v835_v10 = vpop.f32.mrf.mxu2  ;;  %v1223_v44 = vpop.f32.mrf.mxu0 }
 0x127   : > { %v919_v16 = vadd.f32 %v835_v10, %v674_v4  ;;  %v2591_v4 = vld [vmem:[%s3768_s1] ss:$0 sm:$0xff] }
 0x128   : > { %v676_v27 = vpop.f32.mrf.mxu1  ;;  %v1029_v29 = vpop.f32.mrf.mxu3 }
 0x129   : > { %v1113_v36 = vadd.f32 %v1029_v29, %v919_v16  ;;  %1270 = vmatmul.f32.gmra.mxu0 %v1161_v38  ;;  %v677_v37 = vadd.f32 %v676_v27, %v3465_v52  ;;  %v2448_v52 = vld [vmem:[%s3769_s2 + $0x308] sm:$0xff]  ;;  %v2592_v16 = vld [vmem:[%s3768_s1 + $0x1] ss:$0 sm:$0xff] }
 0x12a   : > { %1591 = vmatpush.msra.mxu2 %v2448_v52  ;;  %v970_v27 = vld [vmem:[#allocation2 + $0x140] sm:$0xff]  ;;  %v971_v52 = vld [vmem:[#allocation2 + $0x150] sm:$0xff] }
 0x12b   : > { %v3538_v22 = vadd.f32 %v1223_v44, %v1113_v36  ;;  %723 = vmatmul.f32.gmra.mxu1 %v966_v5  ;;  %885 = vmatmul.f32.gmra.mxu2 %v774_v62  ;;  %v969_v5 = vld [vmem:[#allocation2 + $0x138] sm:$0xff]  ;;  %v776_v44 = vld [vmem:[#allocation2 + $0x12a] sm:$0xff] }
 0x12c   : > { %1592 = vmatpush.msra.mxu2 %v2447_v57  ;;  %v1167_v57 = vld [vmem:[#allocation2 + $0x169] sm:$0xff] }
 0x12d   : > { %1079 = vmatmul.f32.gmra.mxu3 %v968_v21 }
 0x12e   : > { %v838_v63 = vpop.f32.mrf.mxu2  ;;  %v1226_v14 = vpop.f32.mrf.mxu0 }
 0x12f   : > { %v920_v39 = vadd.f32 %v838_v63, %v677_v37  ;;  %v2480_v37 = vld [vmem:[%s3769_s2 + $0x408] sm:$0xff] }
 0x130   : > { %v679_v11 = vpop.f32.mrf.mxu1  ;;  %v1032_v41 = vpop.f32.mrf.mxu3  ;;  %1979 = vmatpush.msra.mxu0 %v2480_v37 }
 0x131   : > { %v1114_v56 = vadd.f32 %v1032_v41, %v920_v39  ;;  %1273 = vmatmul.f32.gmra.mxu0 %v1162_v20  ;;  %v680_v55 = vadd.f32 %v679_v11, %v3350_v30  ;;  %v274_v30 = vmul.f32 %v2591_v4, %v239_v33  ;;  %v240_v20 = vld [vmem:[%s2761_s20 + $0xf8] sm:$0xff]  ;;  %s2273_s20 = sshll.u32 %s2269_s12, 4  ;;  %s2274_s20 = int_to_ptr.hbm [resolvable:$true] %s2273_s20 }
 0x132   : > { %s2608_s22 = sshra.s32 %s2274_s20, 4  ;;  %s2609_s22 = int_to_ptr.hbm [resolvable:$true] %s2608_s22 }
 0x133   : > { %v3544_v19 = vadd.f32 %v1226_v14, %v1114_v56  ;;  %726 = vmatmul.f32.gmra.mxu1 %v967_v2  ;;  %888 = vmatmul.f32.gmra.mxu2 %v775_v47  ;;  %v2432_v2 = vld [vmem:[%s3769_s2 + $0x288] sm:$0xff]  ;;  %v3563_v42 = vadd.f32 %v2592_v16, %v274_v30  ;;  %v777_v47 = vld [vmem:[#allocation2 + $0x13a] sm:$0xff]  ;;  %s2610_s23 = scalar_lea.hbm %s2609_s22, 2  ;;  %p2615_p0 = scmp.lt.s32.totalorder %s2609_s22, %s3771_s4 }
 0x134   : > { %1396 = vmatpush.msra.mxu1 %v2432_v2  ;;  %v1164_v14 = vld [vmem:[#allocation2 + $0x141] sm:$0xff]  ;;  %p2611_p11 = scmp.ne.s32.totalorder %s2609_s22, %s2610_s23  ;;  %p2616_p1 = scmp.lt.s32.totalorder %s2614_s29, %s2610_s23 }
 0x135   : > { %1082 = vmatmul.f32.gmra.mxu3 %v969_v5  ;;  %v339_v62 = vmax.f32 %v3563_v42, 0.0  ;;  %v1722_v42 = vld [vmem:[#allocation2 + $0x31] sm:$0xff] }
 0x136   : > { %v841_v59 = vpop.f32.mrf.mxu2  ;;  %v1229_v60 = vpop.f32.mrf.mxu0  ;;  %p2612_p12 = pnand %p2611_p11, %p2722_p5  ;;  %p2617_p2 = por %p2616_p1, %p2615_p0 }
 0x137   : > { %v921_v15 = vadd.f32 %v841_v59, %v680_v55  ;;  %426 = vst [vmem:[#allocation2 + $0x181] sm:$0xff] %v339_v62 }
 0x138   : > { %v682_v61 = vpop.f32.mrf.mxu1  ;;  %v1035_v10 = vpop.f32.mrf.mxu3  ;;  %p2613_p13 = pneg %p2612_p12 }
 0x139   : > { %v1115_v38 = vadd.f32 %v1035_v10, %v921_v15  ;;  %1276 = vmatmul.f32.gmra.mxu0 %v1163_v24  ;;  %v683_v36 = vadd.f32 %v682_v61, %v3366_v1  ;;  %v2463_v24 = vld [vmem:[%s3769_s2 + $0x380] sm:$0xff]  ;;  %v1165_v15 = vld [vmem:[#allocation2 + $0x151] sm:$0xff] }
 0x13a   : > { %1786 = vmatpush.msra.mxu3 %v2463_v24  ;;  %p2618_p3 = pnand %p2617_p2, %p2613_p13 }
 0x13b   : > { %v3565_v29 = vadd.f32 %v1229_v60, %v1115_v38  ;;  %729 = vmatmul.f32.gmra.mxu1 %v968_v21  ;;  %891 = vmatmul.f32.gmra.mxu2 %v776_v44  ;;  %v275_v21 = vmul.f32 %v2591_v4, %v240_v20  ;;  %v2431_v4 = vld [vmem:[%s3769_s2 + $0x280] sm:$0xff]  ;;  %v972_v44 = vld [vmem:[#allocation2 + $0x158] sm:$0xff] }
 0x13c   : > { %1397 = vmatpush.msra.mxu1 %v2431_v4 }
 0x13d   : > { %1085 = vmatmul.f32.gmra.mxu3 %v970_v27  ;;  %v3575_v1 = vadd.f32 %v2592_v16, %v275_v21  ;;  %v779_v21 = vld [vmem:[#allocation2 + $0x152] sm:$0xff] }
 0x13e   : > { %v844_v48 = vpop.f32.mrf.mxu2  ;;  %v1232_v63 = vpop.f32.mrf.mxu0 }
 0x13f   : > { %v922_v39 = vadd.f32 %v844_v48, %v683_v36  ;;  %v340_v59 = vmax.f32 %v3575_v1, 0.0  ;;  %v2479_v36 = vld [vmem:[%s3769_s2 + $0x400] sm:$0xff] }
 0x140   : > { %v685_v11 = vpop.f32.mrf.mxu1  ;;  %v1038_v41 = vpop.f32.mrf.mxu3  ;;  %1980 = vmatpush.msra.mxu0 %v2479_v36  ;;  %v781_v36 = vld [vmem:[#allocation2 + $0x16a] sm:$0xff]  ;;  %v1723_v1 = vld [vmem:[#allocation2 + $0x39] sm:$0xff] }
 0x141   : > { %v1116_v56 = vadd.f32 %v1038_v41, %v922_v39  ;;  %1279 = vmatmul.f32.gmra.mxu0 %v1164_v14  ;;  %v686_v60 = vadd.f32 %v685_v11, %v3378_v8  ;;  %427 = vst [vmem:[#allocation2 + $0x189] sm:$0xff] %v340_v59  ;;  %v778_v8 = vld [vmem:[#allocation2 + $0x142] sm:$0xff] }
 0x142   : > { %v973_v41 = vld [vmem:[#allocation2 + $0x168] sm:$0xff] }
 0x143   : > { %v3577_v55 = vadd.f32 %v1232_v63, %v1116_v56  ;;  %732 = vmatmul.f32.gmra.mxu1 %v969_v5  ;;  %894 = vmatmul.f32.gmra.mxu2 %v777_v47  ;;  %v1166_v63 = vld [vmem:[#allocation2 + $0x159] sm:$0xff] }
 0x145   : > { %1088 = vmatmul.f32.gmra.mxu3 %v971_v52 }
 0x146   : > { %v847_v33 = vpop.f32.mrf.mxu2  ;;  %v1235_v5 = vpop.f32.mrf.mxu0 }
 0x147   : > { %v923_v2 = vadd.f32 %v847_v33, %v686_v60 }
 0x148   : > { %v688_v30 = vpop.f32.mrf.mxu1  ;;  %v1041_v61 = vpop.f32.mrf.mxu3 }
 0x149   : > { %v1117_v10 = vadd.f32 %v1041_v61, %v923_v2  ;;  %1282 = vmatmul.f32.gmra.mxu0 %v1165_v15  ;;  %v689_v16 = vadd.f32 %v688_v30, %v3396_v51  ;;  %v974_v2 = vld [vmem:[#allocation2 + $0x170] sm:$0xff] }
 0x14a   : > { %v1168_v61 = vld [vmem:[#allocation2 + $0x171] sm:$0xff] }
 0x14b   : > { %v3592_v38 = vadd.f32 %v1235_v5, %v1117_v10  ;;  %735 = vmatmul.f32.gmra.mxu1 %v970_v27  ;;  %897 = vmatmul.f32.gmra.mxu2 %v778_v8  ;;  %v780_v5 = vld [vmem:[#allocation2 + $0x15a] sm:$0xff] }
 0x14d   : > { %1091 = vmatmul.f32.gmra.mxu3 %v972_v44 }
 0x14e   : > { %v850_v37 = vpop.f32.mrf.mxu2  ;;  %v1238_v48 = vpop.f32.mrf.mxu0 }
 0x14f   : > { %v924_v14 = vadd.f32 %v850_v37, %v689_v16 }
 0x150   : > { %v691_v20 = vpop.f32.mrf.mxu1  ;;  %v1044_v39 = vpop.f32.mrf.mxu3 }
 0x151   : > { %v1118_v11 = vadd.f32 %v1044_v39, %v924_v14  ;;  %1285 = vmatmul.f32.gmra.mxu0 %v1166_v63  ;;  %v692_v51 = vadd.f32 %v691_v20, %v3408_v0 }
 0x153   : > { %v3598_v27 = vadd.f32 %v1238_v48, %v1118_v11  ;;  %738 = vmatmul.f32.gmra.mxu1 %v971_v52  ;;  %900 = vmatmul.f32.gmra.mxu2 %v779_v21  ;;  %v975_v48 = vld [vmem:[#allocation2 + $0x180] sm:$0xff]  ;;  %v782_v11 = vld [vmem:[#allocation2 + $0x172] sm:$0xff] }
 0x155   : > { %1094 = vmatmul.f32.gmra.mxu3 %v973_v41 }
 0x156   : > { %v853_v47 = vpop.f32.mrf.mxu2  ;;  %v1241_v56 = vpop.f32.mrf.mxu0 }
 0x157   : > { %v925_v60 = vadd.f32 %v853_v47, %v692_v51  ;;  %v976_v47 = vld [vmem:[#allocation2 + $0x188] sm:$0xff] }
 0x158   : > { %v694_v24 = vpop.f32.mrf.mxu1  ;;  %v1047_v33 = vpop.f32.mrf.mxu3 }
 0x159   : > { %v1119_v15 = vadd.f32 %v1047_v33, %v925_v60  ;;  %1288 = vmatmul.f32.gmra.mxu0 %v1167_v57  ;;  %v695_v52 = vadd.f32 %v694_v24, %v3426_v6 }
 0x15b   : > { %v3601_v4 = vadd.f32 %v1241_v56, %v1119_v15  ;;  %741 = vmatmul.f32.gmra.mxu1 %v972_v44  ;;  %903 = vmatmul.f32.gmra.mxu2 %v780_v5  ;;  %v1333_v5 = vld [vmem:[#allocation2 + $0x1a] sm:$0xff]  ;;  %v1528_v15 = vld [vmem:[#allocation2 + $0x30] sm:$0xff] }
 0x15d   : > { %1097 = vmatmul.f32.gmra.mxu3 %v974_v2 }
 0x15e   : > { %v856_v30 = vpop.f32.mrf.mxu2  ;;  %v1244_v0 = vpop.f32.mrf.mxu0 }
 0x15f   : > { %v926_v8 = vadd.f32 %v856_v30, %v695_v52 }
 0x160   : > { %v697_v10 = vpop.f32.mrf.mxu1  ;;  %v1050_v16 = vpop.f32.mrf.mxu3 }
 0x161   : > { %v1120_v37 = vadd.f32 %v1050_v16, %v926_v8  ;;  %1291 = vmatmul.f32.gmra.mxu0 %v1168_v61  ;;  %v698_v44 = vadd.f32 %v697_v10, %v3438_v25  ;;  %v1334_v16 = vld [vmem:[#allocation2 + $0x22] sm:$0xff] }
 0x163   : > { %v3604_v63 = vadd.f32 %v1244_v0, %v1120_v37  ;;  %744 = vmatmul.f32.gmra.mxu1 %v973_v41  ;;  %906 = vmatmul.f32.gmra.mxu2 %v781_v36  ;;  %v1916_v0 = vld [vmem:[#allocation2 + $0x32] sm:$0xff] }
 0x164   : > { %v1529_v36 = vld [vmem:[#allocation2 + $0x38] sm:$0xff] }
 0x165   : > { %1100 = vmatmul.f32.gmra.mxu3 %v975_v48 }
 0x166   : > { %v859_v14 = vpop.f32.mrf.mxu2  ;;  %v1247_v6 = vpop.f32.mrf.mxu0 }
 0x167   : > { %v927_v20 = vadd.f32 %v859_v14, %v698_v44  ;;  %v1917_v14 = vld [vmem:[#allocation2 + $0x3a] sm:$0xff] }
 0x168   : > { %v700_v39 = vpop.f32.mrf.mxu1  ;;  %v1053_v21 = vpop.f32.mrf.mxu3 }
 0x169   : > { %v1121_v51 = vadd.f32 %v1053_v21, %v927_v20  ;;  %1294 = vmatmul.f32.gmra.mxu0 %v339_v62  ;;  %v701_v41 = vadd.f32 %v700_v39, %v3456_v23  ;;  %v1530_v21 = vld [vmem:[#allocation2 + $0x48] sm:$0xff] }
 0x16b   : > { %v3609_v56 = vadd.f32 %v1247_v6, %v1121_v51  ;;  %747 = vmatmul.f32.gmra.mxu1 %v974_v2  ;;  %909 = vmatmul.f32.gmra.mxu2 %v782_v11  ;;  %v1724_v51 = vld [vmem:[#allocation2 + $0x49] sm:$0xff] }
 0x16d   : > { %1103 = vmatmul.f32.gmra.mxu3 %v976_v47 }
 0x16e   : > { %v862_v25 = vpop.f32.mrf.mxu2  ;;  %v1250_v57 = vpop.f32.mrf.mxu0 }
 0x16f   : > { %v928_v60 = vadd.f32 %v862_v25, %v701_v41 }
 0x170   : > { %v703_v24 = vpop.f32.mrf.mxu1  ;;  %v1056_v33 = vpop.f32.mrf.mxu3 }
 0x171   : > { %v1122_v52 = vadd.f32 %v1056_v33, %v928_v60  ;;  %1297 = vmatmul.f32.gmra.mxu0 %v340_v59  ;;  %v704_v2 = vadd.f32 %v703_v24, %v3359_v31 }
 0x173   : > { %v3614_v62 = vadd.f32 %v1250_v57, %v1122_v52  ;;  %1398 = vmatmul.f32.vlgmr.msra.gmra.mxu1 %v1333_v5  ;;  %1593 = vmatmul.f32.vlgmr.msra.gmra.mxu2 %v1528_v15  ;;  %v1918_v57 = vld [vmem:[#allocation2 + $0x4a] sm:$0xff] }
 0x174   : > { %v1531_v5 = vld [vmem:[#allocation2 + $0x50] sm:$0xff] }
 0x175   : > { %1787 = vmatmul.f32.vlgmr.msra.gmra.mxu3 %v1722_v42  ;;  %v1725_v52 = vld [vmem:[#allocation2 + $0x51] sm:$0xff] }
 0x176   : > { %v865_v23 = vpop.f32.mrf.mxu2  ;;  %v1253_v30 = vpop.f32.mrf.mxu0 }
 0x177   : > { %v929_v61 = vadd.f32 %v865_v23, %v704_v2 }
 0x178   : > { %v706_v8 = vpop.f32.mrf.mxu1  ;;  %v1059_v10 = vpop.f32.mrf.mxu3 }
 0x179   : > { %v1123_v37 = vadd.f32 %v1059_v10, %v929_v61  ;;  %1981 = vmatmul.f32.vlgmr.msra.gmra.mxu0 %v1916_v0  ;;  %v707_v48 = vadd.f32 %v706_v8, %v3374_v26  ;;  %v1532_v10 = vld [vmem:[#allocation2 + $0x60] sm:$0xff] }
 0x17b   : > { %v3617_v59 = vadd.f32 %v1253_v30, %v1123_v37  ;;  %1401 = vmatmul.f32.gmra.mxu1 %v1334_v16  ;;  %1596 = vmatmul.f32.gmra.mxu2 %v1529_v36  ;;  %v1919_v30 = vld [vmem:[#allocation2 + $0x52] sm:$0xff]  ;;  %v1726_v36 = vld [vmem:[#allocation2 + $0x61] sm:$0xff] }
 0x17d   : > { %1790 = vmatmul.f32.gmra.mxu3 %v1723_v1 }
 0x17e   : > { %v868_v31 = vpop.f32.mrf.mxu2  ;;  %v1256_v44 = vpop.f32.mrf.mxu0 }
 0x17f   : > { %v930_v6 = vadd.f32 %v868_v31, %v707_v48  ;;  %v1920_v31 = vld [vmem:[#allocation2 + $0x62] sm:$0xff] }
 0x180   : > { %v709_v20 = vpop.f32.mrf.mxu1  ;;  %v1062_v39 = vpop.f32.mrf.mxu3 }
 0x181   : > { %v1124_v11 = vadd.f32 %v1062_v39, %v930_v6  ;;  %1984 = vmatmul.f32.gmra.mxu0 %v1917_v14  ;;  %v710_v41 = vadd.f32 %v709_v20, %v3389_v49  ;;  %v1533_v20 = vld [vmem:[#allocation2 + $0x68] sm:$0xff] }
 0x183   : > { %v3620_v47 = vadd.f32 %v1256_v44, %v1124_v11  ;;  %1404 = vmatmul.f32.gmra.mxu1 %v1916_v0  ;;  %1599 = vmatmul.f32.gmra.mxu2 %v1530_v21  ;;  %v1727_v21 = vld [vmem:[#allocation2 + $0x69] sm:$0xff] }
 0x185   : > { %1793 = vmatmul.f32.gmra.mxu3 %v1724_v51 }
 0x186   : > { %v871_v25 = vpop.f32.mrf.mxu2  ;;  %v1259_v26 = vpop.f32.mrf.mxu0 }
 0x187   : > { %v931_v60 = vadd.f32 %v871_v25, %v710_v41  ;;  %v1921_v25 = vld [vmem:[#allocation2 + $0x6a] sm:$0xff] }
 0x188   : > { %v712_v24 = vpop.f32.mrf.mxu1  ;;  %v1065_v33 = vpop.f32.mrf.mxu3 }
 0x189   : > { %v1125_v15 = vadd.f32 %v1065_v33, %v931_v60  ;;  %1987 = vmatmul.f32.gmra.mxu0 %v1918_v57  ;;  %v713_v2 = vadd.f32 %v712_v24, %v3404_v46  ;;  %v1534_v24 = vld [vmem:[#allocation2 + $0x78] sm:$0xff] }
 0x18b   : > { %v3623_v42 = vadd.f32 %v1259_v26, %v1125_v15  ;;  %1407 = vmatmul.f32.gmra.mxu1 %v1917_v14  ;;  %1602 = vmatmul.f32.gmra.mxu2 %v1531_v5  ;;  %v1728_v5 = vld [vmem:[#allocation2 + $0x79] sm:$0xff] }
 0x18d   : > { %1796 = vmatmul.f32.gmra.mxu3 %v1725_v52 }
 0x18e   : > { %v874_v23 = vpop.f32.mrf.mxu2  ;;  %v1262_v49 = vpop.f32.mrf.mxu0 }
 0x18f   : > { %v932_v0 = vadd.f32 %v874_v23, %v713_v2  ;;  %v1922_v23 = vld [vmem:[#allocation2 + $0x7a] sm:$0xff] }
 0x190   : > { %v715_v61 = vpop.f32.mrf.mxu1  ;;  %v1068_v8 = vpop.f32.mrf.mxu3 }
 0x191   : > { %v1126_v16 = vadd.f32 %v1068_v8, %v932_v0  ;;  %1990 = vmatmul.f32.gmra.mxu0 %v1919_v30  ;;  %v716_v1 = vadd.f32 %v715_v61, %v3419_v17  ;;  %v1535_v61 = vld [vmem:[#allocation2 + $0x80] sm:$0xff] }
 0x193   : > { %v3626_v37 = vadd.f32 %v1262_v49, %v1126_v16  ;;  %1410 = vmatmul.f32.gmra.mxu1 %v1918_v57  ;;  %1605 = vmatmul.f32.gmra.mxu2 %v1532_v10  ;;  %v1729_v10 = vld [vmem:[#allocation2 + $0x81] sm:$0xff] }
 0x195   : > { %1799 = vmatmul.f32.gmra.mxu3 %v1726_v36 }
 0x196   : > { %v877_v48 = vpop.f32.mrf.mxu2  ;;  %v1265_v46 = vpop.f32.mrf.mxu0 }
 0x197   : > { %v933_v44 = vadd.f32 %v877_v48, %v716_v1  ;;  %v1923_v48 = vld [vmem:[#allocation2 + $0x82] sm:$0xff] }
 0x198   : > { %v718_v14 = vpop.f32.mrf.mxu1  ;;  %v1071_v6 = vpop.f32.mrf.mxu3 }
 0x199   : > { %v1127_v39 = vadd.f32 %v1071_v6, %v933_v44  ;;  %1993 = vmatmul.f32.gmra.mxu0 %v1920_v31  ;;  %v719_v51 = vadd.f32 %v718_v14, %v3434_v13  ;;  %v1536_v14 = vld [vmem:[#allocation2 + $0x90] sm:$0xff] }
 0x19b   : > { %v3629_v11 = vadd.f32 %v1265_v46, %v1127_v39  ;;  %1413 = vmatmul.f32.gmra.mxu1 %v1919_v30  ;;  %1608 = vmatmul.f32.gmra.mxu2 %v1533_v20  ;;  %v1730_v20 = vld [vmem:[#allocation2 + $0x91] sm:$0xff] }
 0x19d   : > { %1802 = vmatmul.f32.gmra.mxu3 %v1727_v21 }
 0x19e   : > { %v880_v41 = vpop.f32.mrf.mxu2  ;;  %v1268_v17 = vpop.f32.mrf.mxu0 }
 0x19f   : > { %v934_v26 = vadd.f32 %v880_v41, %v719_v51  ;;  %v1924_v41 = vld [vmem:[#allocation2 + $0x92] sm:$0xff] }
 0x1a0   : > { %v721_v57 = vpop.f32.mrf.mxu1  ;;  %v1074_v60 = vpop.f32.mrf.mxu3 }
 0x1a1   : > { %v1128_v33 = vadd.f32 %v1074_v60, %v934_v26  ;;  %1996 = vmatmul.f32.gmra.mxu0 %v1921_v25  ;;  %v722_v52 = vadd.f32 %v721_v57, %v3449_v18  ;;  %v1537_v57 = vld [vmem:[#allocation2 + $0x98] sm:$0xff] }
 0x1a3   : > { %v3632_v15 = vadd.f32 %v1268_v17, %v1128_v33  ;;  %1416 = vmatmul.f32.gmra.mxu1 %v1920_v31  ;;  %1611 = vmatmul.f32.gmra.mxu2 %v1534_v24  ;;  %v1731_v24 = vld [vmem:[#allocation2 + $0x99] sm:$0xff] }
 0x1a5   : > { %1805 = vmatmul.f32.gmra.mxu3 %v1728_v5 }
 0x1a6   : > { %v883_v2 = vpop.f32.mrf.mxu2  ;;  %v1271_v13 = vpop.f32.mrf.mxu0 }
 0x1a7   : > { %v935_v49 = vadd.f32 %v883_v2, %v722_v52  ;;  %v1925_v2 = vld [vmem:[#allocation2 + $0x9a] sm:$0xff] }
 0x1a8   : > { %v724_v30 = vpop.f32.mrf.mxu1  ;;  %v1077_v0 = vpop.f32.mrf.mxu3 }
 0x1a9   : > { %v1129_v8 = vadd.f32 %v1077_v0, %v935_v49  ;;  %1999 = vmatmul.f32.gmra.mxu0 %v1922_v23  ;;  %v725_v36 = vadd.f32 %v724_v30, %v3463_v58  ;;  %v1538_v30 = vld [vmem:[#allocation2 + $0xa8] sm:$0xff] }
 0x1ab   : > { %v3635_v16 = vadd.f32 %v1271_v13, %v1129_v8  ;;  %1419 = vmatmul.f32.gmra.mxu1 %v1921_v25  ;;  %1614 = vmatmul.f32.gmra.mxu2 %v1535_v61  ;;  %v1732_v61 = vld [vmem:[#allocation2 + $0xa9] sm:$0xff] }
 0x1ad   : > { %1808 = vmatmul.f32.gmra.mxu3 %v1729_v10 }
 0x1ae   : > { %v886_v1 = vpop.f32.mrf.mxu2  ;;  %v1274_v18 = vpop.f32.mrf.mxu0 }
 0x1af   : > { %v936_v46 = vadd.f32 %v886_v1, %v725_v36  ;;  %v1926_v1 = vld [vmem:[#allocation2 + $0xaa] sm:$0xff] }
 0x1b0   : > { %v727_v31 = vpop.f32.mrf.mxu1  ;;  %v1080_v44 = vpop.f32.mrf.mxu3 }
 0x1b1   : > { %v1130_v6 = vadd.f32 %v1080_v44, %v936_v46  ;;  %2002 = vmatmul.f32.gmra.mxu0 %v1923_v48  ;;  %v728_v21 = vadd.f32 %v727_v31, %v3368_v7  ;;  %v1539_v31 = vld [vmem:[#allocation2 + $0xb0] sm:$0xff] }
 0x1b3   : > { %v3638_v39 = vadd.f32 %v1274_v18, %v1130_v6  ;;  %1422 = vmatmul.f32.gmra.mxu1 %v1922_v23  ;;  %1617 = vmatmul.f32.gmra.mxu2 %v1536_v14  ;;  %v1733_v14 = vld [vmem:[#allocation2 + $0xb1] sm:$0xff] }
 0x1b5   : > { %1811 = vmatmul.f32.gmra.mxu3 %v1730_v20 }
 0x1b6   : > { %v889_v51 = vpop.f32.mrf.mxu2  ;;  %v1277_v58 = vpop.f32.mrf.mxu0 }
 0x1b7   : > { %v937_v17 = vadd.f32 %v889_v51, %v728_v21  ;;  %v1927_v51 = vld [vmem:[#allocation2 + $0xb2] sm:$0xff] }
 0x1b8   : > { %v730_v25 = vpop.f32.mrf.mxu1  ;;  %v1083_v26 = vpop.f32.mrf.mxu3 }
 0x1b9   : > { %v1131_v60 = vadd.f32 %v1083_v26, %v937_v17  ;;  %2005 = vmatmul.f32.gmra.mxu0 %v1924_v41  ;;  %v731_v5 = vadd.f32 %v730_v25, %v3380_v40  ;;  %v1540_v25 = vld [vmem:[#allocation2 + $0xc0] sm:$0xff] }
 0x1bb   : > { %v3641_v33 = vadd.f32 %v1277_v58, %v1131_v60  ;;  %1425 = vmatmul.f32.gmra.mxu1 %v1923_v48  ;;  %1620 = vmatmul.f32.gmra.mxu2 %v1537_v57  ;;  %v1734_v57 = vld [vmem:[#allocation2 + $0xc1] sm:$0xff] }
 0x1bd   : > { %1814 = vmatmul.f32.gmra.mxu3 %v1731_v24 }
 0x1be   : > { %v892_v52 = vpop.f32.mrf.mxu2  ;;  %v1280_v7 = vpop.f32.mrf.mxu0 }
 0x1bf   : > { %v938_v13 = vadd.f32 %v892_v52, %v731_v5  ;;  %v1928_v52 = vld [vmem:[#allocation2 + $0xc2] sm:$0xff] }
 0x1c0   : > { %v733_v23 = vpop.f32.mrf.mxu1  ;;  %v1086_v49 = vpop.f32.mrf.mxu3 }
 0x1c1   : > { %v1132_v0 = vadd.f32 %v1086_v49, %v938_v13  ;;  %2008 = vmatmul.f32.gmra.mxu0 %v1925_v2  ;;  %v734_v10 = vadd.f32 %v733_v23, %v3398_v54  ;;  %v1541_v23 = vld [vmem:[#allocation2 + $0xc8] sm:$0xff] }
 0x1c3   : > { %v3644_v8 = vadd.f32 %v1280_v7, %v1132_v0  ;;  %1428 = vmatmul.f32.gmra.mxu1 %v1924_v41  ;;  %1623 = vmatmul.f32.gmra.mxu2 %v1538_v30  ;;  %v1735_v30 = vld [vmem:[#allocation2 + $0xc9] sm:$0xff] }
 0x1c5   : > { %1817 = vmatmul.f32.gmra.mxu3 %v1732_v61 }
 0x1c6   : > { %v895_v36 = vpop.f32.mrf.mxu2  ;;  %v1283_v40 = vpop.f32.mrf.mxu0 }
 0x1c7   : > { %v939_v18 = vadd.f32 %v895_v36, %v734_v10  ;;  %v1929_v36 = vld [vmem:[#allocation2 + $0xca] sm:$0xff] }
 0x1c8   : > { %v736_v48 = vpop.f32.mrf.mxu1  ;;  %v1089_v46 = vpop.f32.mrf.mxu3 }
 0x1c9   : > { %v1133_v44 = vadd.f32 %v1089_v46, %v939_v18  ;;  %2011 = vmatmul.f32.gmra.mxu0 %v1926_v1  ;;  %v737_v20 = vadd.f32 %v736_v48, %v3410_v3  ;;  %v1542_v48 = vld [vmem:[#allocation2 + $0xd8] sm:$0xff] }
 0x1cb   : > { %v3647_v6 = vadd.f32 %v1283_v40, %v1133_v44  ;;  %1431 = vmatmul.f32.gmra.mxu1 %v1925_v2  ;;  %1626 = vmatmul.f32.gmra.mxu2 %v1539_v31  ;;  %v1736_v31 = vld [vmem:[#allocation2 + $0xd9] sm:$0xff] }
 0x1cd   : > { %1820 = vmatmul.f32.gmra.mxu3 %v1733_v14 }
 0x1ce   : > { %v898_v21 = vpop.f32.mrf.mxu2  ;;  %v1286_v54 = vpop.f32.mrf.mxu0 }
 0x1cf   : > { %v940_v58 = vadd.f32 %v898_v21, %v737_v20  ;;  %v1930_v21 = vld [vmem:[#allocation2 + $0xda] sm:$0xff] }
 0x1d0   : > { %v739_v41 = vpop.f32.mrf.mxu1  ;;  %v1092_v17 = vpop.f32.mrf.mxu3 }
 0x1d1   : > { %v1134_v26 = vadd.f32 %v1092_v17, %v940_v58  ;;  %2014 = vmatmul.f32.gmra.mxu0 %v1927_v51  ;;  %v740_v24 = vadd.f32 %v739_v41, %v3428_v9  ;;  %v1543_v41 = vld [vmem:[#allocation2 + $0xe0] sm:$0xff] }
 0x1d3   : > { %v3650_v60 = vadd.f32 %v1286_v54, %v1134_v26  ;;  %1434 = vmatmul.f32.gmra.mxu1 %v1926_v1  ;;  %1629 = vmatmul.f32.gmra.mxu2 %v1540_v25  ;;  %v1737_v25 = vld [vmem:[#allocation2 + $0xe1] sm:$0xff] }
 0x1d5   : > { %1823 = vmatmul.f32.gmra.mxu3 %v1734_v57 }
 0x1d6   : > { %v901_v5 = vpop.f32.mrf.mxu2  ;;  %v1289_v3 = vpop.f32.mrf.mxu0 }
 0x1d7   : > { %v941_v7 = vadd.f32 %v901_v5, %v740_v24  ;;  %v1931_v5 = vld [vmem:[#allocation2 + $0xe2] sm:$0xff] }
 0x1d8   : > { %v742_v2 = vpop.f32.mrf.mxu1  ;;  %v1095_v13 = vpop.f32.mrf.mxu3 }
 0x1d9   : > { %v1135_v49 = vadd.f32 %v1095_v13, %v941_v7  ;;  %2017 = vmatmul.f32.gmra.mxu0 %v1928_v52  ;;  %v743_v61 = vadd.f32 %v742_v2, %v3440_v32  ;;  %v1544_v2 = vld [vmem:[#allocation2 + $0xf0] sm:$0xff] }
 0x1db   : > { %v3653_v0 = vadd.f32 %v1289_v3, %v1135_v49  ;;  %1437 = vmatmul.f32.gmra.mxu1 %v1927_v51  ;;  %1632 = vmatmul.f32.gmra.mxu2 %v1541_v23  ;;  %v1738_v23 = vld [vmem:[#allocation2 + $0xf1] sm:$0xff] }
 0x1dd   : > { %1826 = vmatmul.f32.gmra.mxu3 %v1735_v30 }
 0x1de   : > { %v904_v10 = vpop.f32.mrf.mxu2  ;;  %v1292_v9 = vpop.f32.mrf.mxu0 }
 0x1df   : > { %v942_v40 = vadd.f32 %v904_v10, %v743_v61  ;;  %v1932_v10 = vld [vmem:[#allocation2 + $0xf2] sm:$0xff] }
 0x1e0   : > { %v745_v1 = vpop.f32.mrf.mxu1  ;;  %v1098_v18 = vpop.f32.mrf.mxu3 }
 0x1e1   : > { %v1136_v46 = vadd.f32 %v1098_v18, %v942_v40  ;;  %2020 = vmatmul.f32.gmra.mxu0 %v1929_v36  ;;  %v746_v14 = vadd.f32 %v745_v1, %v3458_v28  ;;  %v1545_v1 = vld [vmem:[#allocation2 + $0xf8] sm:$0xff] }
 0x1e3   : > { %v3656_v44 = vadd.f32 %v1292_v9, %v1136_v46  ;;  %1440 = vmatmul.f32.gmra.mxu1 %v1928_v52  ;;  %1635 = vmatmul.f32.gmra.mxu2 %v1542_v48  ;;  %v1739_v48 = vld [vmem:[#allocation2 + $0xf9] sm:$0xff] }
 0x1e5   : > { %1829 = vmatmul.f32.gmra.mxu3 %v1736_v31 }
 0x1e6   : > { %v907_v20 = vpop.f32.mrf.mxu2  ;;  %v1295_v32 = vpop.f32.mrf.mxu0 }
 0x1e7   : > { %v943_v54 = vadd.f32 %v907_v20, %v746_v14  ;;  %v1933_v20 = vld [vmem:[#allocation2 + $0xfa] sm:$0xff] }
 0x1e8   : > { %v748_v51 = vpop.f32.mrf.mxu1  ;;  %v1101_v58 = vpop.f32.mrf.mxu3 }
 0x1e9   : > { %v1137_v17 = vadd.f32 %v1101_v58, %v943_v54  ;;  %2023 = vmatmul.f32.gmra.mxu0 %v1930_v21  ;;  %v749_v57 = vadd.f32 %v748_v51, %v3467_v35  ;;  %v1546_v51 = vld [vmem:[#allocation2 + $0x108] sm:$0xff] }
 0x1eb   : > { %v3659_v26 = vadd.f32 %v1295_v32, %v1137_v17  ;;  %1443 = vmatmul.f32.gmra.mxu1 %v1929_v36  ;;  %1638 = vmatmul.f32.gmra.mxu2 %v1543_v41  ;;  %v1740_v41 = vld [vmem:[#allocation2 + $0x109] sm:$0xff] }
 0x1ed   : > { %1832 = vmatmul.f32.gmra.mxu3 %v1737_v25 }
 0x1ee   : > { %v910_v24 = vpop.f32.mrf.mxu2  ;;  %v1298_v28 = vpop.f32.mrf.mxu0 }
 0x1ef   : > { %v944_v3 = vadd.f32 %v910_v24, %v749_v57 }
 0x1f0   : > { %v1104_v52 = vpop.f32.mrf.mxu3  ;;  %v1399_v7 = vpop.f32.mrf.mxu1 }
 0x1f1   : > { %v1138_v13 = vadd.f32 %v1104_v52, %v944_v3  ;;  %2026 = vmatmul.f32.gmra.mxu0 %v1931_v5  ;;  %v1495_v30 = vadd.f32 %v1399_v7, %v3479_v12  ;;  %v1934_v3 = vld [vmem:[#allocation2 + $0x10a] sm:$0xff] }
 0x1f3   : > { %v3662_v49 = vadd.f32 %v1298_v28, %v1138_v13  ;;  %1446 = vmatmul.f32.gmra.mxu1 %v1930_v21  ;;  %1641 = vmatmul.f32.gmra.mxu2 %v1544_v2 }
 0x1f5   : > { %1835 = vmatmul.f32.gmra.mxu3 %v1738_v23  ;;  %v1547_v23 = vld [vmem:[#allocation2 + $0x110] sm:$0xff] }
 0x1f6   : > { %v1594_v35 = vpop.f32.mrf.mxu2  ;;  %v1982_v61 = vpop.f32.mrf.mxu0 }
 0x1f7   : > { %v1690_v9 = vadd.f32 %v1594_v35, %v1495_v30  ;;  %v1741_v35 = vld [vmem:[#allocation2 + $0x111] sm:$0xff] }
 0x1f8   : > { %v1402_v36 = vpop.f32.mrf.mxu1  ;;  %v1788_v40 = vpop.f32.mrf.mxu3 }
 0x1f9   : > { %v1884_v18 = vadd.f32 %v1788_v40, %v1690_v9  ;;  %2029 = vmatmul.f32.gmra.mxu0 %v1932_v10  ;;  %v1496_v12 = vadd.f32 %v1402_v36, %v3486_v53 }
 0x1fb   : > { %v2078_v46 = vadd.f32 %v1982_v61, %v1884_v18  ;;  %1449 = vmatmul.f32.gmra.mxu1 %v1931_v5  ;;  %1644 = vmatmul.f32.gmra.mxu2 %v1545_v1  ;;  %v1935_v1 = vld [vmem:[#allocation2 + $0x112] sm:$0xff] }
 0x1fd   : > { %2110 = vst [vmem:[%s3670_s6] sm:$0xff] %v2078_v46  ;;  %1838 = vmatmul.f32.gmra.mxu3 %v1739_v48  ;;  %v2180_v25 = vmul.f32 %v2078_v46, %v2078_v46 }
 0x1fe   : > { %v1597_v31 = vpop.f32.mrf.mxu2  ;;  %v1985_v14 = vpop.f32.mrf.mxu0 }
 0x1ff   : > { %v1691_v32 = vadd.f32 %v1597_v31, %v1496_v12  ;;  %v1548_v31 = vld [vmem:[#allocation2 + $0x120] sm:$0xff] }
 0x200   : > { %v1405_v21 = vpop.f32.mrf.mxu1  ;;  %v1791_v54 = vpop.f32.mrf.mxu3 }
 0x201   : > { %v1885_v58 = vadd.f32 %v1791_v54, %v1691_v32  ;;  %2032 = vmatmul.f32.gmra.mxu0 %v1933_v20  ;;  %v1497_v57 = vadd.f32 %v1405_v21, %v3499_v45  ;;  %v1742_v32 = vld [vmem:[#allocation2 + $0x121] sm:$0xff] }
 0x203   : > { %v2079_v17 = vadd.f32 %v1985_v14, %v1885_v58  ;;  %1452 = vmatmul.f32.gmra.mxu1 %v1932_v10  ;;  %1647 = vmatmul.f32.gmra.mxu2 %v1546_v51 }
 0x205   : > { %2111 = vst [vmem:[%s3670_s6 + $0x8] sm:$0xff] %v2079_v17  ;;  %v2142_v53 = vadd.f32 %v2079_v17, %v2078_v46  ;;  %v2181_v24 = vmul.f32 %v2079_v17, %v2079_v17  ;;  %1841 = vmatmul.f32.gmra.mxu3 %v1740_v41  ;;  %v1936_v41 = vld [vmem:[#allocation2 + $0x122] sm:$0xff] }
 0x206   : > { %v1600_v28 = vpop.f32.mrf.mxu2  ;;  %v1988_v5 = vpop.f32.mrf.mxu0 }
 0x207   : > { %v2212_v52 = vadd.f32 %v2181_v24, %v2180_v25  ;;  %v1692_v7 = vadd.f32 %v1600_v28, %v1497_v57  ;;  %v1549_v24 = vld [vmem:[#allocation2 + $0x128] sm:$0xff] }
 0x208   : > { %v1408_v2 = vpop.f32.mrf.mxu1  ;;  %v1794_v13 = vpop.f32.mrf.mxu3 }
 0x209   : > { %v1886_v30 = vadd.f32 %v1794_v13, %v1692_v7  ;;  %2035 = vmatmul.f32.gmra.mxu0 %v1934_v3  ;;  %v1498_v45 = vadd.f32 %v1408_v2, %v3506_v34 }
 0x20b   : > { %v2080_v61 = vadd.f32 %v1988_v5, %v1886_v30  ;;  %1455 = vmatmul.f32.gmra.mxu1 %v1933_v20  ;;  %1650 = vmatmul.f32.gmra.mxu2 %v1547_v23  ;;  %v1743_v5 = vld [vmem:[#allocation2 + $0x129] sm:$0xff] }
 0x20c   : > { %v1937_v23 = vld [vmem:[#allocation2 + $0x12a] sm:$0xff] }
 0x20d   : > { %2112 = vst [vmem:[%s3670_s6 + $0x10] sm:$0xff] %v2080_v61  ;;  %v2143_v10 = vadd.f32 %v2142_v53, %v2080_v61  ;;  %v2182_v9 = vmul.f32 %v2080_v61, %v2080_v61  ;;  %1844 = vmatmul.f32.gmra.mxu3 %v1741_v35 }
 0x20e   : > { %v1603_v36 = vpop.f32.mrf.mxu2  ;;  %v1991_v40 = vpop.f32.mrf.mxu0 }
 0x20f   : > { %v2213_v18 = vadd.f32 %v2212_v52, %v2182_v9  ;;  %v1693_v48 = vadd.f32 %v1603_v36, %v1498_v45  ;;  %v1744_v36 = vld [vmem:[#allocation2 + $0x139] sm:$0xff] }
 0x210   : > { %v1411_v46 = vpop.f32.mrf.mxu1  ;;  %v1797_v12 = vpop.f32.mrf.mxu3 }
 0x211   : > { %v1887_v14 = vadd.f32 %v1797_v12, %v1693_v48  ;;  %2038 = vmatmul.f32.gmra.mxu0 %v1935_v1  ;;  %v1499_v34 = vadd.f32 %v1411_v46, %v3519_v43  ;;  %v1938_v12 = vld [vmem:[#allocation2 + $0x13a] sm:$0xff] }
 0x213   : > { %v2081_v20 = vadd.f32 %v1991_v40, %v1887_v14  ;;  %1458 = vmatmul.f32.gmra.mxu1 %v1934_v3  ;;  %1653 = vmatmul.f32.gmra.mxu2 %v1548_v31 }
 0x215   : > { %2113 = vst [vmem:[%s3670_s6 + $0x18] sm:$0xff] %v2081_v20  ;;  %v2144_v21 = vadd.f32 %v2143_v10, %v2081_v20  ;;  %v2183_v54 = vmul.f32 %v2081_v20, %v2081_v20  ;;  %1847 = vmatmul.f32.gmra.mxu3 %v1742_v32  ;;  %v1550_v10 = vld [vmem:[#allocation2 + $0x138] sm:$0xff] }
 0x216   : > { %v1606_v51 = vpop.f32.mrf.mxu2  ;;  %v1994_v58 = vpop.f32.mrf.mxu0 }
 0x217   : > { %v2214_v17 = vadd.f32 %v2213_v18, %v2183_v54  ;;  %v1694_v25 = vadd.f32 %v1606_v51, %v1499_v34  ;;  %v1551_v34 = vld [vmem:[#allocation2 + $0x140] sm:$0xff] }
 0x218   : > { %v1414_v57 = vpop.f32.mrf.mxu1  ;;  %v1800_v53 = vpop.f32.mrf.mxu3  ;;  %v1745_v54 = vld [vmem:[#allocation2 + $0x141] sm:$0xff] }
 0x219   : > { %v1888_v28 = vadd.f32 %v1800_v53, %v1694_v25  ;;  %2041 = vmatmul.f32.gmra.mxu0 %v1936_v41  ;;  %v1500_v43 = vadd.f32 %v1414_v57, %v3526_v50  ;;  %v1939_v57 = vld [vmem:[#allocation2 + $0x142] sm:$0xff] }
 0x21b   : > { %v2082_v3 = vadd.f32 %v1994_v58, %v1888_v28  ;;  %1461 = vmatmul.f32.gmra.mxu1 %v1935_v1  ;;  %1656 = vmatmul.f32.gmra.mxu2 %v1549_v24 }
 0x21d   : > { %2114 = vst [vmem:[%s3670_s6 + $0x20] sm:$0xff] %v2082_v3  ;;  %v2145_v52 = vadd.f32 %v2144_v21, %v2082_v3  ;;  %v2184_v7 = vmul.f32 %v2082_v3, %v2082_v3  ;;  %1850 = vmatmul.f32.gmra.mxu3 %v1743_v5  ;;  %v1552_v3 = vld [vmem:[#allocation2 + $0x150] sm:$0xff] }
 0x21e   : > { %v1609_v2 = vpop.f32.mrf.mxu2  ;;  %v1997_v13 = vpop.f32.mrf.mxu0 }
 0x21f   : > { %v2215_v30 = vadd.f32 %v2214_v17, %v2184_v7  ;;  %v1695_v35 = vadd.f32 %v1609_v2, %v1500_v43 }
 0x220   : > { %v1417_v61 = vpop.f32.mrf.mxu1  ;;  %v1803_v45 = vpop.f32.mrf.mxu3 }
 0x221   : > { %v1889_v9 = vadd.f32 %v1803_v45, %v1695_v35  ;;  %2044 = vmatmul.f32.gmra.mxu0 %v1937_v23  ;;  %v1501_v50 = vadd.f32 %v1417_v61, %v3538_v22  ;;  %v1940_v35 = vld [vmem:[#allocation2 + $0x152] sm:$0xff] }
 0x223   : > { %v2083_v40 = vadd.f32 %v1997_v13, %v1889_v9  ;;  %1464 = vmatmul.f32.gmra.mxu1 %v1936_v41  ;;  %1659 = vmatmul.f32.gmra.mxu2 %v1550_v10 }
 0x225   : > { %2115 = vst [vmem:[%s3670_s6 + $0x28] sm:$0xff] %v2083_v40  ;;  %v2146_v1 = vadd.f32 %v2145_v52, %v2083_v40  ;;  %v2185_v18 = vmul.f32 %v2083_v40, %v2083_v40  ;;  %1853 = vmatmul.f32.gmra.mxu3 %v1744_v36  ;;  %v1746_v52 = vld [vmem:[#allocation2 + $0x151] sm:$0xff] }
 0x226   : > { %v1612_v48 = vpop.f32.mrf.mxu2  ;;  %v2000_v46 = vpop.f32.mrf.mxu0  ;;  %v1553_v36 = vld [vmem:[#allocation2 + $0x158] sm:$0xff] }
 0x227   : > { %v2216_v31 = vadd.f32 %v2215_v30, %v2185_v18  ;;  %v1696_v14 = vadd.f32 %v1612_v48, %v1501_v50  ;;  %v1747_v50 = vld [vmem:[#allocation2 + $0x159] sm:$0xff] }
 0x228   : > { %v1420_v32 = vpop.f32.mrf.mxu1  ;;  %v1806_v20 = vpop.f32.mrf.mxu3 }
 0x229   : > { %v1890_v21 = vadd.f32 %v1806_v20, %v1696_v14  ;;  %2047 = vmatmul.f32.gmra.mxu0 %v1938_v12  ;;  %v1502_v22 = vadd.f32 %v1420_v32, %v3544_v19 }
 0x22b   : > { %v2084_v51 = vadd.f32 %v2000_v46, %v1890_v21  ;;  %1467 = vmatmul.f32.gmra.mxu1 %v1937_v23  ;;  %1662 = vmatmul.f32.gmra.mxu2 %v1551_v34  ;;  %v1554_v21 = vld [vmem:[#allocation2 + $0x168] sm:$0xff] }
 0x22d   : > { %2116 = vst [vmem:[%s3670_s6 + $0x30] sm:$0xff] %v2084_v51  ;;  %v2147_v58 = vadd.f32 %v2146_v1, %v2084_v51  ;;  %v2186_v41 = vmul.f32 %v2084_v51, %v2084_v51  ;;  %1856 = vmatmul.f32.gmra.mxu3 %v1745_v54  ;;  %v1748_v51 = vld [vmem:[#allocation2 + $0x169] sm:$0xff] }
 0x22e   : > { %v1615_v17 = vpop.f32.mrf.mxu2  ;;  %v2003_v25 = vpop.f32.mrf.mxu0 }
 0x22f   : > { %v2217_v53 = vadd.f32 %v2216_v31, %v2186_v41  ;;  %v1697_v24 = vadd.f32 %v1615_v17, %v1502_v22  ;;  %v1941_v31 = vld [vmem:[#allocation2 + $0x15a] sm:$0xff] }
 0x230   : > { %v1423_v28 = vpop.f32.mrf.mxu1  ;;  %v1809_v5 = vpop.f32.mrf.mxu3 }
 0x231   : > { %v1891_v43 = vadd.f32 %v1809_v5, %v1697_v24  ;;  %2050 = vmatmul.f32.gmra.mxu0 %v1939_v57  ;;  %v1503_v19 = vadd.f32 %v1423_v28, %v3565_v29 }
 0x233   : > { %v2085_v7 = vadd.f32 %v2003_v25, %v1891_v43  ;;  %1470 = vmatmul.f32.gmra.mxu1 %v1938_v12  ;;  %1665 = vmatmul.f32.gmra.mxu2 %v1552_v3  ;;  %v1555_v3 = vld [vmem:[#allocation2 + $0x170] sm:$0xff] }
 0x235   : > { %2117 = vst [vmem:[%s3670_s6 + $0x38] sm:$0xff] %v2085_v7  ;;  %v2148_v2 = vadd.f32 %v2147_v58, %v2085_v7  ;;  %v2187_v13 = vmul.f32 %v2085_v7, %v2085_v7  ;;  %1859 = vmatmul.f32.gmra.mxu3 %v1746_v52  ;;  %v1749_v52 = vld [vmem:[#allocation2 + $0x171] sm:$0xff] }
 0x236   : > { %v1618_v23 = vpop.f32.mrf.mxu2  ;;  %v2006_v30 = vpop.f32.mrf.mxu0 }
 0x237   : > { %v2218_v61 = vadd.f32 %v2217_v53, %v2187_v13  ;;  %v1698_v45 = vadd.f32 %v1618_v23, %v1503_v19 }
 0x238   : > { %v1426_v10 = vpop.f32.mrf.mxu1  ;;  %v1812_v9 = vpop.f32.mrf.mxu3 }
 0x239   : > { %v1892_v40 = vadd.f32 %v1812_v9, %v1698_v45  ;;  %2053 = vmatmul.f32.gmra.mxu0 %v1940_v35  ;;  %v1504_v29 = vadd.f32 %v1426_v10, %v3577_v55  ;;  %v1556_v9 = vld [vmem:[#allocation2 + $0x180] sm:$0xff] }
 0x23b   : > { %v2086_v1 = vadd.f32 %v2006_v30, %v1892_v40  ;;  %1473 = vmatmul.f32.gmra.mxu1 %v1939_v57  ;;  %1668 = vmatmul.f32.gmra.mxu2 %v1553_v36  ;;  %v1942_v57 = vld [vmem:[#allocation2 + $0x16a] sm:$0xff]  ;;  %v1943_v30 = vld [vmem:[#allocation2 + $0x172] sm:$0xff]  ;;  %v1750_v40 = vld [vmem:[#allocation2 + $0x181] sm:$0xff] }
 0x23d   : > { %2118 = vst [vmem:[%s3670_s6 + $0x40] sm:$0xff] %v2086_v1  ;;  %v2149_v18 = vadd.f32 %v2148_v2, %v2086_v1  ;;  %v2188_v48 = vmul.f32 %v2086_v1, %v2086_v1  ;;  %1862 = vmatmul.f32.gmra.mxu3 %v1747_v50 }
 0x23e   : > { %v1621_v46 = vpop.f32.mrf.mxu2  ;;  %v2009_v12 = vpop.f32.mrf.mxu0 }
 0x23f   : > { %v2219_v14 = vadd.f32 %v2218_v61, %v2188_v48  ;;  %v1699_v32 = vadd.f32 %v1621_v46, %v1504_v29  ;;  %v1944_v46 = vld [vmem:[#allocation2 + $0x182] sm:$0xff] }
 0x240   : > { %v1429_v20 = vpop.f32.mrf.mxu1  ;;  %v1815_v34 = vpop.f32.mrf.mxu3 }
 0x241   : > { %v1893_v54 = vadd.f32 %v1815_v34, %v1699_v32  ;;  %2056 = vmatmul.f32.gmra.mxu0 %v1941_v31  ;;  %v1505_v55 = vadd.f32 %v1429_v20, %v3592_v38  ;;  %v1557_v20 = vld [vmem:[#allocation2 + $0x188] sm:$0xff] }
 0x243   : > { %v2087_v22 = vadd.f32 %v2009_v12, %v1893_v54  ;;  %1476 = vmatmul.f32.gmra.mxu1 %v1940_v35  ;;  %1671 = vmatmul.f32.gmra.mxu2 %v1554_v21  ;;  %v1751_v21 = vld [vmem:[#allocation2 + $0x189] sm:$0xff] }
 0x245   : > { %2119 = vst [vmem:[%s3670_s6 + $0x48] sm:$0xff] %v2087_v22  ;;  %v2150_v58 = vadd.f32 %v2149_v18, %v2087_v22  ;;  %v2189_v41 = vmul.f32 %v2087_v22, %v2087_v22  ;;  %1865 = vmatmul.f32.gmra.mxu3 %v1748_v51 }
 0x246   : > { %v1624_v17 = vpop.f32.mrf.mxu2  ;;  %v2012_v25 = vpop.f32.mrf.mxu0 }
 0x247   : > { %v2220_v53 = vadd.f32 %v2219_v14, %v2189_v41  ;;  %v1700_v24 = vadd.f32 %v1624_v17, %v1505_v55  ;;  %v1945_v41 = vld [vmem:[#allocation2 + $0x18a] sm:$0xff] }
 0x248   : > { %v1432_v28 = vpop.f32.mrf.mxu1  ;;  %v1818_v5 = vpop.f32.mrf.mxu3 }
 0x249   : > { %v1894_v43 = vadd.f32 %v1818_v5, %v1700_v24  ;;  %2059 = vmatmul.f32.gmra.mxu0 %v1942_v57  ;;  %v1506_v38 = vadd.f32 %v1432_v28, %v3598_v27  ;;  %v1752_v28 = vld [vmem:[#allocation2 + $0x199] sm:$0xff] }
 0x24b   : > { %v2088_v7 = vadd.f32 %v2012_v25, %v1894_v43  ;;  %1479 = vmatmul.f32.gmra.mxu1 %v1941_v31  ;;  %1674 = vmatmul.f32.gmra.mxu2 %v1555_v3  ;;  %v2593_v3 = vld [vmem:[#allocation2] sm:$0xff] }
 0x24d   : > { %2120 = vst [vmem:[%s3670_s6 + $0x50] sm:$0xff] %v2088_v7  ;;  %v2151_v19 = vadd.f32 %v2150_v58, %v2088_v7  ;;  %v2190_v2 = vmul.f32 %v2088_v7, %v2088_v7  ;;  %1868 = vmatmul.f32.gmra.mxu3 %v1749_v52 }
 0x24e   : > { %v1627_v13 = vpop.f32.mrf.mxu2  ;;  %v2015_v23 = vpop.f32.mrf.mxu0 }
 0x24f   : > { %v2221_v35 = vadd.f32 %v2220_v53, %v2190_v2  ;;  %v1701_v61 = vadd.f32 %v1627_v13, %v1506_v38 }
 0x250   : > { %v1435_v45 = vpop.f32.mrf.mxu1  ;;  %v1821_v10 = vpop.f32.mrf.mxu3 }
 0x251   : > { %v1895_v36 = vadd.f32 %v1821_v10, %v1701_v61  ;;  %2062 = vmatmul.f32.gmra.mxu0 %v1943_v30  ;;  %v1507_v27 = vadd.f32 %v1435_v45, %v3601_v4  ;;  %v1753_v61 = vld [vmem:[#allocation2 + $0x1a1] sm:$0xff] }
 0x253   : > { %v2089_v50 = vadd.f32 %v2015_v23, %v1895_v36  ;;  %1482 = vmatmul.f32.gmra.mxu1 %v1942_v57  ;;  %1677 = vmatmul.f32.gmra.mxu2 %v1556_v9 }
 0x255   : > { %2121 = vst [vmem:[%s3670_s6 + $0x58] sm:$0xff] %v2089_v50  ;;  %v2152_v1 = vadd.f32 %v2151_v19, %v2089_v50  ;;  %v2191_v29 = vmul.f32 %v2089_v50, %v2089_v50  ;;  %1871 = vmatmul.f32.gmra.mxu3 %v1750_v40  ;;  %v1946_v19 = vld [vmem:[#allocation2 + $0x19a] sm:$0xff]  ;;  %v1947_v50 = vld [vmem:[#allocation2 + $0x1a2] sm:$0xff] }
 0x256   : > { %v1630_v18 = vpop.f32.mrf.mxu2  ;;  %v2018_v48 = vpop.f32.mrf.mxu0 }
 0x257   : > { %v2222_v12 = vadd.f32 %v2221_v35, %v2191_v29  ;;  %v1702_v31 = vadd.f32 %v1630_v18, %v1507_v27 }
 0x258   : > { %v1438_v14 = vpop.f32.mrf.mxu1  ;;  %v1824_v32 = vpop.f32.mrf.mxu3 }
 0x259   : > { %v1896_v34 = vadd.f32 %v1824_v32, %v1702_v31  ;;  %2065 = vmatmul.f32.gmra.mxu0 %v1944_v46  ;;  %v1508_v4 = vadd.f32 %v1438_v14, %v3604_v63 }
 0x25b   : > { %v2090_v54 = vadd.f32 %v2018_v48, %v1896_v34  ;;  %1485 = vmatmul.f32.gmra.mxu1 %v1943_v30  ;;  %1680 = vmatmul.f32.gmra.mxu2 %v1557_v20 }
 0x25d   : > { %2122 = vst [vmem:[%s3670_s6 + $0x60] sm:$0xff] %v2090_v54  ;;  %v2153_v51 = vadd.f32 %v2152_v1, %v2090_v54  ;;  %v2192_v22 = vmul.f32 %v2090_v54, %v2090_v54  ;;  %1874 = vmatmul.f32.gmra.mxu3 %v1751_v21 }
 0x25e   : > { %v1633_v55 = vpop.f32.mrf.mxu2  ;;  %v2021_v58 = vpop.f32.mrf.mxu0 }
 0x25f   : > { %v2223_v17 = vadd.f32 %v2222_v12, %v2192_v22  ;;  %v1703_v25 = vadd.f32 %v1633_v55, %v1508_v4 }
 0x260   : > { %v1441_v57 = vpop.f32.mrf.mxu1  ;;  %v1827_v53 = vpop.f32.mrf.mxu3 }
 0x261   : > { %v1897_v24 = vadd.f32 %v1827_v53, %v1703_v25  ;;  %2068 = vmatmul.f32.gmra.mxu0 %v1945_v41  ;;  %v1509_v63 = vadd.f32 %v1441_v57, %v3609_v56 }
 0x263   : > { %v2091_v5 = vadd.f32 %v2021_v58, %v1897_v24  ;;  %1488 = vmatmul.f32.gmra.mxu1 %v1944_v46  ;;  %1683 = vmatmul.f32.gmra.mxu2 %v2593_v3 }
 0x265   : > { %2123 = vst [vmem:[%s3670_s6 + $0x68] sm:$0xff] %v2091_v5  ;;  %v2154_v43 = vadd.f32 %v2153_v51, %v2091_v5  ;;  %v2193_v52 = vmul.f32 %v2091_v5, %v2091_v5  ;;  %1877 = vmatmul.f32.gmra.mxu3 %v1752_v28 }
 0x266   : > { %v1636_v7 = vpop.f32.mrf.mxu2  ;;  %v2024_v38 = vpop.f32.mrf.mxu0 }
 0x267   : > { %v2224_v2 = vadd.f32 %v2223_v17, %v2193_v52  ;;  %v1704_v13 = vadd.f32 %v1636_v7, %v1509_v63 }
 0x268   : > { %v1444_v23 = vpop.f32.mrf.mxu1  ;;  %v1830_v30 = vpop.f32.mrf.mxu3 }
 0x269   : > { %v1898_v35 = vadd.f32 %v1830_v30, %v1704_v13  ;;  %2071 = vmatmul.f32.gmra.mxu0 %v1946_v19  ;;  %v1510_v56 = vadd.f32 %v1444_v23, %v3614_v62 }
 0x26b   : > { %v2092_v45 = vadd.f32 %v2024_v38, %v1898_v35  ;;  %1491 = vmatmul.f32.gmra.mxu1 %v1945_v41  ;;  %1686 = vmatmul.f32.gmra.mxu2 %v2593_v3 }
 0x26d   : > { %2124 = vst [vmem:[%s3670_s6 + $0x70] sm:$0xff] %v2092_v45  ;;  %v2155_v10 = vadd.f32 %v2154_v43, %v2092_v45  ;;  %v2194_v9 = vmul.f32 %v2092_v45, %v2092_v45  ;;  %1880 = vmatmul.f32.gmra.mxu3 %v1753_v61 }
 0x26e   : > { %v1639_v36 = vpop.f32.mrf.mxu2  ;;  %v2027_v40 = vpop.f32.mrf.mxu0 }
 0x26f   : > { %v2225_v27 = vadd.f32 %v2224_v2, %v2194_v9  ;;  %v1705_v1 = vadd.f32 %v1639_v36, %v1510_v56 }
 0x270   : > { %v1447_v29 = vpop.f32.mrf.mxu1  ;;  %v1833_v18 = vpop.f32.mrf.mxu3 }
 0x271   : > { %v1899_v48 = vadd.f32 %v1833_v18, %v1705_v1  ;;  %2074 = vmatmul.f32.gmra.mxu0 %v1947_v50  ;;  %v1511_v12 = vadd.f32 %v1447_v29, %v3617_v59 }
 0x273   : > { %v2093_v46 = vadd.f32 %v2027_v40, %v1899_v48 }
 0x275   : > { %2125 = vst [vmem:[%s3670_s6 + $0x78] sm:$0xff] %v2093_v46  ;;  %v2156_v62 = vadd.f32 %v2155_v10, %v2093_v46  ;;  %v2195_v31 = vmul.f32 %v2093_v46, %v2093_v46 }
 0x276   : > { %v1642_v14 = vpop.f32.mrf.mxu2  ;;  %v2030_v32 = vpop.f32.mrf.mxu0 }
 0x277   : > { %v2226_v20 = vadd.f32 %v2225_v27, %v2195_v31  ;;  %v1706_v34 = vadd.f32 %v1642_v14, %v1511_v12 }
 0x278   : > { %v1450_v21 = vpop.f32.mrf.mxu1  ;;  %v1836_v54 = vpop.f32.mrf.mxu3 }
 0x279   : > { %v1900_v4 = vadd.f32 %v1836_v54, %v1706_v34  ;;  %v1512_v22 = vadd.f32 %v1450_v21, %v3620_v47 }
 0x27b   : > { %v2094_v51 = vadd.f32 %v2030_v32, %v1900_v4 }
 0x27d   : > { %2126 = vst [vmem:[%s3670_s6 + $0x80] sm:$0xff] %v2094_v51  ;;  %v2157_v55 = vadd.f32 %v2156_v62, %v2094_v51  ;;  %v2196_v58 = vmul.f32 %v2094_v51, %v2094_v51 }
 0x27e   : > { %v1645_v41 = vpop.f32.mrf.mxu2  ;;  %v2033_v17 = vpop.f32.mrf.mxu0 }
 0x27f   : > { %v2227_v59 = vadd.f32 %v2226_v20, %v2196_v58  ;;  %v1707_v25 = vadd.f32 %v1645_v41, %v1512_v22 }
 0x280   : > { %v1453_v57 = vpop.f32.mrf.mxu1  ;;  %v1839_v53 = vpop.f32.mrf.mxu3 }
 0x281   : > { %v1901_v24 = vadd.f32 %v1839_v53, %v1707_v25  ;;  %v1513_v5 = vadd.f32 %v1453_v57, %v3623_v42 }
 0x283   : > { %v2095_v28 = vadd.f32 %v2033_v17, %v1901_v24 }
 0x285   : > { %2127 = vst [vmem:[%s3670_s6 + $0x88] sm:$0xff] %v2095_v28  ;;  %v2158_v3 = vadd.f32 %v2157_v55, %v2095_v28  ;;  %v2197_v63 = vmul.f32 %v2095_v28, %v2095_v28 }
 0x286   : > { %v1648_v43 = vpop.f32.mrf.mxu2  ;;  %v2036_v52 = vpop.f32.mrf.mxu0 }
 0x287   : > { %v2228_v47 = vadd.f32 %v2227_v59, %v2197_v63  ;;  %v1708_v7 = vadd.f32 %v1648_v43, %v1513_v5 }
 0x288   : > { %v1456_v38 = vpop.f32.mrf.mxu1  ;;  %v1842_v19 = vpop.f32.mrf.mxu3 }
 0x289   : > { %v1902_v2 = vadd.f32 %v1842_v19, %v1708_v7  ;;  %v1514_v23 = vadd.f32 %v1456_v38, %v3626_v37 }
 0x28b   : > { %v2096_v13 = vadd.f32 %v2036_v52, %v1902_v2 }
 0x28d   : > { %2128 = vst [vmem:[%s3670_s6 + $0x90] sm:$0xff] %v2096_v13  ;;  %v2159_v30 = vadd.f32 %v2158_v3, %v2096_v13  ;;  %v2198_v35 = vmul.f32 %v2096_v13, %v2096_v13 }
 0x28e   : > { %v1651_v61 = vpop.f32.mrf.mxu2  ;;  %v2039_v45 = vpop.f32.mrf.mxu0 }
 0x28f   : > { %v2229_v42 = vadd.f32 %v2228_v47, %v2198_v35  ;;  %v1709_v56 = vadd.f32 %v1651_v61, %v1514_v23 }
 0x290   : > { %v1459_v10 = vpop.f32.mrf.mxu1  ;;  %v1845_v9 = vpop.f32.mrf.mxu3 }
 0x291   : > { %v1903_v36 = vadd.f32 %v1845_v9, %v1709_v56  ;;  %v1515_v50 = vadd.f32 %v1459_v10, %v3629_v11 }
 0x293   : > { %v2097_v40 = vadd.f32 %v2039_v45, %v1903_v36 }
 0x295   : > { %2129 = vst [vmem:[%s3670_s6 + $0x98] sm:$0xff] %v2097_v40  ;;  %v2160_v27 = vadd.f32 %v2159_v30, %v2097_v40  ;;  %v2199_v1 = vmul.f32 %v2097_v40, %v2097_v40 }
 0x296   : > { %v1654_v29 = vpop.f32.mrf.mxu2  ;;  %v2042_v18 = vpop.f32.mrf.mxu0 }
 0x297   : > { %v2230_v37 = vadd.f32 %v2229_v42, %v2199_v1  ;;  %v1710_v48 = vadd.f32 %v1654_v29, %v1515_v50 }
 0x298   : > { %v1462_v46 = vpop.f32.mrf.mxu1  ;;  %v1848_v12 = vpop.f32.mrf.mxu3 }
 0x299   : > { %v1904_v62 = vadd.f32 %v1848_v12, %v1710_v48  ;;  %v1516_v14 = vadd.f32 %v1462_v46, %v3632_v15 }
 0x29b   : > { %v2098_v31 = vadd.f32 %v2042_v18, %v1904_v62 }
 0x29d   : > { %2130 = vst [vmem:[%s3670_s6 + $0xa0] sm:$0xff] %v2098_v31  ;;  %v2161_v32 = vadd.f32 %v2160_v27, %v2098_v31  ;;  %v2200_v20 = vmul.f32 %v2098_v31, %v2098_v31 }
 0x29e   : > { %v1657_v34 = vpop.f32.mrf.mxu2  ;;  %v2045_v21 = vpop.f32.mrf.mxu0 }
 0x29f   : > { %v2231_v11 = vadd.f32 %v2230_v37, %v2200_v20  ;;  %v1711_v54 = vadd.f32 %v1657_v34, %v1516_v14 }
 0x2a0   : > { %v1465_v4 = vpop.f32.mrf.mxu1  ;;  %v1851_v51 = vpop.f32.mrf.mxu3 }
 0x2a1   : > { %v1905_v22 = vadd.f32 %v1851_v51, %v1711_v54  ;;  %v1517_v58 = vadd.f32 %v1465_v4, %v3635_v16 }
 0x2a3   : > { %v2099_v55 = vadd.f32 %v2045_v21, %v1905_v22 }
 0x2a5   : > { %2131 = vst [vmem:[%s3670_s6 + $0xa8] sm:$0xff] %v2099_v55  ;;  %v2162_v41 = vadd.f32 %v2161_v32, %v2099_v55  ;;  %v2201_v17 = vmul.f32 %v2099_v55, %v2099_v55 }
 0x2a6   : > { %v1660_v59 = vpop.f32.mrf.mxu2  ;;  %v2048_v25 = vpop.f32.mrf.mxu0 }
 0x2a7   : > { %v2232_v15 = vadd.f32 %v2231_v11, %v2201_v17  ;;  %v1712_v57 = vadd.f32 %v1660_v59, %v1517_v58 }
 0x2a8   : > { %v1468_v53 = vpop.f32.mrf.mxu1  ;;  %v1854_v24 = vpop.f32.mrf.mxu3 }
 0x2a9   : > { %v1906_v28 = vadd.f32 %v1854_v24, %v1712_v57  ;;  %v1518_v3 = vadd.f32 %v1468_v53, %v3638_v39 }
 0x2ab   : > { %v2100_v5 = vadd.f32 %v2048_v25, %v1906_v28 }
 0x2ad   : > { %2132 = vst [vmem:[%s3670_s6 + $0xb0] sm:$0xff] %v2100_v5  ;;  %v2163_v63 = vadd.f32 %v2162_v41, %v2100_v5  ;;  %v2202_v43 = vmul.f32 %v2100_v5, %v2100_v5 }
 0x2ae   : > { %v1663_v52 = vpop.f32.mrf.mxu2  ;;  %v2051_v47 = vpop.f32.mrf.mxu0 }
 0x2af   : > { %v2233_v16 = vadd.f32 %v2232_v15, %v2202_v43  ;;  %v1713_v7 = vadd.f32 %v1663_v52, %v1518_v3 }
 0x2b0   : > { %v1471_v38 = vpop.f32.mrf.mxu1  ;;  %v1857_v19 = vpop.f32.mrf.mxu3 }
 0x2b1   : > { %v1907_v2 = vadd.f32 %v1857_v19, %v1713_v7  ;;  %v1519_v23 = vadd.f32 %v1471_v38, %v3641_v33 }
 0x2b3   : > { %v2101_v13 = vadd.f32 %v2051_v47, %v1907_v2 }
 0x2b5   : > { %2133 = vst [vmem:[%s3670_s6 + $0xb8] sm:$0xff] %v2101_v13  ;;  %v2164_v30 = vadd.f32 %v2163_v63, %v2101_v13  ;;  %v2203_v35 = vmul.f32 %v2101_v13, %v2101_v13 }
 0x2b6   : > { %v1666_v61 = vpop.f32.mrf.mxu2  ;;  %v2054_v45 = vpop.f32.mrf.mxu0 }
 0x2b7   : > { %v2234_v39 = vadd.f32 %v2233_v16, %v2203_v35  ;;  %v1714_v42 = vadd.f32 %v1666_v61, %v1519_v23 }
 0x2b8   : > { %v1474_v56 = vpop.f32.mrf.mxu1  ;;  %v1860_v10 = vpop.f32.mrf.mxu3 }
 0x2b9   : > { %v1908_v9 = vadd.f32 %v1860_v10, %v1714_v42  ;;  %v1520_v40 = vadd.f32 %v1474_v56, %v3644_v8 }
 0x2bb   : > { %v2102_v36 = vadd.f32 %v2054_v45, %v1908_v9 }
 0x2bd   : > { %2134 = vst [vmem:[%s3670_s6 + $0xc0] sm:$0xff] %v2102_v36  ;;  %v2165_v50 = vadd.f32 %v2164_v30, %v2102_v36  ;;  %v2204_v27 = vmul.f32 %v2102_v36, %v2102_v36 }
 0x2be   : > { %v1669_v1 = vpop.f32.mrf.mxu2  ;;  %v2057_v29 = vpop.f32.mrf.mxu0 }
 0x2bf   : > { %v2235_v33 = vadd.f32 %v2234_v39, %v2204_v27  ;;  %v1715_v18 = vadd.f32 %v1669_v1, %v1520_v40 }
 0x2c0   : > { %v1477_v37 = vpop.f32.mrf.mxu1  ;;  %v1863_v48 = vpop.f32.mrf.mxu3 }
 0x2c1   : > { %v1909_v46 = vadd.f32 %v1863_v48, %v1715_v18  ;;  %v1521_v62 = vadd.f32 %v1477_v37, %v3647_v6 }
 0x2c3   : > { %v2103_v12 = vadd.f32 %v2057_v29, %v1909_v46 }
 0x2c5   : > { %2135 = vst [vmem:[%s3670_s6 + $0xc8] sm:$0xff] %v2103_v12  ;;  %v2166_v31 = vadd.f32 %v2165_v50, %v2103_v12  ;;  %v2205_v14 = vmul.f32 %v2103_v12, %v2103_v12 }
 0x2c6   : > { %v1672_v32 = vpop.f32.mrf.mxu2  ;;  %v2060_v20 = vpop.f32.mrf.mxu0 }
 0x2c7   : > { %v2236_v8 = vadd.f32 %v2235_v33, %v2205_v14  ;;  %v1716_v34 = vadd.f32 %v1672_v32, %v1521_v62 }
 0x2c8   : > { %v1480_v21 = vpop.f32.mrf.mxu1  ;;  %v1866_v11 = vpop.f32.mrf.mxu3 }
 0x2c9   : > { %v1910_v54 = vadd.f32 %v1866_v11, %v1716_v34  ;;  %v1522_v51 = vadd.f32 %v1480_v21, %v3650_v60 }
 0x2cb   : > { %v2104_v4 = vadd.f32 %v2060_v20, %v1910_v54 }
 0x2cd   : > { %2136 = vst [vmem:[%s3670_s6 + $0xd0] sm:$0xff] %v2104_v4  ;;  %v2167_v22 = vadd.f32 %v2166_v31, %v2104_v4  ;;  %v2206_v55 = vmul.f32 %v2104_v4, %v2104_v4 }
 0x2ce   : > { %v1675_v58 = vpop.f32.mrf.mxu2  ;;  %v2063_v41 = vpop.f32.mrf.mxu0 }
 0x2cf   : > { %v2237_v6 = vadd.f32 %v2236_v8, %v2206_v55  ;;  %v1717_v17 = vadd.f32 %v1675_v58, %v1522_v51 }
 0x2d0   : > { %v1483_v59 = vpop.f32.mrf.mxu1  ;;  %v1869_v25 = vpop.f32.mrf.mxu3 }
 0x2d1   : > { %v1911_v15 = vadd.f32 %v1869_v25, %v1717_v17  ;;  %v1523_v53 = vadd.f32 %v1483_v59, %v3653_v0 }
 0x2d3   : > { %v2105_v57 = vadd.f32 %v2063_v41, %v1911_v15 }
 0x2d5   : > { %2137 = vst [vmem:[%s3670_s6 + $0xd8] sm:$0xff] %v2105_v57  ;;  %v2168_v24 = vadd.f32 %v2167_v22, %v2105_v57  ;;  %v2207_v28 = vmul.f32 %v2105_v57, %v2105_v57 }
 0x2d6   : > { %v1678_v5 = vpop.f32.mrf.mxu2  ;;  %v2066_v3 = vpop.f32.mrf.mxu0 }
 0x2d7   : > { %v2238_v60 = vadd.f32 %v2237_v6, %v2207_v28  ;;  %v1718_v63 = vadd.f32 %v1678_v5, %v1523_v53 }
 0x2d8   : > { %v1486_v43 = vpop.f32.mrf.mxu1  ;;  %v1872_v52 = vpop.f32.mrf.mxu3 }
 0x2d9   : > { %v1912_v47 = vadd.f32 %v1872_v52, %v1718_v63  ;;  %v1524_v7 = vadd.f32 %v1486_v43, %v3656_v44 }
 0x2db   : > { %v2106_v16 = vadd.f32 %v2066_v3, %v1912_v47 }
 0x2dd   : > { %2138 = vst [vmem:[%s3670_s6 + $0xe0] sm:$0xff] %v2106_v16  ;;  %v2169_v38 = vadd.f32 %v2168_v24, %v2106_v16  ;;  %v2208_v19 = vmul.f32 %v2106_v16, %v2106_v16 }
 0x2de   : > { %v1681_v2 = vpop.f32.mrf.mxu2  ;;  %v2069_v13 = vpop.f32.mrf.mxu0 }
 0x2df   : > { %v2239_v0 = vadd.f32 %v2238_v60, %v2208_v19  ;;  %v1719_v23 = vadd.f32 %v1681_v2, %v1524_v7 }
 0x2e0   : > { %v1489_v30 = vpop.f32.mrf.mxu1  ;;  %v1875_v35 = vpop.f32.mrf.mxu3 }
 0x2e1   : > { %v1913_v61 = vadd.f32 %v1875_v35, %v1719_v23  ;;  %v1525_v39 = vadd.f32 %v1489_v30, %v3659_v26 }
 0x2e3   : > { %v2107_v45 = vadd.f32 %v2069_v13, %v1913_v61 }
 0x2e5   : > { %2139 = vst [vmem:[%s3670_s6 + $0xe8] sm:$0xff] %v2107_v45  ;;  %v2170_v42 = vadd.f32 %v2169_v38, %v2107_v45  ;;  %v2209_v56 = vmul.f32 %v2107_v45, %v2107_v45 }
 0x2e6   : > { %v1684_v10 = vpop.f32.mrf.mxu2  ;;  %v2072_v9 = vpop.f32.mrf.mxu0 }
 0x2e7   : > { %v2240_v44 = vadd.f32 %v2239_v0, %v2209_v56  ;;  %v1720_v36 = vadd.f32 %v1684_v10, %v1525_v39 }
 0x2e8   : > { %v1878_v40 = vpop.f32.mrf.mxu3  ;;  %v1492_v27 = vpop.f32.mrf.mxu1 }
 0x2e9   : > { %v1914_v50 = vadd.f32 %v1878_v40, %v1720_v36  ;;  %v1526_v29 = vadd.f32 %v1492_v27, %v3662_v49 }
 0x2eb   : > { %v2108_v1 = vadd.f32 %v2072_v9, %v1914_v50 }
 0x2ed   : > { %2140 = vst [vmem:[%s3670_s6 + $0xf0] sm:$0xff] %v2108_v1  ;;  %v2171_v33 = vadd.f32 %v2170_v42, %v2108_v1  ;;  %v2210_v18 = vmul.f32 %v2108_v1, %v2108_v1 }
 0x2ee   : > { %v1687_v37 = vpop.f32.mrf.mxu2  ;;  %v2075_v12 = vpop.f32.mrf.mxu0 }
 0x2ef   : > { %v2241_v26 = vadd.f32 %v2240_v44, %v2210_v18  ;;  %v1721_v48 = vadd.f32 %v1687_v37, %v1526_v29 }
 0x2f0   : > { %v1881_v46 = vpop.f32.mrf.mxu3 }
 0x2f1   : > { %v1915_v62 = vadd.f32 %v1881_v46, %v1721_v48 }
 0x2f3   : > { %v2109_v31 = vadd.f32 %v2075_v12, %v1915_v62 }
 0x2f5   : > { %2141 = vst [vmem:[%s3670_s6 + $0xf8] sm:$0xff] %v2109_v31  ;;  %v2172_v14 = vadd.f32 %v2171_v33, %v2109_v31  ;;  %v2211_v32 = vmul.f32 %v2109_v31, %v2109_v31 }
 0x2f7   : > { %v2173_v20 = vrot.slane %v2172_v14, 4  ;;  %v2242_v8 = vadd.f32 %v2241_v26, %v2211_v32 }
 0x2f9   : > { %v2174_v34 = vadd.f32 %v2173_v20, %v2172_v14  ;;  %v2243_v49 = vrot.slane %v2242_v8, 4 }
 0x2fb   : > { %v2175_v21 = vrot.slane %v2174_v34, 2  ;;  %v2244_v11 = vadd.f32 %v2243_v49, %v2242_v8 }
 0x2fd   : > { %v2176_v54 = vadd.f32 %v2175_v21, %v2174_v34  ;;  %v2245_v4 = vrot.slane %v2244_v11, 2 }
 0x2ff   : > { %v2177_v51 = vrot.slane %v2176_v54, 1  ;;  %v2246_v22 = vadd.f32 %v2245_v4, %v2244_v11 }
 0x301   : > { %v2178_v55 = vadd.f32 %v2177_v51, %v2176_v54  ;;  %v2247_v58 = vrot.slane %v2246_v22, 1 }
 0x303   : > { %2179 = vst [vmem:[%s198_s13] sm:$0x1] %v2178_v55  ;;  %v2248_v41 = vadd.f32 %v2247_v58, %v2246_v22 }
 0x305   : > { %2249 = vst [vmem:[%s198_s13 + $0x1] sm:$0x1] %v2248_v41 }
 0x306   : > { %2621 = shalt.err (!%p2618_p3)
}
 0x307   : > { %2549 = dma.vmem_to_hbm [thread:$0]  (%p2722_p5), %s2272_s14, 32, %s2274_s20, %s2256_s19  }
 0x308 PF: > { %p2555_p4 = scmp.ge.s32.totalorder %s2656_s18, 2  ;;  %s2293_s6 = sand.u32 1, %s2644_s15  }
 0x309   : > { %s2294_s7 = scalar_lea.sflag [#allocation4], %s2293_s6 }
 0x30a   : > { %p2552_p7 = pnand %p2555_p4, %p2726_p6 }
 0x30c   : > { %p2553_p8 = pneg %p2552_p7 }
 0x30e   : > { %2639 = dma.done.wait (%p2553_p8), %s2294_s7, 32  }
 0x30f   : > { %2641 = vsyncadd (%p2553_p8), %s2294_s7, 4294967264  ;;  %p15_p9 = scmp.ge.s32.totalorder %s2709_s21, 4   ;;  %s3774_s15 = smov %s2648_s16 }
 0x310   : > { %s3775_s16 = smov %s2652_s17  ;;  %s3776_s17 = smov %s2720_s24 }
 0x311   : > { %s3777_s18 = smov %s2709_s21  ;;  %17 = sbr.rel (!%p15_p9) target bundleno = 3 (0x3), region = 89 }
 0x316   :  { %2300 = vsyncpa [#allocation4], 1 }
 0x317   :  { %2302 = vsyncpa [#allocation4 + $0x1], 1 }

</bundles_post_ra>
